<compile_context>
chip_gen: v6e
topology: v6e:2x2x1
jax: 0.10.0
libtpu: 0.0.40
codegen_flags: <defaults>
</compile_context>

<pallas_src>
import numpy as np
import jax
import jax.numpy as jnp
from jax.experimental import pallas as pl
from jax.experimental.pallas import tpu as pltpu


# ------------------------------ Fused kernel ------------------------------- #

def _lenet_kernel(x_ref, a1_ref, b1_ref, a2_ref, b3_ref,
                  w5_ref, b5_ref, w6_ref, b6_ref, wo_ref, bo_ref,
                  out_ref, pool1_ref, pool2_ref, zin_ref):
    f32 = jnp.float32
    HI = jax.lax.Precision.HIGHEST
    B = out_ref.shape[0]

    # ---- conv1 (1->6, 5x5 valid) as 5 banded MXU matmuls ------------------
    # lhs row = (b, h) holds input row h+i; A1 block i maps input col w_in to
    # output col w*6 + c_out.  Result layout: rows (b,h), cols (w, c_out).
    acc1 = jnp.zeros((B * 24, 144), f32)
    for i in range(5):
        lhs = jnp.concatenate([x_ref[b, 0, i:i + 24, :] for b in range(B)],
                              axis=0)                       # (B*24, 28)
        acc1 = acc1 + jnp.dot(lhs, a1_ref[28 * i:28 * (i + 1), :],
                              preferred_element_type=f32, precision=HI)
    acc1 = acc1 + b1_ref[...]                               # (1,144) broadcast

    # ---- pool1 2x2 max (sparse result: valid rows 2h', valid cols 12w'+c) --
    n1 = B * 24
    pool1_ref[0:n1 - 1, :] = jnp.maximum(acc1[0:n1 - 1, :], acc1[1:n1, :])
    pool1_ref[n1 - 1:n1, :] = acc1[n1 - 1:n1, :]            # finite filler row
    mh = pool1_ref[...]
    pool1_ref[:, 0:138] = jnp.maximum(mh[:, 0:138], mh[:, 6:144])
    pool1_ref[:, 138:144] = mh[:, 138:144]                  # finite filler cols
    p1s = pool1_ref[...]                                    # (B*24, 144) sparse

    # ---- conv2 (6->16, 5x5 valid) as 5 banded MXU matmuls over sparse pool1 -
    # A2 rows for the pool1 "garbage" columns are zero, so no compaction needed.
    acc2 = jnp.zeros((B * 16, 128), f32)
    for i in range(5):
        lhs = jnp.concatenate(
            [p1s[b * 24 + 2 * i: b * 24 + 2 * i + 16, :] for b in range(B)],
            axis=0)                                         # (B*16, 144)
        acc2 = acc2 + jnp.dot(lhs, a2_ref[144 * i:144 * (i + 1), :],
                              preferred_element_type=f32, precision=HI)
    acc2 = acc2 + b3_ref[...]                               # (1,128) broadcast

    # ---- pool2 2x2 max (sparse result: valid rows 4y, valid cols 32x+c) ----
    n2 = B * 16
    pool2_ref[0:n2 - 2, :] = jnp.maximum(acc2[0:n2 - 2, :], acc2[2:n2, :])
    pool2_ref[n2 - 2:n2, :] = acc2[n2 - 2:n2, :]
    mh2 = pool2_ref[...]
    pool2_ref[:, 0:112] = jnp.maximum(mh2[:, 0:112], mh2[:, 16:128])
    pool2_ref[:, 112:128] = mh2[:, 112:128]
    p2s = pool2_ref[...]                                    # (B*16, 128) sparse

    # ---- gather the 4 valid pool2 row-groups into a lane-dense (B, 512) ----
    for b in range(B):
        for y in range(4):
            zin_ref[b:b + 1, 128 * y:128 * (y + 1)] = \
                p2s[b * 16 + 4 * y: b * 16 + 4 * y + 1, :]
    zin = zin_ref[...]                                      # (B, 512)

    # ---- FC chain 256 -> 120 -> 84 -> 10, all N padded to 128 lanes --------
    z = jnp.dot(zin, w5_ref[...], preferred_element_type=f32, precision=HI) + b5_ref[...]
    z = jnp.dot(z, w6_ref[...], preferred_element_type=f32, precision=HI) + b6_ref[...]
    z = jnp.dot(z, wo_ref[...], preferred_element_type=f32, precision=HI) + bo_ref[...]
    out_ref[...] = z[:, 0:10]


def _full_spec(shape):
    if len(shape) == 2:
        return pl.BlockSpec(shape, lambda i: (0, 0))
    assert len(shape) == 4
    return pl.BlockSpec(shape, lambda i: (0, 0, 0, 0))


def lenet_forward(x, prepared):
    """x: (B, 1, 28, 28) f32, prepared = prepare_params(params).
    Returns (B, 10) logits (no activations, matching the PyTorch module)."""
    a1, b1r, a2, b3r, w5p, b5r, w6p, b6r, wop, bor = prepared
    B = x.shape[0]
    args = (x, a1, b1r, a2, b3r, w5p, b5r, w6p, b6r, wop, bor)

    return pl.pallas_call(
        _lenet_kernel,
        out_shape=jax.ShapeDtypeStruct((B, 10), jnp.float32),
        grid=(1,),
        in_specs=[_full_spec(a.shape) for a in args],
        out_specs=_full_spec((B, 10)),
        scratch_shapes=[pltpu.VMEM((B * 24, 144), jnp.float32),   # pool1
                        pltpu.VMEM((B * 16, 128), jnp.float32),   # pool2
                        pltpu.VMEM((B, 512), jnp.float32)],       # fc1 input
        compiler_params=pltpu.CompilerParams(
            dimension_semantics=("arbitrary",)),
    )(*args)


# ------------------- One-time host-side weight preparation ------------------ #

def prepare_params(params):
    """Fold the 5x5 convs into banded matmul operators, permute / zero-pad the
    FC weights.  Called ONCE; the jitted forward path does no weight prep."""
    (w1, b1), (w3, b3), (w5, b5), (w6, b6), (wo, bo) = params
    f32 = jnp.float32

    # conv1 banded operator: rows = i*28 + w_in, cols = w*6 + c_out.
    i, j, w, o = np.meshgrid(np.arange(5), np.arange(5), np.arange(24),
                             np.arange(6), indexing="ij")
    i, j, w, o = i.ravel(), j.ravel(), w.ravel(), o.ravel()
    a1 = jnp.zeros((5 * 28, 24 * 6), f32).at[i * 28 + w + j, w * 6 + o].set(
        w1[o, 0, i, j])
    b1r = jnp.tile(b1, 24).reshape(1, 144)

    # conv2 banded operator over the SPARSE pool1 layout (valid col 12w+c):
    # rows = i*144 + 12*(w_out+j) + c_in, cols = w_out*16 + c_out; all rows
    # that correspond to pool1 "garbage" columns stay zero.
    i, j, w, p, q = np.meshgrid(np.arange(5), np.arange(5), np.arange(8),
                                np.arange(6), np.arange(16), indexing="ij")
    i, j, w, p, q = i.ravel(), j.ravel(), w.ravel(), p.ravel(), q.ravel()
    a2 = jnp.zeros((5 * 144, 128), f32).at[
        i * 144 + 12 * (w + j) + p, w * 16 + q].set(w3[q, p, i, j])
    b3r = jnp.tile(b3, 8).reshape(1, 128)

    # fc1: kernel input col = y*128 + 32*x + c  ->  PyTorch flatten c*16+y*4+x.
    y, x, q = np.meshgrid(np.arange(4), np.arange(4), np.arange(16),
                          indexing="ij")
    y, x, q = y.ravel(), x.ravel(), q.ravel()
    w5rows = jnp.zeros((512, 120), f32).at[y * 128 + 32 * x + q].set(
        w5[:, q * 16 + y * 4 + x].T)
    w5p = jnp.zeros((512, 128), f32).at[:, :120].set(w5rows)
    b5r = jnp.zeros((1, 128), f32).at[0, :120].set(b5)

    w6p = jnp.zeros((128, 128), f32).at[:120, :84].set(w6.T)
    b6r = jnp.zeros((1, 128), f32).at[0, :84].set(b6)

    wop = jnp.zeros((128, 128), f32).at[:84, :10].set(wo.T)
    bor = jnp.zeros((1, 128), f32).at[0, :10].set(bo)

    return (a1, b1r, a2, b3r, w5p, b5r, w6p, b6r, wop, bor)


# --------------------------- Pure-JAX reference ----------------------------- #

def lenet_reference(x, params):
    (w1, b1), (w3, b3), (w5, b5), (w6, b6), (wo, bo) = params
    hp = jax.lax.Precision.HIGHEST

    def conv(x, w, b):
        y = jax.lax.conv_general_dilated(
            x, w, (1, 1), "VALID",
            dimension_numbers=("NCHW", "OIHW", "NCHW"), precision=hp)
        return y + b.reshape(1, -1, 1, 1)

    def pool(x):
        return jax.lax.reduce_window(
            x, -jnp.inf, jax.lax.max, (1, 1, 2, 2), (1, 1, 2, 2), "VALID")

    x = pool(conv(x, w1, b1))
    x = pool(conv(x, w3, b3))
    x = x.reshape(x.shape[0], -1)
    x = jnp.dot(x, w5.T, precision=hp) + b5
    x = jnp.dot(x, w6.T, precision=hp) + b6
    x = jnp.dot(x, wo.T, precision=hp) + bo
    return x


# ------------------------------ Parameter init ------------------------------ #

def init_params(key):
    ks = jax.random.split(key, 10)

    def u(k, shape, fan_in):  # PyTorch-style uniform init bound
        bound = 1.0 / (fan_in ** 0.5)
        return jax.random.uniform(k, shape, jnp.float32, -bound, bound)

    w1 = u(ks[0], (6, 1, 5, 5), 1 * 5 * 5);   b1 = u(ks[1], (6,), 1 * 5 * 5)
    w3 = u(ks[2], (16, 6, 5, 5), 6 * 5 * 5);  b3 = u(ks[3], (16,), 6 * 5 * 5)
    w5 = u(ks[4], (120, 256), 256);           b5 = u(ks[5], (120,), 256)
    w6 = u(ks[6], (84, 120), 120);            b6 = u(ks[7], (84,), 120)
    wo = u(ks[8], (10, 84), 84);              bo = u(ks[9], (10,), 84)
    return [(w1, b1), (w3, b3), (w5, b5), (w6, b6), (wo, bo)]


if __name__ == "__main__":
    key = jax.random.PRNGKey(0)
    kx, kp = jax.random.split(key)
    # LeNet's 16*4*4 flatten implies 1x28x28 inputs; batch=2.
    x = jax.random.normal(kx, (2, 1, 28, 28), jnp.float32)
    params = init_params(kp)
    prepared = prepare_params(params)          # weight re-layouts done ONCE

    fwd = jax.jit(lenet_forward)
    out = jax.block_until_ready(fwd(x, prepared))
    assert out.shape == (2, 10)

    ref = lenet_reference(x, params)
    # All-f32 network on both paths (precision=HIGHEST): 1e-4 is far below any
    # layout/permutation-bug signal and well above f32 accumulation noise.
    np.testing.assert_allclose(np.asarray(out), np.asarray(ref),
                               rtol=1e-4, atol=1e-4)
    print("KERNEL_OK")
</pallas_src>

<mosaic_0001>
module attributes {stable_mosaic.version = 11 : i64} {
  func.func @_lenet_kernel(%arg0: i32, %arg1: memref<2x1x28x28xf32, #tpu.memory_space<vmem>>, %arg2: memref<140x144xf32, #tpu.memory_space<vmem>>, %arg3: memref<1x144xf32, #tpu.memory_space<vmem>>, %arg4: memref<720x128xf32, #tpu.memory_space<vmem>>, %arg5: memref<1x128xf32, #tpu.memory_space<vmem>>, %arg6: memref<512x128xf32, #tpu.memory_space<vmem>>, %arg7: memref<1x128xf32, #tpu.memory_space<vmem>>, %arg8: memref<128x128xf32, #tpu.memory_space<vmem>>, %arg9: memref<1x128xf32, #tpu.memory_space<vmem>>, %arg10: memref<128x128xf32, #tpu.memory_space<vmem>>, %arg11: memref<1x128xf32, #tpu.memory_space<vmem>>, %arg12: memref<2x10xf32, #tpu.memory_space<vmem>>, %arg13: memref<48x144xf32, #tpu.memory_space<vmem>>, %arg14: memref<32x128xf32, #tpu.memory_space<vmem>>, %arg15: memref<2x512xf32, #tpu.memory_space<vmem>>) attributes {dimension_semantics = [#tpu.dimension_semantics<arbitrary>], iteration_bounds = array<i64: 1>, scalar_prefetch = 0 : i64, scratch_operands = 3 : i64, tpu.core_type = #tpu.core_type<tc>, window_params = [{pipeline_mode = #tpu.pipeline_mode<synchronous>, transform_indices = @transform_0, window_bounds = array<i64: 2, 1, 28, 28>}, {pipeline_mode = #tpu.pipeline_mode<synchronous>, transform_indices = @transform_1, window_bounds = array<i64: 140, 144>}, {pipeline_mode = #tpu.pipeline_mode<synchronous>, transform_indices = @transform_2, window_bounds = array<i64: 1, 144>}, {pipeline_mode = #tpu.pipeline_mode<synchronous>, transform_indices = @transform_3, window_bounds = array<i64: 720, 128>}, {pipeline_mode = #tpu.pipeline_mode<synchronous>, transform_indices = @transform_4, window_bounds = array<i64: 1, 128>}, {pipeline_mode = #tpu.pipeline_mode<synchronous>, transform_indices = @transform_5, window_bounds = array<i64: 512, 128>}, {pipeline_mode = #tpu.pipeline_mode<synchronous>, transform_indices = @transform_6, window_bounds = array<i64: 1, 128>}, {pipeline_mode = #tpu.pipeline_mode<synchronous>, transform_indices = @transform_7, window_bounds = array<i64: 128, 128>}, {pipeline_mode = #tpu.pipeline_mode<synchronous>, transform_indices = @transform_8, window_bounds = array<i64: 1, 128>}, {pipeline_mode = #tpu.pipeline_mode<synchronous>, transform_indices = @transform_9, window_bounds = array<i64: 128, 128>}, {pipeline_mode = #tpu.pipeline_mode<synchronous>, transform_indices = @transform_10, window_bounds = array<i64: 1, 128>}, {pipeline_mode = #tpu.pipeline_mode<synchronous>, transform_indices = @transform_11, window_bounds = array<i64: 2, 10>}]} {
    %cst = arith.constant 0.000000e+00 : f32
    %0 = vector.broadcast %cst : f32 to vector<48x144xf32>
    %c0 = arith.constant 0 : index
    %c0_0 = arith.constant 0 : index
    %c0_1 = arith.constant 0 : index
    %c0_2 = arith.constant 0 : index
    %1 = vector.load %arg1[%c0, %c0_0, %c0_1, %c0_2] : memref<2x1x28x28xf32, #tpu.memory_space<vmem>>, vector<1x1x24x28xf32>
    %2 = vector.shape_cast %1 : vector<1x1x24x28xf32> to vector<24x28xf32>
    %c1 = arith.constant 1 : index
    %c0_3 = arith.constant 0 : index
    %c0_4 = arith.constant 0 : index
    %c0_5 = arith.constant 0 : index
    %3 = vector.load %arg1[%c1, %c0_3, %c0_4, %c0_5] : memref<2x1x28x28xf32, #tpu.memory_space<vmem>>, vector<1x1x24x28xf32>
    %4 = vector.shape_cast %3 : vector<1x1x24x28xf32> to vector<24x28xf32>
    %5 = tpu.concatenate %2, %4 in 0 : vector<24x28xf32>, vector<24x28xf32> -> vector<48x28xf32>
    %c0_6 = arith.constant 0 : index
    %c0_7 = arith.constant 0 : index
    %6 = vector.load %arg2[%c0_6, %c0_7] : memref<140x144xf32, #tpu.memory_space<vmem>>, vector<28x144xf32>
    %cst_8 = arith.constant dense<0.000000e+00> : vector<48x144xf32>
    %7 = tpu.matmul %5, %6, %cst_8 {dimension_numbers = #tpu.dot_dimension_numbers<[1], [0], [0], [1], [0, 0, 1, 1], [], []>, precision = #tpu.contract_precision<fp32>} : vector<48x28xf32>, vector<28x144xf32>, vector<48x144xf32> -> vector<48x144xf32>
    %8 = arith.addf %0, %7 : vector<48x144xf32>
    %c0_9 = arith.constant 0 : index
    %c0_10 = arith.constant 0 : index
    %c1_11 = arith.constant 1 : index
    %c0_12 = arith.constant 0 : index
    %9 = vector.load %arg1[%c0_9, %c0_10, %c1_11, %c0_12] : memref<2x1x28x28xf32, #tpu.memory_space<vmem>>, vector<1x1x24x28xf32>
    %10 = vector.shape_cast %9 : vector<1x1x24x28xf32> to vector<24x28xf32>
    %c1_13 = arith.constant 1 : index
    %c0_14 = arith.constant 0 : index
    %c1_15 = arith.constant 1 : index
    %c0_16 = arith.constant 0 : index
    %11 = vector.load %arg1[%c1_13, %c0_14, %c1_15, %c0_16] : memref<2x1x28x28xf32, #tpu.memory_space<vmem>>, vector<1x1x24x28xf32>
    %12 = vector.shape_cast %11 : vector<1x1x24x28xf32> to vector<24x28xf32>
    %13 = tpu.concatenate %10, %12 in 0 : vector<24x28xf32>, vector<24x28xf32> -> vector<48x28xf32>
    %c28 = arith.constant 28 : index
    %c0_17 = arith.constant 0 : index
    %14 = vector.load %arg2[%c28, %c0_17] : memref<140x144xf32, #tpu.memory_space<vmem>>, vector<28x144xf32>
    %cst_18 = arith.constant dense<0.000000e+00> : vector<48x144xf32>
    %15 = tpu.matmul %13, %14, %cst_18 {dimension_numbers = #tpu.dot_dimension_numbers<[1], [0], [0], [1], [0, 0, 1, 1], [], []>, precision = #tpu.contract_precision<fp32>} : vector<48x28xf32>, vector<28x144xf32>, vector<48x144xf32> -> vector<48x144xf32>
    %16 = arith.addf %8, %15 : vector<48x144xf32>
    %c0_19 = arith.constant 0 : index
    %c0_20 = arith.constant 0 : index
    %c2 = arith.constant 2 : index
    %c0_21 = arith.constant 0 : index
    %17 = vector.load %arg1[%c0_19, %c0_20, %c2, %c0_21] : memref<2x1x28x28xf32, #tpu.memory_space<vmem>>, vector<1x1x24x28xf32>
    %18 = vector.shape_cast %17 : vector<1x1x24x28xf32> to vector<24x28xf32>
    %c1_22 = arith.constant 1 : index
    %c0_23 = arith.constant 0 : index
    %c2_24 = arith.constant 2 : index
    %c0_25 = arith.constant 0 : index
    %19 = vector.load %arg1[%c1_22, %c0_23, %c2_24, %c0_25] : memref<2x1x28x28xf32, #tpu.memory_space<vmem>>, vector<1x1x24x28xf32>
    %20 = vector.shape_cast %19 : vector<1x1x24x28xf32> to vector<24x28xf32>
    %21 = tpu.concatenate %18, %20 in 0 : vector<24x28xf32>, vector<24x28xf32> -> vector<48x28xf32>
    %c56 = arith.constant 56 : index
    %c0_26 = arith.constant 0 : index
    %22 = vector.load %arg2[%c56, %c0_26] : memref<140x144xf32, #tpu.memory_space<vmem>>, vector<28x144xf32>
    %cst_27 = arith.constant dense<0.000000e+00> : vector<48x144xf32>
    %23 = tpu.matmul %21, %22, %cst_27 {dimension_numbers = #tpu.dot_dimension_numbers<[1], [0], [0], [1], [0, 0, 1, 1], [], []>, precision = #tpu.contract_precision<fp32>} : vector<48x28xf32>, vector<28x144xf32>, vector<48x144xf32> -> vector<48x144xf32>
    %24 = arith.addf %16, %23 : vector<48x144xf32>
    %c0_28 = arith.constant 0 : index
    %c0_29 = arith.constant 0 : index
    %c3 = arith.constant 3 : index
    %c0_30 = arith.constant 0 : index
    %25 = vector.load %arg1[%c0_28, %c0_29, %c3, %c0_30] : memref<2x1x28x28xf32, #tpu.memory_space<vmem>>, vector<1x1x24x28xf32>
    %26 = vector.shape_cast %25 : vector<1x1x24x28xf32> to vector<24x28xf32>
    %c1_31 = arith.constant 1 : index
    %c0_32 = arith.constant 0 : index
    %c3_33 = arith.constant 3 : index
    %c0_34 = arith.constant 0 : index
    %27 = vector.load %arg1[%c1_31, %c0_32, %c3_33, %c0_34] : memref<2x1x28x28xf32, #tpu.memory_space<vmem>>, vector<1x1x24x28xf32>
    %28 = vector.shape_cast %27 : vector<1x1x24x28xf32> to vector<24x28xf32>
    %29 = tpu.concatenate %26, %28 in 0 : vector<24x28xf32>, vector<24x28xf32> -> vector<48x28xf32>
    %c84 = arith.constant 84 : index
    %c0_35 = arith.constant 0 : index
    %30 = vector.load %arg2[%c84, %c0_35] : memref<140x144xf32, #tpu.memory_space<vmem>>, vector<28x144xf32>
    %cst_36 = arith.constant dense<0.000000e+00> : vector<48x144xf32>
    %31 = tpu.matmul %29, %30, %cst_36 {dimension_numbers = #tpu.dot_dimension_numbers<[1], [0], [0], [1], [0, 0, 1, 1], [], []>, precision = #tpu.contract_precision<fp32>} : vector<48x28xf32>, vector<28x144xf32>, vector<48x144xf32> -> vector<48x144xf32>
    %32 = arith.addf %24, %31 : vector<48x144xf32>
    %c0_37 = arith.constant 0 : index
    %c0_38 = arith.constant 0 : index
    %c4 = arith.constant 4 : index
    %c0_39 = arith.constant 0 : index
    %33 = vector.load %arg1[%c0_37, %c0_38, %c4, %c0_39] : memref<2x1x28x28xf32, #tpu.memory_space<vmem>>, vector<1x1x24x28xf32>
    %34 = vector.shape_cast %33 : vector<1x1x24x28xf32> to vector<24x28xf32>
    %c1_40 = arith.constant 1 : index
    %c0_41 = arith.constant 0 : index
    %c4_42 = arith.constant 4 : index
    %c0_43 = arith.constant 0 : index
    %35 = vector.load %arg1[%c1_40, %c0_41, %c4_42, %c0_43] : memref<2x1x28x28xf32, #tpu.memory_space<vmem>>, vector<1x1x24x28xf32>
    %36 = vector.shape_cast %35 : vector<1x1x24x28xf32> to vector<24x28xf32>
    %37 = tpu.concatenate %34, %36 in 0 : vector<24x28xf32>, vector<24x28xf32> -> vector<48x28xf32>
    %c112 = arith.constant 112 : index
    %c0_44 = arith.constant 0 : index
    %38 = vector.load %arg2[%c112, %c0_44] : memref<140x144xf32, #tpu.memory_space<vmem>>, vector<28x144xf32>
    %cst_45 = arith.constant dense<0.000000e+00> : vector<48x144xf32>
    %39 = tpu.matmul %37, %38, %cst_45 {dimension_numbers = #tpu.dot_dimension_numbers<[1], [0], [0], [1], [0, 0, 1, 1], [], []>, precision = #tpu.contract_precision<fp32>} : vector<48x28xf32>, vector<28x144xf32>, vector<48x144xf32> -> vector<48x144xf32>
    %40 = arith.addf %32, %39 : vector<48x144xf32>
    %c0_46 = arith.constant 0 : index
    %c0_47 = arith.constant 0 : index
    %41 = vector.load %arg3[%c0_46, %c0_47] : memref<1x144xf32, #tpu.memory_space<vmem>>, vector<1x144xf32>
    %42 = vector.broadcast %41 : vector<1x144xf32> to vector<48x144xf32>
    %43 = arith.addf %40, %42 : vector<48x144xf32>
    %44 = vector.extract_strided_slice %43 {offsets = [0, 0], sizes = [47, 144], strides = [1, 1]} : vector<48x144xf32> to vector<47x144xf32>
    %45 = vector.extract_strided_slice %43 {offsets = [1, 0], sizes = [47, 144], strides = [1, 1]} : vector<48x144xf32> to vector<47x144xf32>
    %46 = arith.maximumf %44, %45 : vector<47x144xf32>
    %c0_48 = arith.constant 0 : index
    %c0_49 = arith.constant 0 : index
    %47 = vector.load %arg13[%c0_48, %c0_49] : memref<48x144xf32, #tpu.memory_space<vmem>>, vector<47x144xf32>
    tpu.vector_store %arg13[%c0_48, %c0_49], %46 {strides = array<i32>} : memref<48x144xf32, #tpu.memory_space<vmem>>, vector<47x144xf32>,
    %48 = vector.extract_strided_slice %43 {offsets = [47, 0], sizes = [1, 144], strides = [1, 1]} : vector<48x144xf32> to vector<1x144xf32>
    %c47 = arith.constant 47 : index
    %c0_50 = arith.constant 0 : index
    %49 = vector.load %arg13[%c47, %c0_50] : memref<48x144xf32, #tpu.memory_space<vmem>>, vector<1x144xf32>
    tpu.vector_store %arg13[%c47, %c0_50], %48 {strides = array<i32>} : memref<48x144xf32, #tpu.memory_space<vmem>>, vector<1x144xf32>,
    %c0_51 = arith.constant 0 : index
    %c0_52 = arith.constant 0 : index
    %50 = vector.load %arg13[%c0_51, %c0_52] : memref<48x144xf32, #tpu.memory_space<vmem>>, vector<48x144xf32>
    %51 = vector.extract_strided_slice %50 {offsets = [0, 0], sizes = [48, 138], strides = [1, 1]} : vector<48x144xf32> to vector<48x138xf32>
    %52 = vector.extract_strided_slice %50 {offsets = [0, 6], sizes = [48, 138], strides = [1, 1]} : vector<48x144xf32> to vector<48x138xf32>
    %53 = arith.maximumf %51, %52 : vector<48x138xf32>
    %c0_53 = arith.constant 0 : index
    %c0_54 = arith.constant 0 : index
    %54 = vector.load %arg13[%c0_53, %c0_54] : memref<48x144xf32, #tpu.memory_space<vmem>>, vector<48x138xf32>
    tpu.vector_store %arg13[%c0_53, %c0_54], %53 {strides = array<i32>} : memref<48x144xf32, #tpu.memory_space<vmem>>, vector<48x138xf32>,
    %55 = vector.extract_strided_slice %50 {offsets = [0, 138], sizes = [48, 6], strides = [1, 1]} : vector<48x144xf32> to vector<48x6xf32>
    %c0_55 = arith.constant 0 : index
    %c138 = arith.constant 138 : index
    %56 = vector.load %arg13[%c0_55, %c138] : memref<48x144xf32, #tpu.memory_space<vmem>>, vector<48x6xf32>
    tpu.vector_store %arg13[%c0_55, %c138], %55 {strides = array<i32>} : memref<48x144xf32, #tpu.memory_space<vmem>>, vector<48x6xf32>,
    %c0_56 = arith.constant 0 : index
    %c0_57 = arith.constant 0 : index
    %57 = vector.load %arg13[%c0_56, %c0_57] : memref<48x144xf32, #tpu.memory_space<vmem>>, vector<48x144xf32>
    %cst_58 = arith.constant 0.000000e+00 : f32
    %58 = vector.broadcast %cst_58 : f32 to vector<32x128xf32>
    %59 = vector.extract_strided_slice %57 {offsets = [0, 0], sizes = [16, 144], strides = [1, 1]} : vector<48x144xf32> to vector<16x144xf32>
    %60 = vector.extract_strided_slice %57 {offsets = [24, 0], sizes = [16, 144], strides = [1, 1]} : vector<48x144xf32> to vector<16x144xf32>
    %61 = tpu.concatenate %59, %60 in 0 : vector<16x144xf32>, vector<16x144xf32> -> vector<32x144xf32>
    %c0_59 = arith.constant 0 : index
    %c0_60 = arith.constant 0 : index
    %62 = vector.load %arg4[%c0_59, %c0_60] : memref<720x128xf32, #tpu.memory_space<vmem>>, vector<144x128xf32>
    %cst_61 = arith.constant dense<0.000000e+00> : vector<32x128xf32>
    %63 = tpu.matmul %61, %62, %cst_61 {dimension_numbers = #tpu.dot_dimension_numbers<[1], [0], [0], [1], [0, 0, 1, 1], [], []>, precision = #tpu.contract_precision<fp32>} : vector<32x144xf32>, vector<144x128xf32>, vector<32x128xf32> -> vector<32x128xf32>
    %64 = arith.addf %58, %63 : vector<32x128xf32>
    %65 = vector.extract_strided_slice %57 {offsets = [2, 0], sizes = [16, 144], strides = [1, 1]} : vector<48x144xf32> to vector<16x144xf32>
    %66 = vector.extract_strided_slice %57 {offsets = [26, 0], sizes = [16, 144], strides = [1, 1]} : vector<48x144xf32> to vector<16x144xf32>
    %67 = tpu.concatenate %65, %66 in 0 : vector<16x144xf32>, vector<16x144xf32> -> vector<32x144xf32>
    %c144 = arith.constant 144 : index
    %c0_62 = arith.constant 0 : index
    %68 = vector.load %arg4[%c144, %c0_62] : memref<720x128xf32, #tpu.memory_space<vmem>>, vector<144x128xf32>
    %cst_63 = arith.constant dense<0.000000e+00> : vector<32x128xf32>
    %69 = tpu.matmul %67, %68, %cst_63 {dimension_numbers = #tpu.dot_dimension_numbers<[1], [0], [0], [1], [0, 0, 1, 1], [], []>, precision = #tpu.contract_precision<fp32>} : vector<32x144xf32>, vector<144x128xf32>, vector<32x128xf32> -> vector<32x128xf32>
    %70 = arith.addf %64, %69 : vector<32x128xf32>
    %71 = vector.extract_strided_slice %57 {offsets = [4, 0], sizes = [16, 144], strides = [1, 1]} : vector<48x144xf32> to vector<16x144xf32>
    %72 = vector.extract_strided_slice %57 {offsets = [28, 0], sizes = [16, 144], strides = [1, 1]} : vector<48x144xf32> to vector<16x144xf32>
    %73 = tpu.concatenate %71, %72 in 0 : vector<16x144xf32>, vector<16x144xf32> -> vector<32x144xf32>
    %c288 = arith.constant 288 : index
    %c0_64 = arith.constant 0 : index
    %74 = vector.load %arg4[%c288, %c0_64] : memref<720x128xf32, #tpu.memory_space<vmem>>, vector<144x128xf32>
    %cst_65 = arith.constant dense<0.000000e+00> : vector<32x128xf32>
    %75 = tpu.matmul %73, %74, %cst_65 {dimension_numbers = #tpu.dot_dimension_numbers<[1], [0], [0], [1], [0, 0, 1, 1], [], []>, precision = #tpu.contract_precision<fp32>} : vector<32x144xf32>, vector<144x128xf32>, vector<32x128xf32> -> vector<32x128xf32>
    %76 = arith.addf %70, %75 : vector<32x128xf32>
    %77 = vector.extract_strided_slice %57 {offsets = [6, 0], sizes = [16, 144], strides = [1, 1]} : vector<48x144xf32> to vector<16x144xf32>
    %78 = vector.extract_strided_slice %57 {offsets = [30, 0], sizes = [16, 144], strides = [1, 1]} : vector<48x144xf32> to vector<16x144xf32>
    %79 = tpu.concatenate %77, %78 in 0 : vector<16x144xf32>, vector<16x144xf32> -> vector<32x144xf32>
    %c432 = arith.constant 432 : index
    %c0_66 = arith.constant 0 : index
    %80 = vector.load %arg4[%c432, %c0_66] : memref<720x128xf32, #tpu.memory_space<vmem>>, vector<144x128xf32>
    %cst_67 = arith.constant dense<0.000000e+00> : vector<32x128xf32>
    %81 = tpu.matmul %79, %80, %cst_67 {dimension_numbers = #tpu.dot_dimension_numbers<[1], [0], [0], [1], [0, 0, 1, 1], [], []>, precision = #tpu.contract_precision<fp32>} : vector<32x144xf32>, vector<144x128xf32>, vector<32x128xf32> -> vector<32x128xf32>
    %82 = arith.addf %76, %81 : vector<32x128xf32>
    %83 = vector.extract_strided_slice %57 {offsets = [8, 0], sizes = [16, 144], strides = [1, 1]} : vector<48x144xf32> to vector<16x144xf32>
    %84 = vector.extract_strided_slice %57 {offsets = [32, 0], sizes = [16, 144], strides = [1, 1]} : vector<48x144xf32> to vector<16x144xf32>
    %85 = tpu.concatenate %83, %84 in 0 : vector<16x144xf32>, vector<16x144xf32> -> vector<32x144xf32>
    %c576 = arith.constant 576 : index
    %c0_68 = arith.constant 0 : index
    %86 = vector.load %arg4[%c576, %c0_68] : memref<720x128xf32, #tpu.memory_space<vmem>>, vector<144x128xf32>
    %cst_69 = arith.constant dense<0.000000e+00> : vector<32x128xf32>
    %87 = tpu.matmul %85, %86, %cst_69 {dimension_numbers = #tpu.dot_dimension_numbers<[1], [0], [0], [1], [0, 0, 1, 1], [], []>, precision = #tpu.contract_precision<fp32>} : vector<32x144xf32>, vector<144x128xf32>, vector<32x128xf32> -> vector<32x128xf32>
    %88 = arith.addf %82, %87 : vector<32x128xf32>
    %c0_70 = arith.constant 0 : index
    %c0_71 = arith.constant 0 : index
    %89 = vector.load %arg5[%c0_70, %c0_71] : memref<1x128xf32, #tpu.memory_space<vmem>>, vector<1x128xf32>
    %90 = vector.broadcast %89 : vector<1x128xf32> to vector<32x128xf32>
    %91 = arith.addf %88, %90 : vector<32x128xf32>
    %92 = vector.extract_strided_slice %91 {offsets = [0, 0], sizes = [30, 128], strides = [1, 1]} : vector<32x128xf32> to vector<30x128xf32>
    %93 = vector.extract_strided_slice %91 {offsets = [2, 0], sizes = [30, 128], strides = [1, 1]} : vector<32x128xf32> to vector<30x128xf32>
    %94 = arith.maximumf %92, %93 : vector<30x128xf32>
    %c0_72 = arith.constant 0 : index
    %c0_73 = arith.constant 0 : index
    %95 = vector.load %arg14[%c0_72, %c0_73] : memref<32x128xf32, #tpu.memory_space<vmem>>, vector<30x128xf32>
    tpu.vector_store %arg14[%c0_72, %c0_73], %94 {strides = array<i32>} : memref<32x128xf32, #tpu.memory_space<vmem>>, vector<30x128xf32>,
    %96 = vector.extract_strided_slice %91 {offsets = [30, 0], sizes = [2, 128], strides = [1, 1]} : vector<32x128xf32> to vector<2x128xf32>
    %c30 = arith.constant 30 : index
    %c0_74 = arith.constant 0 : index
    %97 = vector.load %arg14[%c30, %c0_74] : memref<32x128xf32, #tpu.memory_space<vmem>>, vector<2x128xf32>
    tpu.vector_store %arg14[%c30, %c0_74], %96 {strides = array<i32>} : memref<32x128xf32, #tpu.memory_space<vmem>>, vector<2x128xf32>,
    %c0_75 = arith.constant 0 : index
    %c0_76 = arith.constant 0 : index
    %98 = vector.load %arg14[%c0_75, %c0_76] : memref<32x128xf32, #tpu.memory_space<vmem>>, vector<32x128xf32>
    %99 = vector.extract_strided_slice %98 {offsets = [0, 0], sizes = [32, 112], strides = [1, 1]} : vector<32x128xf32> to vector<32x112xf32>
    %100 = vector.extract_strided_slice %98 {offsets = [0, 16], sizes = [32, 112], strides = [1, 1]} : vector<32x128xf32> to vector<32x112xf32>
    %101 = arith.maximumf %99, %100 : vector<32x112xf32>
    %c0_77 = arith.constant 0 : index
    %c0_78 = arith.constant 0 : index
    %102 = vector.load %arg14[%c0_77, %c0_78] : memref<32x128xf32, #tpu.memory_space<vmem>>, vector<32x112xf32>
    tpu.vector_store %arg14[%c0_77, %c0_78], %101 {strides = array<i32>} : memref<32x128xf32, #tpu.memory_space<vmem>>, vector<32x112xf32>,
    %103 = vector.extract_strided_slice %98 {offsets = [0, 112], sizes = [32, 16], strides = [1, 1]} : vector<32x128xf32> to vector<32x16xf32>
    %c0_79 = arith.constant 0 : index
    %c112_80 = arith.constant 112 : index
    %104 = vector.load %arg14[%c0_79, %c112_80] : memref<32x128xf32, #tpu.memory_space<vmem>>, vector<32x16xf32>
    tpu.vector_store %arg14[%c0_79, %c112_80], %103 {strides = array<i32>} : memref<32x128xf32, #tpu.memory_space<vmem>>, vector<32x16xf32>,
    %c0_81 = arith.constant 0 : index
    %c0_82 = arith.constant 0 : index
    %105 = vector.load %arg14[%c0_81, %c0_82] : memref<32x128xf32, #tpu.memory_space<vmem>>, vector<32x128xf32>
    %106 = vector.extract_strided_slice %105 {offsets = [0, 0], sizes = [1, 128], strides = [1, 1]} : vector<32x128xf32> to vector<1x128xf32>
    %c0_83 = arith.constant 0 : index
    %c0_84 = arith.constant 0 : index
    %107 = vector.load %arg15[%c0_83, %c0_84] : memref<2x512xf32, #tpu.memory_space<vmem>>, vector<1x128xf32>
    tpu.vector_store %arg15[%c0_83, %c0_84], %106 {strides = array<i32>} : memref<2x512xf32, #tpu.memory_space<vmem>>, vector<1x128xf32>,
    %108 = vector.extract_strided_slice %105 {offsets = [4, 0], sizes = [1, 128], strides = [1, 1]} : vector<32x128xf32> to vector<1x128xf32>
    %c0_85 = arith.constant 0 : index
    %c128 = arith.constant 128 : index
    %109 = vector.load %arg15[%c0_85, %c128] : memref<2x512xf32, #tpu.memory_space<vmem>>, vector<1x128xf32>
    tpu.vector_store %arg15[%c0_85, %c128], %108 {strides = array<i32>} : memref<2x512xf32, #tpu.memory_space<vmem>>, vector<1x128xf32>,
    %110 = vector.extract_strided_slice %105 {offsets = [8, 0], sizes = [1, 128], strides = [1, 1]} : vector<32x128xf32> to vector<1x128xf32>
    %c0_86 = arith.constant 0 : index
    %c256 = arith.constant 256 : index
    %111 = vector.load %arg15[%c0_86, %c256] : memref<2x512xf32, #tpu.memory_space<vmem>>, vector<1x128xf32>
    tpu.vector_store %arg15[%c0_86, %c256], %110 {strides = array<i32>} : memref<2x512xf32, #tpu.memory_space<vmem>>, vector<1x128xf32>,
    %112 = vector.extract_strided_slice %105 {offsets = [12, 0], sizes = [1, 128], strides = [1, 1]} : vector<32x128xf32> to vector<1x128xf32>
    %c0_87 = arith.constant 0 : index
    %c384 = arith.constant 384 : index
    %113 = vector.load %arg15[%c0_87, %c384] : memref<2x512xf32, #tpu.memory_space<vmem>>, vector<1x128xf32>
    tpu.vector_store %arg15[%c0_87, %c384], %112 {strides = array<i32>} : memref<2x512xf32, #tpu.memory_space<vmem>>, vector<1x128xf32>,
    %114 = vector.extract_strided_slice %105 {offsets = [16, 0], sizes = [1, 128], strides = [1, 1]} : vector<32x128xf32> to vector<1x128xf32>
    %c1_88 = arith.constant 1 : index
    %c0_89 = arith.constant 0 : index
    %115 = vector.load %arg15[%c1_88, %c0_89] : memref<2x512xf32, #tpu.memory_space<vmem>>, vector<1x128xf32>
    tpu.vector_store %arg15[%c1_88, %c0_89], %114 {strides = array<i32>} : memref<2x512xf32, #tpu.memory_space<vmem>>, vector<1x128xf32>,
    %116 = vector.extract_strided_slice %105 {offsets = [20, 0], sizes = [1, 128], strides = [1, 1]} : vector<32x128xf32> to vector<1x128xf32>
    %c1_90 = arith.constant 1 : index
    %c128_91 = arith.constant 128 : index
    %117 = vector.load %arg15[%c1_90, %c128_91] : memref<2x512xf32, #tpu.memory_space<vmem>>, vector<1x128xf32>
    tpu.vector_store %arg15[%c1_90, %c128_91], %116 {strides = array<i32>} : memref<2x512xf32, #tpu.memory_space<vmem>>, vector<1x128xf32>,
    %118 = vector.extract_strided_slice %105 {offsets = [24, 0], sizes = [1, 128], strides = [1, 1]} : vector<32x128xf32> to vector<1x128xf32>
    %c1_92 = arith.constant 1 : index
    %c256_93 = arith.constant 256 : index
    %119 = vector.load %arg15[%c1_92, %c256_93] : memref<2x512xf32, #tpu.memory_space<vmem>>, vector<1x128xf32>
    tpu.vector_store %arg15[%c1_92, %c256_93], %118 {strides = array<i32>} : memref<2x512xf32, #tpu.memory_space<vmem>>, vector<1x128xf32>,
    %120 = vector.extract_strided_slice %105 {offsets = [28, 0], sizes = [1, 128], strides = [1, 1]} : vector<32x128xf32> to vector<1x128xf32>
    %c1_94 = arith.constant 1 : index
    %c384_95 = arith.constant 384 : index
    %121 = vector.load %arg15[%c1_94, %c384_95] : memref<2x512xf32, #tpu.memory_space<vmem>>, vector<1x128xf32>
    tpu.vector_store %arg15[%c1_94, %c384_95], %120 {strides = array<i32>} : memref<2x512xf32, #tpu.memory_space<vmem>>, vector<1x128xf32>,
    %c0_96 = arith.constant 0 : index
    %c0_97 = arith.constant 0 : index
    %122 = vector.load %arg15[%c0_96, %c0_97] : memref<2x512xf32, #tpu.memory_space<vmem>>, vector<2x512xf32>
    %c0_98 = arith.constant 0 : index
    %c0_99 = arith.constant 0 : index
    %123 = vector.load %arg6[%c0_98, %c0_99] : memref<512x128xf32, #tpu.memory_space<vmem>>, vector<512x128xf32>
    %cst_100 = arith.constant dense<0.000000e+00> : vector<2x128xf32>
    %124 = tpu.matmul %122, %123, %cst_100 {dimension_numbers = #tpu.dot_dimension_numbers<[1], [0], [0], [1], [0, 0, 1, 1], [], []>, precision = #tpu.contract_precision<fp32>} : vector<2x512xf32>, vector<512x128xf32>, vector<2x128xf32> -> vector<2x128xf32>
    %c0_101 = arith.constant 0 : index
    %c0_102 = arith.constant 0 : index
    %125 = vector.load %arg7[%c0_101, %c0_102] : memref<1x128xf32, #tpu.memory_space<vmem>>, vector<1x128xf32>
    %126 = vector.broadcast %125 : vector<1x128xf32> to vector<2x128xf32>
    %127 = arith.addf %124, %126 : vector<2x128xf32>
    %c0_103 = arith.constant 0 : index
    %c0_104 = arith.constant 0 : index
    %128 = vector.load %arg8[%c0_103, %c0_104] : memref<128x128xf32, #tpu.memory_space<vmem>>, vector<128x128xf32>
    %cst_105 = arith.constant dense<0.000000e+00> : vector<2x128xf32>
    %129 = tpu.matmul %127, %128, %cst_105 {dimension_numbers = #tpu.dot_dimension_numbers<[1], [0], [0], [1], [0, 0, 1, 1], [], []>, precision = #tpu.contract_precision<fp32>} : vector<2x128xf32>, vector<128x128xf32>, vector<2x128xf32> -> vector<2x128xf32>
    %c0_106 = arith.constant 0 : index
    %c0_107 = arith.constant 0 : index
    %130 = vector.load %arg9[%c0_106, %c0_107] : memref<1x128xf32, #tpu.memory_space<vmem>>, vector<1x128xf32>
    %131 = vector.broadcast %130 : vector<1x128xf32> to vector<2x128xf32>
    %132 = arith.addf %129, %131 : vector<2x128xf32>
    %c0_108 = arith.constant 0 : index
    %c0_109 = arith.constant 0 : index
    %133 = vector.load %arg10[%c0_108, %c0_109] : memref<128x128xf32, #tpu.memory_space<vmem>>, vector<128x128xf32>
    %cst_110 = arith.constant dense<0.000000e+00> : vector<2x128xf32>
    %134 = tpu.matmul %132, %133, %cst_110 {dimension_numbers = #tpu.dot_dimension_numbers<[1], [0], [0], [1], [0, 0, 1, 1], [], []>, precision = #tpu.contract_precision<fp32>} : vector<2x128xf32>, vector<128x128xf32>, vector<2x128xf32> -> vector<2x128xf32>
    %c0_111 = arith.constant 0 : index
    %c0_112 = arith.constant 0 : index
    %135 = vector.load %arg11[%c0_111, %c0_112] : memref<1x128xf32, #tpu.memory_space<vmem>>, vector<1x128xf32>
    %136 = vector.broadcast %135 : vector<1x128xf32> to vector<2x128xf32>
    %137 = arith.addf %134, %136 : vector<2x128xf32>
    %138 = vector.extract_strided_slice %137 {offsets = [0, 0], sizes = [2, 10], strides = [1, 1]} : vector<2x128xf32> to vector<2x10xf32>
    %c0_113 = arith.constant 0 : index
    %c0_114 = arith.constant 0 : index
    %139 = vector.load %arg12[%c0_113, %c0_114] : memref<2x10xf32, #tpu.memory_space<vmem>>, vector<2x10xf32>
    tpu.vector_store %arg12[%c0_113, %c0_114], %138 {strides = array<i32>} : memref<2x10xf32, #tpu.memory_space<vmem>>, vector<2x10xf32>,
    return
  }
  func.func @transform_0(%arg0: i32) -> (i32, i32, i32, i32) {
    %c0_i32 = arith.constant 0 : i32
    %c0_i32_0 = arith.constant 0 : i32
    %c0_i32_1 = arith.constant 0 : i32
    %c0_i32_2 = arith.constant 0 : i32
    %c0_i32_3 = arith.constant 0 : i32
    return %c0_i32, %c0_i32_0, %c0_i32_1, %c0_i32_2 : i32, i32, i32, i32
  }
  func.func @transform_1(%arg0: i32) -> (i32, i32) {
    %c0_i32 = arith.constant 0 : i32
    %c0_i32_0 = arith.constant 0 : i32
    %c0_i32_1 = arith.constant 0 : i32
    return %c0_i32, %c0_i32_0 : i32, i32
  }
  func.func @transform_2(%arg0: i32) -> (i32, i32) {
    %c0_i32 = arith.constant 0 : i32
    %c0_i32_0 = arith.constant 0 : i32
    %c0_i32_1 = arith.constant 0 : i32
    return %c0_i32, %c0_i32_0 : i32, i32
  }
  func.func @transform_3(%arg0: i32) -> (i32, i32) {
    %c0_i32 = arith.constant 0 : i32
    %c0_i32_0 = arith.constant 0 : i32
    %c0_i32_1 = arith.constant 0 : i32
    return %c0_i32, %c0_i32_0 : i32, i32
  }
  func.func @transform_4(%arg0: i32) -> (i32, i32) {
    %c0_i32 = arith.constant 0 : i32
    %c0_i32_0 = arith.constant 0 : i32
    %c0_i32_1 = arith.constant 0 : i32
    return %c0_i32, %c0_i32_0 : i32, i32
  }
  func.func @transform_5(%arg0: i32) -> (i32, i32) {
    %c0_i32 = arith.constant 0 : i32
    %c0_i32_0 = arith.constant 0 : i32
    %c0_i32_1 = arith.constant 0 : i32
    return %c0_i32, %c0_i32_0 : i32, i32
  }
  func.func @transform_6(%arg0: i32) -> (i32, i32) {
    %c0_i32 = arith.constant 0 : i32
    %c0_i32_0 = arith.constant 0 : i32
    %c0_i32_1 = arith.constant 0 : i32
    return %c0_i32, %c0_i32_0 : i32, i32
  }
  func.func @transform_7(%arg0: i32) -> (i32, i32) {
    %c0_i32 = arith.constant 0 : i32
    %c0_i32_0 = arith.constant 0 : i32
    %c0_i32_1 = arith.constant 0 : i32
    return %c0_i32, %c0_i32_0 : i32, i32
  }
  func.func @transform_8(%arg0: i32) -> (i32, i32) {
    %c0_i32 = arith.constant 0 : i32
    %c0_i32_0 = arith.constant 0 : i32
    %c0_i32_1 = arith.constant 0 : i32
    return %c0_i32, %c0_i32_0 : i32, i32
  }
  func.func @transform_9(%arg0: i32) -> (i32, i32) {
    %c0_i32 = arith.constant 0 : i32
    %c0_i32_0 = arith.constant 0 : i32
    %c0_i32_1 = arith.constant 0 : i32
    return %c0_i32, %c0_i32_0 : i32, i32
  }
  func.func @transform_10(%arg0: i32) -> (i32, i32) {
    %c0_i32 = arith.constant 0 : i32
    %c0_i32_0 = arith.constant 0 : i32
    %c0_i32_1 = arith.constant 0 : i32
    return %c0_i32, %c0_i32_0 : i32, i32
  }
  func.func @transform_11(%arg0: i32) -> (i32, i32) {
    %c0_i32 = arith.constant 0 : i32
    %c0_i32_0 = arith.constant 0 : i32
    %c0_i32_1 = arith.constant 0 : i32
    return %c0_i32, %c0_i32_0 : i32, i32
  }
}

</mosaic_0001>

<bundles_post_ra>
// kernel: lenet_forward.1
= control target key start
LH: loop header
LB: loop body
LE: loop exit
PB: predicated region body
PF: predicated region fallthrough
CT: control target
= control target key end

     0   :  { %16 = vsyncpa [#allocation6], 0  ;;  %s20417_s0 = inlined_call_operand.vmem [shape: f32[2,1,28,28], index: 0, kind: input, shape index: {}]   ;;  %s20418_s1 = inlined_call_operand.hbm [shape: f32[140,144], index: 1, kind: input, shape index: {}]   ;;  %s20419_s2 = inlined_call_operand.vmem [shape: f32[1,144], index: 2, kind: input, shape index: {}]   ;;  %s20420_s3 = inlined_call_operand.hbm [shape: f32[720,128], index: 3, kind: input, shape index: {}]   ;;  %s20421_s4 = inlined_call_operand.vmem [shape: f32[1,128], index: 4, kind: input, shape index: {}]   ;;  %s20422_s5 = inlined_call_operand.hbm [shape: f32[512,128], index: 5, kind: input, shape index: {}]   ;;  %s20423_s6 = inlined_call_operand.vmem [shape: f32[1,128], index: 6, kind: input, shape index: {}]   ;;  %s20424_s7 = inlined_call_operand.vmem [shape: f32[128,128], index: 7, kind: input, shape index: {}]   ;;  %s20425_s8 = inlined_call_operand.vmem [shape: f32[1,128], index: 8, kind: input, shape index: {}]   ;;  %s20426_s9 = inlined_call_operand.hbm [shape: f32[128,128], index: 9, kind: input, shape index: {}]   ;;  %s20427_s10 = inlined_call_operand.vmem [shape: f32[1,128], index: 10, kind: input, shape index: {}]   ;;  %s20428_s11 = inlined_call_operand.hbm [shape: f32[2,10], index: 11, kind: output, shape index: {}]  }
   0x1   :  { %17 = vsyncpa [#allocation9], 0 }
   0x2   :  { %18 = vsyncpa [#allocation12], 0 }
   0x3   :  { %19 = vsyncpa [#allocation7], 0  ;;  %s13498_s17 = smov [#allocation8]  }
   0x4   :  { %s41_s18 = sshll.u32 %s13498_s17, 4  ;;  %s42_s18 = int_to_ptr.vmem [resolvable:$true] %s41_s18 }
   0x5   :  { %s13398_s19 = scalar_lea.vmem %s42_s18, 11520  ;;  %p13403_p1 = scmp.lt.s32.totalorder %s42_s18, %s42_s18 }
   0x6   :  { %p13399_p0 = scmp.ne.s32.totalorder %s42_s18, %s13398_s19  ;;  %p13404_p2 = scmp.lt.s32.totalorder %s13398_s19, %s13398_s19 }
   0x8   :  { %p13405_p3 = por %p13404_p2, %p13403_p1 }
   0xa   :  { %p13406_p4 = pnand %p13405_p3, %p13399_p0 }
   0xc   :  { %13409 = shalt.err (!%p13406_p4)
}
   0xd   :  { %s13499_s20 = smov 128   ;;  %s13500_s21 = smov 8  }
   0xe   :  { %47 = dma.hbm_to_vmem [thread:$0]  %s20420_s3, 11520, %s42_s18, [#allocation9], %s13499_s20, %s13499_s20, %s13500_s21  }
   0xf   :  { %s13501_s24 = smov [#allocation5]  }
  0x10   :  { %s27_s25 = sshll.u32 %s13501_s24, 4  ;;  %s28_s25 = int_to_ptr.vmem [resolvable:$true] %s27_s25 }
  0x11   :  { %s13418_s26 = scalar_lea.vmem %s28_s25, 4608  ;;  %p13423_p6 = scmp.lt.s32.totalorder %s28_s25, %s28_s25 }
  0x12   :  { %p13419_p5 = scmp.ne.s32.totalorder %s28_s25, %s13418_s26  ;;  %p13424_p7 = scmp.lt.s32.totalorder %s13418_s26, %s13418_s26 }
  0x14   :  { %p13425_p8 = por %p13424_p7, %p13423_p6 }
  0x16   :  { %p13426_p9 = pnand %p13425_p8, %p13419_p5 }
  0x18   :  { %13429 = shalt.err (!%p13426_p9)
}
  0x19   :  { %s13502_s27 = smov 256   ;;  %s13503_s28 = smov 16  }
  0x1a   :  { %33 = dma.hbm_to_vmem [thread:$0]  %s20418_s1, 4608, %s28_s25, [#allocation6], %s13502_s27, %s13502_s27, %s13503_s28  }
  0x1b   :  { %s13504_s12 = smov [#allocation10]   ;;  %s13505_s14 = smov [#allocation11]  }
  0x1c   :  { %s55_s13 = sshll.u32 %s13504_s12, 4  ;;  %s73_s3 = sshll.u32 %s13505_s14, 4  ;;  %s56_s13 = int_to_ptr.vmem [resolvable:$true] %s55_s13  ;;  %s74_s3 = int_to_ptr.vmem [resolvable:$true] %s73_s3 }
  0x1d   :  { %s13438_s15 = scalar_lea.vmem %s56_s13, 8192  ;;  %p13443_p11 = scmp.lt.s32.totalorder %s56_s13, %s56_s13 }
  0x1e   :  { %p13439_p10 = scmp.ne.s32.totalorder %s56_s13, %s13438_s15  ;;  %p13444_p12 = scmp.lt.s32.totalorder %s13438_s15, %s13438_s15 }
  0x20   :  { %p13445_p13 = por %p13444_p12, %p13443_p11 }
  0x22   :  { %p13446_p0 = pnand %p13445_p13, %p13439_p10 }
  0x24   :  { %13449 = shalt.err (!%p13446_p0)
}
  0x25   :  { %61 = dma.hbm_to_vmem [thread:$0]  %s20422_s5, 8192, %s56_s13, [#allocation9], %s13499_s20, %s13499_s20, %s13500_s21  }
  0x26   :  { %s13458_s1 = scalar_lea.vmem %s74_s3, 2048  ;;  %p13463_p2 = scmp.lt.s32.totalorder %s74_s3, %s74_s3 }
  0x27   :  { %p13459_p1 = scmp.ne.s32.totalorder %s74_s3, %s13458_s1  ;;  %p13464_p3 = scmp.lt.s32.totalorder %s13458_s1, %s13458_s1 }
  0x29   :  { %p13465_p4 = por %p13464_p3, %p13463_p2 }
  0x2b   :  { %p13466_p5 = pnand %p13465_p4, %p13459_p1 }
  0x2d   :  { %13469 = shalt.err (!%p13466_p5)
}
  0x2e   :  { %79 = dma.hbm_to_vmem [thread:$0]  %s20426_s9, 2048, %s74_s3, [#allocation12], %s13499_s20, %s13499_s20, %s13500_s21  }
  0x2f   :  { %13490 = dma.done.wait [#allocation6], 4608  }
  0x30   :  { %13491 = vsyncadd [#allocation6], 4294962688 }
  0x31   :  { %13492 = dma.done.wait [#allocation9], 19712  }
  0x32   :  { %13493 = vsyncadd [#allocation9], 4294947584 }
  0x33   :  { %13494 = dma.done.wait [#allocation12], 2048  }
  0x34   :  { %13495 = vsyncadd [#allocation12], 4294965248  ;;  %v20431_v0 = vmov 0.0   ;;  %v122_v1 = vld [vmem:[#allocation5 + $0x68] sm:$0xff]  ;;  %vm131_vm0 = vcmask 1043456   ;;  %v121_v2 = vld [vmem:[#allocation5 + $0x60] sm:$0xff] }
  0x35   :  { %247 = vmatprep.mubr.f32.mxu0 %v20431_v0  ;;  %418 = vmatprep.mubr.f32.mxu1 %v20431_v0  ;;  %v120_v3 = vld [vmem:[#allocation5 + $0x58] sm:$0xff]  ;;  %v144_v4 = vrot.slane %v122_v1, 4  ;;  %v142_v5 = vrot.slane %v121_v2, 4  ;;  %v119_v7 = vld [vmem:[#allocation5 + $0x50] sm:$0xff]  ;;  %v118_v8 = vld [vmem:[#allocation5 + $0x48] sm:$0xff]  ;;  %vm152_vm1 = vcmask 228352  }
  0x36   :  { %v140_v6 = vrot.slane %v120_v3, 4  ;;  %v117_v9 = vld [vmem:[#allocation5 + $0x40] sm:$0xff]  ;;  %v138_v10 = vrot.slane %v119_v7, 4  ;;  %v136_v11 = vrot.slane %v118_v8, 4  ;;  %v116_v13 = vld [vmem:[#allocation5 + $0x38] sm:$0xf0] }
  0x37   :  { %v133_v12 = vrot.slane %v117_v9, 4  ;;  %v173_v14 = vsel %vm131_vm0, %v144_v4, 0  ;;  %v171_v15 = vsel %vm131_vm0, %v142_v5, 0  ;;  %v135_v17 = vrot.slane %v116_v13, 4  ;;  %v115_v18 = vld [vmem:[#allocation5 + $0x30] sm:$0xf0] }
  0x38   :  { %v145_v16 = vsel %vm131_vm0, %v140_v6, %v144_v4  ;;  %v13599_v19 = vand.u32 4294901760, %v173_v14  ;;  %v13601_v20 = vand.u32 4294901760, %v171_v15  ;;  %v143_v22 = vsel %vm131_vm0, %v138_v10, %v142_v5  ;;  %v109_v23 = vld [vmem:[%s20417_s0 + $0x1] sm:$0xff]  ;;  %v110_v28 = vld [vmem:[%s20417_s0 + $0x9] sm:$0xff]  ;;  %v111_v57 = vld [vmem:[%s20417_s0 + $0x11] sm:$0xff]  ;;  %s13512_s21 = smov [#allocation13]  }
  0x39   :  { %v13603_v21 = vand.u32 4294901760, %v145_v16  ;;  %v13609_v24 = vand.u32 4294901760, %v143_v22  ;;  %v141_v25 = vsel %vm131_vm0, %v136_v11, %v140_v6  ;;  %v139_v26 = vsel %vm131_vm0, %v133_v12, %v138_v10  ;;  %v12301_v3 = vld [vmem:[%s20417_s0 + $0x21] sm:$0xff]  ;;  %v12302_v8 = vld [vmem:[%s20417_s0 + $0x29] sm:$0xff]  ;;  %v12303_v13 = vld [vmem:[%s20417_s0 + $0x31] sm:$0xff]  ;;  %s12287_s22 = sshll.u32 %s13512_s21, 4  ;;  %s12288_s22 = int_to_ptr.vmem [resolvable:$true] %s12287_s22 }
  0x3a   :  { %v137_v27 = vsel %vm131_vm0, %v135_v17, %v136_v11  ;;  %200 = vmatprep.subr.mxu0 %v13599_v19  ;;  %v13618_v29 = vand.u32 4294901760, %v141_v25  ;;  %v13620_v30 = vand.u32 4294901760, %v139_v26  ;;  %v132_v32 = vrot.slane %v115_v18, 4  ;;  %s13470_s23 = scalar_lea.vmem %s12288_s22, 32  ;;  %p13475_p7 = scmp.lt.s32.totalorder %s12288_s22, %s12288_s22 }
  0x3b   :  { %v13622_v31 = vand.u32 4294901760, %v137_v27  ;;  %202 = vmatpush1.msra.mxu0 %v13601_v20  ;;  %v154_v33 = vsel %vm152_vm1, %v109_v23, 0  ;;  %v13627_v34 = vsub.f32 %v173_v14, %v13599_v19  ;;  %v13630_v35 = vsub.f32 %v171_v15, %v13601_v20  ;;  %p13471_p6 = scmp.ne.s32.totalorder %s12288_s22, %s13470_s23  ;;  %p13476_p8 = scmp.lt.s32.totalorder %s13470_s23, %s13470_s23 }
  0x3c   :  { %v13633_v36 = vsub.f32 %v145_v16, %v13603_v21  ;;  %204 = vmatprep.subr.mxu0 %v13603_v21  ;;  %v134_v37 = vsel %vm131_vm0, %v132_v32, %v133_v12  ;;  %v13637_v38 = vand.u32 4294901760, %v154_v33  ;;  %v13640_v39 = vsub.f32 %v143_v22, %v13609_v24 }
  0x3d   :  { %v157_v40 = vsel %vm152_vm1, %v110_v28, 0  ;;  %206 = vmatpush1.msra.mxu0 %v13609_v24  ;;  %v13644_v41 = vand.u32 4294901760, %v134_v37  ;;  %v340_v42 = vand.u32 4294901760, %v13627_v34  ;;  %v346_v43 = vand.u32 4294901760, %v13630_v35  ;;  %p13477_p9 = por %p13476_p8, %p13475_p7 }
  0x3e   :  { %v352_v44 = vand.u32 4294901760, %v13633_v36  ;;  %208 = vmatprep.subr.mxu0 %v13618_v29  ;;  %v13651_v45 = vsub.f32 %v154_v33, %v13637_v38  ;;  %v358_v46 = vand.u32 4294901760, %v13640_v39  ;;  %v13654_v47 = vand.u32 4294901760, %v157_v40 }
  0x3f   :  { %v13657_v48 = vsub.f32 %v141_v25, %v13618_v29  ;;  %210 = vmatpush1.msra.mxu0 %v13620_v30  ;;  %v341_v49 = vsub.f32 %v13627_v34, %v340_v42  ;;  %v347_v50 = vsub.f32 %v13630_v35, %v346_v43  ;;  %v13670_v52 = vsub.f32 %v139_v26, %v13620_v30  ;;  %p13478_p10 = pnand %p13477_p9, %p13471_p6 }
  0x40   :  { %v353_v51 = vsub.f32 %v13633_v36, %v352_v44  ;;  %212 = vmatprep.subr.mxu0 %v13622_v31  ;;  %v250_v53 = vand.u32 4294901760, %v13651_v45  ;;  %v359_v54 = vsub.f32 %v13640_v39, %v358_v46  ;;  %v13678_v55 = vsub.f32 %v157_v40, %v13654_v47 }
  0x41   :  { %v364_v56 = vand.u32 4294901760, %v13657_v48  ;;  %214 = vmatpush1.msra.mxu0 %v13644_v41  ;;  %v342_v58 = vand.u32 4294901760, %v341_v49  ;;  %v348_v59 = vand.u32 4294901760, %v347_v50  ;;  %v370_v61 = vand.u32 4294901760, %v13670_v52 }
  0x42   :  { %v354_v60 = vand.u32 4294901760, %v353_v51  ;;  %v251_v62 = vsub.f32 %v13651_v45, %v250_v53  ;;  %v360_v63 = vand.u32 4294901760, %v359_v54  ;;  %v261_v1 = vand.u32 4294901760, %v13678_v55  ;;  %487 = vmatprep.subr.mxu0 %v13627_v34 }
  0x43   :  { %v365_v2 = vsub.f32 %v13657_v48, %v364_v56  ;;  %343 = vmatprep.subr.mxu1 %v342_v58  ;;  %v371_v4 = vsub.f32 %v13670_v52, %v370_v61  ;;  %v13701_v5 = vsub.f32 %v137_v27, %v13622_v31  ;;  %v13704_v6 = vsub.f32 %v134_v37, %v13644_v41 }
  0x44   :  { %v160_v7 = vsel %vm152_vm1, %v111_v57, 0  ;;  %v252_v9 = vand.u32 4294901760, %v251_v62  ;;  %349 = vmatpush1.msra.mxu1 %v348_v59  ;;  %v262_v10 = vsub.f32 %v13678_v55, %v261_v1  ;;  %v163_v17 = vsel %vm152_vm1, %v12301_v3, 0 }
  0x45   :  { %v366_v11 = vand.u32 4294901760, %v365_v2  ;;  %v13713_v12 = vand.u32 4294901760, %v160_v7  ;;  %355 = vmatprep.subr.mxu1 %v354_v60  ;;  %v372_v14 = vand.u32 4294901760, %v371_v4  ;;  %v376_v15 = vand.u32 4294901760, %v13701_v5 }
  0x46   :  { %v382_v16 = vand.u32 4294901760, %v13704_v6  ;;  %253 = vmatmul.mubr.f32.vlgmr.msra.gmra.mxu0 %v252_v9  ;;  %361 = vmatpush1.msra.mxu1 %v360_v63  ;;  %v263_v18 = vand.u32 4294901760, %v262_v10  ;;  %v13724_v23 = vand.u32 4294901760, %v163_v17  ;;  %v166_v25 = vsel %vm152_vm1, %v12302_v8, 0  ;;  %v108_v9 = vld [vmem:[#allocation5 + $0x38] sm:$0xf] }
  0x47   :  { %v13722_v22 = vsub.f32 %v160_v7, %v13713_v12  ;;  %258 = vmatprep.mubr.f32.mxu0 %v20431_v0  ;;  %367 = vmatprep.subr.mxu1 %v366_v11  ;;  %v377_v26 = vsub.f32 %v13701_v5, %v376_v15  ;;  %v13734_v28 = vand.u32 4294901760, %v166_v25  ;;  %v169_v32 = vsel %vm152_vm1, %v12303_v13, 0  ;;  %v94_v11 = vld [vmem:[%s20417_s0] sm:$0xff] }
  0x48   :  { %v383_v27 = vsub.f32 %v13704_v6, %v382_v16  ;;  %373 = vmatpush1.msra.mxu1 %v372_v14  ;;  %490 = vmatpush1.msra.mxu0 %v13630_v35  ;;  %v13740_v37 = vsub.f32 %v163_v17, %v13724_v23  ;;  %v13742_v40 = vand.u32 4294901760, %v169_v32  ;;  %v985_v10 = vsel %vm131_vm0, %v108_v9, 0 }
  0x49   :  { %v272_v33 = vand.u32 4294901760, %v13722_v22  ;;  %v378_v49 = vand.u32 4294901760, %v377_v26  ;;  %493 = vmatprep.subr.mxu0 %v13633_v36  ;;  %v13746_v51 = vsub.f32 %v166_v25, %v13734_v28  ;;  %v13804_v34 = vand.u32 4294901760, %v985_v10  ;;  %v95_v25 = vld [vmem:[%s20417_s0 + $0x8] sm:$0xff] }
  0x4a   :  { %v384_v50 = vand.u32 4294901760, %v383_v27  ;;  %264 = vmatmul.mubr.f32.gmra.mxu0 %v263_v18  ;;  %v283_v57 = vand.u32 4294901760, %v13740_v37  ;;  %v13753_v58 = vsub.f32 %v169_v32, %v13742_v40  ;;  %vm4351_vm2 = vcmask 1046528  }
  0x4b   :  { %v273_v54 = vsub.f32 %v13722_v22, %v272_v33  ;;  %379 = vmatprep.subr.mxu1 %v378_v49  ;;  %269 = vmatprep.mubr.f32.mxu0 %v20431_v0  ;;  %v294_v59 = vand.u32 4294901760, %v13746_v51  ;;  %v13817_v35 = vsub.f32 %v985_v10, %v13804_v34  ;;  %v967_v49 = vsel %vm152_vm1, %v95_v25, 0 }
  0x4c   :  { %385 = vmatpush1.msra.mxu1 %v384_v50  ;;  %v284_v62 = vsub.f32 %v13740_v37, %v283_v57  ;;  %496 = vmatpush1.msra.mxu0 %v13640_v39  ;;  %v305_v3 = vand.u32 4294901760, %v13753_v58  ;;  %vm4399_vm3 = vcmask 130048   ;;  %vm4410_vm4 = vcmask 129024  }
  0x4d   :  { %v274_v60 = vand.u32 4294901760, %v273_v54  ;;  %420 = vmatmul.mubr.f32.vlgmr.msra.gmra.mxu1 %v13637_v38  ;;  %615 = vmatprep.subr.mxu1 %v13599_v19  ;;  %v295_v2 = vsub.f32 %v13746_v51, %v294_v59  ;;  %v1152_v39 = vand.u32 4294901760, %v13817_v35  ;;  %vm4485_vm6 = vcmask 998400  }
  0x4e   :  { %617 = vmatpush1.msra.mxu1 %v13601_v20  ;;  %v285_v63 = vand.u32 4294901760, %v284_v62  ;;  %425 = vmatprep.mubr.f32.mxu1 %v20431_v0  ;;  %v306_v7 = vsub.f32 %v13753_v58, %v305_v3  ;;  %vm4517_vm7 = vcmask 80896   ;;  %vm4529_vm8 = vcmask 130128  }
  0x4f   :  { %275 = vmatmul.mubr.f32.gmra.mxu0 %v274_v60  ;;  %619 = vmatprep.subr.mxu1 %v13603_v21  ;;  %v296_v4 = vand.u32 4294901760, %v295_v2  ;;  %v12298_v2 = vld [vmem:[%s20417_s0 + $0x20] sm:$0xff]  ;;  %vm4572_vm9 = vcmask 1045504   ;;  %vm7235_vm10 = vcmask 1041408   ;;  %vm9071_vm11 = vcmask 916480  }
  0x50   :  { %280 = vmatprep.mubr.f32.mxu0 %v20431_v0  ;;  %499 = vmatprep.subr.mxu0 %v13657_v48  ;;  %v307_v8 = vand.u32 4294901760, %v306_v7  ;;  %v973_v10 = vsel %vm152_vm1, %v12298_v2, 0  ;;  %vm9076_vm12 = vcmask 1048448   ;;  %vm13511_vm13 = vmmov 0  }
  0x51   :  { %427 = vmatmul.mubr.f32.gmra.mxu1 %v13654_v47  ;;  %502 = vmatpush1.msra.mxu0 %v13670_v52  ;;  %vm12279_vm14 = vcmask 74752  }
  0x52   :  { %432 = vmatprep.mubr.f32.mxu1 %v20431_v0  ;;  %621 = vmatpush1.msra.mxu1 %v13609_v24 }
  0x53   :  { %286 = vmatmul.mubr.f32.gmra.mxu0 %v285_v63  ;;  %623 = vmatprep.subr.mxu1 %v13618_v29 }
  0x54   :  { %291 = vmatprep.mubr.f32.mxu0 %v20431_v0  ;;  %505 = vmatprep.subr.mxu0 %v13701_v5 }
  0x55   :  { %434 = vmatmul.mubr.f32.gmra.mxu1 %v13713_v12  ;;  %508 = vmatpush1.msra.mxu0 %v13704_v6  ;;  %v101_v6 = vld [vmem:[#allocation5] sm:$0xff] }
  0x56   :  { %439 = vmatprep.mubr.f32.mxu1 %v20431_v0  ;;  %625 = vmatpush1.msra.mxu1 %v13620_v30 }
  0x57   :  { %297 = vmatmul.mubr.f32.gmra.mxu0 %v296_v4  ;;  %627 = vmatprep.subr.mxu1 %v13622_v31 }
  0x58   :  { %302 = vmatprep.mubr.f32.mxu0 %v20431_v0  ;;  %744 = vmatprep.subr.mxu0 %v340_v42  ;;  %v106_v42 = vld [vmem:[#allocation5 + $0x28] sm:$0xff] }
  0x59   :  { %441 = vmatmul.mubr.f32.gmra.mxu1 %v13724_v23 }
  0x5a   :  { %446 = vmatprep.mubr.f32.mxu1 %v20431_v0  ;;  %629 = vmatpush1.msra.mxu1 %v13644_v41 }
  0x5b   :  { %308 = vmatmul.mubr.f32.gmra.mxu0 %v307_v8  ;;  %873 = vmatprep.subr.mxu1 %v13599_v19  ;;  %v107_v19 = vld [vmem:[#allocation5 + $0x30] sm:$0xf] }
  0x5c   :  { %541 = vmatprep.mubr.f32.mxu0 %v20431_v0  ;;  %v982_v36 = vsel %vm131_vm0, %v107_v19, 0 }
  0x5d   :  { %448 = vmatmul.mubr.f32.gmra.mxu1 %v13734_v28 }
  0x5e   :  { %453 = vmatprep.mubr.f32.mxu1 %v20431_v0 }
  0x5f   :  { %544 = vmatmul.mubr.f32.vlgmr.msra.gmra.mxu0 %v13651_v45  ;;  %v104_v45 = vld [vmem:[#allocation5 + $0x18] sm:$0xff] }
  0x60   :  { %549 = vmatprep.mubr.f32.mxu0 %v20431_v0  ;;  %748 = vmatpush1.msra.mxu0 %v346_v43  ;;  %v13845_v43 = vand.u32 4294901760, %v106_v42  ;;  %v13862_v52 = vand.u32 4294901760, %v104_v45 }
  0x61   :  { %752 = vmatprep.subr.mxu0 %v352_v44  ;;  %455 = vmatmul.mubr.f32.gmra.mxu1 %v13742_v40  ;;  %v105_v44 = vld [vmem:[#allocation5 + $0x20] sm:$0xff] }
  0x62   :  { %756 = vmatpush1.msra.mxu0 %v358_v46  ;;  %662 = vmatprep.mubr.f32.mxu1 %v20431_v0  ;;  %v13860_v48 = vsub.f32 %v106_v42, %v13845_v43  ;;  %v12299_v42 = vld [vmem:[%s20417_s0 + $0x28] sm:$0xff] }
  0x63   :  { %552 = vmatmul.mubr.f32.gmra.mxu0 %v13678_v55  ;;  %760 = vmatprep.subr.mxu0 %v364_v56  ;;  %v102_v55 = vld [vmem:[#allocation5 + $0x8] sm:$0xff] }
  0x64   :  { %557 = vmatprep.mubr.f32.mxu0 %v20431_v0  ;;  %764 = vmatpush1.msra.mxu0 %v370_v61  ;;  %v1164_v61 = vand.u32 4294901760, %v13860_v48  ;;  %v13880_v5 = vand.u32 4294901760, %v102_v55 }
  0x65   :  { %666 = vmatmul.mubr.f32.vlgmr.msra.gmra.mxu1 %v250_v53  ;;  %768 = vmatprep.subr.mxu0 %v376_v15  ;;  %v103_v53 = vld [vmem:[#allocation5 + $0x10] sm:$0xff]  ;;  %v13898_v15 = vand.u32 4294901760, %v101_v6 }
  0x66   :  { %875 = vmatpush1.msra.mxu1 %v13601_v20  ;;  %671 = vmatprep.mubr.f32.mxu1 %v20431_v0  ;;  %v13837_v20 = vand.u32 4294901760, %v982_v36  ;;  %v13874_v56 = vand.u32 4294901760, %v103_v53  ;;  %v1165_v17 = vsub.f32 %v13860_v48, %v1164_v61 }
  0x67   :  { %560 = vmatmul.mubr.f32.gmra.mxu0 %v13722_v22  ;;  %877 = vmatprep.subr.mxu1 %v13603_v21  ;;  %v1153_v21 = vsub.f32 %v13817_v35, %v1152_v39  ;;  %v13907_v22 = vsub.f32 %v102_v55, %v13880_v5  ;;  %v12300_v55 = vld [vmem:[%s20417_s0 + $0x30] sm:$0xff] }
  0x68   :  { %565 = vmatprep.mubr.f32.mxu0 %v20431_v0  ;;  %772 = vmatpush1.msra.mxu0 %v382_v16  ;;  %v13852_v46 = vsub.f32 %v982_v36, %v13837_v20  ;;  %v13896_v14 = vsub.f32 %v103_v53, %v13874_v56  ;;  %v964_v16 = vsel %vm152_vm1, %v94_v11, 0  ;;  %v1166_v50 = vand.u32 4294901760, %v1165_v17 }
  0x69   :  { %675 = vmatmul.mubr.f32.gmra.mxu1 %v261_v1  ;;  %1012 = vmatprep.subr.mxu0 %v13804_v34  ;;  %v13878_v1 = vsub.f32 %v104_v45, %v13862_v52  ;;  %v13917_v27 = vand.u32 4294901760, %v964_v16  ;;  %v1188_v54 = vand.u32 4294901760, %v13907_v22 }
  0x6a   :  { %680 = vmatprep.mubr.f32.mxu1 %v20431_v0  ;;  %879 = vmatpush1.msra.mxu1 %v13609_v24  ;;  %v13856_v24 = vand.u32 4294901760, %v105_v44 }
  0x6b   :  { %568 = vmatmul.mubr.f32.gmra.mxu0 %v13740_v37  ;;  %881 = vmatprep.subr.mxu1 %v13618_v29  ;;  %v1154_v29 = vand.u32 4294901760, %v1153_v21  ;;  %v1176_v18 = vand.u32 4294901760, %v13878_v1  ;;  %v13926_v37 = vsub.f32 %v101_v6, %v13898_v15  ;;  %v1189_v4 = vsub.f32 %v13907_v22, %v1188_v54 }
  0x6c   :  { %573 = vmatprep.mubr.f32.mxu0 %v20431_v0  ;;  %883 = vmatpush1.msra.mxu1 %v13620_v30  ;;  %v1158_v30 = vand.u32 4294901760, %v13852_v46  ;;  %v13978_v21 = vand.u32 4294901760, %v973_v10 }
  0x6d   :  { %684 = vmatmul.mubr.f32.gmra.mxu1 %v272_v33  ;;  %885 = vmatprep.subr.mxu1 %v13622_v31  ;;  %v13872_v31 = vsub.f32 %v105_v44, %v13856_v24  ;;  %v1182_v33 = vand.u32 4294901760, %v13896_v14  ;;  %v1190_v36 = vand.u32 4294901760, %v1189_v4 }
  0x6e   :  { %689 = vmatprep.mubr.f32.mxu1 %v20431_v0  ;;  %887 = vmatpush1.msra.mxu1 %v13644_v41  ;;  %v1159_v41 = vsub.f32 %v13852_v46, %v1158_v30  ;;  %v13996_v6 = vsub.f32 %v973_v10, %v13978_v21 }
  0x6f   :  { %576 = vmatmul.mubr.f32.gmra.mxu0 %v13746_v51  ;;  %1155 = vmatprep.subr.mxu1 %v1154_v29  ;;  %v1170_v13 = vand.u32 4294901760, %v13872_v31  ;;  %v1177_v51 = vsub.f32 %v13878_v1, %v1176_v18  ;;  %v1183_v62 = vsub.f32 %v13896_v14, %v1182_v33 }
  0x70   :  { %581 = vmatprep.mubr.f32.mxu0 %v20431_v0  ;;  %v1160_v26 = vand.u32 4294901760, %v1159_v41  ;;  %v1095_v25 = vand.u32 4294901760, %v13996_v6 }
  0x71   :  { %693 = vmatmul.mubr.f32.gmra.mxu1 %v283_v57  ;;  %v1171_v32 = vsub.f32 %v13872_v31, %v1170_v13  ;;  %v96_v57 = vld [vmem:[%s20417_s0 + $0x10] sm:$0xff]  ;;  %v1184_v19 = vand.u32 4294901760, %v1183_v62 }
  0x72   :  { %698 = vmatprep.mubr.f32.mxu1 %v20431_v0  ;;  %v970_v63 = vsel %vm152_vm1, %v96_v57, 0 }
  0x73   :  { %584 = vmatmul.mubr.f32.gmra.mxu0 %v13753_v58  ;;  %v13941_v58 = vsub.f32 %v964_v16, %v13917_v27  ;;  %v1172_v60 = vand.u32 4294901760, %v1171_v32  ;;  %v13967_v9 = vand.u32 4294901760, %v970_v63 }
  0x74   :  { %805 = vmatprep.mubr.f32.mxu0 %v20431_v0 }
  0x75   :  { %702 = vmatmul.mubr.f32.gmra.mxu1 %v294_v59  ;;  %v13943_v59 = vand.u32 4294901760, %v967_v49  ;;  %v1062_v7 = vand.u32 4294901760, %v13941_v58  ;;  %v13987_v29 = vsub.f32 %v970_v63, %v13967_v9 }
  0x76   :  { %707 = vmatprep.mubr.f32.mxu1 %v20431_v0 }
  0x77   :  { %807 = vmatmul.mubr.f32.vlgmr.msra.gmra.mxu0 %v13637_v38  ;;  %v13965_v8 = vsub.f32 %v967_v49, %v13943_v59  ;;  %v1063_v44 = vsub.f32 %v13941_v58, %v1062_v7  ;;  %v1084_v16 = vand.u32 4294901760, %v13987_v29 }
  0x78   :  { %812 = vmatprep.mubr.f32.mxu0 %v20431_v0  ;;  %1014 = vmatpush1.msra.mxu0 %v13837_v20 }
  0x79   :  { %1016 = vmatprep.subr.mxu0 %v13845_v43  ;;  %711 = vmatmul.mubr.f32.gmra.mxu1 %v305_v3  ;;  %v1178_v3 = vand.u32 4294901760, %v1177_v51  ;;  %v1073_v45 = vand.u32 4294901760, %v13965_v8  ;;  %v1064_v11 = vand.u32 4294901760, %v1063_v44  ;;  %v1085_v32 = vsub.f32 %v13987_v29, %v1084_v16 }
  0x7a   :  { %1018 = vmatpush1.msra.mxu0 %v13856_v24  ;;  %920 = vmatprep.mubr.f32.mxu1 %v20431_v0  ;;  %v1096_v51 = vsub.f32 %v13996_v6, %v1095_v25 }
  0x7b   :  { %814 = vmatmul.mubr.f32.gmra.mxu0 %v13654_v47  ;;  %1020 = vmatprep.subr.mxu0 %v13862_v52  ;;  %v1074_v41 = vsub.f32 %v13965_v8, %v1073_v45 }
  0x7c   :  { %819 = vmatprep.mubr.f32.mxu0 %v20431_v0  ;;  %1022 = vmatpush1.msra.mxu0 %v13874_v56 }
  0x7d   :  { %922 = vmatmul.mubr.f32.vlgmr.msra.gmra.mxu1 %v13637_v38  ;;  %1024 = vmatprep.subr.mxu0 %v13880_v5  ;;  %v1194_v38 = vand.u32 4294901760, %v13926_v37 }
  0x7e   :  { %1161 = vmatpush1.msra.mxu1 %v1160_v26  ;;  %927 = vmatprep.mubr.f32.mxu1 %v20431_v0  ;;  %v1075_v26 = vand.u32 4294901760, %v1074_v41 }
  0x7f   :  { %821 = vmatmul.mubr.f32.gmra.mxu0 %v13713_v12  ;;  %1167 = vmatprep.subr.mxu1 %v1166_v50 }
  0x80   :  { %826 = vmatprep.mubr.f32.mxu0 %v20431_v0  ;;  %1026 = vmatpush1.msra.mxu0 %v13898_v15 }
  0x81   :  { %929 = vmatmul.mubr.f32.gmra.mxu1 %v13654_v47  ;;  %1299 = vmatprep.subr.mxu0 %v13817_v35  ;;  %v1195_v47 = vsub.f32 %v13926_v37, %v1194_v38 }
  0x82   :  { %934 = vmatprep.mubr.f32.mxu1 %v20431_v0  ;;  %1173 = vmatpush1.msra.mxu1 %v1172_v60 }
  0x83   :  { %828 = vmatmul.mubr.f32.gmra.mxu0 %v13724_v23  ;;  %1179 = vmatprep.subr.mxu1 %v1178_v3  ;;  %v1196_v53 = vand.u32 4294901760, %v1195_v47 }
  0x84   :  { %833 = vmatprep.mubr.f32.mxu0 %v20431_v0  ;;  %1185 = vmatpush1.msra.mxu1 %v1184_v19  ;;  %v1775_v19 = vld [vmem:[%s20417_s0 + $0x2] sm:$0xff] }
  0x85   :  { %936 = vmatmul.mubr.f32.gmra.mxu1 %v13713_v12  ;;  %v976_v12 = vsel %vm152_vm1, %v12299_v42, 0  ;;  %1191 = vmatprep.subr.mxu1 %v1190_v36  ;;  %v1790_v44 = vsel %vm152_vm1, %v1775_v19, 0 }
  0x86   :  { %941 = vmatprep.mubr.f32.mxu1 %v20431_v0  ;;  %v14004_v17 = vand.u32 4294901760, %v976_v12  ;;  %1197 = vmatpush1.msra.mxu1 %v1196_v53 }
  0x87   :  { %835 = vmatmul.mubr.f32.gmra.mxu0 %v13734_v28  ;;  %1427 = vmatprep.subr.mxu1 %v13804_v34 }
  0x88   :  { %840 = vmatprep.mubr.f32.mxu0 %v20431_v0  ;;  %v14016_v49 = vsub.f32 %v976_v12, %v14004_v17  ;;  %v1776_v12 = vld [vmem:[%s20417_s0 + $0xa] sm:$0xff] }
  0x89   :  { %943 = vmatmul.mubr.f32.gmra.mxu1 %v13724_v23  ;;  %v979_v23 = vsel %vm152_vm1, %v12300_v55, 0 }
  0x8a   :  { %948 = vmatprep.mubr.f32.mxu1 %v20431_v0  ;;  %v14018_v50 = vand.u32 4294901760, %v979_v23  ;;  %v1106_v57 = vand.u32 4294901760, %v14016_v49 }
  0x8b   :  { %842 = vmatmul.mubr.f32.gmra.mxu0 %v13742_v40 }
  0x8c   :  { %1059 = vmatprep.mubr.f32.mxu0 %v20431_v0  ;;  %v14031_v60 = vsub.f32 %v979_v23, %v14018_v50  ;;  %v1107_v62 = vsub.f32 %v14016_v49, %v1106_v57  ;;  %v1793_v23 = vsel %vm152_vm1, %v1776_v12, 0 }
  0x8d   :  { %950 = vmatmul.mubr.f32.gmra.mxu1 %v13734_v28  ;;  %v1086_v28 = vand.u32 4294901760, %v1085_v32 }
  0x8e   :  { %955 = vmatprep.mubr.f32.mxu1 %v20431_v0  ;;  %v1117_v63 = vand.u32 4294901760, %v14031_v60  ;;  %v1108_v2 = vand.u32 4294901760, %v1107_v62 }
  0x8f   :  { %1065 = vmatmul.mubr.f32.vlgmr.msra.gmra.mxu0 %v1064_v11 }
  0x90   :  { %1070 = vmatprep.mubr.f32.mxu0 %v20431_v0  ;;  %1302 = vmatpush1.msra.mxu0 %v13852_v46  ;;  %v1118_v3 = vsub.f32 %v14031_v60, %v1117_v63 }
  0x91   :  { %1305 = vmatprep.subr.mxu0 %v13860_v48  ;;  %957 = vmatmul.mubr.f32.gmra.mxu1 %v13742_v40  ;;  %v1097_v40 = vand.u32 4294901760, %v1096_v51  ;;  %v14215_v51 = vand.u32 4294901760, %v1793_v23 }
  0x92   :  { %1308 = vmatpush1.msra.mxu0 %v13872_v31  ;;  %1230 = vmatprep.mubr.f32.mxu1 %v20431_v0  ;;  %v1119_v35 = vand.u32 4294901760, %v1118_v3  ;;  %v1786_v31 = vld [vmem:[#allocation5 + $0x98] sm:$0xff] }
  0x93   :  { %1076 = vmatmul.mubr.f32.gmra.mxu0 %v1075_v26  ;;  %1311 = vmatprep.subr.mxu0 %v13878_v1  ;;  %v1785_v1 = vld [vmem:[#allocation5 + $0x90] sm:$0xff] }
  0x94   :  { %1081 = vmatprep.mubr.f32.mxu0 %v20431_v0  ;;  %1314 = vmatpush1.msra.mxu0 %v13896_v14 }
  0x95   :  { %1232 = vmatmul.mubr.f32.vlgmr.msra.gmra.mxu1 %v13917_v27  ;;  %1317 = vmatprep.subr.mxu0 %v13907_v22 }
  0x96   :  { %1429 = vmatpush1.msra.mxu1 %v13837_v20  ;;  %1237 = vmatprep.mubr.f32.mxu1 %v20431_v0 }
  0x97   :  { %1087 = vmatmul.mubr.f32.gmra.mxu0 %v1086_v28  ;;  %1431 = vmatprep.subr.mxu1 %v13845_v43 }
  0x98   :  { %1092 = vmatprep.mubr.f32.mxu0 %v20431_v0  ;;  %1320 = vmatpush1.msra.mxu0 %v13926_v37  ;;  %v1782_v37 = vld [vmem:[#allocation5 + $0x78] sm:$0xff] }
  0x99   :  { %1239 = vmatmul.mubr.f32.gmra.mxu1 %v13943_v59  ;;  %1556 = vmatprep.subr.mxu0 %v1152_v39  ;;  %v1788_v39 = vld [vmem:[#allocation5 + $0xa8] sm:$0xf] }
  0x9a   :  { %1244 = vmatprep.mubr.f32.mxu1 %v20431_v0  ;;  %1433 = vmatpush1.msra.mxu1 %v13856_v24  ;;  %v1811_v4 = vsel %vm131_vm0, %v1788_v39, 0 }
  0x9b   :  { %1098 = vmatmul.mubr.f32.gmra.mxu0 %v1097_v40  ;;  %1435 = vmatprep.subr.mxu1 %v13862_v52  ;;  %v14076_v10 = vand.u32 4294901760, %v1811_v4 }
  0x9c   :  { %1103 = vmatprep.mubr.f32.mxu0 %v20431_v0  ;;  %1437 = vmatpush1.msra.mxu1 %v13874_v56 }
  0x9d   :  { %1246 = vmatmul.mubr.f32.gmra.mxu1 %v13967_v9  ;;  %1439 = vmatprep.subr.mxu1 %v13880_v5  ;;  %v14089_v46 = vsub.f32 %v1811_v4, %v14076_v10  ;;  %v12305_v4 = vld [vmem:[%s20417_s0 + $0x2a] sm:$0xff] }
  0x9e   :  { %1251 = vmatprep.mubr.f32.mxu1 %v20431_v0  ;;  %1441 = vmatpush1.msra.mxu1 %v13898_v15 }
  0x9f   :  { %1109 = vmatmul.mubr.f32.gmra.mxu0 %v1108_v2  ;;  %1685 = vmatprep.subr.mxu1 %v13804_v34  ;;  %v1787_v34 = vld [vmem:[#allocation5 + $0xa0] sm:$0xf] }
  0xa0   :  { %1114 = vmatprep.mubr.f32.mxu0 %v20431_v0  ;;  %v1808_v48 = vsel %vm131_vm0, %v1787_v34, 0  ;;  %v12304_v2 = vld [vmem:[%s20417_s0 + $0x22] sm:$0xff] }
  0xa1   :  { %1253 = vmatmul.mubr.f32.gmra.mxu1 %v13978_v21 }
  0xa2   :  { %1258 = vmatprep.mubr.f32.mxu1 %v20431_v0 }
  0xa3   :  { %1120 = vmatmul.mubr.f32.gmra.mxu0 %v1119_v35  ;;  %v14237_v35 = vsub.f32 %v1793_v23, %v14215_v51 }
  0xa4   :  { %1353 = vmatprep.mubr.f32.mxu0 %v20431_v0 }
  0xa5   :  { %1260 = vmatmul.mubr.f32.gmra.mxu1 %v14004_v17 }
  0xa6   :  { %1265 = vmatprep.mubr.f32.mxu1 %v20431_v0 }
  0xa7   :  { %1356 = vmatmul.mubr.f32.vlgmr.msra.gmra.mxu0 %v13941_v58 }
  0xa8   :  { %1361 = vmatprep.mubr.f32.mxu0 %v20431_v0  ;;  %1560 = vmatpush1.msra.mxu0 %v1158_v30  ;;  %v1978_v30 = vand.u32 4294901760, %v14089_v46 }
  0xa9   :  { %1564 = vmatprep.subr.mxu0 %v1164_v61  ;;  %1267 = vmatmul.mubr.f32.gmra.mxu1 %v14018_v50  ;;  %v14117_v61 = vand.u32 4294901760, %v1786_v31 }
  0xaa   :  { %1568 = vmatpush1.msra.mxu0 %v1170_v13  ;;  %1474 = vmatprep.mubr.f32.mxu1 %v20431_v0  ;;  %v1784_v13 = vld [vmem:[#allocation5 + $0x88] sm:$0xff] }
  0xab   :  { %1364 = vmatmul.mubr.f32.gmra.mxu0 %v13965_v8  ;;  %1572 = vmatprep.subr.mxu0 %v1176_v18  ;;  %v14132_v18 = vsub.f32 %v1786_v31, %v14117_v61  ;;  %v14134_v22 = vand.u32 4294901760, %v1784_v13  ;;  %v1781_v8 = vld [vmem:[#allocation5 + $0x70] sm:$0xff] }
  0xac   :  { %1369 = vmatprep.mubr.f32.mxu0 %v20431_v0  ;;  %1576 = vmatpush1.msra.mxu0 %v1182_v33  ;;  %v1783_v33 = vld [vmem:[#allocation5 + $0x80] sm:$0xff]  ;;  %v14170_v42 = vand.u32 4294901760, %v1781_v8 }
  0xad   :  { %1478 = vmatmul.mubr.f32.vlgmr.msra.gmra.mxu1 %v1062_v7  ;;  %1580 = vmatprep.subr.mxu0 %v1188_v54  ;;  %v14146_v54 = vand.u32 4294901760, %v1783_v33  ;;  %v1990_v58 = vand.u32 4294901760, %v14132_v18  ;;  %v14152_v7 = vand.u32 4294901760, %v1782_v37 }
  0xae   :  { %1687 = vmatpush1.msra.mxu1 %v13837_v20  ;;  %1483 = vmatprep.mubr.f32.mxu1 %v20431_v0  ;;  %v14109_v20 = vand.u32 4294901760, %v1808_v48 }
  0xaf   :  { %1372 = vmatmul.mubr.f32.gmra.mxu0 %v13987_v29  ;;  %1689 = vmatprep.subr.mxu1 %v13845_v43  ;;  %v1979_v43 = vsub.f32 %v14089_v46, %v1978_v30  ;;  %v14168_v36 = vsub.f32 %v1783_v33, %v14146_v54  ;;  %v14179_v53 = vsub.f32 %v1782_v37, %v14152_v7  ;;  %v12306_v37 = vld [vmem:[%s20417_s0 + $0x32] sm:$0xff] }
  0xb0   :  { %1377 = vmatprep.mubr.f32.mxu0 %v20431_v0  ;;  %1584 = vmatpush1.msra.mxu0 %v1194_v38  ;;  %v14124_v14 = vsub.f32 %v1808_v48, %v14109_v20  ;;  %v14150_v38 = vsub.f32 %v1784_v13, %v14134_v22  ;;  %v1799_v48 = vsel %vm152_vm1, %v12304_v2, 0  ;;  %v1899_v13 = vand.u32 4294901760, %v14237_v35  ;;  %v2626_v2 = vld [vmem:[#allocation5 + $0xd8] sm:$0xff] }
  0xb1   :  { %1487 = vmatmul.mubr.f32.gmra.mxu1 %v1073_v45  ;;  %1838 = vmatprep.subr.mxu0 %v14076_v10  ;;  %v1991_v45 = vsub.f32 %v14132_v18, %v1990_v58  ;;  %v2008_v41 = vand.u32 4294901760, %v14168_v36  ;;  %v2014_v32 = vand.u32 4294901760, %v14179_v53  ;;  %v14260_v33 = vand.u32 4294901760, %v1799_v48 }
  0xb2   :  { %1492 = vmatprep.mubr.f32.mxu1 %v20431_v0  ;;  %1691 = vmatpush1.msra.mxu1 %v13856_v24  ;;  %v14128_v24 = vand.u32 4294901760, %v1785_v1  ;;  %v2002_v29 = vand.u32 4294901760, %v14150_v38 }
  0xb3   :  { %1380 = vmatmul.mubr.f32.gmra.mxu0 %v13996_v6  ;;  %1693 = vmatprep.subr.mxu1 %v13862_v52  ;;  %v1980_v52 = vand.u32 4294901760, %v1979_v43  ;;  %v14189_v6 = vand.u32 4294901760, %v1790_v44  ;;  %v1802_v43 = vsel %vm152_vm1, %v12305_v4, 0 }
  0xb4   :  { %1385 = vmatprep.mubr.f32.mxu0 %v20431_v0  ;;  %1695 = vmatpush1.msra.mxu1 %v13874_v56  ;;  %v1984_v56 = vand.u32 4294901760, %v14124_v14  ;;  %v2003_v26 = vsub.f32 %v14150_v38, %v2002_v29 }
  0xb5   :  { %1496 = vmatmul.mubr.f32.gmra.mxu1 %v1084_v16  ;;  %1697 = vmatprep.subr.mxu1 %v13880_v5  ;;  %v14144_v5 = vsub.f32 %v1785_v1, %v14128_v24  ;;  %v14198_v16 = vsub.f32 %v1781_v8, %v14170_v42  ;;  %v14213_v28 = vsub.f32 %v1790_v44, %v14189_v6  ;;  %v14267_v8 = vand.u32 4294901760, %v1802_v43 }
  0xb6   :  { %1501 = vmatprep.mubr.f32.mxu1 %v20431_v0  ;;  %1699 = vmatpush1.msra.mxu1 %v13898_v15  ;;  %v1985_v15 = vsub.f32 %v14124_v14, %v1984_v56  ;;  %v2004_v62 = vand.u32 4294901760, %v2003_v26 }
  0xb7   :  { %1388 = vmatmul.mubr.f32.gmra.mxu0 %v14016_v49  ;;  %1981 = vmatprep.subr.mxu1 %v1980_v52  ;;  %v1996_v47 = vand.u32 4294901760, %v14144_v5  ;;  %v1777_v49 = vld [vmem:[%s20417_s0 + $0x12] sm:$0xff]  ;;  %v1888_v3 = vand.u32 4294901760, %v14213_v28  ;;  %v14283_v12 = vsub.f32 %v1802_v43, %v14267_v8 }
  0xb8   :  { %1393 = vmatprep.mubr.f32.mxu0 %v20431_v0  ;;  %v1986_v55 = vand.u32 4294901760, %v1985_v15  ;;  %v1796_v40 = vsel %vm152_vm1, %v1777_v49, 0  ;;  %v1900_v15 = vsub.f32 %v14237_v35, %v1899_v13 }
  0xb9   :  { %1505 = vmatmul.mubr.f32.gmra.mxu1 %v1095_v25  ;;  %v1997_v11 = vsub.f32 %v14144_v5, %v1996_v47  ;;  %v1992_v25 = vand.u32 4294901760, %v1991_v45  ;;  %v14239_v39 = vand.u32 4294901760, %v1796_v40  ;;  %v1889_v1 = vsub.f32 %v14213_v28, %v1888_v3 }
  0xba   :  { %1510 = vmatprep.mubr.f32.mxu1 %v20431_v0  ;;  %v14276_v45 = vsub.f32 %v1799_v48, %v14260_v33  ;;  %v1932_v49 = vand.u32 4294901760, %v14283_v12  ;;  %v2619_v48 = vld [vmem:[#allocation5 + $0xa0] sm:$0xf0] }
  0xbb   :  { %1396 = vmatmul.mubr.f32.gmra.mxu0 %v14031_v60  ;;  %v2009_v60 = vsub.f32 %v14168_v36, %v2008_v41  ;;  %v14258_v52 = vsub.f32 %v1796_v40, %v14239_v39  ;;  %v1890_v19 = vand.u32 4294901760, %v1889_v1 }
  0xbc   :  { %1617 = vmatprep.mubr.f32.mxu0 %v20431_v0  ;;  %v1921_v23 = vand.u32 4294901760, %v14276_v45 }
  0xbd   :  { %1514 = vmatmul.mubr.f32.gmra.mxu1 %v1106_v57  ;;  %v1998_v57 = vand.u32 4294901760, %v1997_v11  ;;  %v1910_v44 = vand.u32 4294901760, %v14258_v52 }
  0xbe   :  { %1519 = vmatprep.mubr.f32.mxu1 %v20431_v0  ;;  %v1922_v26 = vsub.f32 %v14276_v45, %v1921_v23 }
  0xbf   :  { %1619 = vmatmul.mubr.f32.vlgmr.msra.gmra.mxu0 %v13917_v27  ;;  %v1911_v11 = vsub.f32 %v14258_v52, %v1910_v44 }
  0xc0   :  { %1624 = vmatprep.mubr.f32.mxu0 %v20431_v0  ;;  %1840 = vmatpush1.msra.mxu0 %v14109_v20 }
  0xc1   :  { %1842 = vmatprep.subr.mxu0 %v14117_v61  ;;  %1523 = vmatmul.mubr.f32.gmra.mxu1 %v1117_v63  ;;  %v2015_v63 = vsub.f32 %v14179_v53, %v2014_v32 }
  0xc2   :  { %1844 = vmatpush1.msra.mxu0 %v14128_v24  ;;  %1732 = vmatprep.mubr.f32.mxu1 %v20431_v0 }
  0xc3   :  { %1626 = vmatmul.mubr.f32.gmra.mxu0 %v13943_v59  ;;  %1846 = vmatprep.subr.mxu0 %v14134_v22  ;;  %v2016_v31 = vand.u32 4294901760, %v2015_v63 }
  0xc4   :  { %1631 = vmatprep.mubr.f32.mxu0 %v20431_v0  ;;  %1848 = vmatpush1.msra.mxu0 %v14146_v54 }
  0xc5   :  { %1734 = vmatmul.mubr.f32.vlgmr.msra.gmra.mxu1 %v13917_v27  ;;  %1850 = vmatprep.subr.mxu0 %v14152_v7  ;;  %v2020_v27 = vand.u32 4294901760, %v14198_v16 }
  0xc6   :  { %1987 = vmatpush1.msra.mxu1 %v1986_v55  ;;  %1739 = vmatprep.mubr.f32.mxu1 %v20431_v0  ;;  %v1901_v55 = vand.u32 4294901760, %v1900_v15 }
  0xc7   :  { %1633 = vmatmul.mubr.f32.gmra.mxu0 %v13967_v9  ;;  %1993 = vmatprep.subr.mxu1 %v1992_v25  ;;  %v2021_v34 = vsub.f32 %v14198_v16, %v2020_v27 }
  0xc8   :  { %1638 = vmatprep.mubr.f32.mxu0 %v20431_v0  ;;  %1852 = vmatpush1.msra.mxu0 %v14170_v42 }
  0xc9   :  { %1741 = vmatmul.mubr.f32.gmra.mxu1 %v13943_v59  ;;  %2125 = vmatprep.subr.mxu0 %v14089_v46  ;;  %v2010_v59 = vand.u32 4294901760, %v2009_v60  ;;  %v1933_v60 = vsub.f32 %v14283_v12, %v1932_v49 }
  0xca   :  { %1746 = vmatprep.mubr.f32.mxu1 %v20431_v0  ;;  %1999 = vmatpush1.msra.mxu1 %v1998_v57 }
  0xcb   :  { %1640 = vmatmul.mubr.f32.gmra.mxu0 %v13978_v21  ;;  %2005 = vmatprep.subr.mxu1 %v2004_v62  ;;  %v1934_v62 = vand.u32 4294901760, %v1933_v60 }
  0xcc   :  { %1645 = vmatprep.mubr.f32.mxu0 %v20431_v0  ;;  %2011 = vmatpush1.msra.mxu1 %v2010_v59 }
  0xcd   :  { %1748 = vmatmul.mubr.f32.gmra.mxu1 %v13967_v9  ;;  %v2022_v9 = vand.u32 4294901760, %v2021_v34  ;;  %2017 = vmatprep.subr.mxu1 %v2016_v31  ;;  %v2625_v34 = vld [vmem:[#allocation5 + $0xd0] sm:$0xff] }
  0xce   :  { %1753 = vmatprep.mubr.f32.mxu1 %v20431_v0 }
  0xcf   :  { %1647 = vmatmul.mubr.f32.gmra.mxu0 %v14004_v17  ;;  %2023 = vmatpush1.msra.mxu1 %v2022_v9 }
  0xd0   :  { %1652 = vmatprep.mubr.f32.mxu0 %v20431_v0  ;;  %2253 = vmatprep.subr.mxu1 %v14076_v10 }
  0xd1   :  { %1755 = vmatmul.mubr.f32.gmra.mxu1 %v13978_v21  ;;  %v1805_v21 = vsel %vm152_vm1, %v12306_v37, 0 }
  0xd2   :  { %1760 = vmatprep.mubr.f32.mxu1 %v20431_v0  ;;  %v14290_v25 = vand.u32 4294901760, %v1805_v21 }
  0xd3   :  { %1654 = vmatmul.mubr.f32.gmra.mxu0 %v14018_v50 }
  0xd4   :  { %1885 = vmatprep.mubr.f32.mxu0 %v20431_v0  ;;  %v14303_v57 = vsub.f32 %v1805_v21, %v14290_v25  ;;  %v2613_v21 = vld [vmem:[%s20417_s0 + $0x3] sm:$0xff] }
  0xd5   :  { %1762 = vmatmul.mubr.f32.gmra.mxu1 %v14004_v17  ;;  %v1912_v17 = vand.u32 4294901760, %v1911_v11 }
  0xd6   :  { %1767 = vmatprep.mubr.f32.mxu1 %v20431_v0  ;;  %v1943_v40 = vand.u32 4294901760, %v14303_v57 }
  0xd7   :  { %1891 = vmatmul.mubr.f32.vlgmr.msra.gmra.mxu0 %v1890_v19 }
  0xd8   :  { %1896 = vmatprep.mubr.f32.mxu0 %v20431_v0  ;;  %2128 = vmatpush1.msra.mxu0 %v14124_v14  ;;  %v1944_v63 = vsub.f32 %v14303_v57, %v1943_v40  ;;  %v2645_v14 = vrot.slane %v2625_v34, 4 }
  0xd9   :  { %2131 = vmatprep.subr.mxu0 %v14132_v18  ;;  %1769 = vmatmul.mubr.f32.gmra.mxu1 %v14018_v50  ;;  %v1923_v50 = vand.u32 4294901760, %v1922_v26  ;;  %v2614_v26 = vld [vmem:[%s20417_s0 + $0xb] sm:$0xff] }
  0xda   :  { %2134 = vmatpush1.msra.mxu0 %v14144_v5  ;;  %2056 = vmatprep.mubr.f32.mxu1 %v20431_v0  ;;  %v1945_v46 = vand.u32 4294901760, %v1944_v63  ;;  %v2623_v5 = vld [vmem:[#allocation5 + $0xc0] sm:$0xff] }
  0xdb   :  { %1902 = vmatmul.mubr.f32.gmra.mxu0 %v1901_v55  ;;  %2137 = vmatprep.subr.mxu0 %v14150_v38  ;;  %v2673_v38 = vsel %vm131_vm0, %v2645_v14, 0 }
  0xdc   :  { %1907 = vmatprep.mubr.f32.mxu0 %v20431_v0  ;;  %2140 = vmatpush1.msra.mxu0 %v14168_v36  ;;  %v2641_v36 = vrot.slane %v2623_v5, 4  ;;  %v2615_v5 = vld [vmem:[%s20417_s0 + $0x13] sm:$0xff] }
  0xdd   :  { %2058 = vmatmul.mubr.f32.vlgmr.msra.gmra.mxu1 %v14189_v6  ;;  %2143 = vmatprep.subr.mxu0 %v14179_v53  ;;  %v2621_v53 = vld [vmem:[#allocation5 + $0xb0] sm:$0xff] }
  0xde   :  { %2255 = vmatpush1.msra.mxu1 %v14109_v20  ;;  %2063 = vmatprep.mubr.f32.mxu1 %v20431_v0 }
  0xdf   :  { %1913 = vmatmul.mubr.f32.gmra.mxu0 %v1912_v17  ;;  %2257 = vmatprep.subr.mxu1 %v14117_v61  ;;  %v2656_v17 = vsel %vm152_vm1, %v2613_v21, 0 }
  0xe0   :  { %1918 = vmatprep.mubr.f32.mxu0 %v20431_v0  ;;  %2146 = vmatpush1.msra.mxu0 %v14198_v16 }
  0xe1   :  { %2065 = vmatmul.mubr.f32.gmra.mxu1 %v14215_v51  ;;  %2382 = vmatprep.subr.mxu0 %v1978_v30  ;;  %v2647_v30 = vrot.slane %v2626_v2, 4 }
  0xe2   :  { %2070 = vmatprep.mubr.f32.mxu1 %v20431_v0  ;;  %2259 = vmatpush1.msra.mxu1 %v14128_v24 }
  0xe3   :  { %1924 = vmatmul.mubr.f32.gmra.mxu0 %v1923_v50  ;;  %2261 = vmatprep.subr.mxu1 %v14134_v22  ;;  %v2675_v4 = vsel %vm131_vm0, %v2647_v30, 0 }
  0xe4   :  { %1929 = vmatprep.mubr.f32.mxu0 %v20431_v0  ;;  %2263 = vmatpush1.msra.mxu1 %v14146_v54  ;;  %v14346_v59 = vand.u32 4294901760, %v2675_v4 }
  0xe5   :  { %2072 = vmatmul.mubr.f32.gmra.mxu1 %v14239_v39  ;;  %2265 = vmatprep.subr.mxu1 %v14152_v7 }
  0xe6   :  { %2077 = vmatprep.mubr.f32.mxu1 %v20431_v0  ;;  %2267 = vmatpush1.msra.mxu1 %v14170_v42  ;;  %v14359_v18 = vsub.f32 %v2675_v4, %v14346_v59 }
  0xe7   :  { %1935 = vmatmul.mubr.f32.gmra.mxu0 %v1934_v62  ;;  %2511 = vmatprep.subr.mxu1 %v14076_v10  ;;  %v2624_v10 = vld [vmem:[#allocation5 + $0xc8] sm:$0xff] }
  0xe8   :  { %1940 = vmatprep.mubr.f32.mxu0 %v20431_v0 }
  0xe9   :  { %2079 = vmatmul.mubr.f32.gmra.mxu1 %v14260_v33 }
  0xea   :  { %2084 = vmatprep.mubr.f32.mxu1 %v20431_v0 }
  0xeb   :  { %1946 = vmatmul.mubr.f32.gmra.mxu0 %v1945_v46  ;;  %v14467_v46 = vand.u32 4294901760, %v2656_v17 }
  0xec   :  { %2179 = vmatprep.mubr.f32.mxu0 %v20431_v0 }
  0xed   :  { %2086 = vmatmul.mubr.f32.gmra.mxu1 %v14267_v8 }
  0xee   :  { %2091 = vmatprep.mubr.f32.mxu1 %v20431_v0 }
  0xef   :  { %2182 = vmatmul.mubr.f32.vlgmr.msra.gmra.mxu0 %v14213_v28  ;;  %v2646_v28 = vsel %vm131_vm0, %v2641_v36, %v2645_v14 }
  0xf0   :  { %2187 = vmatprep.mubr.f32.mxu0 %v20431_v0  ;;  %2386 = vmatpush1.msra.mxu0 %v1984_v56  ;;  %v2643_v56 = vrot.slane %v2624_v10, 4  ;;  %v14403_v31 = vand.u32 4294901760, %v2646_v28 }
  0xf1   :  { %2390 = vmatprep.subr.mxu0 %v1990_v58  ;;  %2093 = vmatmul.mubr.f32.gmra.mxu1 %v14290_v25  ;;  %v2622_v58 = vld [vmem:[#allocation5 + $0xb8] sm:$0xff] }
  0xf2   :  { %2394 = vmatpush1.msra.mxu0 %v1996_v47  ;;  %2300 = vmatprep.mubr.f32.mxu1 %v20431_v0  ;;  %v2842_v47 = vand.u32 4294901760, %v14359_v18 }
  0xf3   :  { %2190 = vmatmul.mubr.f32.gmra.mxu0 %v14237_v35  ;;  %2398 = vmatprep.subr.mxu0 %v2002_v29  ;;  %v2639_v29 = vrot.slane %v2622_v58, 4 }
  0xf4   :  { %2195 = vmatprep.mubr.f32.mxu0 %v20431_v0  ;;  %2402 = vmatpush1.msra.mxu0 %v2008_v41  ;;  %v14382_v41 = vand.u32 4294901760, %v2673_v38  ;;  %v2843_v16 = vsub.f32 %v14359_v18, %v2842_v47 }
  0xf5   :  { %2304 = vmatmul.mubr.f32.vlgmr.msra.gmra.mxu1 %v1888_v3  ;;  %2406 = vmatprep.subr.mxu0 %v2014_v32  ;;  %v2644_v3 = vsel %vm131_vm0, %v2639_v29, %v2643_v56 }
  0xf6   :  { %2513 = vmatpush1.msra.mxu1 %v14109_v20  ;;  %2309 = vmatprep.mubr.f32.mxu1 %v20431_v0  ;;  %v2648_v20 = vsel %vm131_vm0, %v2643_v56, %v2647_v30  ;;  %v14409_v1 = vand.u32 4294901760, %v2644_v3  ;;  %v2659_v30 = vsel %vm152_vm1, %v2614_v26, 0 }
  0xf7   :  { %2198 = vmatmul.mubr.f32.gmra.mxu0 %v14258_v52  ;;  %2515 = vmatprep.subr.mxu1 %v14117_v61  ;;  %v2620_v61 = vld [vmem:[#allocation5 + $0xa8] sm:$0xf0]  ;;  %v14390_v32 = vand.u32 4294901760, %v2648_v20  ;;  %v2635_v52 = vrot.slane %v2619_v48, 4 }
  0xf8   :  { %2203 = vmatprep.mubr.f32.mxu0 %v20431_v0  ;;  %2410 = vmatpush1.msra.mxu0 %v2020_v27  ;;  %v2636_v27 = vrot.slane %v2621_v53, 4  ;;  %v2638_v35 = vrot.slane %v2620_v61, 4  ;;  %v14427_v15 = vsub.f32 %v2644_v3, %v14409_v1 }
  0xf9   :  { %2313 = vmatmul.mubr.f32.gmra.mxu1 %v1899_v13  ;;  %2702 = vmatprep.subr.mxu0 %v14346_v59  ;;  %v14407_v43 = vsub.f32 %v2648_v20, %v14390_v32 }
  0xfa   :  { %2318 = vmatprep.mubr.f32.mxu1 %v20431_v0  ;;  %2517 = vmatpush1.msra.mxu1 %v14128_v24  ;;  %v14399_v24 = vsub.f32 %v2673_v38, %v14382_v41  ;;  %v2642_v13 = vsel %vm131_vm0, %v2636_v27, %v2641_v36  ;;  %v2640_v9 = vsel %vm131_vm0, %v2638_v35, %v2639_v29  ;;  %v2866_v60 = vand.u32 4294901760, %v14427_v15 }
  0xfb   :  { %2206 = vmatmul.mubr.f32.gmra.mxu0 %v14276_v45  ;;  %2519 = vmatprep.subr.mxu1 %v14134_v22  ;;  %v2844_v22 = vand.u32 4294901760, %v2843_v16  ;;  %v14423_v37 = vand.u32 4294901760, %v2642_v13  ;;  %v2854_v19 = vand.u32 4294901760, %v14407_v43  ;;  %v2637_v45 = vsel %vm131_vm0, %v2635_v52, %v2636_v27  ;;  %v12307_v27 = vld [vmem:[%s20417_s0 + $0x23] sm:$0xff] }
  0xfc   :  { %2211 = vmatprep.mubr.f32.mxu0 %v20431_v0  ;;  %2521 = vmatpush1.msra.mxu1 %v14146_v54  ;;  %v2848_v54 = vand.u32 4294901760, %v14399_v24  ;;  %v2867_v14 = vsub.f32 %v14427_v15, %v2866_v60  ;;  %v14489_v38 = vand.u32 4294901760, %v2659_v30  ;;  %v14495_v29 = vsub.f32 %v2656_v17, %v14467_v46 }
  0xfd   :  { %2322 = vmatmul.mubr.f32.gmra.mxu1 %v1910_v44  ;;  %2523 = vmatprep.subr.mxu1 %v14152_v7  ;;  %v14421_v7 = vsub.f32 %v2646_v28, %v14403_v31  ;;  %v14429_v44 = vand.u32 4294901760, %v2640_v9  ;;  %v2855_v50 = vsub.f32 %v14407_v43, %v2854_v19  ;;  %v2662_v28 = vsel %vm152_vm1, %v2615_v5, 0 }
  0xfe   :  { %2327 = vmatprep.mubr.f32.mxu1 %v20431_v0  ;;  %2525 = vmatpush1.msra.mxu1 %v14170_v42  ;;  %v2849_v55 = vsub.f32 %v14399_v24, %v2848_v54  ;;  %v2868_v48 = vand.u32 4294901760, %v2867_v14  ;;  %v14515_v52 = vsub.f32 %v2659_v30, %v14489_v38  ;;  %v2752_v21 = vand.u32 4294901760, %v14495_v29 }
  0xff   :  { %2214 = vmatmul.mubr.f32.gmra.mxu0 %v14283_v12  ;;  %2845 = vmatprep.subr.mxu1 %v2844_v22  ;;  %v2860_v11 = vand.u32 4294901760, %v14421_v7  ;;  %v14448_v12 = vand.u32 4294901760, %v2637_v45  ;;  %v14460_v62 = vsub.f32 %v2640_v9, %v14429_v44  ;;  %v2856_v10 = vand.u32 4294901760, %v2855_v50 }
 0x100   :  { %2219 = vmatprep.mubr.f32.mxu0 %v20431_v0  ;;  %v2850_v2 = vand.u32 4294901760, %v2849_v55  ;;  %v2665_v55 = vsel %vm152_vm1, %v12307_v27, 0  ;;  %v12309_v27 = vld [vmem:[%s20417_s0 + $0x33] sm:$0xff] }
 0x101   :  { %2331 = vmatmul.mubr.f32.gmra.mxu1 %v1921_v23  ;;  %v14446_v23 = vsub.f32 %v2642_v13, %v14423_v37  ;;  %v2861_v4 = vsub.f32 %v14421_v7, %v2860_v11  ;;  %v2878_v56 = vand.u32 4294901760, %v14460_v62 }
 0x102   :  { %2336 = vmatprep.mubr.f32.mxu1 %v20431_v0 }
 0x103   :  { %2222 = vmatmul.mubr.f32.gmra.mxu0 %v14303_v57  ;;  %v2872_v57 = vand.u32 4294901760, %v14446_v23  ;;  %v2862_v61 = vand.u32 4294901760, %v2861_v4  ;;  %v2879_v22 = vsub.f32 %v14460_v62, %v2878_v56  ;;  %v2763_v4 = vand.u32 4294901760, %v14515_v52 }
 0x104   :  { %2443 = vmatprep.mubr.f32.mxu0 %v20431_v0 }
 0x105   :  { %2340 = vmatmul.mubr.f32.gmra.mxu1 %v1932_v49 }
 0x106   :  { %v254_v42 = vpop.f32.mrf.mxu0  ;;  %2345 = vmatprep.mubr.f32.mxu1 %v20431_v0 }
 0x107   :  { %2445 = vmatmul.mubr.f32.vlgmr.msra.gmra.mxu0 %v14189_v6 }
 0x108   :  { %2450 = vmatprep.mubr.f32.mxu0 %v20431_v0  ;;  %2704 = vmatpush1.msra.mxu0 %v14382_v41  ;;  %v256_v49 = vpop.f32.mrf.mxu0 }
 0x109   :  { %2706 = vmatprep.subr.mxu0 %v14390_v32  ;;  %2349 = vmatmul.mubr.f32.gmra.mxu1 %v1943_v40  ;;  %v14477_v40 = vsub.f32 %v2637_v45, %v14448_v12 }
 0x10a   :  { %2708 = vmatpush1.msra.mxu0 %v14403_v31  ;;  %v265_v63 = vpop.f32.mrf.mxu0  ;;  %2558 = vmatprep.mubr.f32.mxu1 %v20431_v0 }
 0x10b   :  { %2452 = vmatmul.mubr.f32.gmra.mxu0 %v14215_v51  ;;  %2710 = vmatprep.subr.mxu0 %v14409_v1  ;;  %v2884_v16 = vand.u32 4294901760, %v14477_v40 }
 0x10c   :  { %2457 = vmatprep.mubr.f32.mxu0 %v20431_v0  ;;  %v267_v34 = vpop.f32.mrf.mxu0  ;;  %2712 = vmatpush1.msra.mxu0 %v14423_v37 }
 0x10d   :  { %v421_v58 = vpop.f32.mrf.mxu1  ;;  %2560 = vmatmul.mubr.f32.vlgmr.msra.gmra.mxu1 %v14189_v6  ;;  %2714 = vmatprep.subr.mxu0 %v14429_v44  ;;  %v2873_v6 = vsub.f32 %v14446_v23, %v2872_v57  ;;  %v2885_v26 = vsub.f32 %v14477_v40, %v2884_v16 }
 0x10e   :  { %v14491_v20 = vadd.f32 %v421_v58, %v254_v42  ;;  %2851 = vmatpush1.msra.mxu1 %v2850_v2  ;;  %2565 = vmatprep.mubr.f32.mxu1 %v20431_v0  ;;  %v14523_v42 = vand.u32 4294901760, %v2662_v28  ;;  %v12308_v2 = vld [vmem:[%s20417_s0 + $0x2b] sm:$0xff] }
 0x10f   :  { %v276_v36 = vpop.f32.mrf.mxu0  ;;  %2459 = vmatmul.mubr.f32.gmra.mxu0 %v14239_v39  ;;  %v423_v53 = vpop.f32.mrf.mxu1  ;;  %2857 = vmatprep.subr.mxu1 %v2856_v10  ;;  %v14537_v10 = vand.u32 4294901760, %v2665_v55 }
 0x110   :  { %2464 = vmatprep.mubr.f32.mxu0 %v20431_v0  ;;  %v14507_v35 = vadd.f32 %v423_v53, %v256_v49  ;;  %2716 = vmatpush1.msra.mxu0 %v14448_v12  ;;  %v14547_v58 = vsub.f32 %v2662_v28, %v14523_v42  ;;  %v2764_v28 = vsub.f32 %v14515_v52, %v2763_v4 }
 0x111   :  { %v278_v3 = vpop.f32.mrf.mxu0  ;;  %v428_v13 = vpop.f32.mrf.mxu1  ;;  %2567 = vmatmul.mubr.f32.gmra.mxu1 %v14215_v51  ;;  %2989 = vmatprep.subr.mxu0 %v14359_v18  ;;  %v2874_v51 = vand.u32 4294901760, %v2873_v6 }
 0x112   :  { %v14518_v45 = vadd.f32 %v428_v13, %v265_v63  ;;  %2572 = vmatprep.mubr.f32.mxu1 %v20431_v0  ;;  %2863 = vmatpush1.msra.mxu1 %v2862_v61  ;;  %v2880_v63 = vand.u32 4294901760, %v2879_v22  ;;  %v2668_v61 = vsel %vm152_vm1, %v12308_v2, 0  ;;  %v14561_v22 = vsub.f32 %v2665_v55, %v14537_v10 }
 0x113   :  { %v287_v9 = vpop.f32.mrf.mxu0  ;;  %2466 = vmatmul.mubr.f32.gmra.mxu0 %v14260_v33  ;;  %v430_v17 = vpop.f32.mrf.mxu1  ;;  %2869 = vmatprep.subr.mxu1 %v2868_v48 }
 0x114   :  { %2471 = vmatprep.mubr.f32.mxu0 %v20431_v0  ;;  %v14530_v50 = vadd.f32 %v430_v17, %v267_v34  ;;  %v2753_v34 = vsub.f32 %v14495_v29, %v2752_v21  ;;  %2875 = vmatpush1.msra.mxu1 %v2874_v51  ;;  %v2774_v51 = vand.u32 4294901760, %v14547_v58 }
 0x115   :  { %v289_v49 = vpop.f32.mrf.mxu0  ;;  %v435_v30 = vpop.f32.mrf.mxu1  ;;  %2574 = vmatmul.mubr.f32.gmra.mxu1 %v14239_v39  ;;  %v2886_v39 = vand.u32 4294901760, %v2885_v26  ;;  %2881 = vmatprep.subr.mxu1 %v2880_v63  ;;  %v14568_v26 = vand.u32 4294901760, %v2668_v61  ;;  %v2671_v63 = vsel %vm152_vm1, %v12309_v27, 0 }
 0x116   :  { %v14539_v5 = vadd.f32 %v435_v30, %v276_v36  ;;  %2579 = vmatprep.mubr.f32.mxu1 %v20431_v0  ;;  %v2765_v30 = vand.u32 4294901760, %v2764_v28  ;;  %v14586_v27 = vand.u32 4294901760, %v2671_v63 }
 0x117   :  { %v298_v14 = vpop.f32.mrf.mxu0  ;;  %2473 = vmatmul.mubr.f32.gmra.mxu0 %v14267_v8  ;;  %v437_v53 = vpop.f32.mrf.mxu1  ;;  %2887 = vmatpush1.msra.mxu1 %v2886_v39  ;;  %v2775_v39 = vsub.f32 %v14547_v58, %v2774_v51 }
 0x118   :  { %2478 = vmatprep.mubr.f32.mxu0 %v20431_v0  ;;  %v14551_v6 = vadd.f32 %v437_v53, %v278_v3  ;;  %v2754_v3 = vand.u32 4294901760, %v2753_v34  ;;  %3117 = vmatprep.subr.mxu1 %v14346_v59  ;;  %v20429_v34 = vand.u32 4294901760, %v14561_v22 }
 0x119   :  { %v300_v36 = vpop.f32.mrf.mxu0  ;;  %v442_v48 = vpop.f32.mrf.mxu1  ;;  %2581 = vmatmul.mubr.f32.gmra.mxu1 %v14260_v33 }
 0x11a   :  { %v14563_v17 = vadd.f32 %v442_v48, %v287_v9  ;;  %2586 = vmatprep.mubr.f32.mxu1 %v20431_v0 }
 0x11b   :  { %v309_v13 = vpop.f32.mrf.mxu0  ;;  %2480 = vmatmul.mubr.f32.gmra.mxu0 %v14290_v25  ;;  %v444_v33 = vpop.f32.mrf.mxu1 }
 0x11c   :  { %2749 = vmatprep.mubr.f32.mxu0 %v20431_v0  ;;  %v14572_v2 = vadd.f32 %v444_v33, %v289_v49  ;;  %v14584_v49 = vsub.f32 %v2668_v61, %v14568_v26  ;;  %v2786_v61 = vsub.f32 %v14561_v22, %v20429_v34 }
 0x11d   :  { %v311_v55 = vpop.f32.mrf.mxu0  ;;  %v449_v9 = vpop.f32.mrf.mxu1  ;;  %2588 = vmatmul.mubr.f32.gmra.mxu1 %v14267_v8 }
 0x11e   :  { %v14577_v53 = vadd.f32 %v449_v9, %v298_v14  ;;  %2593 = vmatprep.mubr.f32.mxu1 %v20431_v0 }
 0x11f   :  { %v545_v48 = vpop.f32.mrf.mxu0  ;;  %2755 = vmatmul.mubr.f32.vlgmr.msra.gmra.mxu0 %v2754_v3  ;;  %v451_v28 = vpop.f32.mrf.mxu1 }
 0x120   :  { %v546_v8 = vadd.f32 %v545_v48, %v14491_v20  ;;  %2760 = vmatprep.mubr.f32.mxu0 %v20431_v0  ;;  %2992 = vmatpush1.msra.mxu0 %v14399_v24  ;;  %v14591_v14 = vadd.f32 %v451_v28, %v300_v36  ;;  %v2776_v36 = vand.u32 4294901760, %v2775_v39  ;;  %v2796_v28 = vand.u32 4294901760, %v14584_v49 }
 0x121   :  { %v547_v3 = vpop.f32.mrf.mxu0  ;;  %2995 = vmatprep.subr.mxu0 %v14407_v43  ;;  %v456_v9 = vpop.f32.mrf.mxu1  ;;  %2595 = vmatmul.mubr.f32.gmra.mxu1 %v14290_v25 }
 0x122   :  { %v548_v33 = vadd.f32 %v547_v3, %v14507_v35  ;;  %2998 = vmatpush1.msra.mxu0 %v14421_v7  ;;  %v14600_v20 = vadd.f32 %v456_v9, %v309_v13  ;;  %2920 = vmatprep.mubr.f32.mxu1 %v20431_v0  ;;  %v14605_v35 = vsub.f32 %v2671_v63, %v14586_v27  ;;  %v3489_v7 = vld [vmem:[#allocation5 + $0x110] sm:$0xf] }
 0x123   :  { %v553_v48 = vpop.f32.mrf.mxu0  ;;  %2766 = vmatmul.mubr.f32.gmra.mxu0 %v2765_v30  ;;  %v458_v3 = vpop.f32.mrf.mxu1  ;;  %3001 = vmatprep.subr.mxu0 %v14427_v15 }
 0x124   :  { %v554_v25 = vadd.f32 %v553_v48, %v14518_v45  ;;  %2771 = vmatprep.mubr.f32.mxu0 %v20431_v0  ;;  %v14610_v34 = vadd.f32 %v458_v3, %v311_v55  ;;  %3004 = vmatpush1.msra.mxu0 %v14446_v23  ;;  %v2787_v45 = vand.u32 4294901760, %v2786_v61  ;;  %v2797_v55 = vsub.f32 %v14584_v49, %v2796_v28 }
 0x125   :  { %v555_v13 = vpop.f32.mrf.mxu0  ;;  %v667_v39 = vpop.f32.mrf.mxu1  ;;  %2922 = vmatmul.mubr.f32.vlgmr.msra.gmra.mxu1 %v14467_v46  ;;  %3007 = vmatprep.subr.mxu0 %v14460_v62  ;;  %v2807_v48 = vand.u32 4294901760, %v14605_v35 }
 0x126   :  { %v556_v30 = vadd.f32 %v555_v13, %v14530_v50  ;;  %v14616_v9 = vadd.f32 %v667_v39, %v546_v8  ;;  %3119 = vmatpush1.msra.mxu1 %v14382_v41  ;;  %2927 = vmatprep.mubr.f32.mxu1 %v20431_v0 }
 0x127   :  { %v561_v63 = vpop.f32.mrf.mxu0  ;;  %2777 = vmatmul.mubr.f32.gmra.mxu0 %v2776_v36  ;;  %v669_v3 = vpop.f32.mrf.mxu1  ;;  %3121 = vmatprep.subr.mxu1 %v14390_v32 }
 0x128   :  { %v562_v50 = vadd.f32 %v561_v63, %v14539_v5  ;;  %2782 = vmatprep.mubr.f32.mxu0 %v20431_v0  ;;  %v14626_v8 = vadd.f32 %v669_v3, %v548_v33  ;;  %3010 = vmatpush1.msra.mxu0 %v14477_v40  ;;  %v2798_v33 = vand.u32 4294901760, %v2797_v55  ;;  %v2808_v63 = vsub.f32 %v14605_v35, %v2807_v48 }
 0x129   :  { %v563_v13 = vpop.f32.mrf.mxu0  ;;  %v676_v36 = vpop.f32.mrf.mxu1  ;;  %2929 = vmatmul.mubr.f32.gmra.mxu1 %v14489_v38  ;;  %3246 = vmatprep.subr.mxu0 %v2842_v47 }
 0x12a   :  { %v564_v61 = vadd.f32 %v563_v13, %v14551_v6  ;;  %v14634_v39 = vadd.f32 %v676_v36, %v554_v25  ;;  %2934 = vmatprep.mubr.f32.mxu1 %v20431_v0  ;;  %3123 = vmatpush1.msra.mxu1 %v14403_v31 }
 0x12b   :  { %v569_v5 = vpop.f32.mrf.mxu0  ;;  %2788 = vmatmul.mubr.f32.gmra.mxu0 %v2787_v45  ;;  %v678_v6 = vpop.f32.mrf.mxu1  ;;  %3125 = vmatprep.subr.mxu1 %v14409_v1 }
 0x12c   :  { %v570_v3 = vadd.f32 %v569_v5, %v14563_v17  ;;  %2793 = vmatprep.mubr.f32.mxu0 %v20431_v0  ;;  %v14643_v47 = vadd.f32 %v678_v6, %v556_v30  ;;  %v2809_v17 = vand.u32 4294901760, %v2808_v63  ;;  %3127 = vmatpush1.msra.mxu1 %v14423_v37 }
 0x12d   :  { %v571_v18 = vpop.f32.mrf.mxu0  ;;  %v685_v45 = vpop.f32.mrf.mxu1  ;;  %2936 = vmatmul.mubr.f32.gmra.mxu1 %v14523_v42  ;;  %3129 = vmatprep.subr.mxu1 %v14429_v44 }
 0x12e   :  { %v572_v25 = vadd.f32 %v571_v18, %v14572_v2  ;;  %v14648_v13 = vadd.f32 %v685_v45, %v562_v50  ;;  %2941 = vmatprep.mubr.f32.mxu1 %v20431_v0  ;;  %3131 = vmatpush1.msra.mxu1 %v14448_v12 }
 0x12f   :  { %v577_v55 = vpop.f32.mrf.mxu0  ;;  %2799 = vmatmul.mubr.f32.gmra.mxu0 %v2798_v33  ;;  %v687_v5 = vpop.f32.mrf.mxu1  ;;  %3375 = vmatprep.subr.mxu1 %v14346_v59 }
 0x130   :  { %v578_v36 = vadd.f32 %v577_v55, %v14577_v53  ;;  %2804 = vmatprep.mubr.f32.mxu0 %v20431_v0  ;;  %v14654_v6 = vadd.f32 %v687_v5, %v564_v61  ;;  %v3490_v53 = vld [vmem:[#allocation5 + $0x118] sm:$0xf] }
 0x131   :  { %v579_v30 = vpop.f32.mrf.mxu0  ;;  %v694_v50 = vpop.f32.mrf.mxu1  ;;  %2943 = vmatmul.mubr.f32.gmra.mxu1 %v14537_v10 }
 0x132   :  { %v580_v2 = vadd.f32 %v579_v30, %v14591_v14  ;;  %v14659_v18 = vadd.f32 %v694_v50, %v570_v3  ;;  %2948 = vmatprep.mubr.f32.mxu1 %v20431_v0 }
 0x133   :  { %v585_v33 = vpop.f32.mrf.mxu0  ;;  %2810 = vmatmul.mubr.f32.gmra.mxu0 %v2809_v17  ;;  %v696_v45 = vpop.f32.mrf.mxu1  ;;  %v3513_v17 = vsel %vm131_vm0, %v3490_v53, 0 }
 0x134   :  { %v586_v63 = vadd.f32 %v585_v33, %v14600_v20  ;;  %3043 = vmatprep.mubr.f32.mxu0 %v20431_v0  ;;  %v14665_v55 = vadd.f32 %v696_v45, %v572_v25 }
 0x135   :  { %v587_v61 = vpop.f32.mrf.mxu0  ;;  %v703_v3 = vpop.f32.mrf.mxu1  ;;  %2950 = vmatmul.mubr.f32.gmra.mxu1 %v14568_v26 }
 0x136   :  { %v588_v14 = vadd.f32 %v587_v61, %v14610_v34  ;;  %v14671_v5 = vadd.f32 %v703_v3, %v578_v36  ;;  %2955 = vmatprep.mubr.f32.mxu1 %v20431_v0  ;;  %v14683_v36 = vand.u32 4294901760, %v3513_v17  ;;  %v3487_v61 = vld [vmem:[#allocation5 + $0x100] sm:$0xff]  ;;  %v3486_v3 = vld [vmem:[#allocation5 + $0xf8] sm:$0xff] }
 0x137   :  { %v808_v20 = vpop.f32.mrf.mxu0  ;;  %3046 = vmatmul.mubr.f32.vlgmr.msra.gmra.mxu0 %v14495_v29  ;;  %v705_v25 = vpop.f32.mrf.mxu1  ;;  %v3510_v29 = vsel %vm131_vm0, %v3489_v7, 0 }
 0x138   :  { %v809_v30 = vadd.f32 %v808_v20, %v14616_v9  ;;  %3051 = vmatprep.mubr.f32.mxu0 %v20431_v0  ;;  %3250 = vmatpush1.msra.mxu0 %v2848_v54  ;;  %v14679_v59 = vadd.f32 %v705_v25, %v580_v2 }
 0x139   :  { %v810_v34 = vpop.f32.mrf.mxu0  ;;  %3254 = vmatprep.subr.mxu0 %v2854_v19  ;;  %v712_v33 = vpop.f32.mrf.mxu1  ;;  %2957 = vmatmul.mubr.f32.gmra.mxu1 %v14586_v27 }
 0x13a   :  { %v811_v50 = vadd.f32 %v810_v34, %v14626_v8  ;;  %3258 = vmatpush1.msra.mxu0 %v2860_v11  ;;  %v14689_v9 = vadd.f32 %v712_v33, %v586_v63  ;;  %3164 = vmatprep.mubr.f32.mxu1 %v20431_v0  ;;  %v14702_v11 = vsub.f32 %v3513_v17, %v14683_v36  ;;  %v3485_v33 = vld [vmem:[#allocation5 + $0xf0] sm:$0xff] }
 0x13b   :  { %v815_v24 = vpop.f32.mrf.mxu0  ;;  %3054 = vmatmul.mubr.f32.gmra.mxu0 %v14515_v52  ;;  %v714_v54 = vpop.f32.mrf.mxu1  ;;  %3262 = vmatprep.subr.mxu0 %v2866_v60 }
 0x13c   :  { %v816_v43 = vadd.f32 %v815_v24, %v14634_v39  ;;  %3059 = vmatprep.mubr.f32.mxu0 %v20431_v0  ;;  %v14697_v19 = vadd.f32 %v714_v54, %v588_v14  ;;  %3266 = vmatpush1.msra.mxu0 %v2872_v57  ;;  %v3680_v62 = vand.u32 4294901760, %v14702_v11 }
 0x13d   :  { %v817_v8 = vpop.f32.mrf.mxu0  ;;  %v923_v53 = vpop.f32.mrf.mxu1  ;;  %3168 = vmatmul.mubr.f32.vlgmr.msra.gmra.mxu1 %v2752_v21  ;;  %3270 = vmatprep.subr.mxu0 %v2878_v56 }
 0x13e   :  { %v818_v2 = vadd.f32 %v817_v8, %v14643_v47  ;;  %v14709_v60 = vadd.f32 %v923_v53, %v809_v30  ;;  %3377 = vmatpush1.msra.mxu1 %v14382_v41  ;;  %3173 = vmatprep.mubr.f32.mxu1 %v20431_v0  ;;  %v3488_v47 = vld [vmem:[#allocation5 + $0x108] sm:$0xff]  ;;  %v3477_v53 = vld [vmem:[%s20417_s0 + $0x4] sm:$0xff] }
 0x13f   :  { %v822_v15 = vpop.f32.mrf.mxu0  ;;  %3062 = vmatmul.mubr.f32.gmra.mxu0 %v14547_v58  ;;  %v925_v57 = vpop.f32.mrf.mxu1  ;;  %3379 = vmatprep.subr.mxu1 %v14390_v32  ;;  %v14731_v32 = vand.u32 4294901760, %v3510_v29  ;;  %v14742_v45 = vand.u32 4294901760, %v3488_v47  ;;  %v14757_v58 = vand.u32 4294901760, %v3487_v61 }
 0x140   :  { %v823_v23 = vadd.f32 %v822_v15, %v14648_v13  ;;  %3067 = vmatprep.mubr.f32.mxu0 %v20431_v0  ;;  %v14717_v39 = vadd.f32 %v925_v57, %v811_v50  ;;  %3274 = vmatpush1.msra.mxu0 %v2884_v16  ;;  %v14765_v50 = vand.u32 4294901760, %v3486_v3 }
 0x141   :  { %v824_v21 = vpop.f32.mrf.mxu0  ;;  %v930_v56 = vpop.f32.mrf.mxu1  ;;  %3177 = vmatmul.mubr.f32.gmra.mxu1 %v2763_v4  ;;  %3540 = vmatprep.subr.mxu0 %v14683_v36  ;;  %v14763_v34 = vsub.f32 %v3488_v47, %v14742_v45 }
 0x142   :  { %v825_v41 = vadd.f32 %v824_v21, %v14654_v6  ;;  %v14727_v63 = vadd.f32 %v930_v56, %v816_v43  ;;  %3182 = vmatprep.mubr.f32.mxu1 %v20431_v0  ;;  %3381 = vmatpush1.msra.mxu1 %v14403_v31  ;;  %v3681_v6 = vsub.f32 %v14702_v11, %v3680_v62  ;;  %v20745_v43 = vand.u32 4294901760, %v14561_v22 }
 0x143   :  { %v829_v13 = vpop.f32.mrf.mxu0  ;;  %3070 = vmatmul.mubr.f32.gmra.mxu0 %v14561_v22  ;;  %v932_v16 = vpop.f32.mrf.mxu1  ;;  %3383 = vmatprep.subr.mxu1 %v14409_v1  ;;  %v14752_v1 = vsub.f32 %v3510_v29, %v14731_v32  ;;  %v14779_v22 = vsub.f32 %v3487_v61, %v14757_v58  ;;  %v14790_v57 = vsub.f32 %v3486_v3, %v14765_v50 }
 0x144   :  { %v830_v40 = vadd.f32 %v829_v13, %v14659_v18  ;;  %3075 = vmatprep.mubr.f32.mxu0 %v20431_v0  ;;  %v14736_v4 = vadd.f32 %v932_v16, %v818_v2  ;;  %3385 = vmatpush1.msra.mxu1 %v14423_v37  ;;  %v3682_v25 = vand.u32 4294901760, %v3681_v6  ;;  %v3484_v37 = vld [vmem:[#allocation5 + $0xe8] sm:$0xff] }
 0x145   :  { %v831_v52 = vpop.f32.mrf.mxu0  ;;  %v937_v18 = vpop.f32.mrf.mxu1  ;;  %3186 = vmatmul.mubr.f32.gmra.mxu1 %v2774_v51  ;;  %3387 = vmatprep.subr.mxu1 %v14429_v44  ;;  %v3686_v44 = vand.u32 4294901760, %v14752_v1  ;;  %v14792_v29 = vand.u32 4294901760, %v3484_v37  ;;  %v3478_v6 = vld [vmem:[%s20417_s0 + $0xc] sm:$0xff] }
 0x146   :  { %v832_v14 = vadd.f32 %v831_v52, %v14665_v55  ;;  %v14747_v17 = vadd.f32 %v937_v18, %v823_v23  ;;  %3191 = vmatprep.mubr.f32.mxu1 %v20431_v0  ;;  %3389 = vmatpush1.msra.mxu1 %v14448_v12  ;;  %v3483_v12 = vld [vmem:[#allocation5 + $0xe0] sm:$0xff]  ;;  %v3704_v18 = vand.u32 4294901760, %v14790_v57 }
 0x147   :  { %v836_v31 = vpop.f32.mrf.mxu0  ;;  %3078 = vmatmul.mubr.f32.gmra.mxu0 %v14584_v49  ;;  %v939_v30 = vpop.f32.mrf.mxu1  ;;  %3683 = vmatprep.subr.mxu1 %v3682_v25  ;;  %v3687_v13 = vsub.f32 %v14752_v1, %v3686_v44  ;;  %v3698_v49 = vand.u32 4294901760, %v14779_v22  ;;  %v14812_v52 = vand.u32 4294901760, %v3483_v12  ;;  %v14825_v3 = vsub.f32 %v3484_v37, %v14792_v29  ;;  %v3479_v37 = vld [vmem:[%s20417_s0 + $0x14] sm:$0xff] }
 0x148   :  { %v837_v20 = vadd.f32 %v836_v31, %v14671_v5  ;;  %3083 = vmatprep.mubr.f32.mxu0 %v20431_v0  ;;  %v14759_v55 = vadd.f32 %v939_v30, %v825_v41 }
 0x149   :  { %v838_v51 = vpop.f32.mrf.mxu0  ;;  %v944_v24 = vpop.f32.mrf.mxu1  ;;  %3195 = vmatmul.mubr.f32.gmra.mxu1 %v20745_v43  ;;  %v3688_v25 = vand.u32 4294901760, %v3687_v13  ;;  %v14846_v43 = vsub.f32 %v3483_v12, %v14812_v52 }
 0x14a   :  { %v839_v5 = vadd.f32 %v838_v51, %v14679_v59  ;;  %v14770_v8 = vadd.f32 %v944_v24, %v830_v40  ;;  %3200 = vmatprep.mubr.f32.mxu1 %v20431_v0  ;;  %v14781_v59 = vand.u32 4294901760, %v3485_v33  ;;  %v3492_v40 = vsel %vm152_vm1, %v3477_v53, 0 }
 0x14b   :  { %v843_v54 = vpop.f32.mrf.mxu0  ;;  %3086 = vmatmul.mubr.f32.gmra.mxu0 %v14605_v35  ;;  %v946_v2 = vpop.f32.mrf.mxu1  ;;  %v3699_v35 = vsub.f32 %v14779_v22, %v3698_v49  ;;  %v3716_v53 = vand.u32 4294901760, %v14825_v3 }
 0x14c   :  { %v844_v7 = vadd.f32 %v843_v54, %v14689_v9  ;;  %3307 = vmatprep.mubr.f32.mxu0 %v20431_v0  ;;  %v14786_v23 = vadd.f32 %v946_v2, %v832_v14  ;;  %v3692_v9 = vand.u32 4294901760, %v14763_v34  ;;  %v3705_v2 = vsub.f32 %v14790_v57, %v3704_v18 }
 0x14d   :  { %v845_v15 = vpop.f32.mrf.mxu0  ;;  %v951_v41 = vpop.f32.mrf.mxu1  ;;  %3204 = vmatmul.mubr.f32.gmra.mxu1 %v2796_v28  ;;  %v14810_v28 = vsub.f32 %v3485_v33, %v14781_v59  ;;  %v14835_v33 = vand.u32 4294901760, %v3492_v40 }
 0x14e   :  { %v846_v21 = vadd.f32 %v845_v15, %v14697_v19  ;;  %v14797_v56 = vadd.f32 %v951_v41, %v837_v20  ;;  %3209 = vmatprep.mubr.f32.mxu1 %v20431_v0 }
 0x14f   :  { %v1066_v47 = vpop.f32.mrf.mxu0  ;;  %3309 = vmatmul.mubr.f32.vlgmr.msra.gmra.mxu0 %v14467_v46  ;;  %v953_v19 = vpop.f32.mrf.mxu1  ;;  %v14867_v13 = vsub.f32 %v3492_v40, %v14835_v33  ;;  %v3706_v40 = vand.u32 4294901760, %v3705_v2 }
 0x150   :  { %v1067_v16 = vadd.f32 %v1066_v47, %v14709_v60  ;;  %3314 = vmatprep.mubr.f32.mxu0 %v20431_v0  ;;  %3542 = vmatpush1.msra.mxu0 %v14731_v32  ;;  %v14817_v61 = vadd.f32 %v953_v19, %v839_v5  ;;  %v3693_v60 = vsub.f32 %v14763_v34, %v3692_v9  ;;  %v3495_v5 = vsel %vm152_vm1, %v3478_v6, 0 }
 0x151   :  { %v1068_v14 = vpop.f32.mrf.mxu0  ;;  %3544 = vmatprep.subr.mxu0 %v14742_v45  ;;  %v958_v20 = vpop.f32.mrf.mxu1  ;;  %3213 = vmatmul.mubr.f32.gmra.mxu1 %v2807_v48  ;;  %v3710_v48 = vand.u32 4294901760, %v14810_v28  ;;  %v14861_v41 = vand.u32 4294901760, %v3495_v5  ;;  %v3498_v19 = vsel %vm152_vm1, %v3479_v37, 0 }
 0x152   :  { %v1069_v31 = vadd.f32 %v1068_v14, %v14717_v39  ;;  %3546 = vmatpush1.msra.mxu0 %v14757_v58  ;;  %v14831_v30 = vadd.f32 %v958_v20, %v844_v7  ;;  %3422 = vmatprep.mubr.f32.mxu1 %v20431_v0  ;;  %v3694_v7 = vand.u32 4294901760, %v3693_v60  ;;  %v20430_v14 = vand.u32 4294901760, %v14846_v43 }
 0x153   :  { %v1077_v51 = vpop.f32.mrf.mxu0  ;;  %3316 = vmatmul.mubr.f32.gmra.mxu0 %v14489_v38  ;;  %v960_v24 = vpop.f32.mrf.mxu1  ;;  %3548 = vmatprep.subr.mxu0 %v14765_v50 }
 0x154   :  { %v1078_v39 = vadd.f32 %v1077_v51, %v14727_v63  ;;  %3321 = vmatprep.mubr.f32.mxu0 %v20431_v0  ;;  %v14851_v54 = vadd.f32 %v960_v24, %v846_v21  ;;  %3550 = vmatpush1.msra.mxu0 %v14781_v59  ;;  %v12310_v51 = vld [vmem:[%s20417_s0 + $0x24] sm:$0xff] }
 0x155   :  { %v1079_v63 = vpop.f32.mrf.mxu0  ;;  %v1233_v12 = vpop.f32.mrf.mxu1  ;;  %3424 = vmatmul.mubr.f32.vlgmr.msra.gmra.mxu1 %v14467_v46  ;;  %3552 = vmatprep.subr.mxu0 %v14792_v29  ;;  %v3700_v46 = vand.u32 4294901760, %v3699_v35  ;;  %v14892_v35 = vand.u32 4294901760, %v3498_v19 }
 0x156   :  { %v1080_v15 = vadd.f32 %v1079_v63, %v14736_v4  ;;  %v14863_v47 = vadd.f32 %v1233_v12, %v1067_v16  ;;  %3689 = vmatpush1.msra.mxu1 %v3688_v25  ;;  %3429 = vmatprep.mubr.f32.mxu1 %v20431_v0  ;;  %v3711_v16 = vsub.f32 %v14810_v28, %v3710_v48 }
 0x157   :  { %v1088_v21 = vpop.f32.mrf.mxu0  ;;  %3323 = vmatmul.mubr.f32.gmra.mxu0 %v14523_v42  ;;  %v1235_v6 = vpop.f32.mrf.mxu1  ;;  %3695 = vmatprep.subr.mxu1 %v3694_v7  ;;  %v3590_v7 = vand.u32 4294901760, %v14867_v13 }
 0x158   :  { %v1089_v4 = vadd.f32 %v1088_v21, %v14747_v17  ;;  %3328 = vmatprep.mubr.f32.mxu0 %v20431_v0  ;;  %v14877_v20 = vadd.f32 %v1235_v6, %v1069_v31  ;;  %3554 = vmatpush1.msra.mxu0 %v14812_v52  ;;  %v3717_v17 = vsub.f32 %v14825_v3, %v3716_v53 }
 0x159   :  { %v1090_v60 = vpop.f32.mrf.mxu0  ;;  %v1240_v24 = vpop.f32.mrf.mxu1  ;;  %3431 = vmatmul.mubr.f32.gmra.mxu1 %v14489_v38  ;;  %v14889_v31 = vsub.f32 %v3495_v5, %v14861_v41  ;;  %3827 = vmatprep.subr.mxu0 %v14702_v11  ;;  %v3712_v38 = vand.u32 4294901760, %v3711_v16  ;;  %v3723_v5 = vsub.f32 %v14846_v43, %v20430_v14  ;;  %v14914_v16 = vsub.f32 %v3498_v19, %v14892_v35 }
 0x15a   :  { %v1091_v25 = vadd.f32 %v1090_v60, %v14759_v55  ;;  %v14894_v63 = vadd.f32 %v1240_v24, %v1078_v39  ;;  %3436 = vmatprep.mubr.f32.mxu1 %v20431_v0  ;;  %3701 = vmatpush1.msra.mxu1 %v3700_v46  ;;  %v3501_v39 = vsel %vm152_vm1, %v12310_v51, 0  ;;  %v3718_v6 = vand.u32 4294901760, %v3717_v17 }
 0x15b   :  { %v1099_v37 = vpop.f32.mrf.mxu0  ;;  %3330 = vmatmul.mubr.f32.gmra.mxu0 %v14537_v10  ;;  %v1242_v2 = vpop.f32.mrf.mxu1  ;;  %3707 = vmatprep.subr.mxu1 %v3706_v40  ;;  %v3601_v46 = vand.u32 4294901760, %v14889_v31  ;;  %v3724_v19 = vand.u32 4294901760, %v3723_v5 }
 0x15c   :  { %v1100_v55 = vadd.f32 %v1099_v37, %v14770_v8  ;;  %3335 = vmatprep.mubr.f32.mxu0 %v20431_v0  ;;  %v14905_v21 = vadd.f32 %v1242_v2, %v1080_v15  ;;  %v12311_v8 = vld [vmem:[%s20417_s0 + $0x2c] sm:$0xff]  ;;  %v3591_v15 = vsub.f32 %v14867_v13, %v3590_v7  ;;  %3713 = vmatpush1.msra.mxu1 %v3712_v38  ;;  %v3612_v38 = vand.u32 4294901760, %v14914_v16 }
 0x15d   :  { %v1101_v12 = vpop.f32.mrf.mxu0  ;;  %v1247_v24 = vpop.f32.mrf.mxu1  ;;  %3438 = vmatmul.mubr.f32.gmra.mxu1 %v14523_v42  ;;  %3719 = vmatprep.subr.mxu1 %v3718_v6 }
 0x15e   :  { %v1102_v60 = vadd.f32 %v1101_v12, %v14786_v23  ;;  %v14916_v37 = vadd.f32 %v1247_v24, %v1089_v4  ;;  %3443 = vmatprep.mubr.f32.mxu1 %v20431_v0  ;;  %v14923_v23 = vand.u32 4294901760, %v3501_v39  ;;  %v3504_v4 = vsel %vm152_vm1, %v12311_v8, 0  ;;  %v12312_v12 = vld [vmem:[%s20417_s0 + $0x34] sm:$0xff]  ;;  %3725 = vmatpush1.msra.mxu1 %v3724_v19 }
 0x15f   :  { %v1110_v51 = vpop.f32.mrf.mxu0  ;;  %3337 = vmatmul.mubr.f32.gmra.mxu0 %v14568_v26  ;;  %v1249_v40 = vpop.f32.mrf.mxu1  ;;  %3955 = vmatprep.subr.mxu1 %v14683_v36 }
 0x160   :  { %v1111_v42 = vadd.f32 %v1110_v51, %v14797_v56  ;;  %3342 = vmatprep.mubr.f32.mxu0 %v20431_v0  ;;  %v14928_v2 = vadd.f32 %v1249_v40, %v1091_v25  ;;  %v3602_v56 = vsub.f32 %v14889_v31, %v3601_v46  ;;  %v3592_v25 = vand.u32 4294901760, %v3591_v15 }
 0x161   :  { %v1112_v17 = vpop.f32.mrf.mxu0  ;;  %v1254_v14 = vpop.f32.mrf.mxu1  ;;  %3445 = vmatmul.mubr.f32.gmra.mxu1 %v14537_v10  ;;  %v14944_v6 = vsub.f32 %v3501_v39, %v14923_v23  ;;  %v3507_v40 = vsel %vm152_vm1, %v12312_v12, 0 }
 0x162   :  { %v1113_v24 = vadd.f32 %v1112_v17, %v14817_v61  ;;  %v14939_v8 = vadd.f32 %v1254_v14, %v1100_v55  ;;  %3450 = vmatprep.mubr.f32.mxu1 %v20431_v0  ;;  %v14946_v61 = vand.u32 4294901760, %v3504_v4  ;;  %v3603_v39 = vand.u32 4294901760, %v3602_v56 }
 0x163   :  { %v1121_v5 = vpop.f32.mrf.mxu0  ;;  %3344 = vmatmul.mubr.f32.gmra.mxu0 %v14586_v27  ;;  %v1256_v51 = vpop.f32.mrf.mxu1 }
 0x164   :  { %v1122_v10 = vadd.f32 %v1121_v5, %v14831_v30  ;;  %3587 = vmatprep.mubr.f32.mxu0 %v20431_v0  ;;  %v14951_v55 = vadd.f32 %v1256_v51, %v1102_v60  ;;  %v3613_v30 = vsub.f32 %v14914_v16, %v3612_v38  ;;  %v3623_v60 = vand.u32 4294901760, %v14944_v6 }
 0x165   :  { %v1123_v14 = vpop.f32.mrf.mxu0  ;;  %v1261_v17 = vpop.f32.mrf.mxu1  ;;  %3452 = vmatmul.mubr.f32.gmra.mxu1 %v14568_v26  ;;  %v14964_v12 = vsub.f32 %v3504_v4, %v14946_v61 }
 0x166   :  { %v1124_v15 = vadd.f32 %v1123_v14, %v14851_v54  ;;  %v14959_v5 = vadd.f32 %v1261_v17, %v1111_v42  ;;  %3457 = vmatprep.mubr.f32.mxu1 %v20431_v0  ;;  %v14966_v54 = vand.u32 4294901760, %v3507_v40  ;;  %v3614_v4 = vand.u32 4294901760, %v3613_v30 }
 0x167   :  { %v1357_v19 = vpop.f32.mrf.mxu0  ;;  %3593 = vmatmul.mubr.f32.vlgmr.msra.gmra.mxu0 %v3592_v25  ;;  %v1263_v56 = vpop.f32.mrf.mxu1 }
 0x168   :  { %v1358_v26 = vadd.f32 %v1357_v19, %v14863_v47  ;;  %3598 = vmatprep.mubr.f32.mxu0 %v20431_v0  ;;  %3830 = vmatpush1.msra.mxu0 %v14752_v1  ;;  %v14971_v42 = vadd.f32 %v1263_v56, %v1113_v24  ;;  %v3624_v24 = vsub.f32 %v14944_v6, %v3623_v60  ;;  %v3634_v19 = vand.u32 4294901760, %v14964_v12 }
 0x169   :  { %v1359_v51 = vpop.f32.mrf.mxu0  ;;  %3833 = vmatprep.subr.mxu0 %v14763_v34  ;;  %v1268_v14 = vpop.f32.mrf.mxu1  ;;  %3459 = vmatmul.mubr.f32.gmra.mxu1 %v14586_v27 }
 0x16a   :  { %v1360_v25 = vadd.f32 %v1359_v51, %v14877_v20  ;;  %3836 = vmatpush1.msra.mxu0 %v14779_v22  ;;  %v14977_v17 = vadd.f32 %v1268_v14, %v1122_v10  ;;  %3758 = vmatprep.mubr.f32.mxu1 %v20431_v0  ;;  %v14985_v20 = vsub.f32 %v3507_v40, %v14966_v54 }
 0x16b   :  { %v1365_v47 = vpop.f32.mrf.mxu0  ;;  %3604 = vmatmul.mubr.f32.gmra.mxu0 %v3603_v39  ;;  %v1270_v30 = vpop.f32.mrf.mxu1  ;;  %3839 = vmatprep.subr.mxu0 %v14790_v57 }
 0x16c   :  { %v1366_v27 = vadd.f32 %v1365_v47, %v14894_v63  ;;  %3609 = vmatprep.mubr.f32.mxu0 %v20431_v0  ;;  %v14990_v10 = vadd.f32 %v1270_v30, %v1124_v15  ;;  %3842 = vmatpush1.msra.mxu0 %v14810_v28  ;;  %v3625_v63 = vand.u32 4294901760, %v3624_v24  ;;  %v3635_v15 = vsub.f32 %v14964_v12, %v3634_v19 }
 0x16d   :  { %v1367_v39 = vpop.f32.mrf.mxu0  ;;  %v1479_v51 = vpop.f32.mrf.mxu1  ;;  %3760 = vmatmul.mubr.f32.vlgmr.msra.gmra.mxu1 %v14835_v33  ;;  %3845 = vmatprep.subr.mxu0 %v14825_v3  ;;  %v3645_v47 = vand.u32 4294901760, %v14985_v20  ;;  %v20747_v3 = vand.u32 4294901760, %v14846_v43 }
 0x16e   :  { %v1368_v56 = vadd.f32 %v1367_v39, %v14905_v21  ;;  %v14996_v14 = vadd.f32 %v1479_v51, %v1358_v26  ;;  %3957 = vmatpush1.msra.mxu1 %v14731_v32  ;;  %3765 = vmatprep.mubr.f32.mxu1 %v20431_v0 }
 0x16f   :  { %v1373_v40 = vpop.f32.mrf.mxu0  ;;  %3615 = vmatmul.mubr.f32.gmra.mxu0 %v3614_v4  ;;  %v1481_v30 = vpop.f32.mrf.mxu1  ;;  %3959 = vmatprep.subr.mxu1 %v14742_v45 }
 0x170   :  { %v1374_v21 = vadd.f32 %v1373_v40, %v14916_v37  ;;  %3620 = vmatprep.mubr.f32.mxu0 %v20431_v0  ;;  %v15006_v26 = vadd.f32 %v1481_v30, %v1360_v25  ;;  %3848 = vmatpush1.msra.mxu0 %v14846_v43  ;;  %v3636_v25 = vand.u32 4294901760, %v3635_v15  ;;  %v3646_v40 = vsub.f32 %v14985_v20, %v3645_v47 }
 0x171   :  { %v1375_v39 = vpop.f32.mrf.mxu0  ;;  %v1488_v24 = vpop.f32.mrf.mxu1  ;;  %3767 = vmatmul.mubr.f32.gmra.mxu1 %v14861_v41  ;;  %4084 = vmatprep.subr.mxu0 %v3680_v62 }
 0x172   :  { %v1376_v4 = vadd.f32 %v1375_v39, %v14928_v2  ;;  %v15014_v51 = vadd.f32 %v1488_v24, %v1366_v27  ;;  %3772 = vmatprep.mubr.f32.mxu1 %v20431_v0  ;;  %3961 = vmatpush1.msra.mxu1 %v14757_v58 }
 0x173   :  { %v1381_v37 = vpop.f32.mrf.mxu0  ;;  %3626 = vmatmul.mubr.f32.gmra.mxu0 %v3625_v63  ;;  %v1490_v2 = vpop.f32.mrf.mxu1  ;;  %3963 = vmatprep.subr.mxu1 %v14765_v50 }
 0x174   :  { %v1382_v30 = vadd.f32 %v1381_v37, %v14939_v8  ;;  %3631 = vmatprep.mubr.f32.mxu0 %v20431_v0  ;;  %v1491_v62 = vadd.f32 %v1490_v2, %v1368_v56  ;;  %v3647_v8 = vand.u32 4294901760, %v3646_v40  ;;  %3965 = vmatpush1.msra.mxu1 %v14781_v59 }
 0x175   :  { %v1383_v11 = vpop.f32.mrf.mxu0  ;;  %v1497_v63 = vpop.f32.mrf.mxu1  ;;  %3774 = vmatmul.mubr.f32.gmra.mxu1 %v14892_v35  ;;  %3967 = vmatprep.subr.mxu1 %v14792_v29 }
 0x176   :  { %v1384_v27 = vadd.f32 %v1383_v11, %v14951_v55  ;;  %v1498_v39 = vadd.f32 %v1497_v63, %v1374_v21  ;;  %3779 = vmatprep.mubr.f32.mxu1 %v20431_v0  ;;  %3969 = vmatpush1.msra.mxu1 %v14812_v52 }
 0x177   :  { %v1389_v15 = vpop.f32.mrf.mxu0  ;;  %3637 = vmatmul.mubr.f32.gmra.mxu0 %v3636_v25  ;;  %v1499_v37 = vpop.f32.mrf.mxu1  ;;  %4213 = vmatprep.subr.mxu1 %v14683_v36 }
 0x178   :  { %v1390_v24 = vadd.f32 %v1389_v15, %v14959_v5  ;;  %3642 = vmatprep.mubr.f32.mxu0 %v20431_v0  ;;  %v1500_v2 = vadd.f32 %v1499_v37, %v1376_v4 }
 0x179   :  { %v1391_v56 = vpop.f32.mrf.mxu0  ;;  %v1506_v11 = vpop.f32.mrf.mxu1  ;;  %3781 = vmatmul.mubr.f32.gmra.mxu1 %v14923_v23 }
 0x17a   :  { %v1392_v55 = vadd.f32 %v1391_v56, %v14971_v42  ;;  %v15033_v25 = vadd.f32 %v1506_v11, %v1382_v30  ;;  %3786 = vmatprep.mubr.f32.mxu1 %v20431_v0 }
 0x17b   :  { %v1397_v21 = vpop.f32.mrf.mxu0  ;;  %3648 = vmatmul.mubr.f32.gmra.mxu0 %v3647_v8  ;;  %v1508_v40 = vpop.f32.mrf.mxu1 }
 0x17c   :  { %v1398_v5 = vadd.f32 %v1397_v21, %v14977_v17  ;;  %3881 = vmatprep.mubr.f32.mxu0 %v20431_v0  ;;  %v1509_v63 = vadd.f32 %v1508_v40, %v1384_v27 }
 0x17d   :  { %v1399_v4 = vpop.f32.mrf.mxu0  ;;  %v1515_v15 = vpop.f32.mrf.mxu1  ;;  %3788 = vmatmul.mubr.f32.gmra.mxu1 %v14946_v61 }
 0x17e   :  { %v1400_v42 = vadd.f32 %v1399_v4, %v14990_v10  ;;  %v15042_v30 = vadd.f32 %v1515_v15, %v1390_v24  ;;  %3793 = vmatprep.mubr.f32.mxu1 %v20431_v0 }
 0x17f   :  { %v1620_v8 = vpop.f32.mrf.mxu0  ;;  %3884 = vmatmul.mubr.f32.vlgmr.msra.gmra.mxu0 %v14867_v13  ;;  %v1517_v37 = vpop.f32.mrf.mxu1 }
 0x180   :  { %v1621_v17 = vadd.f32 %v1620_v8, %v14996_v14  ;;  %3889 = vmatprep.mubr.f32.mxu0 %v20431_v0  ;;  %4088 = vmatpush1.msra.mxu0 %v3686_v44  ;;  %v15050_v36 = vadd.f32 %v1517_v37, %v1392_v55 }
 0x181   :  { %v1622_v10 = vpop.f32.mrf.mxu0  ;;  %4092 = vmatprep.subr.mxu0 %v3692_v9  ;;  %v1524_v24 = vpop.f32.mrf.mxu1  ;;  %3795 = vmatmul.mubr.f32.gmra.mxu1 %v14966_v54 }
 0x182   :  { %v1623_v27 = vadd.f32 %v1622_v10, %v15006_v26  ;;  %4096 = vmatpush1.msra.mxu0 %v3698_v49  ;;  %v1525_v14 = vadd.f32 %v1524_v24, %v1398_v5  ;;  %4002 = vmatprep.mubr.f32.mxu1 %v20431_v0 }
 0x183   :  { %v1627_v56 = vpop.f32.mrf.mxu0  ;;  %3892 = vmatmul.mubr.f32.gmra.mxu0 %v14889_v31  ;;  %v1526_v44 = vpop.f32.mrf.mxu1  ;;  %4100 = vmatprep.subr.mxu0 %v3704_v18 }
 0x184   :  { %v1628_v1 = vadd.f32 %v1627_v56, %v15014_v51  ;;  %3897 = vmatprep.mubr.f32.mxu0 %v20431_v0  ;;  %v15064_v34 = vadd.f32 %v1526_v44, %v1400_v42  ;;  %4104 = vmatpush1.msra.mxu0 %v3710_v48 }
 0x185   :  { %v1629_v9 = vpop.f32.mrf.mxu0  ;;  %v1735_v49 = vpop.f32.mrf.mxu1  ;;  %4006 = vmatmul.mubr.f32.vlgmr.msra.gmra.mxu1 %v3590_v7  ;;  %4108 = vmatprep.subr.mxu0 %v3716_v53 }
 0x186   :  { %v1630_v22 = vadd.f32 %v1629_v9, %v1491_v62  ;;  %v15072_v51 = vadd.f32 %v1735_v49, %v1621_v17  ;;  %4215 = vmatpush1.msra.mxu1 %v14731_v32  ;;  %4011 = vmatprep.mubr.f32.mxu1 %v20431_v0 }
 0x187   :  { %v1634_v26 = vpop.f32.mrf.mxu0  ;;  %3900 = vmatmul.mubr.f32.gmra.mxu0 %v14914_v16  ;;  %v1737_v18 = vpop.f32.mrf.mxu1  ;;  %4217 = vmatprep.subr.mxu1 %v14742_v45 }
 0x188   :  { %v1635_v57 = vadd.f32 %v1634_v26, %v1498_v39  ;;  %3905 = vmatprep.mubr.f32.mxu0 %v20431_v0  ;;  %v15078_v48 = vadd.f32 %v1737_v18, %v1623_v27  ;;  %4112 = vmatpush1.msra.mxu0 %v20747_v3 }
 0x189   :  { %v1636_v28 = vpop.f32.mrf.mxu0  ;;  %v1742_v13 = vpop.f32.mrf.mxu1  ;;  %4015 = vmatmul.mubr.f32.gmra.mxu1 %v3601_v46  ;;  %4629 = vmatprep.subr.mxu0 %v20431_v0 }
 0x18a   :  { %20746 = vst [vmem:[#allocation18_spill] sm:$0xff] %v15078_v48  ;;  %v1637_v53 = vadd.f32 %v1636_v28, %v1500_v2  ;;  %v15086_v7 = vadd.f32 %v1742_v13, %v1628_v1  ;;  %4020 = vmatprep.mubr.f32.mxu1 %v20431_v0  ;;  %4219 = vmatpush1.msra.mxu1 %v14757_v58 }
 0x18b   :  { %v1641_v32 = vpop.f32.mrf.mxu0  ;;  %3908 = vmatmul.mubr.f32.gmra.mxu0 %v14944_v6  ;;  %v1744_v45 = vpop.f32.mrf.mxu1  ;;  %4221 = vmatprep.subr.mxu1 %v14765_v50 }
 0x18c   :  { %v1642_v62 = vadd.f32 %v1641_v32, %v15033_v25  ;;  %3913 = vmatprep.mubr.f32.mxu0 %v20431_v0  ;;  %v15093_v39 = vadd.f32 %v1744_v45, %v1630_v22  ;;  %4223 = vmatpush1.msra.mxu1 %v14781_v59 }
 0x18d   :  { %v1643_v43 = vpop.f32.mrf.mxu0  ;;  %v1749_v46 = vpop.f32.mrf.mxu1  ;;  %4024 = vmatmul.mubr.f32.gmra.mxu1 %v3612_v38  ;;  %4225 = vmatprep.subr.mxu1 %v14792_v29 }
 0x18e   :  { %20748 = vst [vmem:[#allocation19_spill] sm:$0xff] %v15093_v39  ;;  %v1644_v31 = vadd.f32 %v1643_v43, %v1509_v63  ;;  %v15098_v55 = vadd.f32 %v1749_v46, %v1635_v57  ;;  %4029 = vmatprep.mubr.f32.mxu1 %v20431_v0  ;;  %4227 = vmatpush1.msra.mxu1 %v14812_v52 }
 0x18f   :  { %v1648_v2 = vpop.f32.mrf.mxu0  ;;  %3916 = vmatmul.mubr.f32.gmra.mxu0 %v14964_v12  ;;  %v1751_v58 = vpop.f32.mrf.mxu1  ;;  %4772 = vmatprep.subr.mxu1 %v20431_v0 }
 0x190   :  { %v1649_v11 = vadd.f32 %v1648_v2, %v15042_v30  ;;  %3921 = vmatprep.mubr.f32.mxu0 %v20431_v0  ;;  %v15107_v21 = vadd.f32 %v1751_v58, %v1637_v53 }
 0x191   :  { %v15105_v50 = vpop.f32.mrf.mxu0  ;;  %v1756_v16 = vpop.f32.mrf.mxu1  ;;  %4033 = vmatmul.mubr.f32.gmra.mxu1 %v3623_v60 }
 0x192   :  { %20749 = vst [vmem:[#allocation20_spill] sm:$0xff] %v15107_v21  ;;  %v15112_v25 = vadd.f32 %v1756_v16, %v1642_v62  ;;  %4038 = vmatprep.mubr.f32.mxu1 %v20431_v0 }
 0x193   :  { %v1655_v38 = vpop.f32.mrf.mxu0  ;;  %3924 = vmatmul.mubr.f32.gmra.mxu0 %v14985_v20  ;;  %v1758_v40 = vpop.f32.mrf.mxu1 }
 0x194   :  { %v1656_v5 = vadd.f32 %v1655_v38, %v1525_v14  ;;  %4145 = vmatprep.mubr.f32.mxu0 %v20431_v0  ;;  %v15120_v29 = vadd.f32 %v1758_v40, %v1644_v31 }
 0x195   :  { %v15118_v59 = vpop.f32.mrf.mxu0  ;;  %v1763_v6 = vpop.f32.mrf.mxu1  ;;  %4042 = vmatmul.mubr.f32.gmra.mxu1 %v3634_v19 }
 0x196   :  { %20750 = vst [vmem:[#allocation21_spill] sm:$0xff] %v15120_v29  ;;  %v15125_v60 = vadd.f32 %v1763_v6, %v1649_v11  ;;  %4047 = vmatprep.mubr.f32.mxu1 %v20431_v0 }
 0x197   :  { %v1892_v4 = vpop.f32.mrf.mxu0  ;;  %4147 = vmatmul.mubr.f32.vlgmr.msra.gmra.mxu0 %v14835_v33  ;;  %v15129_v63 = vpop.f32.mrf.mxu1 }
 0x198   :  { %20751 = vst [vmem:[#allocation22_spill] sm:$0xff] %v15129_v63  ;;  %4152 = vmatprep.mubr.f32.mxu0 %v20431_v0 }
 0x199   :  { %v15132_v52 = vpop.f32.mrf.mxu0  ;;  %v1770_v42 = vpop.f32.mrf.mxu1  ;;  %4051 = vmatmul.mubr.f32.gmra.mxu1 %v3645_v47 }
 0x19a   :  { %v15136_v15 = vadd.f32 %v1770_v42, %v1656_v5  ;;  %4260 = vmatprep.mubr.f32.mxu1 %v20431_v0 }
 0x19b   :  { %v1903_v12 = vpop.f32.mrf.mxu0  ;;  %4154 = vmatmul.mubr.f32.gmra.mxu0 %v14861_v41  ;;  %v15140_v19 = vpop.f32.mrf.mxu1 }
 0x19c   :  { %20752 = vst [vmem:[#allocation23_spill] sm:$0xff] %v15140_v19  ;;  %4159 = vmatprep.mubr.f32.mxu0 %v20431_v0 }
 0x19d   :  { %v15143_v30 = vpop.f32.mrf.mxu0  ;;  %v2059_v8 = vpop.f32.mrf.mxu1  ;;  %4262 = vmatmul.mubr.f32.vlgmr.msra.gmra.mxu1 %v14835_v33 }
 0x19e   :  { %v2060_v37 = vadd.f32 %v2059_v8, %v1892_v4  ;;  %4267 = vmatprep.mubr.f32.mxu1 %v20431_v0 }
 0x19f   :  { %v1914_v17 = vpop.f32.mrf.mxu0  ;;  %4161 = vmatmul.mubr.f32.gmra.mxu0 %v14892_v35  ;;  %v15148_v20 = vpop.f32.mrf.mxu1 }
 0x1a0   :  { %4166 = vmatprep.mubr.f32.mxu0 %v20431_v0 }
 0x1a1   :  { %v15151_v47 = vpop.f32.mrf.mxu0  ;;  %v2066_v10 = vpop.f32.mrf.mxu1  ;;  %4269 = vmatmul.mubr.f32.gmra.mxu1 %v14861_v41 }
 0x1a2   :  { %v2067_v24 = vadd.f32 %v2066_v10, %v1903_v12  ;;  %4274 = vmatprep.mubr.f32.mxu1 %v20431_v0 }
 0x1a3   :  { %v1925_v27 = vpop.f32.mrf.mxu0  ;;  %4168 = vmatmul.mubr.f32.gmra.mxu0 %v14923_v23  ;;  %v15156_v33 = vpop.f32.mrf.mxu1 }
 0x1a4   :  { %4173 = vmatprep.mubr.f32.mxu0 %v20431_v0 }
 0x1a5   :  { %v15159_v14 = vpop.f32.mrf.mxu0  ;;  %v2073_v56 = vpop.f32.mrf.mxu1  ;;  %4276 = vmatmul.mubr.f32.gmra.mxu1 %v14892_v35 }
 0x1a6   :  { %v2074_v44 = vadd.f32 %v2073_v56, %v1914_v17  ;;  %4281 = vmatprep.mubr.f32.mxu1 %v20431_v0 }
 0x1a7   :  { %v1936_v1 = vpop.f32.mrf.mxu0  ;;  %4175 = vmatmul.mubr.f32.gmra.mxu0 %v14946_v61  ;;  %v15164_v41 = vpop.f32.mrf.mxu1 }
 0x1a8   :  { %4180 = vmatprep.mubr.f32.mxu0 %v20431_v0 }
 0x1a9   :  { %v15167_v9 = vpop.f32.mrf.mxu0  ;;  %v2080_v22 = vpop.f32.mrf.mxu1  ;;  %4283 = vmatmul.mubr.f32.gmra.mxu1 %v14923_v23 }
 0x1aa   :  { %v2081_v26 = vadd.f32 %v2080_v22, %v1925_v27  ;;  %4288 = vmatprep.mubr.f32.mxu1 %v20431_v0 }
 0x1ab   :  { %v1947_v49 = vpop.f32.mrf.mxu0  ;;  %4182 = vmatmul.mubr.f32.gmra.mxu0 %v14966_v54  ;;  %v15172_v35 = vpop.f32.mrf.mxu1 }
 0x1ad   :  { %v15174_v57 = vpop.f32.mrf.mxu0  ;;  %v2087_v18 = vpop.f32.mrf.mxu1  ;;  %4290 = vmatmul.mubr.f32.gmra.mxu1 %v14946_v61 }
 0x1ae   :  { %v2088_v28 = vadd.f32 %v2087_v18, %v1936_v1  ;;  %4295 = vmatprep.mubr.f32.mxu1 %v20431_v0 }
 0x1af   :  { %v2183_v3 = vpop.f32.mrf.mxu0  ;;  %v15178_v13 = vpop.f32.mrf.mxu1 }
 0x1b0   :  { %v2184_v53 = vadd.f32 %v2183_v3, %v2060_v37 }
 0x1b1   :  { %v15180_v23 = vpop.f32.mrf.mxu0  ;;  %v2094_v32 = vpop.f32.mrf.mxu1  ;;  %4297 = vmatmul.mubr.f32.gmra.mxu1 %v14966_v54 }
 0x1b2   :  { %v2095_v62 = vadd.f32 %v2094_v32, %v1947_v49 }
 0x1b3   :  { %v2191_v45 = vpop.f32.mrf.mxu0  ;;  %v15183_v31 = vpop.f32.mrf.mxu1 }
 0x1b4   :  { %v2192_v43 = vadd.f32 %v2191_v45, %v2067_v24 }
 0x1b5   :  { %v15185_v46 = vpop.f32.mrf.mxu0  ;;  %v2305_v61 = vpop.f32.mrf.mxu1 }
 0x1b6   :  { %v2306_v11 = vadd.f32 %v2305_v61, %v2184_v53 }
 0x1b7   :  { %v2199_v2 = vpop.f32.mrf.mxu0  ;;  %v15187_v16 = vpop.f32.mrf.mxu1 }
 0x1b8   :  { %v2200_v58 = vadd.f32 %v2199_v2, %v2074_v44 }
 0x1b9   :  { %v15189_v38 = vpop.f32.mrf.mxu0  ;;  %v2314_v5 = vpop.f32.mrf.mxu1 }
 0x1ba   :  { %v2315_v6 = vadd.f32 %v2314_v5, %v2192_v43 }
 0x1bb   :  { %v2207_v40 = vpop.f32.mrf.mxu0  ;;  %v15191_v54 = vpop.f32.mrf.mxu1 }
 0x1bc   :  { %v2208_v4 = vadd.f32 %v2207_v40, %v2081_v26 }
 0x1bd   :  { %v15193_v42 = vpop.f32.mrf.mxu0  ;;  %v2323_v12 = vpop.f32.mrf.mxu1 }
 0x1be   :  { %v2324_v17 = vadd.f32 %v2323_v12, %v2200_v58 }
 0x1bf   :  { %v2215_v8 = vpop.f32.mrf.mxu0  ;;  %v15195_v10 = vpop.f32.mrf.mxu1 }
 0x1c0   :  { %v2216_v37 = vadd.f32 %v2215_v8, %v2088_v28 }
 0x1c1   :  { %v15197_v27 = vpop.f32.mrf.mxu0  ;;  %v2332_v24 = vpop.f32.mrf.mxu1 }
 0x1c2   :  { %v2333_v1 = vadd.f32 %v2332_v24, %v2208_v4 }
 0x1c3   :  { %v2223_v56 = vpop.f32.mrf.mxu0  ;;  %v15199_v22 = vpop.f32.mrf.mxu1 }
 0x1c4   :  { %v2224_v44 = vadd.f32 %v2223_v56, %v2095_v62 }
 0x1c5   :  { %v15201_v49 = vpop.f32.mrf.mxu0  ;;  %v2341_v26 = vpop.f32.mrf.mxu1 }
 0x1c6   :  { %v2342_v18 = vadd.f32 %v2341_v26, %v2216_v37 }
 0x1c7   :  { %v2446_v3 = vpop.f32.mrf.mxu0  ;;  %v15203_v32 = vpop.f32.mrf.mxu1 }
 0x1c8   :  { %v2447_v53 = vadd.f32 %v2446_v3, %v2306_v11  ;;  %20753 = vst [vmem:[#allocation24_spill] sm:$0xff] %v15203_v32 }
 0x1c9   :  { %v15205_v45 = vpop.f32.mrf.mxu0  ;;  %v2350_v28 = vpop.f32.mrf.mxu1 }
 0x1ca   :  { %v2351_v43 = vadd.f32 %v2350_v28, %v2224_v44 }
 0x1cb   :  { %v2453_v61 = vpop.f32.mrf.mxu0  ;;  %v15207_v58 = vpop.f32.mrf.mxu1 }
 0x1cc   :  { %v2454_v2 = vadd.f32 %v2453_v61, %v2315_v6  ;;  %20754 = vst [vmem:[#allocation25_spill] sm:$0xff] %v15207_v58 }
 0x1cd   :  { %v15209_v5 = vpop.f32.mrf.mxu0  ;;  %v2561_v62 = vpop.f32.mrf.mxu1 }
 0x1ce   :  { %v2562_v4 = vadd.f32 %v2561_v62, %v2447_v53 }
 0x1cf   :  { %v2460_v40 = vpop.f32.mrf.mxu0  ;;  %v15211_v8 = vpop.f32.mrf.mxu1 }
 0x1d0   :  { %v2461_v12 = vadd.f32 %v2460_v40, %v2324_v17  ;;  %20755 = vst [vmem:[#allocation26_spill] sm:$0xff] %v15211_v8  ;;  %v15214_v11 = vadd.f32 %v2562_v4, %v15072_v51 }
 0x1d1   :  { %v15216_v37 = vpop.f32.mrf.mxu0  ;;  %v2568_v24 = vpop.f32.mrf.mxu1 }
 0x1d2   :  { %v2569_v44 = vadd.f32 %v2568_v24, %v2454_v2 }
 0x1d3   :  { %v2467_v56 = vpop.f32.mrf.mxu0  ;;  %v15218_v6 = vpop.f32.mrf.mxu1 }
 0x1d4   :  { %v2468_v26 = vadd.f32 %v2467_v56, %v2333_v1  ;;  %20756 = vst [vmem:[#allocation27_spill] sm:$0xff] %v15218_v6  ;;  %v15221_v3 = vadd.f32 %v2569_v44, %v15086_v7 }
 0x1d5   :  { %v15223_v28 = vpop.f32.mrf.mxu0  ;;  %v2575_v53 = vpop.f32.mrf.mxu1 }
 0x1d6   :  { %20757 = vst [vmem:[#allocation28_spill] sm:$0xff] %v15223_v28  ;;  %v2576_v61 = vadd.f32 %v2575_v53, %v2461_v12 }
 0x1d7   :  { %v2474_v17 = vpop.f32.mrf.mxu0  ;;  %v15225_v40 = vpop.f32.mrf.mxu1 }
 0x1d8   :  { %v2475_v62 = vadd.f32 %v2474_v17, %v2342_v18  ;;  %20758 = vst [vmem:[#allocation29_spill] sm:$0xff] %v15225_v40  ;;  %v15228_v51 = vadd.f32 %v2576_v61, %v15098_v55 }
 0x1d9   :  { %v15230_v4 = vpop.f32.mrf.mxu0  ;;  %v2582_v2 = vpop.f32.mrf.mxu1 }
 0x1da   :  { %20759 = vst [vmem:[#allocation30_spill] sm:$0xff] %v15230_v4  ;;  %v2583_v24 = vadd.f32 %v2582_v2, %v2468_v26 }
 0x1db   :  { %v2481_v1 = vpop.f32.mrf.mxu0  ;;  %v15232_v0 = vpop.f32.mrf.mxu1 }
 0x1dc   :  { %v2482_v56 = vadd.f32 %v2481_v1, %v2351_v43  ;;  %20760 = vst [vmem:[#allocation31_spill] sm:$0xff] %v15232_v0  ;;  %v15235_v7 = vadd.f32 %v2583_v24, %v15112_v25 }
 0x1dd   :  { %v15237_v44 = vpop.f32.mrf.mxu0  ;;  %v2589_v12 = vpop.f32.mrf.mxu1 }
 0x1de   :  { %20761 = vst [vmem:[#allocation32_spill] sm:$0xff] %v15237_v44  ;;  %v2590_v18 = vadd.f32 %v2589_v12, %v2475_v62 }
 0x1df   :  { %v2756_v53 = vpop.f32.mrf.mxu0  ;;  %v15239_v17 = vpop.f32.mrf.mxu1 }
 0x1e0   :  { %20762 = vst [vmem:[#allocation33_spill] sm:$0xff] %v15239_v17  ;;  %v15242_v55 = vadd.f32 %v2590_v18, %v15125_v60 }
 0x1e1   :  { %v15244_v61 = vpop.f32.mrf.mxu0  ;;  %v2596_v29 = vpop.f32.mrf.mxu1 }
 0x1e2   :  { %20763 = vst [vmem:[#allocation34_spill] sm:$0xff] %v15244_v61  ;;  %v2597_v26 = vadd.f32 %v2596_v29, %v2482_v56 }
 0x1e3   :  { %v2767_v43 = vpop.f32.mrf.mxu0  ;;  %v15246_v2 = vpop.f32.mrf.mxu1 }
 0x1e4   :  { %20764 = vst [vmem:[#allocation35_spill] sm:$0xff] %v15246_v2  ;;  %v15249_v25 = vadd.f32 %v2597_v26, %v15136_v15 }
 0x1e5   :  { %v15251_v1 = vpop.f32.mrf.mxu0  ;;  %v2923_v24 = vpop.f32.mrf.mxu1 }
 0x1e6   :  { %20765 = vst [vmem:[#allocation36_spill] sm:$0xff] %v15251_v1  ;;  %v2924_v12 = vadd.f32 %v2923_v24, %v2756_v53 }
 0x1e7   :  { %v2778_v62 = vpop.f32.mrf.mxu0  ;;  %v15253_v21 = vpop.f32.mrf.mxu1 }
 0x1e8   :  { %20766 = vst [vmem:[#allocation37_spill] sm:$0xff] %v15253_v21 }
 0x1e9   :  { %v15255_v39 = vpop.f32.mrf.mxu0  ;;  %v2930_v60 = vpop.f32.mrf.mxu1 }
 0x1ea   :  { %20767 = vst [vmem:[#allocation38_spill] sm:$0xff] %v15255_v39  ;;  %v2931_v48 = vadd.f32 %v2930_v60, %v2767_v43 }
 0x1eb   :  { %v2789_v18 = vpop.f32.mrf.mxu0  ;;  %v15257_v19 = vpop.f32.mrf.mxu1 }
 0x1ec   :  { %20768 = vst [vmem:[#allocation39_spill] sm:$0xff] %v15257_v19 }
 0x1ed   :  { %v15259_v29 = vpop.f32.mrf.mxu0  ;;  %v2937_v56 = vpop.f32.mrf.mxu1 }
 0x1ee   :  { %20769 = vst [vmem:[#allocation40_spill] sm:$0xff] %v15259_v29  ;;  %v2938_v15 = vadd.f32 %v2937_v56, %v2778_v62 }
 0x1ef   :  { %v2800_v2 = vpop.f32.mrf.mxu0  ;;  %v15261_v26 = vpop.f32.mrf.mxu1 }
 0x1f0   :  { %20770 = vst [vmem:[#allocation41_spill] sm:$0xff] %v15261_v26 }
 0x1f1   :  { %v15263_v17 = vpop.f32.mrf.mxu0  ;;  %v2944_v0 = vpop.f32.mrf.mxu1 }
 0x1f2   :  { %20771 = vst [vmem:[#allocation42_spill] sm:$0xff] %v15263_v17  ;;  %v2945_v24 = vadd.f32 %v2944_v0, %v2789_v18 }
 0x1f3   :  { %v2811_v53 = vpop.f32.mrf.mxu0  ;;  %v15265_v44 = vpop.f32.mrf.mxu1 }
 0x1f4   :  { %20772 = vst [vmem:[#allocation43_spill] sm:$0xff] %v15265_v44 }
 0x1f5   :  { %v15267_v39 = vpop.f32.mrf.mxu0  ;;  %v2951_v1 = vpop.f32.mrf.mxu1 }
 0x1f6   :  { %20773 = vst [vmem:[#allocation44_spill] sm:$0xff] %v15267_v39  ;;  %v2952_v43 = vadd.f32 %v2951_v1, %v2800_v2 }
 0x1f7   :  { %v3047_v60 = vpop.f32.mrf.mxu0  ;;  %v15269_v21 = vpop.f32.mrf.mxu1 }
 0x1f8   :  { %v3048_v19 = vadd.f32 %v3047_v60, %v2924_v12  ;;  %20774 = vst [vmem:[#allocation45_spill] sm:$0xff] %v15269_v21 }
 0x1f9   :  { %v15271_v29 = vpop.f32.mrf.mxu0  ;;  %v2958_v62 = vpop.f32.mrf.mxu1 }
 0x1fa   :  { %20775 = vst [vmem:[#allocation46_spill] sm:$0xff] %v15271_v29  ;;  %v2959_v56 = vadd.f32 %v2958_v62, %v2811_v53 }
 0x1fb   :  { %v3055_v26 = vpop.f32.mrf.mxu0  ;;  %v15273_v17 = vpop.f32.mrf.mxu1 }
 0x1fc   :  { %v3056_v61 = vadd.f32 %v3055_v26, %v2931_v48  ;;  %20776 = vst [vmem:[#allocation47_spill] sm:$0xff] %v15273_v17 }
 0x1fd   :  { %v15275_v4 = vpop.f32.mrf.mxu0  ;;  %v3169_v0 = vpop.f32.mrf.mxu1 }
 0x1fe   :  { %20777 = vst [vmem:[#allocation48_spill] sm:$0xff] %v15275_v4  ;;  %v3170_v44 = vadd.f32 %v3169_v0, %v3048_v19 }
 0x1ff   :  { %v3063_v18 = vpop.f32.mrf.mxu0  ;;  %v15277_v40 = vpop.f32.mrf.mxu1 }
 0x200   :  { %v3064_v39 = vadd.f32 %v3063_v18, %v2938_v15  ;;  %20778 = vst [vmem:[#allocation49_spill] sm:$0xff] %v15277_v40 }
 0x201   :  { %v15279_v2 = vpop.f32.mrf.mxu0  ;;  %v3178_v1 = vpop.f32.mrf.mxu1 }
 0x202   :  { %20779 = vst [vmem:[#allocation50_spill] sm:$0xff] %v15279_v2  ;;  %v3179_v60 = vadd.f32 %v3178_v1, %v3056_v61 }
 0x203   :  { %v3071_v12 = vpop.f32.mrf.mxu0  ;;  %v15281_v21 = vpop.f32.mrf.mxu1 }
 0x204   :  { %v3072_v29 = vadd.f32 %v3071_v12, %v2945_v24  ;;  %20780 = vst [vmem:[#allocation51_spill] sm:$0xff] %v15281_v21 }
 0x205   :  { %v15283_v53 = vpop.f32.mrf.mxu0  ;;  %v3187_v48 = vpop.f32.mrf.mxu1 }
 0x206   :  { %20781 = vst [vmem:[#allocation52_spill] sm:$0xff] %v15283_v53  ;;  %v3188_v62 = vadd.f32 %v3187_v48, %v3064_v39  ;;  %v4618_v48 = vld [vmem:[#allocation8 + $0x108] sm:$0xff] }
 0x207   :  { %v3079_v26 = vpop.f32.mrf.mxu0  ;;  %v15285_v17 = vpop.f32.mrf.mxu1 }
 0x208   :  { %v3080_v4 = vadd.f32 %v3079_v26, %v2952_v43  ;;  %20782 = vst [vmem:[#allocation53_spill] sm:$0xff] %v15285_v17  ;;  %v4617_v26 = vld [vmem:[#allocation8 + $0x100] sm:$0xff]  ;;  %v4616_v17 = vld [vmem:[#allocation8 + $0xf8] sm:$0xff] }
 0x209   :  { %v15287_v19 = vpop.f32.mrf.mxu0  ;;  %v3196_v15 = vpop.f32.mrf.mxu1 }
 0x20a   :  { %20783 = vst [vmem:[#allocation54_spill] sm:$0xff] %v15287_v19  ;;  %v15289_v18 = vadd.f32 %v3196_v15, %v3072_v29  ;;  %v15301_v29 = vand.u32 4294901760, %v4618_v48  ;;  %v15305_v15 = vand.u32 4294901760, %v4616_v17 }
 0x20b   :  { %v3087_v0 = vpop.f32.mrf.mxu0  ;;  %v15291_v2 = vpop.f32.mrf.mxu1 }
 0x20c   :  { %v3088_v40 = vadd.f32 %v3087_v0, %v2959_v56  ;;  %20784 = vst [vmem:[#allocation55_spill] sm:$0xff] %v15291_v2  ;;  %20788 = vst [vmem:[#allocation59_spill] sm:$0xff] %v15301_v29  ;;  %v15303_v56 = vand.u32 4294901760, %v4617_v26  ;;  %v4615_v0 = vld [vmem:[#allocation8 + $0xf0] sm:$0xff]  ;;  %v4614_v2 = vld [vmem:[#allocation8 + $0xe8] sm:$0xff]  ;;  %v15318_v6 = vsub.f32 %v4618_v48, %v15301_v29  ;;  %v15324_v8 = vsub.f32 %v4616_v17, %v15305_v15 }
 0x20d   :  { %v15293_v61 = vpop.f32.mrf.mxu0  ;;  %v3205_v24 = vpop.f32.mrf.mxu1  ;;  %20790 = vst [vmem:[#allocation61_spill] sm:$0xff] %v15305_v15  ;;  %4631 = vmatpush1.msra.mxu0 %v15301_v29 }
 0x20e   :  { %20785 = vst [vmem:[#allocation56_spill] sm:$0xff] %v15293_v61  ;;  %v15295_v1 = vadd.f32 %v3205_v24, %v3080_v4  ;;  %20789 = vst [vmem:[#allocation60_spill] sm:$0xff] %v15303_v56  ;;  %v4613_v4 = vld [vmem:[#allocation8 + $0xe0] sm:$0xff]  ;;  %v15321_v28 = vsub.f32 %v4617_v26, %v15303_v56 }
 0x20f   :  { %v3310_v12 = vpop.f32.mrf.mxu0  ;;  %v15297_v39 = vpop.f32.mrf.mxu1  ;;  %20795 = vst [vmem:[#allocation66_spill] sm:$0xff] %v15318_v6  ;;  %20797 = vst [vmem:[#allocation68_spill] sm:$0xff] %v15324_v8 }
 0x210   :  { %v3311_v21 = vadd.f32 %v3310_v12, %v3170_v44  ;;  %20786 = vst [vmem:[#allocation57_spill] sm:$0xff] %v15297_v39  ;;  %v15309_v12 = vand.u32 4294901760, %v4615_v0  ;;  %v15311_v39 = vand.u32 4294901760, %v4614_v2  ;;  %20796 = vst [vmem:[#allocation67_spill] sm:$0xff] %v15321_v28  ;;  %v20438_v26 = vand.u32 4294901760, %v15321_v28 }
 0x211   :  { %v15299_v43 = vpop.f32.mrf.mxu0  ;;  %v3214_v19 = vpop.f32.mrf.mxu1 }
 0x212   :  { %20787 = vst [vmem:[#allocation58_spill] sm:$0xff] %v15299_v43  ;;  %v15307_v24 = vadd.f32 %v3214_v19, %v3088_v40  ;;  %20791 = vst [vmem:[#allocation62_spill] sm:$0xff] %v15309_v12  ;;  %v15313_v43 = vand.u32 4294901760, %v4613_v4  ;;  %v15330_v19 = vsub.f32 %v4615_v0, %v15309_v12 }
 0x213   :  { %v3317_v44 = vpop.f32.mrf.mxu0  ;;  %20792 = vst [vmem:[#allocation63_spill] sm:$0xff] %v15311_v39  ;;  %v15315_v53 = vpop.f32.mrf.mxu1 }
 0x214   :  { %20793 = vst [vmem:[#allocation64_spill] sm:$0xff] %v15313_v43  ;;  %v3318_v61 = vadd.f32 %v3317_v44, %v3179_v60  ;;  %20794 = vst [vmem:[#allocation65_spill] sm:$0xff] %v15315_v53  ;;  %v15333_v60 = vsub.f32 %v4614_v2, %v15311_v39  ;;  %v20801_v44 = vmov 0.0   ;;  %v20437_v53 = vand.u32 4294901760, %v15318_v6 }
 0x215   :  { %v15327_v40 = vpop.f32.mrf.mxu0  ;;  %20799 = vst [vmem:[#allocation70_spill] sm:$0xff] %v15330_v19  ;;  %4632 = vmatprep.subr.mxu0 %v20801_v44  ;;  %v3425_v48 = vpop.f32.mrf.mxu1  ;;  %v15341_v29 = vsub.f32 %v4613_v4, %v15313_v43  ;;  %v20445_v58 = vand.u32 4294901760, %v15330_v19  ;;  %v4783_v4 = vsub.f32 %v15321_v28, %v20438_v26 }
 0x216   :  { %20798 = vst [vmem:[#allocation69_spill] sm:$0xff] %v15327_v40  ;;  %20800 = vst [vmem:[#allocation71_spill] sm:$0xff] %v15333_v60  ;;  %4634 = vmatpush1.msra.mxu0 %v15303_v56  ;;  %v3426_v0 = vadd.f32 %v3425_v48, %v3311_v21  ;;  %v4776_v17 = vsub.f32 %v15318_v6, %v20437_v53  ;;  %v20803_v56 = vand.u32 4294901760, %v15324_v8 }
 0x217   :  { %20802 = vst [vmem:[#allocation72_spill] sm:$0xff] %v15341_v29  ;;  %v3324_v40 = vpop.f32.mrf.mxu0  ;;  %4635 = vmatprep.subr.mxu0 %v20801_v44  ;;  %v15346_v63 = vpop.f32.mrf.mxu1  ;;  %v4784_v53 = vand.u32 4294901760, %v4783_v4  ;;  %v4797_v26 = vsub.f32 %v15330_v19, %v20445_v58 }
 0x218   :  { %v3325_v32 = vadd.f32 %v3324_v40, %v3188_v62  ;;  %v4790_v21 = vsub.f32 %v15324_v8, %v20803_v56  ;;  %4637 = vmatpush1.msra.mxu0 %v15305_v15  ;;  %v15359_v48 = vadd.f32 %v3426_v0, %v15214_v11  ;;  %v4777_v2 = vand.u32 4294901760, %v4776_v17 }
 0x219   :  { %v15361_v62 = vpop.f32.mrf.mxu0  ;;  %4638 = vmatprep.subr.mxu0 %v20801_v44  ;;  %v3432_v40 = vpop.f32.mrf.mxu1  ;;  %v20805_v17 = vand.u32 4294901760, %v15333_v60 }
 0x21a   :  { %20804 = vst [vmem:[#allocation73_spill] sm:$0xff] %v15359_v48  ;;  %4640 = vmatpush1.msra.mxu0 %v15309_v12  ;;  %v3433_v8 = vadd.f32 %v3432_v40, %v3318_v61  ;;  %4778 = vmatpush1.msra.mxu1 %v4777_v2  ;;  %v4791_v6 = vand.u32 4294901760, %v4790_v21  ;;  %v4798_v61 = vand.u32 4294901760, %v4797_v26  ;;  %v20807_v2 = vand.u32 4294901760, %v15341_v29 }
 0x21b   :  { %v3331_v56 = vpop.f32.mrf.mxu0  ;;  %4641 = vmatprep.subr.mxu0 %v20801_v44  ;;  %v15371_v0 = vpop.f32.mrf.mxu1  ;;  %v4804_v4 = vsub.f32 %v15333_v60, %v20805_v17  ;;  %4779 = vmatprep.subr.mxu1 %v20801_v44  ;;  %v2076_v48 = vadd.f32 %v15164_v41, %v15151_v47 }
 0x21c   :  { %v3332_v11 = vadd.f32 %v3331_v56, %v15289_v18  ;;  %4643 = vmatpush1.msra.mxu0 %v15311_v39  ;;  %v15378_v58 = vadd.f32 %v3433_v8, %v15221_v3  ;;  %4785 = vmatpush1.msra.mxu1 %v4784_v53  ;;  %v4811_v21 = vsub.f32 %v15341_v29, %v20807_v2 }
 0x21d   :  { %v15380_v28 = vpop.f32.mrf.mxu0  ;;  %4644 = vmatprep.subr.mxu0 %v20801_v44  ;;  %v3439_v18 = vpop.f32.mrf.mxu1  ;;  %4786 = vmatprep.subr.mxu1 %v20801_v44  ;;  %v4805_v17 = vand.u32 4294901760, %v4804_v4 }
 0x21e   :  { %20806 = vst [vmem:[#allocation74_spill] sm:$0xff] %v15378_v58  ;;  %4646 = vmatpush1.msra.mxu0 %v15313_v43  ;;  %v3440_v56 = vadd.f32 %v3439_v18, %v3325_v32  ;;  %4792 = vmatpush1.msra.mxu1 %v4791_v6  ;;  %v4812_v32 = vand.u32 4294901760, %v4811_v21  ;;  %v2062_v58 = vadd.f32 %v15148_v20, %v15132_v52 }
 0x21f   :  { %v3338_v40 = vpop.f32.mrf.mxu0  ;;  %4647 = vmatprep.subr.mxu0 %v20801_v44  ;;  %v15391_v3 = vpop.f32.mrf.mxu1  ;;  %4793 = vmatprep.subr.mxu1 %v20801_v44  ;;  %v2097_v20 = vadd.f32 %v15183_v31, %v15174_v57  ;;  %v20461_v31 = vlaneseq }
 0x220   :  { %v3339_v8 = vadd.f32 %v3338_v40, %v15295_v1  ;;  %v15394_v53 = vadd.f32 %v3440_v56, %v15228_v51  ;;  %4799 = vmatpush1.msra.mxu1 %v4798_v61 }
 0x221   :  { %v15396_v26 = vpop.f32.mrf.mxu0  ;;  %v3446_v2 = vpop.f32.mrf.mxu1  ;;  %4800 = vmatprep.subr.mxu1 %v20801_v44 }
 0x222   :  { %20808 = vst [vmem:[#allocation75_spill] sm:$0xff] %v15394_v53  ;;  %v3447_v29 = vadd.f32 %v3446_v2, %v3332_v11  ;;  %4806 = vmatpush1.msra.mxu1 %v4805_v17 }
 0x223   :  { %v3345_v18 = vpop.f32.mrf.mxu0  ;;  %v15401_v40 = vpop.f32.mrf.mxu1  ;;  %4807 = vmatprep.subr.mxu1 %v20801_v44 }
 0x224   :  { %v3346_v1 = vadd.f32 %v3345_v18, %v15307_v24  ;;  %v15404_v6 = vadd.f32 %v3447_v29, %v15235_v7  ;;  %4813 = vmatpush1.msra.mxu1 %v4812_v32 }
 0x225   :  { %v15406_v51 = vpop.f32.mrf.mxu0  ;;  %v3453_v4 = vpop.f32.mrf.mxu1  ;;  %4814 = vmatprep.subr.mxu1 %v20801_v44  ;;  %v2069_v44 = vadd.f32 %v15156_v33, %v15143_v30  ;;  %v2090_v30 = vadd.f32 %v15178_v13, %v15167_v9  ;;  %v2226_v13 = vadd.f32 %v15201_v49, %v2097_v20  ;;  %v20823_v49 = vld [vmem:[#allocation24_spill] sm:$0xff] }
 0x226   :  { %20809 = vst [vmem:[#allocation76_spill] sm:$0xff] %v15404_v6  ;;  %v3454_v61 = vadd.f32 %v3453_v4, %v3339_v8 }
 0x227   :  { %v15409_v21 = vpop.f32.mrf.mxu0  ;;  %v15412_v11 = vpop.f32.mrf.mxu1  ;;  %v2218_v9 = vadd.f32 %v15197_v27, %v2090_v30 }
 0x228   :  { %v15415_v24 = vadd.f32 %v3454_v61, %v15242_v55 }
 0x229   :  { %v15417_v56 = vpop.f32.mrf.mxu0  ;;  %v3460_v7 = vpop.f32.mrf.mxu1 }
 0x22a   :  { %20810 = vst [vmem:[#allocation77_spill] sm:$0xff] %v15415_v24  ;;  %v3461_v29 = vadd.f32 %v3460_v7, %v3346_v1 }
 0x22b   :  { %v15419_v17 = vpop.f32.mrf.mxu0  ;;  %v15421_v2 = vpop.f32.mrf.mxu1 }
 0x22c   :  { %v15424_v32 = vadd.f32 %v3461_v29, %v15249_v25 }
 0x22d   :  { %v15426_v8 = vpop.f32.mrf.mxu0  ;;  %v15428_v18 = vpop.f32.mrf.mxu1 }
 0x22e   :  { %20811 = vst [vmem:[#allocation78_spill] sm:$0xff] %v15424_v32 }
 0x22f   :  { %v15430_v4 = vpop.f32.mrf.mxu0  ;;  %v15432_v60 = vpop.f32.mrf.mxu1 }
 0x231   :  { %v15434_v55 = vpop.f32.mrf.mxu0  ;;  %v15436_v61 = vpop.f32.mrf.mxu1 }
 0x233   :  { %v15438_v1 = vpop.f32.mrf.mxu0  ;;  %v15440_v7 = vpop.f32.mrf.mxu1 }
 0x235   :  { %v15442_v19 = vpop.f32.mrf.mxu0  ;;  %v15444_v25 = vpop.f32.mrf.mxu1 }
 0x237   :  { %v15446_v29 = vpop.f32.mrf.mxu0  ;;  %v15448_v43 = vpop.f32.mrf.mxu1 }
 0x238   :  { %20812 = vst [vmem:[#allocation79_spill] sm:$0xff] %v15446_v29  ;;  %v2202_v29 = vadd.f32 %v15189_v38, %v2076_v48 }
 0x239   :  { %v15450_v39 = vpop.f32.mrf.mxu0  ;;  %v15452_v12 = vpop.f32.mrf.mxu1 }
 0x23a   :  { %20813 = vst [vmem:[#allocation80_spill] sm:$0xff] %v15450_v39 }
 0x23b   :  { %v15454_v15 = vpop.f32.mrf.mxu0  ;;  %v15456_v32 = vpop.f32.mrf.mxu1 }
 0x23c   :  { %20814 = vst [vmem:[#allocation81_spill] sm:$0xff] %v15454_v15 }
 0x23d   :  { %v15458_v24 = vpop.f32.mrf.mxu0  ;;  %v15460_v6 = vpop.f32.mrf.mxu1 }
 0x23e   :  { %20815 = vst [vmem:[#allocation82_spill] sm:$0xff] %v15458_v24  ;;  %20816 = vst [vmem:[#allocation83_spill] sm:$0xff] %v15460_v6  ;;  %v2083_v24 = vadd.f32 %v15172_v35, %v15159_v14  ;;  %v2186_v6 = vadd.f32 %v15180_v23, %v2062_v58  ;;  %v2326_v35 = vadd.f32 %v15195_v10, %v2202_v29  ;;  %v20829_v29 = vld [vmem:[#allocation29_spill] sm:$0xff] }
 0x23f   :  { %v15462_v53 = vpop.f32.mrf.mxu0  ;;  %v15470_v39 = vpop.f32.mrf.mxu1  ;;  %v2344_v58 = vadd.f32 %v20823_v49, %v2218_v9  ;;  %v20840_v49 = vld [vmem:[#allocation40_spill] sm:$0xff] }
 0x240   :  { %20817 = vst [vmem:[#allocation84_spill] sm:$0xff] %v15462_v53  ;;  %v2194_v53 = vadd.f32 %v15185_v46, %v2069_v44  ;;  %v2308_v33 = vadd.f32 %v15187_v16, %v2186_v6  ;;  %v2210_v14 = vadd.f32 %v15193_v42, %v2083_v24  ;;  %v1651_v46 = vadd.f32 %v15105_v50, %v15050_v36  ;;  %v20822_v50 = vld [vmem:[#allocation22_spill] sm:$0xff]  ;;  %v20824_v44 = vld [vmem:[#allocation25_spill] sm:$0xff]  ;;  %v20827_v6 = vld [vmem:[#allocation28_spill] sm:$0xff] }
 0x241   :  { %v15472_v15 = vpop.f32.mrf.mxu0  ;;  %v15479_v52 = vpop.f32.mrf.mxu1  ;;  %v2463_v42 = vadd.f32 %v15216_v37, %v2326_v35  ;;  %v1658_v36 = vadd.f32 %v15118_v59, %v15064_v34  ;;  %v2353_v48 = vadd.f32 %v20824_v44, %v2226_v13  ;;  %v20828_v24 = vld [vmem:[#allocation27_spill] sm:$0xff]  ;;  %v20831_v34 = vld [vmem:[#allocation30_spill] sm:$0xff]  ;;  %v20834_v35 = vld [vmem:[#allocation36_spill] sm:$0xff] }
 0x242   :  { %v2317_v41 = vadd.f32 %v15191_v54, %v2194_v53  ;;  %v2335_v16 = vadd.f32 %v15199_v22, %v2210_v14  ;;  %v2449_v38 = vadd.f32 %v15205_v45, %v2308_v33  ;;  %v15508_v27 = vadd.f32 %v20822_v50, %v1651_v46  ;;  %v20826_v22 = vld [vmem:[#allocation26_spill] sm:$0xff]  ;;  %v20833_v14 = vld [vmem:[#allocation37_spill] sm:$0xff]  ;;  %v20835_v46 = vld [vmem:[#allocation39_spill] sm:$0xff] }
 0x243   :  { %v15485_v47 = vpop.f32.mrf.mxu0  ;;  %v15491_v23 = vpop.f32.mrf.mxu1  ;;  %v2578_v30 = vadd.f32 %v20829_v29, %v2463_v42  ;;  %v2477_v59 = vadd.f32 %v20831_v34, %v2344_v58  ;;  %v20832_v33 = vld [vmem:[#allocation34_spill] sm:$0xff]  ;;  %v2933_v9 = vadd.f32 %v20835_v46, %v20834_v35  ;;  %v20839_v50 = vld [vmem:[#allocation41_spill] sm:$0xff]  ;;  %v20841_v42 = vld [vmem:[#allocation43_spill] sm:$0xff] }
 0x244   :  { %20818 = vst [vmem:[#allocation85_spill] sm:$0xff] %v15485_v47  ;;  %20819 = vst [vmem:[#allocation86_spill] sm:$0xff] %v15491_v23  ;;  %v2456_v54 = vadd.f32 %v15209_v5, %v2317_v41  ;;  %v2564_v45 = vadd.f32 %v20826_v22, %v2449_v38  ;;  %v2470_v5 = vadd.f32 %v20827_v6, %v2335_v16  ;;  %v15528_v38 = vshrl.u32 %v20461_v31, 7  ;;  %v20838_v16 = vld [vmem:[#allocation38_spill] sm:$0xff]  ;;  %v20843_v6 = vld [vmem:[#allocation45_spill] sm:$0xff] }
 0x245   :  { %v15497_v57 = vpop.f32.mrf.mxu0  ;;  %v15503_v10 = vpop.f32.mrf.mxu1  ;;  %v2926_v41 = vadd.f32 %v20833_v14, %v20832_v33  ;;  %v2947_v44 = vadd.f32 %v20841_v42, %v20840_v49  ;;  %v20842_v22 = vld [vmem:[#allocation42_spill] sm:$0xff]  ;;  %v20845_v29 = vld [vmem:[#allocation32_spill] sm:$0xff]  ;;  %v20846_v33 = vld [vmem:[#allocation31_spill] sm:$0xff] }
 0x246   :  { %20820 = vst [vmem:[#allocation87_spill] sm:$0xff] %v15497_v57  ;;  %20821 = vst [vmem:[#allocation88_spill] sm:$0xff] %v15503_v10  ;;  %v2571_v37 = vadd.f32 %v20828_v24, %v2456_v54  ;;  %v2940_v54 = vadd.f32 %v20839_v50, %v20838_v16  ;;  %v2954_v58 = vadd.f32 %v20843_v6, %v20842_v22  ;;  %v20847_v35 = vld [vmem:[#allocation46_spill] sm:$0xff]  ;;  %v20849_v31 = vld [vmem:[#allocation47_spill] sm:$0xff] }
 0x247   :  { %v15512_v53 = vpop.f32.mrf.mxu0  ;;  %v15518_v20 = vpop.f32.mrf.mxu1  ;;  %20837 = vst [vmem:[#allocation26_spill] sm:$0xff] %v15528_v38  ;;  %v2484_v34 = vadd.f32 %v20845_v29, %v2353_v48  ;;  %v2585_v14 = vadd.f32 %v20846_v33, %v2470_v5  ;;  %v3050_v46 = vadd.f32 %v20847_v35, %v2926_v41  ;;  %v20851_v16 = vld [vmem:[#allocation48_spill] sm:$0xff]  ;;  %v20854_v22 = vld [vmem:[#allocation54_spill] sm:$0xff]  ;;  %v20856_v48 = vld [vmem:[#allocation49_spill] sm:$0xff] }
 0x248   :  { %20825 = vst [vmem:[#allocation22_spill] sm:$0xff] %v15512_v53  ;;  %20830 = vst [vmem:[#allocation24_spill] sm:$0xff] %v15518_v20  ;;  %v3058_v50 = vadd.f32 %v20851_v16, %v2933_v9  ;;  %v20852_v53 = vld [vmem:[#allocation50_spill] sm:$0xff]  ;;  %v20853_v42 = vld [vmem:[#allocation52_spill] sm:$0xff]  ;;  %v3082_v6 = vadd.f32 %v20854_v22, %v2954_v58 }
 0x249   :  { %v15525_v13 = vpop.f32.mrf.mxu0  ;;  %v15536_v24 = vpop.f32.mrf.mxu1  ;;  %v3066_v49 = vadd.f32 %v20852_v53, %v2940_v54  ;;  %v3074_v23 = vadd.f32 %v20853_v42, %v2947_v44  ;;  %v3172_v29 = vadd.f32 %v20856_v48, %v3050_v46  ;;  %v20857_v5 = vld [vmem:[#allocation56_spill] sm:$0xff]  ;;  %v20860_v16 = vld [vmem:[#allocation53_spill] sm:$0xff]  ;;  %v20861_v54 = vld [vmem:[#allocation55_spill] sm:$0xff] }
 0x24a   :  { %20836 = vst [vmem:[#allocation25_spill] sm:$0xff] %v15525_v13  ;;  %20844 = vst [vmem:[#allocation28_spill] sm:$0xff] %v15536_v24  ;;  %v20848_v13 = vld [vmem:[#allocation44_spill] sm:$0xff]  ;;  %v20862_v42 = vld [vmem:[#allocation57_spill] sm:$0xff] }
 0x24b   :  { %v2961_v20 = vadd.f32 %v20849_v31, %v20848_v13  ;;  %v15543_v10 = vpop.f32.mrf.mxu0  ;;  %v15549_v24 = vpop.f32.mrf.mxu1  ;;  %v4319_v31 = vsub.s32 0, %v15528_v38  ;;  %v13507_v13 = vmov 1966171168   ;;  %v3190_v53 = vadd.f32 %v20860_v16, %v3066_v49  ;;  %v20864_v48 = vld [vmem:[#allocation58_spill] sm:$0xff]  ;;  %v20866_v47 = vld [vmem:[#allocation69_spill] sm:$0xff]  ;;  %v20867_v16 = vld [vmem:[#allocation35_spill] sm:$0xff] }
 0x24c   :  { %20850 = vst [vmem:[#allocation27_spill] sm:$0xff] %v15543_v10  ;;  %20855 = vst [vmem:[#allocation29_spill] sm:$0xff] %v15549_v24  ;;  %v4414_v35 = vunpack.c.l.s4 %v13507_v13  ;;  %v20859_v10 = vld [vmem:[#allocation51_spill] sm:$0xff]  ;;  %v3199_v44 = vadd.f32 %v20861_v54, %v3074_v23  ;;  %v3208_v58 = vadd.f32 %v20862_v42, %v3082_v6  ;;  %v20863_v24 = vld [vmem:[#allocation33_spill] sm:$0xff]  ;;  %v4323_v13 = vsub.s32 1, %v15528_v38 }
 0x24d   :  { %v3090_v33 = vadd.f32 %v20857_v5, %v2961_v20  ;;  %v15553_v41 = vpop.f32.mrf.mxu0  ;;  %v3181_v9 = vadd.f32 %v20859_v10, %v3058_v50  ;;  %v15560_v22 = vpop.f32.mrf.mxu1  ;;  %v2592_v46 = vadd.f32 %v20863_v24, %v2477_v59  ;;  %v3313_v20 = vadd.f32 %v20864_v48, %v3172_v29  ;;  %v20865_v5 = vld [vmem:[#allocation65_spill] sm:$0xff]  ;;  %v20868_v54 = vld [vmem:[#allocation23_spill] sm:$0xff] }
 0x24e   :  { %20858 = vst [vmem:[#allocation30_spill] sm:$0xff] %v15553_v41  ;;  %v3327_v50 = vadd.f32 %v15361_v62, %v3190_v53  ;;  %v3334_v23 = vadd.f32 %v15380_v28, %v3199_v44  ;;  %v3341_v49 = vadd.f32 %v15396_v26, %v3208_v58  ;;  %v2599_v59 = vadd.f32 %v20867_v16, %v2484_v34  ;;  %v20869_v44 = vld [vmem:[#allocation18_spill] sm:$0xff] }
 0x24f   :  { %v3217_v41 = vadd.f32 %v20865_v5, %v3090_v33  ;;  %v15565_v57 = vpop.f32.mrf.mxu0  ;;  %v3320_v10 = vadd.f32 %v20866_v47, %v3181_v9  ;;  %v15572_v6 = vpop.f32.mrf.mxu1  ;;  %v3428_v24 = vadd.f32 %v15346_v63, %v3313_v20  ;;  %v4315_v47 = vld [vmem:[%s20419_s2] sm:$0x3]  ;;  %v4415_v9 = vunpack.c.0.s8 %v4414_v35  ;;  %v20871_v20 = vld [vmem:[#allocation20_spill] sm:$0xff]  ;;  %v20872_v5 = vld [vmem:[#allocation21_spill] sm:$0xff]  ;;  %s13508_s2 = smov 122  }
 0x250   :  { %v3442_v28 = vadd.f32 %v15391_v3, %v3327_v50  ;;  %v3449_v26 = vadd.f32 %v15401_v40, %v3334_v23  ;;  %v3456_v53 = vadd.f32 %v15412_v11, %v3341_v49  ;;  %v1773_v63 = vadd.f32 %v20868_v54, %v1658_v36  ;;  %v20882_v54 = vld [vmem:[#allocation22_spill] sm:$0xff] }
 0x251   :  { %v3348_v29 = vadd.f32 %v15406_v51, %v3217_v41  ;;  %v15577_v33 = vpop.f32.mrf.mxu0  ;;  %v3435_v62 = vadd.f32 %v15371_v0, %v3320_v10  ;;  %v4034_v34 = vpop.f32.mrf.mxu1  ;;  %v2602_v51 = vadd.f32 %v2564_v45, %v20869_v44  ;;  %v20870_v41 = vld [vmem:[#allocation19_spill] sm:$0xff]  ;;  %v2606_v35 = vadd.f32 %v2578_v30, %v20871_v20  ;;  %v20883_v44 = vld [vmem:[#allocation88_spill] sm:$0xff] }
 0x252   :  { %v2604_v42 = vadd.f32 %v2571_v37, %v20870_v41  ;;  %v2608_v0 = vadd.f32 %v2585_v14, %v20872_v5  ;;  %v2610_v3 = vadd.f32 %v2592_v46, %v15508_v27  ;;  %v15593_v40 = vrot.slane %v4315_v47, %v4319_v31 }
 0x253   :  { %v3463_v58 = vadd.f32 %v15421_v2, %v3348_v29  ;;  %v3925_v48 = vpop.f32.mrf.mxu0  ;;  %v4036_v10 = vpop.f32.mrf.mxu1  ;;  %v2612_v11 = vadd.f32 %v2599_v59, %v1773_v63  ;;  %v15595_v50 = vadd.f32 %v3428_v24, %v2602_v51  ;;  %v15597_v23 = vrot.slane %v4315_v47, %v4323_v13  ;;  %v20886_v20 = vld [vmem:[#allocation27_spill] sm:$0xff] }
 0x254   :  { %v15600_v45 = vsub.s32 %v4415_v9, %v15528_v38  ;;  %v15602_v2 = vadd.f32 %v3435_v62, %v2604_v42  ;;  %v15604_v37 = vadd.f32 %v3442_v28, %v2606_v35  ;;  %v15606_v30 = vadd.f32 %v3449_v26, %v2608_v0  ;;  %v20876_v62 = vld [vmem:[#allocation80_spill] sm:$0xff]  ;;  %v20888_v0 = vld [vmem:[#allocation29_spill] sm:$0xff] }
 0x255   :  { %v3927_v36 = vpop.f32.mrf.mxu0  ;;  %v15608_v14 = vadd.f32 %v3456_v53, %v2610_v3  ;;  %v4043_v27 = vpop.f32.mrf.mxu1  ;;  %v15610_v31 = vadd.f32 %v3463_v58, %v2612_v11  ;;  %v3762_v46 = vadd.f32 %v15428_v18, %v15409_v21  ;;  %v3764_v13 = vadd.f32 %v15432_v60, %v15417_v56  ;;  %v20873_v56 = vld [vmem:[#allocation79_spill] sm:$0xff]  ;;  %v20885_v58 = vld [vmem:[#allocation25_spill] sm:$0xff] }
 0x256   :  { %v3769_v49 = vadd.f32 %v15436_v61, %v15419_v17  ;;  %v3771_v59 = vadd.f32 %v15440_v7, %v15426_v8  ;;  %v3776_v24 = vadd.f32 %v15444_v25, %v15430_v4  ;;  %v3778_v29 = vadd.f32 %v15448_v43, %v15434_v55  ;;  %v20874_v18 = vld [vmem:[#allocation83_spill] sm:$0xff]  ;;  %v20875_v61 = vld [vmem:[#allocation84_spill] sm:$0xff]  ;;  %v20877_v25 = vld [vmem:[#allocation81_spill] sm:$0xff] }
 0x257   :  { %v4148_v16 = vpop.f32.mrf.mxu0  ;;  %v3783_v47 = vadd.f32 %v15452_v12, %v15438_v1  ;;  %v4045_v21 = vpop.f32.mrf.mxu1  ;;  %v3785_v60 = vadd.f32 %v15456_v32, %v15442_v19  ;;  %v3790_v17 = vadd.f32 %v20874_v18, %v20873_v56  ;;  %v3886_v9 = vadd.f32 %v20875_v61, %v3762_v46  ;;  %v20878_v55 = vld [vmem:[#allocation85_spill] sm:$0xff]  ;;  %v20879_v1 = vld [vmem:[#allocation87_spill] sm:$0xff]  ;;  %v20880_v19 = vld [vmem:[#allocation82_spill] sm:$0xff] }
 0x258   :  { %v3888_v8 = vadd.f32 %v15472_v15, %v3764_v13  ;;  %v3792_v4 = vadd.f32 %v15470_v39, %v20876_v62  ;;  %v3797_v43 = vadd.f32 %v15479_v52, %v20877_v25  ;;  %v3894_v12 = vadd.f32 %v20878_v55, %v3769_v49  ;;  %v20881_v32 = vld [vmem:[#allocation86_spill] sm:$0xff]  ;;  %v20884_v15 = vld [vmem:[#allocation24_spill] sm:$0xff] }
 0x259   :  { %v4150_v7 = vpop.f32.mrf.mxu0  ;;  %v3896_v28 = vadd.f32 %v20879_v1, %v3771_v59  ;;  %v4052_v26 = vpop.f32.mrf.mxu1  ;;  %v3799_v53 = vadd.f32 %v20881_v32, %v20880_v19  ;;  %v3902_v63 = vadd.f32 %v20882_v54, %v3776_v24  ;;  %v4008_v51 = vadd.f32 %v20883_v44, %v3886_v9  ;;  %v20887_v52 = vld [vmem:[#allocation28_spill] sm:$0xff]  ;;  %v20889_v46 = vld [vmem:[#allocation30_spill] sm:$0xff] }
 0x25a   :  { %v4010_v41 = vadd.f32 %v20884_v15, %v3888_v8  ;;  %v3904_v39 = vadd.f32 %v20885_v58, %v3778_v29  ;;  %v3910_v35 = vadd.f32 %v20886_v20, %v3783_v47  ;;  %v4017_v5 = vadd.f32 %v20887_v52, %v3894_v12  ;;  %v4612_v1 = vld [vmem:[#allocation8 + $0xd8] sm:$0xff] }
 0x25b   :  { %v4155_v42 = vpop.f32.mrf.mxu0  ;;  %v4019_v3 = vadd.f32 %v20888_v0, %v3896_v28  ;;  %v4054_v11 = vpop.f32.mrf.mxu1  ;;  %v3912_v13 = vadd.f32 %v20889_v46, %v3785_v60  ;;  %v3918_v49 = vadd.f32 %v15565_v57, %v3790_v17  ;;  %v4026_v59 = vadd.f32 %v15560_v22, %v3902_v63  ;;  %v4610_v63 = vld [vmem:[#allocation8 + $0xc8] sm:$0xff] }
 0x25c   :  { %v4149_v24 = vadd.f32 %v4148_v16, %v4008_v51  ;;  %v3920_v18 = vadd.f32 %v15577_v33, %v3792_v4  ;;  %v4028_v61 = vadd.f32 %v15572_v6, %v3904_v39  ;;  %v3926_v29 = vadd.f32 %v3925_v48, %v3797_v43  ;;  %v20891_v6 = vld [vmem:[#allocation73_spill] sm:$0xff] }
 0x25d   :  { %v4157_v56 = vpop.f32.mrf.mxu0  ;;  %v4035_v9 = vadd.f32 %v4034_v34, %v3910_v35  ;;  %v4263_v47 = vpop.f32.mrf.mxu1  ;;  %v3928_v8 = vadd.f32 %v3927_v36, %v3799_v53  ;;  %v4037_v62 = vadd.f32 %v4036_v10, %v3912_v13  ;;  %v4151_v25 = vadd.f32 %v4150_v7, %v4010_v41  ;;  %v4611_v10 = vld [vmem:[#allocation8 + $0xd0] sm:$0xff] }
 0x25e   :  { %v4264_v12 = vadd.f32 %v4263_v47, %v4149_v24  ;;  %v4044_v60 = vadd.f32 %v4043_v27, %v3918_v49  ;;  %v4046_v28 = vadd.f32 %v4045_v21, %v3920_v18  ;;  %v15652_v57 = vadd.f32 %v4052_v26, %v3926_v29 }
 0x25f   :  { %v4162_v55 = vpop.f32.mrf.mxu0  ;;  %v4265_v22 = vpop.f32.mrf.mxu1  ;;  %v15654_v16 = vand.u32 4294901760, %v4612_v1  ;;  %v4156_v33 = vadd.f32 %v4155_v42, %v4017_v5  ;;  %v15656_v17 = vadd.f32 %v4054_v11, %v3928_v8  ;;  %v4158_v7 = vadd.f32 %v4157_v56, %v4019_v3 }
 0x260   :  { %v4303_v34 = vadd.f32 %v4264_v12, %v20891_v6  ;;  %v4266_v36 = vadd.f32 %v4265_v22, %v4151_v25  ;;  %v4163_v4 = vadd.f32 %v4162_v55, %v4026_v59  ;;  %v15662_v21 = vand.u32 4294901760, %v4611_v10  ;;  %v20896_v12 = vld [vmem:[#allocation75_spill] sm:$0xff] }
 0x261   :  { %20890 = vst [vmem:[#allocation34_spill] sm:$0xff] %v15654_v16  ;;  %v4164_v48 = vpop.f32.mrf.mxu0  ;;  %v4270_v43 = vpop.f32.mrf.mxu1  ;;  %v15660_v27 = vsub.f32 %v4612_v1, %v15654_v16  ;;  %4649 = vmatpush1.msra.mxu0 %v15654_v16  ;;  %v20893_v44 = vmov 0.0   ;;  %v15672_v58 = vand.u32 4294901760, %v4610_v63 }
 0x262   :  { %20892 = vst [vmem:[#allocation37_spill] sm:$0xff] %v15662_v21  ;;  %v4327_v26 = vadd.f32 %v15593_v40, %v4303_v34  ;;  %v4165_v19 = vadd.f32 %v4164_v48, %v4028_v61  ;;  %v4304_v32 = vadd.f32 %v4266_v36, %v15595_v50  ;;  %v4271_v54 = vadd.f32 %v4270_v43, %v4156_v33  ;;  %v20895_v50 = vld [vmem:[#allocation74_spill] sm:$0xff]  ;;  %v4609_v61 = vld [vmem:[#allocation8 + $0xc0] sm:$0xff] }
 0x263   :  { %v4169_v53 = vpop.f32.mrf.mxu0  ;;  %4650 = vmatprep.subr.mxu0 %v20893_v44  ;;  %v4272_v15 = vpop.f32.mrf.mxu1  ;;  %v20473_v41 = vand.u32 4294901760, %v15660_v27  ;;  %v15670_v42 = vsub.f32 %v4611_v10, %v15662_v21  ;;  %20894 = vst [vmem:[#allocation36_spill] sm:$0xff] %v15672_v58  ;;  %v15685_v13 = vsub.f32 %v4610_v63, %v15672_v58  ;;  %v15703_v48 = vand.u32 4294901760, %v4609_v61 }
 0x264   :  { %v4170_v51 = vadd.f32 %v4169_v53, %v4035_v9  ;;  %4652 = vmatpush1.msra.mxu0 %v15662_v21  ;;  %v4352_v39 = vrot.slane %v4327_v26, 1  ;;  %v15676_v20 = vadd.f32 %v15597_v23, %v4304_v32  ;;  %v4305_v35 = vadd.f32 %v4271_v54, %v20895_v50 }
 0x265   :  { %v4171_v52 = vpop.f32.mrf.mxu0  ;;  %v4273_v5 = vadd.f32 %v4272_v15, %v4158_v7  ;;  %4653 = vmatprep.subr.mxu0 %v20893_v44  ;;  %v4277_v3 = vpop.f32.mrf.mxu1  ;;  %v4818_v11 = vsub.f32 %v15660_v27, %v20473_v41  ;;  %v20472_v46 = vand.u32 4294901760, %v15670_v42 }
 0x266   :  { %v4172_v0 = vadd.f32 %v4171_v52, %v4037_v62  ;;  %4655 = vmatpush1.msra.mxu0 %v15672_v58  ;;  %v4355_v49 = vrot.slane %v15676_v20, 1  ;;  %v4329_v59 = vadd.f32 %v15593_v40, %v4305_v35  ;;  %v4278_v18 = vadd.f32 %v4277_v3, %v4163_v4 }
 0x267   :  { %v4306_v24 = vadd.f32 %v4273_v5, %v15602_v2  ;;  %v4176_v56 = vpop.f32.mrf.mxu0  ;;  %4656 = vmatprep.subr.mxu0 %v20893_v44  ;;  %v4279_v9 = vpop.f32.mrf.mxu1  ;;  %v4819_v47 = vand.u32 4294901760, %v4818_v11  ;;  %v4825_v8 = vsub.f32 %v15670_v42, %v20472_v46  ;;  %v20471_v62 = vand.u32 4294901760, %v15685_v13 }
 0x268   :  { %v4177_v29 = vadd.f32 %v4176_v56, %v4044_v60  ;;  %v4353_v25 = vrot.slane %v4329_v59, 1  ;;  %v4307_v2 = vadd.f32 %v4278_v18, %v20896_v12  ;;  %v4280_v22 = vadd.f32 %v4279_v9, %v4165_v19  ;;  %4658 = vmatpush1.msra.mxu0 %v15703_v48 }
 0x269   :  { %v15697_v55 = vadd.f32 %v15597_v23, %v4306_v24  ;;  %v4178_v1 = vpop.f32.mrf.mxu0  ;;  %v4284_v6 = vpop.f32.mrf.mxu1  ;;  %4820 = vmatpush1.msra.mxu1 %v4819_v47  ;;  %v4826_v60 = vand.u32 4294901760, %v4825_v8  ;;  %v4832_v34 = vsub.f32 %v15685_v13, %v20471_v62  ;;  %4659 = vmatprep.subr.mxu0 %v20893_v44  ;;  %v15736_v18 = vsub.f32 %v4609_v61, %v15703_v48  ;;  %v20898_v47 = vld [vmem:[#allocation77_spill] sm:$0xff]  ;;  %v20908_v62 = vld [vmem:[#allocation62_spill] sm:$0xff] }
 0x26a   :  { %v4179_v33 = vadd.f32 %v4178_v1, %v4046_v28  ;;  %v4354_v36 = vsel %vm4351_vm2, %v4352_v39, %v4353_v25  ;;  %v4331_v7 = vadd.f32 %v15593_v40, %v4307_v2  ;;  %v4308_v4 = vadd.f32 %v4280_v22, %v15604_v37  ;;  %4821 = vmatprep.subr.mxu1 %v20893_v44  ;;  %v4608_v28 = vld [vmem:[#allocation8 + $0xb8] sm:$0xff] }
 0x26b   :  { %v4356_v10 = vrot.slane %v15697_v55, 1  ;;  %v4183_v43 = vpop.f32.mrf.mxu0  ;;  %v15710_v19 = vmax.f32 %v4327_v26, %v4354_v36  ;;  %v4285_v53 = vadd.f32 %v4284_v6, %v4170_v51  ;;  %v4286_v54 = vpop.f32.mrf.mxu1  ;;  %4827 = vmatpush1.msra.mxu1 %v4826_v60  ;;  %v4833_v63 = vand.u32 4294901760, %v4832_v34  ;;  %v20897_v26 = vld [vmem:[#allocation76_spill] sm:$0xff] }
 0x26c   :  { %v4184_v32 = vadd.f32 %v4183_v43, %v15652_v57  ;;  %v4358_v39 = vrot.slane %v4331_v7, 1  ;;  %v15716_v50 = vadd.f32 %v15597_v23, %v4308_v4  ;;  %v4287_v35 = vadd.f32 %v4286_v54, %v4172_v0  ;;  %4828 = vmatprep.subr.mxu1 %v20893_v44  ;;  %v4606_v54 = vld [vmem:[#allocation8 + $0xa8] sm:$0xff] }
 0x26d   :  { %v4357_v15 = vsel %vm4351_vm2, %v4355_v49, %v4356_v10  ;;  %v4185_v37 = vpop.f32.mrf.mxu0  ;;  %v4309_v51 = vadd.f32 %v4285_v53, %v20897_v26  ;;  %v4291_v5 = vpop.f32.mrf.mxu1  ;;  %4461 = vrot.lane.b32.xlu1 %v15710_v19, %s13508_s2  ;;  %4834 = vmatpush1.msra.mxu1 %v4833_v63  ;;  %v15725_v3 = vand.u32 4294901760, %v4608_v28  ;;  %v20470_v1 = vand.u32 4294901760, %v15736_v18  ;;  %v4604_v26 = vld [vmem:[#allocation8 + $0x98] sm:$0xff] }
 0x26e   :  { %v4387_v57 = vmax.f32 %v15676_v20, %v4357_v15  ;;  %v4186_v52 = vadd.f32 %v4185_v37, %v15656_v17  ;;  %v4359_v0 = vsel %vm4351_vm2, %v4353_v25, %v4358_v39  ;;  %v4360_v11 = vrot.slane %v15716_v50, 1  ;;  %4835 = vmatprep.subr.mxu1 %v20893_v44  ;;  %v4607_v25 = vld [vmem:[#allocation8 + $0xb0] sm:$0xff] }
 0x26f   :  { %v4310_v49 = vadd.f32 %v4287_v35, %v15606_v30  ;;  %v4292_v24 = vadd.f32 %v4291_v5, %v4177_v29  ;;  %v15732_v17 = vmax.f32 %v4329_v59, %v4359_v0  ;;  %v4333_v20 = vadd.f32 %v15593_v40, %v4309_v51  ;;  %v4293_v56 = vpop.f32.mrf.mxu1  ;;  %4661 = vmatpush1.msra.mxu0 %v15725_v3  ;;  %v20899_v15 = vld [vmem:[#allocation78_spill] sm:$0xff] }
 0x270   :  { %4400 = vst.msk [vmem:[#allocation2 + $0x8] sm:$0xff] %vm4399_vm3, %v4387_v57  ;;  %v15739_v9 = vsub.f32 %v4608_v28, %v15725_v3  ;;  %v4361_v30 = vsel %vm4351_vm2, %v4356_v10, %v4360_v11  ;;  %v4294_v59 = vadd.f32 %v4293_v56, %v4179_v33  ;;  %4662 = vmatprep.subr.mxu0 %v20893_v44  ;;  %v15764_v43 = vand.u32 4294901760, %v4607_v25  ;;  %v4605_v57 = vld [vmem:[#allocation8 + $0xa0] sm:$0xff]  ;;  %v4603_v56 = vld [vmem:[#allocation8 + $0x90] sm:$0xff] }
 0x271   :  { %v15744_v29 = vadd.f32 %v15597_v23, %v4310_v49  ;;  %v4311_v8 = vadd.f32 %v4292_v24, %v20898_v47  ;;  %v4389_v12 = vmax.f32 %v15697_v55, %v4361_v30  ;;  %v4362_v61 = vrot.slane %v4333_v20, 1  ;;  %v4298_v2 = vpop.f32.mrf.mxu1  ;;  %4465 = vrot.lane.b32.xlu1 %v15732_v17, %s13508_s2 }
 0x272   :  { %v20469_v22 = vand.u32 4294901760, %v15739_v9  ;;  %v4312_v33 = vadd.f32 %v4294_v59, %v15608_v14  ;;  %v4299_v34 = vadd.f32 %v4298_v2, %v4184_v32  ;;  %v4839_v10 = vsub.f32 %v15736_v18, %v20470_v1  ;;  %4664 = vmatpush1.msra.mxu0 %v15764_v43 }
 0x273   :  { %v4364_v6 = vrot.slane %v15744_v29, 1  ;;  %v4335_v60 = vadd.f32 %v15593_v40, %v4311_v8  ;;  %4402 = vst.msk [vmem:[#allocation2 + $0x18] sm:$0xff] %vm4399_vm3, %v4389_v12  ;;  %v4363_v55 = vsel %vm4351_vm2, %v4358_v39, %v4362_v61  ;;  %v4300_v36 = vpop.f32.mrf.mxu1  ;;  %4665 = vmatprep.subr.mxu0 %v20893_v44  ;;  %v15792_v24 = vand.u32 4294901760, %v4606_v54 }
 0x274   :  { %v4846_v4 = vsub.f32 %v15739_v9, %v20469_v22  ;;  %v15766_v28 = vmax.f32 %v4331_v7, %v4363_v55  ;;  %v15770_v53 = vadd.f32 %v15597_v23, %v4312_v33  ;;  %v4313_v39 = vadd.f32 %v4299_v34, %v20899_v15 }
 0x275   :  { %v4365_v14 = vsel %vm4351_vm2, %v4360_v11, %v4364_v6  ;;  %v4366_v32 = vrot.slane %v4335_v60, 1  ;;  %v4301_v37 = vadd.f32 %v4300_v36, %v4186_v52  ;;  %v4840_v35 = vand.u32 4294901760, %v4839_v10  ;;  %4667 = vmatpush1.msra.mxu0 %v15792_v24 }
 0x276   :  { %v4391_v63 = vmax.f32 %v15716_v50, %v4365_v14  ;;  %v4368_v51 = vrot.slane %v15770_v53, 1  ;;  %4469 = vrot.lane.b32.xlu1 %v15766_v28, %s13508_s2  ;;  %v4847_v0 = vand.u32 4294901760, %v4846_v4  ;;  %v15782_v50 = vsub.f32 %v4607_v25, %v15764_v43  ;;  %4668 = vmatprep.subr.mxu0 %v20893_v44 }
 0x277   :  { %v4367_v7 = vsel %vm4351_vm2, %v4362_v61, %v4366_v32  ;;  %v15777_v5 = vld [vmem:[#allocation2 + $0x8] sm:$0xff]  ;;  %v4337_v11 = vadd.f32 %v15593_v40, %v4313_v39  ;;  %v4314_v49 = vadd.f32 %v4301_v37, %v15610_v31  ;;  %4841 = vmatpush1.msra.mxu1 %v4840_v35  ;;  %v15797_v8 = vand.u32 4294901760, %v4605_v57 }
 0x278   :  { %4404 = vst.msk [vmem:[#allocation2 + $0x28] sm:$0xff] %vm4399_vm3, %v4391_v63  ;;  %v15786_v52 = vmax.f32 %v4333_v20, %v4367_v7  ;;  %4463 = vrot.lane.b32.xlu0 %v15777_v5, %s13508_s2  ;;  %v4369_v30 = vsel %vm4351_vm2, %v4364_v6, %v4368_v51  ;;  %4842 = vmatprep.subr.mxu1 %v20893_v44  ;;  %v20468_v47 = vand.u32 4294901760, %v15782_v50  ;;  %v15799_v20 = vand.u32 4294901760, %v4604_v26  ;;  %v4619_v63 = vld [vmem:[#allocation8 + $0x110] sm:$0xff] }
 0x279   :  { %v4393_v40 = vmax.f32 %v15744_v29, %v4369_v30  ;;  %v4370_v31 = vrot.slane %v4337_v11, 1  ;;  %v4338_v59 = vadd.f32 %v15597_v23, %v4314_v49  ;;  %4848 = vmatpush1.msra.mxu1 %v4847_v0  ;;  %v15804_v25 = vsub.f32 %v4606_v54, %v15792_v24  ;;  %4670 = vmatpush1.msra.mxu0 %v15797_v8  ;;  %v4620_v54 = vld [vmem:[#allocation8 + $0x118] sm:$0xff] }
 0x27a   :  { %v15807_v12 = vld [vmem:[#allocation2 + $0x18] sm:$0xff]  ;;  %4849 = vmatprep.subr.mxu1 %v20893_v44  ;;  %v4853_v61 = vsub.f32 %v15782_v50, %v20468_v47  ;;  %v15814_v2 = vsub.f32 %v4605_v57, %v15797_v8  ;;  %v15817_v29 = vsub.f32 %v4604_v26, %v15799_v20  ;;  %v15819_v23 = vand.u32 4294901760, %v4603_v56  ;;  %4671 = vmatprep.subr.mxu0 %v20893_v44 }
 0x27b   :  { %4406 = vst.msk [vmem:[#allocation2 + $0x38] sm:$0xff] %vm4399_vm3, %v4393_v40  ;;  %v4371_v6 = vsel %vm4351_vm2, %v4366_v32, %v4370_v31  ;;  %v4396_v33 = vmax.f32 %v4337_v11, %v4370_v31  ;;  %v4372_v34 = vrot.slane %v4338_v59, 1  ;;  %v4412_v55 = vcombine.high %v4337_v11, %v4338_v59  ;;  %4673 = vmatpush1.msra.mxu0 %v15799_v20 }
 0x27c   :  { %4467 = vrot.lane.b32.xlu0 %v15807_v12, %s13508_s2  ;;  %v15827_v36 = vmax.f32 %v4335_v60, %v4371_v6  ;;  %v4854_v10 = vand.u32 4294901760, %v4853_v61  ;;  %v20467_v4 = vand.u32 4294901760, %v15804_v25  ;;  %v20466_v14 = vand.u32 4294901760, %v15814_v2  ;;  %4674 = vmatprep.subr.mxu0 %v20893_v44 }
 0x27d   :  { %4409 = vst [vmem:[#allocation2 + $0x50] sm:$0x7f] %v4396_v33  ;;  %v4373_v32 = vsel %vm4351_vm2, %v4368_v51, %v4372_v34  ;;  %v4397_v15 = vmax.f32 %v4338_v59, %v4372_v34  ;;  %v4419_v39 = vrot.slane %v4412_v55, %v15600_v45  ;;  %v20465_v37 = vand.u32 4294901760, %v15817_v29  ;;  %4676 = vmatpush1.msra.mxu0 %v15819_v23 }
 0x27e   :  { %v4395_v60 = vmax.f32 %v15770_v53, %v4373_v32  ;;  %4855 = vmatpush1.msra.mxu1 %v4854_v10  ;;  %v4860_v57 = vsub.f32 %v15804_v25, %v20467_v4  ;;  %v4867_v26 = vsub.f32 %v15814_v2, %v20466_v14  ;;  %v15846_v7 = vsub.f32 %v4603_v56, %v15819_v23  ;;  %v20907_v14 = vld [vmem:[#allocation61_spill] sm:$0xff] }
 0x27f   :  { %v15837_v35 = vld [vmem:[#allocation2 + $0x28] sm:$0xff]  ;;  %4411 = vst.msk [vmem:[#allocation2 + $0x58] sm:$0x7f] %vm4410_vm4, %v4397_v15  ;;  %v4420_v51 = vcombine.high %v4419_v39, %v4419_v39  ;;  %4856 = vmatprep.subr.mxu1 %v20893_v44  ;;  %v4874_v53 = vsub.f32 %v15817_v29, %v20465_v37  ;;  %v15855_v0 = vand.u32 4294901760, %v4620_v54  ;;  %v15857_v11 = vand.u32 4294901760, %v4619_v63  ;;  %4705 = vmatprep.subr.mxu0 %v20893_v44 }
 0x280   :  { %4471 = vrot.lane.b32.xlu0 %v15837_v35, %s13508_s2  ;;  %4408 = vst.msk [vmem:[#allocation2 + $0x48] sm:$0xff] %vm4399_vm3, %v4395_v60  ;;  %v4861_v49 = vand.u32 4294901760, %v4860_v57  ;;  %v4868_v56 = vand.u32 4294901760, %v4867_v26  ;;  %v20464_v30 = vand.u32 4294901760, %v15846_v7  ;;  %v20900_v61 = vlaneseq }
 0x281   :  { %v4427_v40 = vrot.slane %v4420_v51, %v15600_v45  ;;  %v15864_v31 = vsub.f32 %v4620_v54, %v15855_v0  ;;  %v15867_v59 = vsub.f32 %v4619_v63, %v15857_v11  ;;  %v4875_v6 = vand.u32 4294901760, %v4874_v53  ;;  %4707 = vmatpush2.msra.mxu0 %v15855_v0 }
 0x282   :  { %vm4432_vm5 = vcmp.lt.s32.totalorder %v20900_v61, 144  ;;  %4862 = vmatpush1.msra.mxu1 %v4861_v49  ;;  %v4881_v33 = vsub.f32 %v15846_v7, %v20464_v30  ;;  %4708 = vmatprep.subr.mxu0 %v20893_v44  ;;  %v15889_v32 = vld [vmem:[#allocation2 + $0x38] sm:$0xff] }
 0x283   :  { %v4428_v34 = vcombine.high %v4427_v40, %v4427_v40  ;;  %4863 = vmatprep.subr.mxu1 %v20893_v44  ;;  %v20463_v45 = vand.u32 4294901760, %v15864_v31  ;;  %v20462_v55 = vand.u32 4294901760, %v15867_v59  ;;  %4710 = vmatpush2.msra.mxu0 %v15857_v11 }
 0x284   :  { %4473 = vrot.lane.b32.xlu0 %v15786_v52, %s13508_s2  ;;  %4869 = vmatpush1.msra.mxu1 %v4868_v56  ;;  %v4882_v10 = vand.u32 4294901760, %v4881_v33 }
 0x285   :  { %4435 = vst.msk [vmem:[#allocation2 + $0x57] ss:$8 sm:$0x3] %vm4432_vm5, %v4428_v34  ;;  %4870 = vmatprep.subr.mxu1 %v20893_v44  ;;  %v4916_v54 = vsub.f32 %v15864_v31, %v20463_v45  ;;  %v4923_v63 = vsub.f32 %v15867_v59, %v20462_v55  ;;  %4955 = vmatprep.subr.mxu0 %v20893_v44 }
 0x286   :  { %4876 = vmatpush1.msra.mxu1 %v4875_v6 }
 0x287   :  { %v15894_v15 = vld [vmem:[#allocation2 + $0x48] sm:$0xff]  ;;  %4877 = vmatprep.subr.mxu1 %v20893_v44  ;;  %v4917_v39 = vand.u32 4294901760, %v4916_v54  ;;  %v4924_v60 = vand.u32 4294901760, %v4923_v63 }
 0x288   :  { %4475 = vrot.lane.b32.xlu0 %v15889_v32, %s13508_s2  ;;  %4479 = vrot.lane.b32.xlu1 %v15894_v15, %s13508_s2 }
 0x289   :  { %4883 = vmatpush1.msra.mxu1 %v4882_v10 }
 0x28a   :  { %4912 = vmatprep.subr.mxu1 %v20893_v44 }
 0x28b   :  { %4918 = vmatpush2.msra.mxu1 %v4917_v39 }
 0x28c   :  { %4919 = vmatprep.subr.mxu1 %v20893_v44  ;;  %4477 = vrot.lane.b32.xlu1 %v15827_v36, %s13508_s2  ;;  %v15904_v57 = vld [vmem:[#allocation2 + $0x58] sm:$0xff]  ;;  %v15909_v26 = vld [vmem:[#allocation2 + $0x50] sm:$0xff] }
 0x28d   :  { %4925 = vmatpush2.msra.mxu1 %v4924_v60  ;;  %4483 = vrot.lane.b32.xlu0 %v15904_v57, %s13508_s2 }
 0x28e   :  { %5092 = vmatprep.subr.mxu1 %v20893_v44 }
 0x290   :  { %4481 = vrot.lane.b32.xlu1 %v15909_v26, %s13508_s2 }
 0x2df   :  { %v4462_v51 = vpop.permute.xlu1 %4461 }
 0x2e3   :  { %v4466_v61 = vpop.permute.xlu1 %4465 }
 0x2ea   :  { %v4464_v53 = vpop.permute.xlu0 %4463 }
 0x2eb   :  { %v4486_v49 = vsel %vm4485_vm6, %v4462_v51, %v4464_v53  ;;  %v4505_v56 = vmax.f32 %v15777_v5, %v4464_v53 }
 0x2ec   :  { %v15916_v40 = vmax.f32 %v15710_v19, %v4486_v49  ;;  %v4470_v19 = vpop.permute.xlu1 %4469 }
 0x2ed   :  { %4518 = vst.msk [vmem:[#allocation2 + $0x8] sm:$0xff] %vm4517_vm7, %v4505_v56 }
 0x2ee   :  { %4516 = vst [vmem:[#allocation2] sm:$0xff] %v15916_v40  ;;  %4530 = vst.msk [vmem:[#allocation2 + $0x8] sm:$0xff] %vm4529_vm8, %v15777_v5  ;;  %v4468_v6 = vpop.permute.xlu0 %4467  ;;  %v4573_v5 = vrot.slane %v15916_v40, 2 }
 0x2ef   :  { %v4487_v33 = vsel %vm4485_vm6, %v4466_v61, %v4468_v6  ;;  %v4507_v34 = vmax.f32 %v15807_v12, %v4468_v6 }
 0x2f0   :  { %v15925_v10 = vmax.f32 %v15732_v17, %v4487_v33 }
 0x2f1   :  { %4520 = vst.msk [vmem:[#allocation2 + $0x18] sm:$0xff] %vm4517_vm7, %v4507_v34 }
 0x2f2   :  { %4519 = vst [vmem:[#allocation2 + $0x10] sm:$0xff] %v15925_v10  ;;  %4531 = vst.msk [vmem:[#allocation2 + $0x18] sm:$0xff] %vm4529_vm8, %v15807_v12  ;;  %v4472_v54 = vpop.permute.xlu0 %4471  ;;  %v4574_v63 = vrot.slane %v15925_v10, 2 }
 0x2f3   :  { %v4488_v39 = vsel %vm4485_vm6, %v4470_v19, %v4472_v54  ;;  %v4509_v60 = vmax.f32 %v15837_v35, %v4472_v54 }
 0x2f4   :  { %v15936_v17 = vmax.f32 %v15766_v28, %v4488_v39  ;;  %v4575_v51 = vsel %vm4572_vm9, %v4573_v5, %v4574_v63 }
 0x2f5   :  { %4522 = vst.msk [vmem:[#allocation2 + $0x28] sm:$0xff] %vm4517_vm7, %v4509_v60  ;;  %v15944_v49 = vld [vmem:[#allocation2 + $0x8] sm:$0xff]  ;;  %v15946_v56 = vand.u32 4294901760, %v4575_v51 }
 0x2f6   :  { %4521 = vst [vmem:[#allocation2 + $0x20] sm:$0xff] %v15936_v17  ;;  %4532 = vst.msk [vmem:[#allocation2 + $0x28] sm:$0xff] %vm4529_vm8, %v15837_v35  ;;  %v4474_v12 = vpop.permute.xlu0 %4473  ;;  %v4579_v53 = vrot.slane %v15936_v17, 2  ;;  %v4576_v6 = vrot.slane %v15944_v49, 2 }
 0x2f7   :  { %20901 = vst [vmem:[#allocation39_spill] sm:$0xff] %v15946_v56  ;;  %v15956_v5 = vsub.f32 %v4575_v51, %v15946_v56 }
 0x2f8   :  { %v4580_v34 = vsel %vm4572_vm9, %v4574_v63, %v4579_v53 }
 0x2f9   :  { %v15948_v61 = vld [vmem:[#allocation2 + $0x18] sm:$0xff] }
 0x2fa   :  { %v4476_v28 = vpop.permute.xlu0 %4475  ;;  %v4577_v33 = vrot.slane %v15948_v61, 2  ;;  %v4480_v54 = vpop.permute.xlu1 %4479 }
 0x2fb   :  { %v4489_v19 = vsel %vm4485_vm6, %v4474_v12, %v4476_v28  ;;  %v4511_v35 = vmax.f32 %v15889_v32, %v4476_v28  ;;  %v4513_v60 = vmax.f32 %v15894_v15, %v4480_v54  ;;  %v15967_v12 = vand.u32 4294901760, %v4580_v34 }
 0x2fc   :  { %v15959_v39 = vmax.f32 %v15786_v52, %v4489_v19  ;;  %v4578_v55 = vsel %vm4572_vm9, %v4576_v6, %v4577_v33 }
 0x2fd   :  { %4524 = vst.msk [vmem:[#allocation2 + $0x38] sm:$0xff] %vm4517_vm7, %v4511_v35  ;;  %v4621_v45 = vsel %vm4399_vm3, %v4578_v55, 0  ;;  %v15965_v63 = vld [vmem:[#allocation2 + $0x28] sm:$0xff]  ;;  %20902 = vst [vmem:[#allocation38_spill] sm:$0xff] %v15967_v12  ;;  %v20474_v55 = vand.u32 4294901760, %v15956_v5  ;;  %v15992_v30 = vsub.f32 %v4580_v34, %v15967_v12 }
 0x2fe   :  { %4523 = vst [vmem:[#allocation2 + $0x30] sm:$0xff] %v15959_v39  ;;  %4533 = vst.msk [vmem:[#allocation2 + $0x38] sm:$0xff] %vm4529_vm8, %v15889_v32  ;;  %v15973_v52 = vand.u32 4294901760, %v4621_v45  ;;  %v4581_v51 = vrot.slane %v15965_v63, 2  ;;  %v4478_v53 = vpop.permute.xlu1 %4477 }
 0x2ff   :  { %4526 = vst.msk [vmem:[#allocation2 + $0x48] sm:$0xff] %vm4517_vm7, %v4513_v60  ;;  %v4490_v28 = vsel %vm4485_vm6, %v4478_v53, %v4480_v54  ;;  %v4484_v6 = vpop.permute.xlu0 %4483  ;;  %v20904_v54 = vld [vmem:[#allocation59_spill] sm:$0xff] }
 0x300   :  { %20903 = vst [vmem:[#allocation41_spill] sm:$0xff] %v15973_v52  ;;  %4534 = vst.msk [vmem:[#allocation2 + $0x48] sm:$0xff] %vm4529_vm8, %v15894_v15  ;;  %4927 = vmatprep.mubr.f32.mxu1 %v15973_v52  ;;  %v4582_v19 = vsel %vm4572_vm9, %v4577_v33, %v4581_v51  ;;  %v15983_v32 = vsub.f32 %v4621_v45, %v15973_v52  ;;  %v15986_v35 = vmax.f32 %v15827_v36, %v4490_v28  ;;  %v20906_v28 = vld [vmem:[#allocation60_spill] sm:$0xff] }
 0x301   :  { %v4515_v60 = vmax.f32 %v15904_v57, %v4484_v6  ;;  %4929 = vmatmul.mubr.f32.vlgmr.msra.gmra.mxu1 %v15946_v56  ;;  %v4623_v15 = vsel %vm4399_vm3, %v4582_v19, 0  ;;  %v4720_v45 = vsub.f32 %v15956_v5, %v20474_v55  ;;  %v20909_v55 = vld [vmem:[#allocation66_spill] sm:$0xff] }
 0x302   :  { %5094 = vmatpush1.msra.mxu1 %v20904_v54  ;;  %v15995_v53 = vand.u32 4294901760, %v4623_v15  ;;  %v20475_v33 = vand.u32 4294901760, %v15983_v32  ;;  %4525 = vst [vmem:[#allocation2 + $0x40] sm:$0xff] %v15986_v35  ;;  %v4482_v36 = vpop.permute.xlu1 %4481  ;;  %v4592_v34 = vrot.slane %v15986_v35, 2 }
 0x303   :  { %4528 = vst.msk [vmem:[#allocation2 + $0x58] sm:$0xff] %vm4517_vm7, %v4515_v60  ;;  %5095 = vmatprep.subr.mxu1 %v20893_v44  ;;  %v4491_v51 = vsel %vm4485_vm6, %v4482_v36, %v4484_v6  ;;  %v20478_v6 = vand.u32 4294901760, %v15992_v30  ;;  %v4591_v36 = vrot.slane %v15959_v39, 2 }
 0x304   :  { %20905 = vst [vmem:[#allocation40_spill] sm:$0xff] %v15995_v53  ;;  %4535 = vst.msk [vmem:[#allocation2 + $0x58] sm:$0xff] %vm4529_vm8, %v15904_v57  ;;  %5097 = vmatpush1.msra.mxu1 %v20906_v28  ;;  %4934 = vmatprep.mubr.f32.mxu1 %v15995_v53  ;;  %v4714_v19 = vsub.f32 %v15983_v32, %v20475_v33  ;;  %v16014_v60 = vsub.f32 %v4623_v15, %v15995_v53 }
 0x305   :  { %v16017_v37 = vmax.f32 %v15909_v26, %v4491_v51  ;;  %5098 = vmatprep.subr.mxu1 %v20893_v44  ;;  %4936 = vmatmul.mubr.f32.gmra.mxu1 %v15967_v12  ;;  %v16021_v57 = vld [vmem:[#allocation2 + $0x38] sm:$0xff]  ;;  %v4721_v51 = vand.u32 4294901760, %v4720_v45  ;;  %v4593_v1 = vsel %vm4572_vm9, %v4591_v36, %v4592_v34  ;;  %v4735_v45 = vsub.f32 %v15992_v30, %v20478_v6  ;;  %v20910_v36 = vld [vmem:[#allocation63_spill] sm:$0xff]  ;;  %v20914_v6 = vld [vmem:[#allocation64_spill] sm:$0xff] }
 0x306   :  { %5100 = vmatpush1.msra.mxu1 %v20907_v14  ;;  %v4715_v4 = vand.u32 4294901760, %v4714_v19  ;;  %v20477_v47 = vand.u32 4294901760, %v16014_v60  ;;  %v4594_v26 = vrot.slane %v16021_v57, 2  ;;  %v16047_v38 = vand.u32 4294901760, %v4593_v1 }
 0x307   :  { %v16027_v15 = vld [vmem:[#allocation2 + $0x48] sm:$0xff]  ;;  %4527 = vst [vmem:[#allocation2 + $0x50] sm:$0xff] %v16017_v37  ;;  %5101 = vmatprep.subr.mxu1 %v20893_v44  ;;  %v4597_v46 = vrot.slane %v16017_v37, 2 }
 0x308   :  { %v4595_v22 = vrot.slane %v16027_v15, 2  ;;  %5103 = vmatpush1.msra.mxu1 %v20908_v62  ;;  %4716 = vmatprep.mubr.f32.mxu0 %v4715_v4  ;;  %v4729_v19 = vsub.f32 %v16014_v60, %v20477_v47  ;;  %20911 = vst [vmem:[#allocation43_spill] sm:$0xff] %v16047_v38  ;;  %v20913_v47 = vld [vmem:[#allocation67_spill] sm:$0xff]  ;;  %v16066_v56 = vsub.f32 %v4593_v1, %v16047_v38 }
 0x309   :  { %5104 = vmatprep.subr.mxu1 %v20893_v44  ;;  %4722 = vmatmul.mubr.f32.vlgmr.msra.gmra.mxu0 %v4721_v51 }
 0x30a   :  { %v4596_v41 = vsel %vm4572_vm9, %v4594_v26, %v4595_v22  ;;  %4958 = vmatpush1.msra.mxu0 %v20909_v55  ;;  %5106 = vmatpush1.msra.mxu1 %v20910_v36  ;;  %v4730_v4 = vand.u32 4294901760, %v4729_v19  ;;  %v4598_v19 = vsel %vm4572_vm9, %v4592_v34, %v4597_v46 }
 0x30b   :  { %v4625_v33 = vsel %vm4399_vm3, %v4596_v41, 0  ;;  %4959 = vmatprep.subr.mxu0 %v20893_v44  ;;  %5107 = vmatprep.subr.mxu1 %v20893_v44  ;;  %v16053_v26 = vld [vmem:[#allocation2 + $0x58] sm:$0xff]  ;;  %v4736_v41 = vand.u32 4294901760, %v4735_v45  ;;  %v16071_v34 = vand.u32 4294901760, %v4598_v19 }
 0x30c   :  { %v16051_v51 = vand.u32 4294901760, %v4625_v33  ;;  %4962 = vmatpush1.msra.mxu0 %v20913_v47  ;;  %5109 = vmatpush1.msra.mxu1 %v20914_v6  ;;  %v4599_v12 = vrot.slane %v16053_v26, 2 }
 0x30d   :  { %4731 = vmatprep.mubr.f32.mxu0 %v4730_v4  ;;  %4963 = vmatprep.subr.mxu0 %v20893_v44  ;;  %20915 = vst [vmem:[#allocation45_spill] sm:$0xff] %v16071_v34 }
 0x30e   :  { %20912 = vst [vmem:[#allocation42_spill] sm:$0xff] %v16051_v51  ;;  %4941 = vmatprep.mubr.f32.mxu1 %v16051_v51  ;;  %v16061_v53 = vsub.f32 %v4625_v33, %v16051_v51  ;;  %5110 = vmatprep.subr.mxu1 %v20893_v44  ;;  %v4600_v52 = vsel %vm4572_vm9, %v4595_v22, %v4599_v12  ;;  %v20916_v33 = vld [vmem:[#allocation68_spill] sm:$0xff]  ;;  %v20918_v22 = vld [vmem:[#allocation70_spill] sm:$0xff]  ;;  %v6337_v12 = vrot.slane %v15948_v61, 4 }
 0x30f   :  { %4737 = vmatmul.mubr.f32.gmra.mxu0 %v4736_v41  ;;  %5112 = vmatpush1.msra.mxu1 %v15654_v16  ;;  %v4627_v46 = vsel %vm4399_vm3, %v4600_v52, 0  ;;  %v16092_v41 = vsub.f32 %v4598_v19, %v16071_v34  ;;  %v6334_v19 = vrot.slane %v15925_v10, 4 }
 0x310   :  { %v20489_v45 = vand.u32 4294901760, %v16061_v53  ;;  %4966 = vmatpush1.msra.mxu0 %v20916_v33  ;;  %5113 = vmatprep.subr.mxu1 %v20893_v44  ;;  %v16076_v4 = vand.u32 4294901760, %v4627_v46  ;;  %v20922_v33 = vld [vmem:[#allocation72_spill] sm:$0xff] }
 0x311   :  { %4967 = vmatprep.subr.mxu0 %v20893_v44  ;;  %4943 = vmatmul.mubr.f32.gmra.mxu1 %v16047_v38  ;;  %v20919_v38 = vld [vmem:[#allocation71_spill] sm:$0xff]  ;;  %v20499_v6 = vand.u32 4294901760, %v16092_v41 }
 0x312   :  { %20917 = vst [vmem:[#allocation32_spill] sm:$0xff] %v16076_v4  ;;  %v4744_v1 = vsub.f32 %v16061_v53, %v20489_v45  ;;  %4970 = vmatpush1.msra.mxu0 %v20918_v22  ;;  %5115 = vmatpush1.msra.mxu1 %v15662_v21  ;;  %v16087_v52 = vsub.f32 %v4627_v46, %v16076_v4  ;;  %v6336_v21 = vrot.slane %v15944_v49, 4  ;;  %v6333_v46 = vrot.slane %v15916_v40, 4 }
 0x313   :  { %4971 = vmatprep.subr.mxu0 %v20893_v44  ;;  %5116 = vmatprep.subr.mxu1 %v20893_v44  ;;  %v6341_v22 = vrot.slane %v15965_v63, 4 }
 0x314   :  { %4948 = vmatprep.mubr.f32.mxu1 %v16076_v4  ;;  %4974 = vmatpush1.msra.mxu0 %v20919_v38  ;;  %v4745_v45 = vand.u32 4294901760, %v4744_v1  ;;  %v6339_v4 = vrot.slane %v15936_v17, 4  ;;  %v20920_v1 = vand.u32 4294901760, %v16066_v56  ;;  %v16114_v16 = vsel %vm131_vm0, %v6336_v21, %v6337_v12 }
 0x315   :  { %5118 = vmatpush1.msra.mxu1 %v15672_v58  ;;  %4975 = vmatprep.subr.mxu0 %v20893_v44  ;;  %v20921_v58 = vand.u32 4294901760, %v16087_v52  ;;  %v16120_v47 = vsel %vm131_vm0, %v6333_v46, %v6334_v19  ;;  %v20925_v21 = vand.u32 4294901760, %v15983_v32 }
 0x316   :  { %5119 = vmatprep.subr.mxu1 %v20893_v44  ;;  %4950 = vmatmul.mubr.f32.gmra.mxu1 %v16071_v34  ;;  %v4750_v51 = vsub.f32 %v16066_v56, %v20920_v1  ;;  %20923 = vst [vmem:[#allocation31_spill] sm:$0xff] %v16120_v47  ;;  %v16123_v34 = vsel %vm131_vm0, %v6337_v12, %v6341_v22  ;;  %v6348_v1 = vrot.slane %v16021_v57, 4  ;;  %v6349_v12 = vrot.slane %v16027_v15, 4 }
 0x317   :  { %v4759_v38 = vsub.f32 %v16087_v52, %v20921_v58  ;;  %4978 = vmatpush1.msra.mxu0 %v20922_v33  ;;  %5121 = vmatpush1.msra.mxu1 %v15703_v48  ;;  %20924 = vst [vmem:[#allocation46_spill] sm:$0xff] %v16123_v34  ;;  %v16130_v58 = vsel %vm131_vm0, %v6334_v19, %v6339_v4  ;;  %v6345_v4 = vrot.slane %v15959_v39, 4  ;;  %v6346_v19 = vrot.slane %v15986_v35, 4 }
 0x318   :  { %4746 = vmatprep.mubr.f32.mxu0 %v4745_v45  ;;  %4979 = vmatprep.subr.mxu0 %v20893_v44  ;;  %20926 = vst [vmem:[#allocation44_spill] sm:$0xff] %v16130_v58  ;;  %v4751_v46 = vand.u32 4294901760, %v4750_v51  ;;  %v4765_v45 = vsub.f32 %v16092_v41, %v20499_v6  ;;  %v6353_v51 = vrot.slane %v16053_v26, 4  ;;  %v6351_v6 = vrot.slane %v16017_v37, 4 }
 0x319   :  { %5122 = vmatprep.subr.mxu1 %v20893_v44  ;;  %5177 = vmatprep.mubr.f32.mxu1 %v20925_v21  ;;  %v4760_v22 = vand.u32 4294901760, %v4759_v38  ;;  %v16148_v38 = vsel %vm131_vm0, %v6348_v1, %v6349_v12  ;;  %v16151_v21 = vsel %vm131_vm0, %v6345_v4, %v6346_v19  ;;  %v7244_v4 = vrot.slane %v15965_v63, 6 }
 0x31a   :  { %4982 = vmatpush1.msra.mxu0 %v15660_v27  ;;  %5124 = vmatpush1.msra.mxu1 %v15725_v3  ;;  %20927 = vst [vmem:[#allocation47_spill] sm:$0xff] %v16148_v38  ;;  %20928 = vst [vmem:[#allocation48_spill] sm:$0xff] %v16151_v21  ;;  %v16158_v58 = vsel %vm131_vm0, %v6349_v12, %v6353_v51  ;;  %v16164_v1 = vsel %vm131_vm0, %v6346_v19, %v6351_v6  ;;  %v7237_v6 = vrot.slane %v15925_v10, 6 }
 0x31b   :  { %4983 = vmatprep.subr.mxu0 %v20893_v44  ;;  %5125 = vmatprep.subr.mxu1 %v20893_v44  ;;  %20929 = vst [vmem:[#allocation50_spill] sm:$0xff] %v16158_v58  ;;  %20930 = vst [vmem:[#allocation52_spill] sm:$0xff] %v16164_v1  ;;  %v7236_v12 = vrot.slane %v15916_v40, 6  ;;  %v7242_v19 = vrot.slane %v15936_v17, 6  ;;  %v7251_v63 = vrot.slane %v16021_v57, 6  ;;  %v16644_v58 = vand.u32 4294901760, %v15986_v35 }
 0x31c   :  { %4752 = vmatmul.mubr.f32.gmra.mxu0 %v4751_v46  ;;  %5127 = vmatpush1.msra.mxu1 %v15764_v43  ;;  %v4766_v46 = vand.u32 4294901760, %v4765_v45  ;;  %v7240_v45 = vrot.slane %v15948_v61, 6 }
 0x31d   :  { %4986 = vmatpush1.msra.mxu0 %v15670_v42  ;;  %5128 = vmatprep.subr.mxu1 %v20893_v44  ;;  %v16188_v10 = vsel %vm7235_vm10, %v7236_v12, %v7237_v6  ;;  %v16198_v17 = vsel %vm7235_vm10, %v7237_v6, %v7242_v19  ;;  %v7249_v12 = vrot.slane %v15986_v35, 6  ;;  %v7256_v6 = vrot.slane %v16053_v26, 6  ;;  %20995 = vst [vmem:[#allocation20_spill] sm:$0xff] %v16644_v58 }
 0x31e   :  { %4987 = vmatprep.subr.mxu0 %v20893_v44  ;;  %4761 = vmatprep.mubr.f32.mxu0 %v4760_v22  ;;  %v7239_v22 = vrot.slane %v15944_v49, 6  ;;  %20932 = vst [vmem:[#allocation49_spill] sm:$0xff] %v16188_v10  ;;  %v16191_v51 = vsel %vm7235_vm10, %v7240_v45, %v7244_v4  ;;  %20934 = vst [vmem:[#allocation51_spill] sm:$0xff] %v16198_v17  ;;  %v20936_v4 = vand.u32 4294901760, %v16014_v60  ;;  %v7254_v17 = vrot.slane %v16017_v37, 6  ;;  %v4564_v10 = vld [vmem:[#allocation8 + $0x80] sm:$0xff] }
 0x31f   :  { %4990 = vmatpush1.msra.mxu0 %v15685_v13  ;;  %5130 = vmatpush1.msra.mxu1 %v15792_v24  ;;  %20933 = vst [vmem:[#allocation56_spill] sm:$0xff] %v16191_v51 }
 0x320   :  { %4991 = vmatprep.subr.mxu0 %v20893_v44  ;;  %5131 = vmatprep.subr.mxu1 %v20893_v44  ;;  %v16235_v37 = vsel %vm7235_vm10, %v7249_v12, %v7254_v17  ;;  %v20945_v17 = vand.u32 4294901760, %v20909_v55  ;;  %v20950_v55 = vld [vmem:[#allocation68_spill] sm:$0xff] }
 0x321   :  { %4767 = vmatmul.mubr.f32.gmra.mxu0 %v4766_v46  ;;  %5133 = vmatpush1.msra.mxu1 %v15797_v8  ;;  %v20935_v46 = vand.u32 4294901760, %v15956_v5  ;;  %20941 = vst [vmem:[#allocation33_spill] sm:$0xff] %v16235_v37 }
 0x322   :  { %4994 = vmatpush1.msra.mxu0 %v15736_v18  ;;  %5057 = vmatprep.mubr.f32.mxu0 %v15983_v32  ;;  %v16178_v32 = vsel %vm7235_vm10, %v7239_v22, %v7240_v45  ;;  %v7252_v22 = vrot.slane %v16027_v15, 6  ;;  %v7248_v45 = vrot.slane %v15959_v39, 6 }
 0x323   :  { %4995 = vmatprep.subr.mxu0 %v20893_v44  ;;  %5134 = vmatprep.subr.mxu1 %v20893_v44  ;;  %20931 = vst [vmem:[#allocation54_spill] sm:$0xff] %v16178_v32 }
 0x324   :  { %4998 = vmatpush1.msra.mxu0 %v15739_v9  ;;  %5136 = vmatpush1.msra.mxu1 %v15799_v20  ;;  %v16216_v19 = vsel %vm7235_vm10, %v7251_v63, %v7252_v22  ;;  %v16227_v26 = vsel %vm7235_vm10, %v7252_v22, %v7256_v6  ;;  %v20942_v63 = vand.u32 4294901760, %v16061_v53  ;;  %v20948_v22 = vld [vmem:[#allocation64_spill] sm:$0xff] }
 0x325   :  { %4999 = vmatprep.subr.mxu0 %v20893_v44  ;;  %5137 = vmatprep.subr.mxu1 %v20893_v44  ;;  %20937 = vst [vmem:[#allocation53_spill] sm:$0xff] %v16216_v19  ;;  %20939 = vst [vmem:[#allocation57_spill] sm:$0xff] %v16227_v26  ;;  %v4565_v19 = vld [vmem:[#allocation8 + $0x88] sm:$0xff] }
 0x326   :  { %5002 = vmatpush1.msra.mxu0 %v15782_v50  ;;  %5139 = vmatpush1.msra.mxu1 %v15819_v23  ;;  %v16500_v26 = vand.u32 4294901760, %v4565_v19 }
 0x327   :  { %5003 = vmatprep.subr.mxu0 %v20893_v44  ;;  %5168 = vmatprep.subr.mxu1 %v20893_v44 }
 0x328   :  { %5006 = vmatpush1.msra.mxu0 %v15804_v25  ;;  %5170 = vmatpush2.msra.mxu1 %v15855_v0 }
 0x329   :  { %5007 = vmatprep.subr.mxu0 %v20893_v44  ;;  %5171 = vmatprep.subr.mxu1 %v20893_v44 }
 0x32a   :  { %5010 = vmatpush1.msra.mxu0 %v15814_v2  ;;  %5173 = vmatpush2.msra.mxu1 %v15857_v11 }
 0x32b   :  { %5011 = vmatprep.subr.mxu0 %v20893_v44  ;;  %5181 = vmatmul.mubr.f32.vlgmr.msra.gmra.mxu1 %v20935_v46  ;;  %v16219_v46 = vsel %vm7235_vm10, %v7248_v45, %v7249_v12  ;;  %v20952_v45 = vld [vmem:[#allocation34_spill] sm:$0xff]  ;;  %v20953_v12 = vld [vmem:[#allocation41_spill] sm:$0xff] }
 0x32c   :  { %5366 = vmatprep.subr.mxu1 %v20893_v44  ;;  %5014 = vmatpush1.msra.mxu0 %v15817_v29  ;;  %20938 = vst [vmem:[#allocation55_spill] sm:$0xff] %v16219_v46 }
 0x32d   :  { %5188 = vmatprep.mubr.f32.mxu1 %v20936_v4  ;;  %5368 = vmatpush1.msra.mxu1 %v20904_v54  ;;  %v20940_v54 = vand.u32 4294901760, %v15992_v30  ;;  %v20956_v4 = vld [vmem:[#allocation37_spill] sm:$0xff] }
 0x32e   :  { %5015 = vmatprep.subr.mxu0 %v20893_v44  ;;  %5369 = vmatprep.subr.mxu1 %v20893_v44 }
 0x32f   :  { %5018 = vmatpush1.msra.mxu0 %v15846_v7  ;;  %5371 = vmatpush1.msra.mxu1 %v20906_v28  ;;  %v20943_v28 = vand.u32 4294901760, %v16066_v56 }
 0x330   :  { %5047 = vmatprep.subr.mxu0 %v20893_v44  ;;  %5192 = vmatmul.mubr.f32.gmra.mxu1 %v20940_v54  ;;  %v20957_v54 = vld [vmem:[#allocation71_spill] sm:$0xff] }
 0x331   :  { %5372 = vmatprep.subr.mxu1 %v20893_v44  ;;  %5050 = vmatpush2.msra.mxu0 %v15864_v31 }
 0x332   :  { %5199 = vmatprep.mubr.f32.mxu1 %v20942_v63  ;;  %5374 = vmatpush1.msra.mxu1 %v20907_v14  ;;  %v20944_v14 = vand.u32 4294901760, %v16087_v52  ;;  %v20958_v63 = vand.u32 4294901760, %v20957_v54 }
 0x333   :  { %5051 = vmatprep.subr.mxu0 %v20893_v44  ;;  %5375 = vmatprep.subr.mxu1 %v20893_v44 }
 0x334   :  { %5054 = vmatpush2.msra.mxu0 %v15867_v59  ;;  %5377 = vmatpush1.msra.mxu1 %v20908_v62  ;;  %v20946_v62 = vld [vmem:[#allocation67_spill] sm:$0xff] }
 0x335   :  { %5060 = vmatmul.mubr.f32.vlgmr.msra.gmra.mxu0 %v15956_v5  ;;  %5203 = vmatmul.mubr.f32.gmra.mxu1 %v20943_v28  ;;  %v20947_v5 = vand.u32 4294901760, %v20946_v62  ;;  %v20959_v28 = vld [vmem:[#allocation36_spill] sm:$0xff] }
 0x336   :  { %5219 = vmatprep.subr.mxu0 %v20893_v44  ;;  %5378 = vmatprep.subr.mxu1 %v20893_v44 }
 0x337   :  { %5066 = vmatprep.mubr.f32.mxu0 %v16014_v60  ;;  %5210 = vmatprep.mubr.f32.mxu1 %v20944_v14  ;;  %v20949_v60 = vand.u32 4294901760, %v16092_v41  ;;  %v4562_v14 = vld [vmem:[#allocation8 + $0x70] sm:$0xff] }
 0x338   :  { %5223 = vmatpush1.msra.mxu0 %v20945_v17  ;;  %5380 = vmatpush1.msra.mxu1 %v20910_v36  ;;  %v20951_v36 = vand.u32 4294901760, %v20950_v55  ;;  %v20960_v17 = vand.u32 4294901760, %v20922_v33  ;;  %v16294_v62 = vand.u32 4294901760, %v4562_v14  ;;  %v4560_v33 = vld [vmem:[#allocation8 + $0x60] sm:$0xff]  ;;  %v20964_v55 = vand.u32 4294901760, %v15736_v18 }
 0x339   :  { %5224 = vmatprep.subr.mxu0 %v20893_v44  ;;  %5381 = vmatprep.subr.mxu1 %v20893_v44 }
 0x33a   :  { %5228 = vmatpush1.msra.mxu0 %v20947_v5  ;;  %5383 = vmatpush1.msra.mxu1 %v20948_v22  ;;  %v4561_v5 = vld [vmem:[#allocation8 + $0x68] sm:$0xff]  ;;  %v20963_v22 = vand.u32 4294901760, %v15685_v13 }
 0x33b   :  { %5069 = vmatmul.mubr.f32.gmra.mxu0 %v15992_v30  ;;  %5214 = vmatmul.mubr.f32.gmra.mxu1 %v20949_v60  ;;  %v20954_v30 = vld [vmem:[#allocation70_spill] sm:$0xff]  ;;  %v16316_v60 = vand.u32 4294901760, %v4560_v33 }
 0x33c   :  { %5229 = vmatprep.subr.mxu0 %v20893_v44  ;;  %5384 = vmatprep.subr.mxu1 %v20893_v44  ;;  %v20955_v6 = vand.u32 4294901760, %v20954_v30  ;;  %v20966_v30 = vand.u32 4294901760, %v15782_v50 }
 0x33d   :  { %5075 = vmatprep.mubr.f32.mxu0 %v16061_v53  ;;  %5233 = vmatpush1.msra.mxu0 %v20951_v36  ;;  %v4563_v53 = vld [vmem:[#allocation8 + $0x78] sm:$0xff]  ;;  %v16334_v18 = vsub.f32 %v4560_v33, %v16316_v60 }
 0x33e   :  { %5386 = vmatpush1.msra.mxu1 %v20952_v45  ;;  %5449 = vmatprep.mubr.f32.mxu1 %v20953_v12  ;;  %v20965_v45 = vand.u32 4294901760, %v15739_v9 }
 0x33f   :  { %5234 = vmatprep.subr.mxu0 %v20893_v44  ;;  %5387 = vmatprep.subr.mxu1 %v20893_v44  ;;  %v20504_v50 = vand.u32 4294901760, %v16334_v18 }
 0x340   :  { %5238 = vmatpush1.msra.mxu0 %v20955_v6  ;;  %5389 = vmatpush1.msra.mxu1 %v20956_v4  ;;  %v4557_v4 = vld [vmem:[#allocation8 + $0x48] sm:$0xff] }
 0x341   :  { %5078 = vmatmul.mubr.f32.gmra.mxu0 %v16066_v56  ;;  %5239 = vmatprep.subr.mxu0 %v20893_v44  ;;  %v16287_v56 = vand.u32 4294901760, %v4563_v53 }
 0x342   :  { %5390 = vmatprep.subr.mxu1 %v20893_v44  ;;  %5084 = vmatprep.mubr.f32.mxu0 %v16087_v52  ;;  %v20961_v52 = vand.u32 4294901760, %v15660_v27  ;;  %v16306_v27 = vand.u32 4294901760, %v4561_v5 }
 0x343   :  { %5243 = vmatpush1.msra.mxu0 %v20958_v63  ;;  %5392 = vmatpush1.msra.mxu1 %v20959_v28  ;;  %v4556_v63 = vld [vmem:[#allocation8 + $0x40] sm:$0xff]  ;;  %v20968_v28 = vand.u32 4294901760, %v15814_v2  ;;  %v20970_v2 = vand.u32 4294901760, %v15817_v29 }
 0x344   :  { %5244 = vmatprep.subr.mxu0 %v20893_v44  ;;  %5393 = vmatprep.subr.mxu1 %v20893_v44  ;;  %v16325_v36 = vsub.f32 %v4561_v5, %v16306_v27  ;;  %v16383_v33 = vand.u32 4294901760, %v4556_v63 }
 0x345   :  { %5248 = vmatpush1.msra.mxu0 %v20960_v17  ;;  %5395 = vmatpush1.msra.mxu1 %v15703_v48  ;;  %v16301_v48 = vsub.f32 %v4563_v53, %v16287_v56  ;;  %v20967_v53 = vand.u32 4294901760, %v15804_v25  ;;  %v20969_v17 = vld [vmem:[#allocation39_spill] sm:$0xff] }
 0x346   :  { %5087 = vmatmul.mubr.f32.gmra.mxu0 %v16092_v41  ;;  %5249 = vmatprep.subr.mxu0 %v20893_v44  ;;  %v20962_v41 = vand.u32 4294901760, %v15670_v42  ;;  %v20505_v9 = vand.u32 4294901760, %v16325_v36 }
 0x347   :  { %5396 = vmatprep.subr.mxu1 %v20893_v44  ;;  %5253 = vmatpush1.msra.mxu0 %v20961_v52  ;;  %v20508_v42 = vand.u32 4294901760, %v16301_v48 }
 0x348   :  { %5338 = vmatprep.mubr.f32.mxu0 %v20953_v12  ;;  %5398 = vmatpush1.msra.mxu1 %v15725_v3  ;;  %v16311_v3 = vsub.f32 %v4562_v14, %v16294_v62  ;;  %v5646_v25 = vsub.f32 %v16325_v36, %v20505_v9  ;;  %v16372_v14 = vand.u32 4294901760, %v4557_v4 }
 0x349   :  { %5254 = vmatprep.subr.mxu0 %v20893_v44  ;;  %5399 = vmatprep.subr.mxu1 %v20893_v44 }
 0x34a   :  { %5258 = vmatpush1.msra.mxu0 %v20962_v41  ;;  %5401 = vmatpush1.msra.mxu1 %v15764_v43  ;;  %v4559_v43 = vld [vmem:[#allocation8 + $0x58] sm:$0xff]  ;;  %v20507_v13 = vand.u32 4294901760, %v16311_v3 }
 0x34b   :  { %5259 = vmatprep.subr.mxu0 %v20893_v44  ;;  %5402 = vmatprep.subr.mxu1 %v20893_v44  ;;  %v16336_v12 = vand.u32 4294901760, %v4559_v43  ;;  %v4555_v41 = vld [vmem:[#allocation8 + $0x38] sm:$0xff] }
 0x34c   :  { %5263 = vmatpush1.msra.mxu0 %v20963_v22  ;;  %5404 = vmatpush1.msra.mxu1 %v15792_v24  ;;  %v4558_v24 = vld [vmem:[#allocation8 + $0x50] sm:$0xff]  ;;  %v5639_v6 = vsub.f32 %v16311_v3, %v20507_v13  ;;  %v20971_v22 = vld [vmem:[#allocation40_spill] sm:$0xff] }
 0x34d   :  { %5264 = vmatprep.subr.mxu0 %v20893_v44  ;;  %5405 = vmatprep.subr.mxu1 %v20893_v44 }
 0x34e   :  { %5268 = vmatpush1.msra.mxu0 %v20964_v55  ;;  %5407 = vmatpush1.msra.mxu1 %v15797_v8  ;;  %v5632_v8 = vsub.f32 %v16301_v48, %v20508_v42  ;;  %v5640_v52 = vand.u32 4294901760, %v5639_v6  ;;  %v16390_v55 = vsub.f32 %v4557_v4, %v16372_v14  ;;  %v4549_v42 = vld [vmem:[#allocation8 + $0x8] sm:$0xff] }
 0x34f   :  { %5269 = vmatprep.subr.mxu0 %v20893_v44  ;;  %5408 = vmatprep.subr.mxu1 %v20893_v44  ;;  %v16475_v46 = vand.u32 4294901760, %v4549_v42 }
 0x350   :  { %5273 = vmatpush1.msra.mxu0 %v20965_v45  ;;  %5410 = vmatpush1.msra.mxu1 %v15799_v20  ;;  %v16347_v20 = vand.u32 4294901760, %v4558_v24  ;;  %v5633_v54 = vand.u32 4294901760, %v5632_v8  ;;  %v20972_v45 = vand.u32 4294901760, %v15846_v7  ;;  %v16394_v8 = vand.u32 4294901760, %v4555_v41 }
 0x351   :  { %5274 = vmatprep.subr.mxu0 %v20893_v44  ;;  %5411 = vmatprep.subr.mxu1 %v20893_v44  ;;  %v20974_v7 = vand.u32 4294901760, %v15864_v31  ;;  %v5477_v31 = vsel %vm4399_vm3, %v15944_v49, 0 }
 0x352   :  { %5278 = vmatpush1.msra.mxu0 %v20966_v30  ;;  %5413 = vmatpush1.msra.mxu1 %v15819_v23  ;;  %v16359_v23 = vsub.f32 %v4559_v43, %v16336_v12  ;;  %v5647_v43 = vand.u32 4294901760, %v5646_v25  ;;  %v20973_v30 = vld [vmem:[#allocation38_spill] sm:$0xff] }
 0x353   :  { %5279 = vmatprep.subr.mxu0 %v20893_v44  ;;  %5442 = vmatprep.subr.mxu1 %v20893_v44  ;;  %v20975_v25 = vld [vmem:[#allocation42_spill] sm:$0xff] }
 0x354   :  { %5283 = vmatpush1.msra.mxu0 %v20967_v53  ;;  %5444 = vmatpush2.msra.mxu1 %v15855_v0  ;;  %v16370_v0 = vsub.f32 %v4558_v24, %v16347_v20  ;;  %v20503_v5 = vand.u32 4294901760, %v16359_v23  ;;  %v4554_v24 = vld [vmem:[#allocation8 + $0x30] sm:$0xff] }
 0x355   :  { %5284 = vmatprep.subr.mxu0 %v20893_v44  ;;  %5445 = vmatprep.subr.mxu1 %v20893_v44  ;;  %v16407_v4 = vand.u32 4294901760, %v4554_v24 }
 0x356   :  { %5288 = vmatpush1.msra.mxu0 %v20968_v28  ;;  %5447 = vmatpush2.msra.mxu1 %v15857_v11  ;;  %v5653_v11 = vsub.f32 %v16334_v18, %v20504_v50  ;;  %v20502_v29 = vand.u32 4294901760, %v16370_v0  ;;  %v5660_v53 = vsub.f32 %v16359_v23, %v20503_v5  ;;  %v4553_v28 = vld [vmem:[#allocation8 + $0x28] sm:$0xff]  ;;  %v20977_v5 = vld [vmem:[#allocation43_spill] sm:$0xff] }
 0x357   :  { %5289 = vmatprep.subr.mxu0 %v20893_v44  ;;  %5451 = vmatmul.mubr.f32.vlgmr.msra.gmra.mxu1 %v20969_v17  ;;  %v16429_v50 = vsub.f32 %v4554_v24, %v16407_v4  ;;  %v20979_v24 = vld [vmem:[#allocation45_spill] sm:$0xff] }
 0x358   :  { %5628 = vmatprep.subr.mxu1 %v20893_v44  ;;  %5293 = vmatpush1.msra.mxu0 %v20970_v2  ;;  %v5654_v6 = vand.u32 4294901760, %v5653_v11  ;;  %v20506_v2 = vand.u32 4294901760, %v16390_v55  ;;  %v4552_v11 = vld [vmem:[#allocation8 + $0x20] sm:$0xff] }
 0x359   :  { %5456 = vmatprep.mubr.f32.mxu1 %v20971_v22  ;;  %5634 = vmatpush1.msra.mxu1 %v5633_v54  ;;  %v16402_v54 = vsub.f32 %v4556_v63, %v16383_v33  ;;  %v16419_v63 = vsub.f32 %v4555_v41, %v16394_v8  ;;  %v16431_v49 = vand.u32 4294901760, %v4552_v11  ;;  %v4551_v41 = vld [vmem:[#allocation8 + $0x18] sm:$0xff] }
 0x35a   :  { %5294 = vmatprep.subr.mxu0 %v20893_v44  ;;  %5635 = vmatprep.subr.mxu1 %v20893_v44 }
 0x35b   :  { %5298 = vmatpush1.msra.mxu0 %v20972_v45  ;;  %5641 = vmatpush1.msra.mxu1 %v5640_v52  ;;  %v5667_v52 = vsub.f32 %v16370_v0, %v20502_v29  ;;  %v20976_v45 = vand.u32 4294901760, %v15867_v59  ;;  %v16424_v29 = vand.u32 4294901760, %v4553_v28  ;;  %v16456_v13 = vsub.f32 %v4552_v11, %v16431_v49  ;;  %v4548_v11 = vld [vmem:[#allocation8] sm:$0xff] }
 0x35c   :  { %5327 = vmatprep.subr.mxu0 %v20893_v44  ;;  %5458 = vmatmul.mubr.f32.gmra.mxu1 %v20973_v30  ;;  %v20980_v37 = vand.u32 4294901760, %v16419_v63 }
 0x35d   :  { %5642 = vmatprep.subr.mxu1 %v20893_v44  ;;  %5331 = vmatpush2.msra.mxu0 %v20974_v7  ;;  %v20509_v7 = vand.u32 4294901760, %v16402_v54  ;;  %v5668_v59 = vand.u32 4294901760, %v5667_v52  ;;  %v16448_v9 = vsub.f32 %v4553_v28, %v16424_v29  ;;  %v20983_v51 = vand.u32 4294901760, %v16456_v13 }
 0x35e   :  { %5463 = vmatprep.mubr.f32.mxu1 %v20975_v25  ;;  %5648 = vmatpush1.msra.mxu1 %v5647_v43  ;;  %v5661_v43 = vand.u32 4294901760, %v5660_v53  ;;  %v16438_v53 = vand.u32 4294901760, %v5477_v31 }
 0x35f   :  { %5332 = vmatprep.subr.mxu0 %v20893_v44  ;;  %5649 = vmatprep.subr.mxu1 %v20893_v44  ;;  %v5681_v52 = vsub.f32 %v16402_v54, %v20509_v7 }
 0x360   :  { %5336 = vmatpush2.msra.mxu0 %v20976_v45  ;;  %5655 = vmatpush1.msra.mxu1 %v5654_v6  ;;  %v5674_v6 = vsub.f32 %v16390_v55, %v20506_v2  ;;  %v4550_v45 = vld [vmem:[#allocation8 + $0x10] sm:$0xff]  ;;  %v16450_v2 = vand.u32 4294901760, %v4551_v41  ;;  %v16460_v7 = vsub.f32 %v5477_v31, %v16438_v53 }
 0x361   :  { %5340 = vmatmul.mubr.f32.vlgmr.msra.gmra.mxu0 %v20969_v17  ;;  %5465 = vmatmul.mubr.f32.gmra.mxu1 %v20977_v5  ;;  %v20978_v17 = vld [vmem:[#allocation32_spill] sm:$0xff]  ;;  %v16462_v28 = vand.u32 4294901760, %v4550_v45 }
 0x362   :  { %5485 = vmatprep.subr.mxu0 %v20893_v44  ;;  %5656 = vmatprep.subr.mxu1 %v20893_v44  ;;  %v16473_v31 = vsub.f32 %v4551_v41, %v16450_v2 }
 0x363   :  { %5345 = vmatprep.mubr.f32.mxu0 %v20971_v22  ;;  %5470 = vmatprep.mubr.f32.mxu1 %v20978_v17  ;;  %v5688_v22 = vsub.f32 %v16419_v63, %v20980_v37  ;;  %v16486_v41 = vsub.f32 %v4550_v45, %v16462_v28  ;;  %v16498_v45 = vsub.f32 %v4549_v42, %v16475_v46 }
 0x364   :  { %5487 = vmatpush1.msra.mxu0 %v16287_v56  ;;  %5662 = vmatpush1.msra.mxu1 %v5661_v43  ;;  %v5675_v43 = vand.u32 4294901760, %v5674_v6  ;;  %v16488_v6 = vand.u32 4294901760, %v4548_v11 }
 0x365   :  { %5488 = vmatprep.subr.mxu0 %v20893_v44  ;;  %5663 = vmatprep.subr.mxu1 %v20893_v44 }
 0x366   :  { %5490 = vmatpush1.msra.mxu0 %v16294_v62  ;;  %5669 = vmatpush1.msra.mxu1 %v5668_v59  ;;  %v5682_v59 = vand.u32 4294901760, %v5681_v52  ;;  %v16514_v32 = vsub.f32 %v4548_v11, %v16488_v6  ;;  %v16526_v52 = vsub.f32 %v4565_v19, %v16500_v26 }
 0x367   :  { %5347 = vmatmul.mubr.f32.gmra.mxu0 %v20973_v30  ;;  %5472 = vmatmul.mubr.f32.gmra.mxu1 %v20979_v24  ;;  %v20981_v30 = vand.u32 4294901760, %v16429_v50 }
 0x368   :  { %5491 = vmatprep.subr.mxu0 %v20893_v44  ;;  %5670 = vmatprep.subr.mxu1 %v20893_v44 }
 0x369   :  { %5352 = vmatprep.mubr.f32.mxu0 %v20975_v25  ;;  %5493 = vmatpush1.msra.mxu0 %v16306_v27  ;;  %v5695_v37 = vsub.f32 %v16429_v50, %v20981_v30  ;;  %v5689_v25 = vand.u32 4294901760, %v5688_v22 }
 0x36a   :  { %5676 = vmatpush1.msra.mxu1 %v5675_v43  ;;  %5783 = vmatprep.mubr.f32.mxu1 %v16438_v53  ;;  %v20982_v43 = vand.u32 4294901760, %v16448_v9 }
 0x36b   :  { %5494 = vmatprep.subr.mxu0 %v20893_v44  ;;  %5677 = vmatprep.subr.mxu1 %v20893_v44  ;;  %v5696_v22 = vand.u32 4294901760, %v5695_v37 }
 0x36c   :  { %5496 = vmatpush1.msra.mxu0 %v16316_v60  ;;  %5683 = vmatpush1.msra.mxu1 %v5682_v59  ;;  %v5702_v30 = vsub.f32 %v16448_v9, %v20982_v43  ;;  %v5709_v59 = vsub.f32 %v16456_v13, %v20983_v51  ;;  %v20984_v43 = vand.u32 4294901760, %v16460_v7 }
 0x36d   :  { %5354 = vmatmul.mubr.f32.gmra.mxu0 %v20977_v5  ;;  %5497 = vmatprep.subr.mxu0 %v20893_v44  ;;  %v16516_v5 = vand.u32 4294901760, %v4564_v10 }
 0x36e   :  { %5684 = vmatprep.subr.mxu1 %v20893_v44  ;;  %5359 = vmatprep.mubr.f32.mxu0 %v20978_v17  ;;  %v5570_v42 = vsub.f32 %v16460_v7, %v20984_v43  ;;  %v5703_v51 = vand.u32 4294901760, %v5702_v30  ;;  %v20985_v17 = vand.u32 4294901760, %v16473_v31  ;;  %v5710_v11 = vand.u32 4294901760, %v5709_v59 }
 0x36f   :  { %5499 = vmatpush1.msra.mxu0 %v16336_v12  ;;  %5690 = vmatpush1.msra.mxu1 %v5689_v25  ;;  %v20986_v30 = vand.u32 4294901760, %v16486_v41  ;;  %v16536_v43 = vsub.f32 %v4564_v10, %v16516_v5  ;;  %v20515_v59 = vand.u32 4294901760, %v16526_v52 }
 0x370   :  { %5500 = vmatprep.subr.mxu0 %v20893_v44  ;;  %5691 = vmatprep.subr.mxu1 %v20893_v44  ;;  %v5716_v37 = vsub.f32 %v16473_v31, %v20985_v17  ;;  %v5571_v25 = vand.u32 4294901760, %v5570_v42  ;;  %v20516_v17 = vand.u32 4294901760, %v16514_v32 }
 0x371   :  { %5502 = vmatpush1.msra.mxu0 %v16347_v20  ;;  %5697 = vmatpush1.msra.mxu1 %v5696_v22  ;;  %v5723_v1 = vsub.f32 %v16486_v41, %v20986_v30 }
 0x372   :  { %5361 = vmatmul.mubr.f32.gmra.mxu0 %v20979_v24  ;;  %5503 = vmatprep.subr.mxu0 %v20893_v44  ;;  %v5717_v19 = vand.u32 4294901760, %v5716_v37  ;;  %v20987_v24 = vand.u32 4294901760, %v16498_v45  ;;  %v5737_v42 = vsub.f32 %v16514_v32, %v20516_v17 }
 0x373   :  { %5698 = vmatprep.subr.mxu1 %v20893_v44  ;;  %5505 = vmatpush1.msra.mxu0 %v16372_v14  ;;  %v5724_v10 = vand.u32 4294901760, %v5723_v1  ;;  %v5479_v1 = vsel %vm4399_vm3, %v15948_v61, 0 }
 0x374   :  { %5572 = vmatprep.mubr.f32.mxu0 %v5571_v25  ;;  %5704 = vmatpush1.msra.mxu1 %v5703_v51  ;;  %v5730_v22 = vsub.f32 %v16498_v45, %v20987_v24  ;;  %v20514_v51 = vand.u32 4294901760, %v16536_v43  ;;  %v5772_v25 = vsub.f32 %v16526_v52, %v20515_v59  ;;  %v16571_v61 = vand.u32 4294901760, %v5479_v1 }
 0x375   :  { %5506 = vmatprep.subr.mxu0 %v20893_v44  ;;  %5705 = vmatprep.subr.mxu1 %v20893_v44 }
 0x376   :  { %5508 = vmatpush1.msra.mxu0 %v16383_v33  ;;  %5711 = vmatpush1.msra.mxu1 %v5710_v11  ;;  %v5731_v37 = vand.u32 4294901760, %v5730_v22  ;;  %v5738_v11 = vand.u32 4294901760, %v5737_v42  ;;  %v5779_v30 = vsub.f32 %v16536_v43, %v20514_v51  ;;  %v5773_v24 = vand.u32 4294901760, %v5772_v25  ;;  %20988 = vst [vmem:[#allocation58_spill] sm:$0xff] %v16571_v61 }
 0x377   :  { %5509 = vmatprep.subr.mxu0 %v20893_v44  ;;  %5712 = vmatprep.subr.mxu1 %v20893_v44  ;;  %v5481_v42 = vsel %vm4399_vm3, %v16021_v57, 0 }
 0x378   :  { %5511 = vmatpush1.msra.mxu0 %v16394_v8  ;;  %5718 = vmatpush1.msra.mxu1 %v5717_v19  ;;  %v16568_v19 = vand.u32 4294901760, %v15916_v40  ;;  %v5780_v22 = vand.u32 4294901760, %v5779_v30  ;;  %v13382_v40 = vld [vmem:[#allocation2] sm:$0xff]  ;;  %v16594_v30 = vand.u32 4294901760, %v5481_v42 }
 0x379   :  { %5512 = vmatprep.subr.mxu0 %v20893_v44  ;;  %5719 = vmatprep.subr.mxu1 %v20893_v44 }
 0x37a   :  { %5514 = vmatpush1.msra.mxu0 %v16407_v4  ;;  %5725 = vmatpush1.msra.mxu1 %v5724_v10  ;;  %v16579_v10 = vsub.f32 %v13382_v40, %v16568_v19  ;;  %v16617_v40 = vand.u32 4294901760, %v15959_v39  ;;  %v16620_v51 = vsub.f32 %v5481_v42, %v16594_v30 }
 0x37b   :  { %5515 = vmatprep.subr.mxu0 %v20893_v44  ;;  %5726 = vmatprep.subr.mxu1 %v20893_v44 }
 0x37c   :  { %5517 = vmatpush1.msra.mxu0 %v16424_v29  ;;  %5732 = vmatpush1.msra.mxu1 %v5731_v37  ;;  %v13383_v37 = vld [vmem:[#allocation2 + $0x10] sm:$0xff]  ;;  %v20517_v57 = vand.u32 4294901760, %v16579_v10  ;;  %v20998_v35 = vand.u32 4294901760, %v16620_v51 }
 0x37d   :  { %5518 = vmatprep.subr.mxu0 %v20893_v44  ;;  %5733 = vmatprep.subr.mxu1 %v20893_v44  ;;  %v16586_v25 = vand.u32 4294901760, %v13383_v37 }
 0x37e   :  { %5520 = vmatpush1.msra.mxu0 %v16431_v49  ;;  %5739 = vmatpush1.msra.mxu1 %v5738_v11  ;;  %v16589_v11 = vsub.f32 %v5479_v1, %v16571_v61 }
 0x37f   :  { %5521 = vmatprep.subr.mxu0 %v20893_v44  ;;  %5768 = vmatprep.subr.mxu1 %v20893_v44  ;;  %20989 = vst [vmem:[#allocation65_spill] sm:$0xff] %v16586_v25 }
 0x380   :  { %5523 = vmatpush1.msra.mxu0 %v16450_v2  ;;  %5774 = vmatpush2.msra.mxu1 %v5773_v24  ;;  %20990 = vst [vmem:[#allocation69_spill] sm:$0xff] %v16589_v11  ;;  %v5483_v24 = vsel %vm4399_vm3, %v16027_v15, 0  ;;  %v16604_v1 = vand.u32 4294901760, %v16589_v11  ;;  %v5576_v15 = vsub.f32 %v16579_v10, %v20517_v57  ;;  %v13384_v57 = vld [vmem:[#allocation2 + $0x30] sm:$0xff] }
 0x381   :  { %5524 = vmatprep.subr.mxu0 %v20893_v44  ;;  %5775 = vmatprep.subr.mxu1 %v20893_v44  ;;  %v16639_v21 = vsub.f32 %v13384_v57, %v16617_v40  ;;  %v5600_v57 = vsub.f32 %v16620_v51, %v20998_v35 }
 0x382   :  { %5526 = vmatpush1.msra.mxu0 %v16462_v28  ;;  %5781 = vmatpush2.msra.mxu1 %v5780_v22  ;;  %20991 = vst [vmem:[#allocation35_spill] sm:$0xff] %v16604_v1  ;;  %v16607_v22 = vsub.f32 %v13383_v37, %v16586_v25  ;;  %v16622_v37 = vand.u32 4294901760, %v5483_v24  ;;  %v5585_v59 = vsub.f32 %v16589_v11, %v16604_v1  ;;  %v5577_v39 = vand.u32 4294901760, %v5576_v15 }
 0x383   :  { %5527 = vmatprep.subr.mxu0 %v20893_v44  ;;  %5785 = vmatmul.mubr.f32.vlgmr.msra.gmra.mxu1 %v16568_v19  ;;  %v5601_v35 = vand.u32 4294901760, %v5600_v57  ;;  %v21003_v57 = vand.u32 4294901760, %v16460_v7 }
 0x384   :  { %5948 = vmatprep.subr.mxu1 %v20893_v44  ;;  %5529 = vmatpush1.msra.mxu0 %v16475_v46  ;;  %20992 = vst [vmem:[#allocation23_spill] sm:$0xff] %v16607_v22  ;;  %20993 = vst [vmem:[#allocation18_spill] sm:$0xff] %v16622_v37  ;;  %v16631_v17 = vand.u32 4294901760, %v16607_v22  ;;  %v16647_v38 = vsub.f32 %v5483_v24, %v16622_v37  ;;  %v16650_v15 = vand.u32 4294901760, %v5585_v59  ;;  %v20521_v24 = vand.u32 4294901760, %v16639_v21 }
 0x385   :  { %5790 = vmatprep.mubr.f32.mxu1 %v16571_v61  ;;  %5950 = vmatpush1.msra.mxu1 %v16287_v56 }
 0x386   :  { %5530 = vmatprep.subr.mxu0 %v20893_v44  ;;  %5951 = vmatprep.subr.mxu1 %v20893_v44  ;;  %20994 = vst [vmem:[#allocation19_spill] sm:$0xff] %v16631_v17  ;;  %20996 = vst [vmem:[#allocation21_spill] sm:$0xff] %v16647_v38  ;;  %v5591_v42 = vsub.f32 %v16607_v22, %v16631_v17  ;;  %v16665_v59 = vand.u32 4294901760, %v16647_v38 }
 0x387   :  { %5532 = vmatpush1.msra.mxu0 %v16488_v6  ;;  %5953 = vmatpush1.msra.mxu1 %v16294_v62  ;;  %20997 = vst [vmem:[#allocation79_spill] sm:$0xff] %v16650_v15 }
 0x388   :  { %5561 = vmatprep.subr.mxu0 %v20893_v44  ;;  %5792 = vmatmul.mubr.f32.gmra.mxu1 %v16586_v25  ;;  %20999 = vst [vmem:[#allocation83_spill] sm:$0xff] %v16665_v59 }
 0x389   :  { %5954 = vmatprep.subr.mxu1 %v20893_v44  ;;  %5563 = vmatpush2.msra.mxu0 %v16500_v26 }
 0x38a   :  { %5797 = vmatprep.mubr.f32.mxu1 %v16594_v30  ;;  %5956 = vmatpush1.msra.mxu1 %v16306_v27 }
 0x38b   :  { %5564 = vmatprep.subr.mxu0 %v20893_v44  ;;  %5957 = vmatprep.subr.mxu1 %v20893_v44 }
 0x38c   :  { %5566 = vmatpush2.msra.mxu0 %v16516_v5  ;;  %5959 = vmatpush1.msra.mxu1 %v16316_v60 }
 0x38d   :  { %5578 = vmatmul.mubr.f32.vlgmr.msra.gmra.mxu0 %v5577_v39  ;;  %5799 = vmatmul.mubr.f32.gmra.mxu1 %v16617_v40  ;;  %v13385_v39 = vld [vmem:[#allocation2 + $0x40] sm:$0xff] }
 0x38e   :  { %5811 = vmatprep.subr.mxu0 %v20893_v44  ;;  %5960 = vmatprep.subr.mxu1 %v20893_v44  ;;  %v16668_v47 = vsub.f32 %v13385_v39, %v16644_v58  ;;  %v5606_v39 = vsub.f32 %v16639_v21, %v20521_v24 }
 0x38f   :  { %5587 = vmatprep.mubr.f32.mxu0 %v16650_v15  ;;  %5804 = vmatprep.mubr.f32.mxu1 %v16622_v37  ;;  %v16672_v15 = vand.u32 4294901760, %v5591_v42  ;;  %v5615_v42 = vsub.f32 %v16647_v38, %v16665_v59 }
 0x390   :  { %5814 = vmatpush1.msra.mxu0 %v16301_v48  ;;  %5962 = vmatpush1.msra.mxu1 %v16336_v12  ;;  %21000 = vst [vmem:[#allocation84_spill] sm:$0xff] %v16668_v47  ;;  %v16686_v34 = vand.u32 4294901760, %v16668_v47  ;;  %v5607_v24 = vand.u32 4294901760, %v5606_v39 }
 0x391   :  { %5815 = vmatprep.subr.mxu0 %v20893_v44  ;;  %5963 = vmatprep.subr.mxu1 %v20893_v44  ;;  %21001 = vst [vmem:[#allocation80_spill] sm:$0xff] %v16672_v15 }
 0x392   :  { %5818 = vmatpush1.msra.mxu0 %v16311_v3  ;;  %5965 = vmatpush1.msra.mxu1 %v16347_v20  ;;  %21002 = vst [vmem:[#allocation81_spill] sm:$0xff] %v16686_v34 }
 0x393   :  { %5593 = vmatmul.mubr.f32.gmra.mxu0 %v16672_v15  ;;  %5806 = vmatmul.mubr.f32.gmra.mxu1 %v16644_v58  ;;  %v16696_v15 = vand.u32 4294901760, %v5615_v42 }
 0x394   :  { %5819 = vmatprep.subr.mxu0 %v20893_v44  ;;  %5966 = vmatprep.subr.mxu1 %v20893_v44 }
 0x395   :  { %5602 = vmatprep.mubr.f32.mxu0 %v5601_v35  ;;  %5822 = vmatpush1.msra.mxu0 %v16325_v36  ;;  %21004 = vst [vmem:[#allocation85_spill] sm:$0xff] %v16696_v15  ;;  %v5621_v35 = vsub.f32 %v16668_v47, %v16686_v34 }
 0x396   :  { %5968 = vmatpush1.msra.mxu1 %v16372_v14  ;;  %6033 = vmatprep.mubr.f32.mxu1 %v21003_v57 }
 0x397   :  { %5823 = vmatprep.subr.mxu0 %v20893_v44  ;;  %5969 = vmatprep.subr.mxu1 %v20893_v44  ;;  %v16707_v39 = vand.u32 4294901760, %v5621_v35  ;;  %v6369_v35 = vld [vmem:[#allocation8 + $0x180] sm:$0xff] }
 0x398   :  { %5826 = vmatpush1.msra.mxu0 %v16334_v18  ;;  %5971 = vmatpush1.msra.mxu1 %v16383_v33 }
 0x399   :  { %5608 = vmatmul.mubr.f32.gmra.mxu0 %v5607_v24  ;;  %5827 = vmatprep.subr.mxu0 %v20893_v44  ;;  %21005 = vst [vmem:[#allocation87_spill] sm:$0xff] %v16707_v39  ;;  %v21007_v24 = vand.u32 4294901760, %v16620_v51 }
 0x39a   :  { %5972 = vmatprep.subr.mxu1 %v20893_v44  ;;  %5617 = vmatprep.mubr.f32.mxu0 %v16696_v15 }
 0x39b   :  { %5830 = vmatpush1.msra.mxu0 %v16359_v23  ;;  %5974 = vmatpush1.msra.mxu1 %v16394_v8 }
 0x39c   :  { %5831 = vmatprep.subr.mxu0 %v20893_v44  ;;  %5975 = vmatprep.subr.mxu1 %v20893_v44 }
 0x39d   :  { %5834 = vmatpush1.msra.mxu0 %v16370_v0  ;;  %5977 = vmatpush1.msra.mxu1 %v16407_v4 }
 0x39e   :  { %5623 = vmatmul.mubr.f32.gmra.mxu0 %v16707_v39  ;;  %5835 = vmatprep.subr.mxu0 %v20893_v44 }
 0x39f   :  { %5978 = vmatprep.subr.mxu1 %v20893_v44  ;;  %5838 = vmatpush1.msra.mxu0 %v16390_v55 }
 0x3a0   :  { %5913 = vmatprep.mubr.f32.mxu0 %v16460_v7  ;;  %5980 = vmatpush1.msra.mxu1 %v16424_v29  ;;  %v21006_v7 = vand.u32 4294901760, %v16579_v10 }
 0x3a1   :  { %5839 = vmatprep.subr.mxu0 %v20893_v44  ;;  %5981 = vmatprep.subr.mxu1 %v20893_v44 }
 0x3a2   :  { %5842 = vmatpush1.msra.mxu0 %v16402_v54  ;;  %5983 = vmatpush1.msra.mxu1 %v16431_v49 }
 0x3a3   :  { %5843 = vmatprep.subr.mxu0 %v20893_v44  ;;  %5984 = vmatprep.subr.mxu1 %v20893_v44 }
 0x3a4   :  { %5846 = vmatpush1.msra.mxu0 %v16419_v63  ;;  %5986 = vmatpush1.msra.mxu1 %v16450_v2 }
 0x3a5   :  { %5847 = vmatprep.subr.mxu0 %v20893_v44  ;;  %5987 = vmatprep.subr.mxu1 %v20893_v44 }
 0x3a6   :  { %5850 = vmatpush1.msra.mxu0 %v16429_v50  ;;  %5989 = vmatpush1.msra.mxu1 %v16462_v28 }
 0x3a7   :  { %5851 = vmatprep.subr.mxu0 %v20893_v44  ;;  %5990 = vmatprep.subr.mxu1 %v20893_v44 }
 0x3a8   :  { %5854 = vmatpush1.msra.mxu0 %v16448_v9  ;;  %5992 = vmatpush1.msra.mxu1 %v16475_v46 }
 0x3a9   :  { %5855 = vmatprep.subr.mxu0 %v20893_v44  ;;  %5993 = vmatprep.subr.mxu1 %v20893_v44 }
 0x3aa   :  { %5858 = vmatpush1.msra.mxu0 %v16456_v13  ;;  %5995 = vmatpush1.msra.mxu1 %v16488_v6 }
 0x3ab   :  { %5859 = vmatprep.subr.mxu0 %v20893_v44  ;;  %6024 = vmatprep.subr.mxu1 %v20893_v44 }
 0x3ac   :  { %5862 = vmatpush1.msra.mxu0 %v16473_v31  ;;  %6026 = vmatpush2.msra.mxu1 %v16500_v26 }
 0x3ad   :  { %5863 = vmatprep.subr.mxu0 %v20893_v44  ;;  %6027 = vmatprep.subr.mxu1 %v20893_v44 }
 0x3ae   :  { %5866 = vmatpush1.msra.mxu0 %v16486_v41  ;;  %6029 = vmatpush2.msra.mxu1 %v16516_v5 }
 0x3af   :  { %5867 = vmatprep.subr.mxu0 %v20893_v44  ;;  %6037 = vmatmul.mubr.f32.vlgmr.msra.gmra.mxu1 %v21006_v7  ;;  %v21016_v7 = vand.u32 4294901760, %v16402_v54 }
 0x3b0   :  { %6222 = vmatprep.subr.mxu1 %v20893_v44  ;;  %5870 = vmatpush1.msra.mxu0 %v16498_v45 }
 0x3b1   :  { %6044 = vmatprep.mubr.f32.mxu1 %v16604_v1  ;;  %6224 = vmatpush1.msra.mxu1 %v16287_v56  ;;  %v21008_v56 = vand.u32 4294901760, %v16639_v21 }
 0x3b2   :  { %5871 = vmatprep.subr.mxu0 %v20893_v44  ;;  %6225 = vmatprep.subr.mxu1 %v20893_v44 }
 0x3b3   :  { %5874 = vmatpush1.msra.mxu0 %v16514_v32  ;;  %6227 = vmatpush1.msra.mxu1 %v16294_v62  ;;  %v21009_v62 = vand.u32 4294901760, %v16301_v48  ;;  %v21011_v48 = vand.u32 4294901760, %v16325_v36 }
 0x3b4   :  { %5903 = vmatprep.subr.mxu0 %v20893_v44  ;;  %6048 = vmatmul.mubr.f32.gmra.mxu1 %v16631_v17 }
 0x3b5   :  { %6228 = vmatprep.subr.mxu1 %v20893_v44  ;;  %5906 = vmatpush2.msra.mxu0 %v16526_v52 }
 0x3b6   :  { %6055 = vmatprep.mubr.f32.mxu1 %v21007_v24  ;;  %6230 = vmatpush1.msra.mxu1 %v16306_v27  ;;  %v21010_v27 = vand.u32 4294901760, %v16311_v3  ;;  %v21017_v24 = vand.u32 4294901760, %v16419_v63 }
 0x3b7   :  { %5907 = vmatprep.subr.mxu0 %v20893_v44  ;;  %6231 = vmatprep.subr.mxu1 %v20893_v44 }
 0x3b8   :  { %5910 = vmatpush2.msra.mxu0 %v16536_v43  ;;  %6233 = vmatpush1.msra.mxu1 %v16316_v60 }
 0x3b9   :  { %5916 = vmatmul.mubr.f32.vlgmr.msra.gmra.mxu0 %v16579_v10  ;;  %6059 = vmatmul.mubr.f32.gmra.mxu1 %v21008_v56  ;;  %v16839_v56 = vand.u32 4294901760, %v6369_v35 }
 0x3ba   :  { %6075 = vmatprep.subr.mxu0 %v20893_v44  ;;  %6234 = vmatprep.subr.mxu1 %v20893_v44 }
 0x3bb   :  { %5922 = vmatprep.mubr.f32.mxu0 %v16589_v11  ;;  %6066 = vmatprep.mubr.f32.mxu1 %v16665_v59 }
 0x3bc   :  { %6079 = vmatpush1.msra.mxu0 %v21009_v62  ;;  %6236 = vmatpush1.msra.mxu1 %v16336_v12  ;;  %v21012_v12 = vand.u32 4294901760, %v16334_v18  ;;  %v6371_v18 = vld [vmem:[#allocation8 + $0x190] sm:$0xff]  ;;  %v6368_v62 = vld [vmem:[#allocation8 + $0x178] sm:$0xff] }
 0x3bd   :  { %6080 = vmatprep.subr.mxu0 %v20893_v44  ;;  %6237 = vmatprep.subr.mxu1 %v20893_v44  ;;  %v16817_v42 = vand.u32 4294901760, %v6371_v18 }
 0x3be   :  { %6084 = vmatpush1.msra.mxu0 %v21010_v27  ;;  %6239 = vmatpush1.msra.mxu1 %v16347_v20  ;;  %v6372_v20 = vld [vmem:[#allocation8 + $0x198] sm:$0xff] }
 0x3bf   :  { %5925 = vmatmul.mubr.f32.gmra.mxu0 %v16607_v22  ;;  %6070 = vmatmul.mubr.f32.gmra.mxu1 %v16686_v34 }
 0x3c0   :  { %6085 = vmatprep.subr.mxu0 %v20893_v44  ;;  %6240 = vmatprep.subr.mxu1 %v20893_v44 }
 0x3c1   :  { %5931 = vmatprep.mubr.f32.mxu0 %v16620_v51  ;;  %6089 = vmatpush1.msra.mxu0 %v21011_v48  ;;  %v4930_v60 = vpop.f32.mrf.mxu1 }
 0x3c2   :  { %6242 = vmatpush1.msra.mxu1 %v16372_v14  ;;  %6305 = vmatprep.mubr.f32.mxu1 %v16438_v53  ;;  %v21013_v14 = vand.u32 4294901760, %v16359_v23 }
 0x3c3   :  { %6090 = vmatprep.subr.mxu0 %v20893_v44  ;;  %6243 = vmatprep.subr.mxu1 %v20893_v44  ;;  %v4932_v3 = vpop.f32.mrf.mxu1 }
 0x3c4   :  { %6094 = vmatpush1.msra.mxu0 %v21012_v12  ;;  %6245 = vmatpush1.msra.mxu1 %v16383_v33  ;;  %v16808_v33 = vand.u32 4294901760, %v6372_v20  ;;  %v6367_v3 = vld [vmem:[#allocation8 + $0x170] sm:$0xff] }
 0x3c5   :  { %5934 = vmatmul.mubr.f32.gmra.mxu0 %v16639_v21  ;;  %6095 = vmatprep.subr.mxu0 %v20893_v44  ;;  %v4937_v36 = vpop.f32.mrf.mxu1  ;;  %v21014_v21 = vand.u32 4294901760, %v16370_v0  ;;  %v6370_v0 = vld [vmem:[#allocation8 + $0x188] sm:$0xff] }
 0x3c6   :  { %6246 = vmatprep.subr.mxu1 %v20893_v44  ;;  %5940 = vmatprep.mubr.f32.mxu0 %v16647_v38 }
 0x3c7   :  { %6099 = vmatpush1.msra.mxu0 %v21013_v14  ;;  %6248 = vmatpush1.msra.mxu1 %v16394_v8  ;;  %v4939_v51 = vpop.f32.mrf.mxu1  ;;  %v21015_v8 = vand.u32 4294901760, %v16390_v55  ;;  %v16829_v55 = vand.u32 4294901760, %v6370_v0  ;;  %v21020_v14 = vand.u32 4294901760, %v16456_v13 }
 0x3c8   :  { %6100 = vmatprep.subr.mxu0 %v20893_v44  ;;  %6249 = vmatprep.subr.mxu1 %v20893_v44 }
 0x3c9   :  { %6104 = vmatpush1.msra.mxu0 %v21014_v21  ;;  %6251 = vmatpush1.msra.mxu1 %v16407_v4  ;;  %v4723_v10 = vpop.f32.mrf.mxu0  ;;  %v16824_v4 = vsub.f32 %v6372_v20, %v16808_v33  ;;  %v6366_v21 = vld [vmem:[#allocation8 + $0x168] sm:$0xff] }
 0x3ca   :  { %5943 = vmatmul.mubr.f32.gmra.mxu0 %v16668_v47  ;;  %6105 = vmatprep.subr.mxu0 %v20893_v44  ;;  %v16812_v23 = vadd.f32 %v4930_v60, %v4723_v10  ;;  %v21018_v60 = vand.u32 4294901760, %v16429_v50  ;;  %v16859_v50 = vsub.f32 %v6369_v35, %v16839_v56  ;;  %v21021_v10 = vand.u32 4294901760, %v16473_v31 }
 0x3cb   :  { %6252 = vmatprep.subr.mxu1 %v20893_v44  ;;  %6109 = vmatpush1.msra.mxu0 %v21015_v8  ;;  %v4725_v57 = vpop.f32.mrf.mxu0  ;;  %v21022_v35 = vand.u32 4294901760, %v16486_v41  ;;  %v21023_v41 = vand.u32 4294901760, %v16498_v45 }
 0x3cc   :  { %6194 = vmatprep.mubr.f32.mxu0 %v16438_v53  ;;  %6254 = vmatpush1.msra.mxu1 %v16424_v29  ;;  %v16834_v29 = vsub.f32 %v6371_v18, %v16817_v42  ;;  %v20527_v13 = vand.u32 4294901760, %v16859_v50  ;;  %v6365_v57 = vld [vmem:[#allocation8 + $0x160] sm:$0xff] }
 0x3cd   :  { %6110 = vmatprep.subr.mxu0 %v20893_v44  ;;  %6255 = vmatprep.subr.mxu1 %v20893_v44 }
 0x3ce   :  { %6114 = vmatpush1.msra.mxu0 %v21016_v7  ;;  %6257 = vmatpush1.msra.mxu1 %v16431_v49  ;;  %v20531_v49 = vand.u32 4294901760, %v16824_v4  ;;  %v20529_v63 = vand.u32 4294901760, %v16834_v29  ;;  %v16897_v7 = vand.u32 4294901760, %v6366_v21 }
 0x3cf   :  { %6115 = vmatprep.subr.mxu0 %v20893_v44  ;;  %6258 = vmatprep.subr.mxu1 %v20893_v44  ;;  %v4738_v53 = vpop.f32.mrf.mxu0 }
 0x3d0   :  { %6119 = vmatpush1.msra.mxu0 %v21017_v24  ;;  %6260 = vmatpush1.msra.mxu1 %v16450_v2  ;;  %v16841_v54 = vadd.f32 %v4937_v36, %v4738_v53  ;;  %v16850_v2 = vsub.f32 %v6370_v0, %v16829_v55  ;;  %v21019_v36 = vand.u32 4294901760, %v16448_v9  ;;  %v6530_v20 = vsub.f32 %v16824_v4, %v20531_v49 }
 0x3d1   :  { %6120 = vmatprep.subr.mxu0 %v20893_v44  ;;  %6261 = vmatprep.subr.mxu1 %v20893_v44  ;;  %v4740_v27 = vpop.f32.mrf.mxu0  ;;  %v4944_v48 = vpop.f32.mrf.mxu1  ;;  %v16872_v9 = vand.u32 4294901760, %v6367_v3  ;;  %v6537_v18 = vsub.f32 %v16834_v29, %v20529_v63 }
 0x3d2   :  { %6124 = vmatpush1.msra.mxu0 %v21018_v60  ;;  %6263 = vmatpush1.msra.mxu1 %v16462_v28  ;;  %v16861_v28 = vand.u32 4294901760, %v6368_v62  ;;  %v6531_v0 = vand.u32 4294901760, %v6530_v20  ;;  %v6364_v27 = vld [vmem:[#allocation8 + $0x158] sm:$0xff]  ;;  %v6363_v20 = vld [vmem:[#allocation8 + $0x150] sm:$0xff] }
 0x3d3   :  { %6125 = vmatprep.subr.mxu0 %v20893_v44  ;;  %6264 = vmatprep.subr.mxu1 %v20893_v44  ;;  %v4946_v12 = vpop.f32.mrf.mxu1  ;;  %v16895_v31 = vsub.f32 %v6367_v3, %v16872_v9  ;;  %v6538_v53 = vand.u32 4294901760, %v6537_v18  ;;  %v21024_v18 = vand.u32 4294901760, %v16514_v32  ;;  %v21025_v32 = vand.u32 4294901760, %v16526_v52 }
 0x3d4   :  { %6129 = vmatpush1.msra.mxu0 %v21019_v36  ;;  %6266 = vmatpush1.msra.mxu1 %v16475_v46  ;;  %v20528_v46 = vand.u32 4294901760, %v16850_v2  ;;  %v16917_v36 = vsub.f32 %v6366_v21, %v16897_v7 }
 0x3d5   :  { %6130 = vmatprep.subr.mxu0 %v20893_v44  ;;  %6267 = vmatprep.subr.mxu1 %v20893_v44  ;;  %v20523_v12 = vand.u32 4294901760, %v16895_v31 }
 0x3d6   :  { %6134 = vmatpush1.msra.mxu0 %v21020_v14  ;;  %6269 = vmatpush1.msra.mxu1 %v16488_v6  ;;  %v4951_v51 = vpop.f32.mrf.mxu1  ;;  %v16884_v6 = vsub.f32 %v6368_v62, %v16861_v28  ;;  %v16908_v62 = vand.u32 4294901760, %v6365_v57 }
 0x3d7   :  { %6135 = vmatprep.subr.mxu0 %v20893_v44  ;;  %6298 = vmatprep.subr.mxu1 %v20893_v44 }
 0x3d8   :  { %6139 = vmatpush1.msra.mxu0 %v21021_v10  ;;  %6300 = vmatpush2.msra.mxu1 %v16500_v26  ;;  %v4953_v8 = vpop.f32.mrf.mxu1  ;;  %v6544_v26 = vsub.f32 %v16850_v2, %v20528_v46  ;;  %v20525_v24 = vand.u32 4294901760, %v16884_v6  ;;  %v16921_v10 = vand.u32 4294901760, %v6364_v27  ;;  %v16929_v21 = vsub.f32 %v6365_v57, %v16908_v62 }
 0x3d9   :  { %6140 = vmatprep.subr.mxu0 %v20893_v44  ;;  %6301 = vmatprep.subr.mxu1 %v20893_v44  ;;  %v6375_v57 = vsel %vm4399_vm3, %v16114_v16, 0 }
 0x3da   :  { %6144 = vmatpush1.msra.mxu0 %v21022_v35  ;;  %6303 = vmatpush2.msra.mxu1 %v16516_v5  ;;  %v6551_v5 = vsub.f32 %v16859_v50, %v20527_v13  ;;  %v6545_v45 = vand.u32 4294901760, %v6544_v26  ;;  %v6558_v8 = vsub.f32 %v16884_v6, %v20525_v24  ;;  %v6362_v35 = vld [vmem:[#allocation8 + $0x148] sm:$0xff]  ;;  %v16948_v52 = vsub.f32 %v6364_v27, %v16921_v10 }
 0x3db   :  { %6145 = vmatprep.subr.mxu0 %v20893_v44  ;;  %6307 = vmatmul.mubr.f32.vlgmr.msra.gmra.mxu1 %v16568_v19  ;;  %v16957_v16 = vand.u32 4294901760, %v6375_v57  ;;  %v6358_v24 = vld [vmem:[#allocation8 + $0x128] sm:$0xff] }
 0x3dc   :  { %6526 = vmatprep.subr.mxu1 %v20893_v44  ;;  %6149 = vmatpush1.msra.mxu0 %v21023_v41  ;;  %v4753_v60 = vpop.f32.mrf.mxu0  ;;  %v20524_v41 = vand.u32 4294901760, %v16917_v36  ;;  %v17006_v63 = vand.u32 4294901760, %v6358_v24 }
 0x3dd   :  { %6312 = vmatprep.mubr.f32.mxu1 %v16571_v61  ;;  %6532 = vmatpush1.msra.mxu1 %v6531_v0  ;;  %v16911_v3 = vadd.f32 %v4944_v48, %v4753_v60  ;;  %v6552_v48 = vand.u32 4294901760, %v6551_v5  ;;  %v16934_v0 = vand.u32 4294901760, %v6363_v20  ;;  %v6361_v5 = vld [vmem:[#allocation8 + $0x140] sm:$0xff] }
 0x3de   :  { %6150 = vmatprep.subr.mxu0 %v20893_v44  ;;  %6533 = vmatprep.subr.mxu1 %v20893_v44  ;;  %v4755_v14 = vpop.f32.mrf.mxu0  ;;  %v16962_v27 = vand.u32 4294901760, %v6361_v5 }
 0x3df   :  { %6154 = vmatpush1.msra.mxu0 %v21024_v18  ;;  %6539 = vmatpush1.msra.mxu1 %v6538_v53  ;;  %v6565_v53 = vsub.f32 %v16895_v31, %v20523_v12  ;;  %v21026_v14 = vand.u32 4294901760, %v16536_v43  ;;  %v6559_v18 = vand.u32 4294901760, %v6558_v8  ;;  %v16953_v12 = vand.u32 4294901760, %v6362_v35 }
 0x3e0   :  { %6183 = vmatprep.subr.mxu0 %v20893_v44  ;;  %6314 = vmatmul.mubr.f32.gmra.mxu1 %v16586_v25 }
 0x3e1   :  { %6540 = vmatprep.subr.mxu1 %v20893_v44  ;;  %6187 = vmatpush2.msra.mxu0 %v21025_v32  ;;  %v4768_v26 = vpop.f32.mrf.mxu0  ;;  %v20526_v32 = vand.u32 4294901760, %v16929_v21  ;;  %v6566_v43 = vand.u32 4294901760, %v6565_v53  ;;  %v16977_v53 = vsub.f32 %v6362_v35, %v16953_v12 }
 0x3e2   :  { %6319 = vmatprep.mubr.f32.mxu1 %v16594_v30  ;;  %6546 = vmatpush1.msra.mxu1 %v6545_v45  ;;  %v16943_v60 = vadd.f32 %v4951_v51, %v4768_v26  ;;  %v16960_v51 = vsub.f32 %v6363_v20, %v16934_v0  ;;  %v6360_v26 = vld [vmem:[#allocation8 + $0x138] sm:$0xff]  ;;  %v6359_v20 = vld [vmem:[#allocation8 + $0x130] sm:$0xff] }
 0x3e3   :  { %6188 = vmatprep.subr.mxu0 %v20893_v44  ;;  %6547 = vmatprep.subr.mxu1 %v20893_v44  ;;  %v4770_v45 = vpop.f32.mrf.mxu0  ;;  %v6579_v8 = vsub.f32 %v16929_v21, %v20526_v32  ;;  %v16991_v32 = vand.u32 4294901760, %v6359_v20  ;;  %v21027_v47 = vand.u32 4294901760, %v16977_v53 }
 0x3e4   :  { %6192 = vmatpush2.msra.mxu0 %v21026_v14  ;;  %6553 = vmatpush1.msra.mxu1 %v6552_v48  ;;  %v6572_v48 = vsub.f32 %v16917_v36, %v20524_v41  ;;  %v16979_v45 = vand.u32 4294901760, %v6360_v26  ;;  %v20534_v14 = vand.u32 4294901760, %v16960_v51  ;;  %v16985_v41 = vsub.f32 %v6375_v57, %v16957_v16  ;;  %v6357_v57 = vld [vmem:[#allocation8 + $0x120] sm:$0xff] }
 0x3e5   :  { %6196 = vmatmul.mubr.f32.vlgmr.msra.gmra.mxu0 %v16568_v19  ;;  %6321 = vmatmul.mubr.f32.gmra.mxu1 %v16617_v40  ;;  %v20530_v19 = vand.u32 4294901760, %v16948_v52 }
 0x3e6   :  { %6383 = vmatprep.subr.mxu0 %v20893_v44  ;;  %6554 = vmatprep.subr.mxu1 %v20893_v44  ;;  %v6573_v35 = vand.u32 4294901760, %v6572_v48  ;;  %v17004_v48 = vsub.f32 %v6360_v26, %v16979_v45  ;;  %v17017_v26 = vsub.f32 %v6359_v20, %v16991_v32  ;;  %v17029_v20 = vsub.f32 %v6358_v24, %v17006_v63 }
 0x3e7   :  { %6201 = vmatprep.mubr.f32.mxu0 %v16571_v61  ;;  %6326 = vmatprep.mubr.f32.mxu1 %v16622_v37  ;;  %v6586_v13 = vsub.f32 %v16948_v52, %v20530_v19  ;;  %v6593_v19 = vsub.f32 %v16960_v51, %v20534_v14  ;;  %v6373_v14 = vld [vmem:[#allocation8 + $0x1a0] sm:$0xff] }
 0x3e8   :  { %6385 = vmatpush1.msra.mxu0 %v16808_v33  ;;  %6560 = vmatpush1.msra.mxu1 %v6559_v18  ;;  %v16988_v18 = vsub.f32 %v6361_v5, %v16962_v27  ;;  %v6580_v5 = vand.u32 4294901760, %v6579_v8  ;;  %v6374_v8 = vld [vmem:[#allocation8 + $0x1a8] sm:$0xff]  ;;  %v21032_v15 = vand.u32 4294901760, %v17029_v20 }
 0x3e9   :  { %6386 = vmatprep.subr.mxu0 %v20893_v44  ;;  %6561 = vmatprep.subr.mxu1 %v20893_v44  ;;  %v17031_v49 = vand.u32 4294901760, %v6374_v8 }
 0x3ea   :  { %6388 = vmatpush1.msra.mxu0 %v16817_v42  ;;  %6567 = vmatpush1.msra.mxu1 %v6566_v43  ;;  %v17019_v43 = vand.u32 4294901760, %v6357_v57 }
 0x3eb   :  { %6203 = vmatmul.mubr.f32.gmra.mxu0 %v16586_v25  ;;  %6328 = vmatmul.mubr.f32.gmra.mxu1 %v16644_v58  ;;  %v16998_v46 = vpop.f32.mrf.mxu1 }
 0x3ec   :  { %6389 = vmatprep.subr.mxu0 %v20893_v44  ;;  %6568 = vmatprep.subr.mxu1 %v20893_v44  ;;  %v17047_v59 = vsub.f32 %v6357_v57, %v17019_v43  ;;  %v17059_v57 = vsub.f32 %v6374_v8, %v17031_v49 }
 0x3ed   :  { %6208 = vmatprep.mubr.f32.mxu0 %v16594_v30  ;;  %6391 = vmatpush1.msra.mxu0 %v16829_v55  ;;  %v5184_v38 = vpop.f32.mrf.mxu1  ;;  %v6587_v30 = vand.u32 4294901760, %v6586_v13  ;;  %v6594_v13 = vand.u32 4294901760, %v6593_v19 }
 0x3ee   :  { %6574 = vmatpush1.msra.mxu1 %v6573_v35  ;;  %6681 = vmatprep.mubr.f32.mxu1 %v16957_v16  ;;  %v6600_v38 = vsub.f32 %v16977_v53, %v21027_v47  ;;  %v21029_v47 = vand.u32 4294901760, %v16988_v18  ;;  %v20543_v24 = vand.u32 4294901760, %v17059_v57 }
 0x3ef   :  { %6392 = vmatprep.subr.mxu0 %v20893_v44  ;;  %6575 = vmatprep.subr.mxu1 %v20893_v44 }
 0x3f0   :  { %6394 = vmatpush1.msra.mxu0 %v16839_v56  ;;  %6581 = vmatpush1.msra.mxu1 %v6580_v5  ;;  %v17033_v34 = vpop.f32.mrf.mxu1  ;;  %v21028_v5 = vand.u32 4294901760, %v16985_v41  ;;  %v6607_v35 = vsub.f32 %v16988_v18, %v21029_v47  ;;  %v21030_v47 = vand.u32 4294901760, %v17004_v48 }
 0x3f1   :  { %6210 = vmatmul.mubr.f32.gmra.mxu0 %v16617_v40  ;;  %6395 = vmatprep.subr.mxu0 %v20893_v44  ;;  %v17049_v40 = vand.u32 4294901760, %v6373_v14 }
 0x3f2   :  { %v6468_v22 = vsub.f32 %v16985_v41, %v21028_v5  ;;  %6582 = vmatprep.subr.mxu1 %v20893_v44  ;;  %6215 = vmatprep.mubr.f32.mxu0 %v16622_v37  ;;  %v5195_v19 = vpop.f32.mrf.mxu1  ;;  %v6601_v5 = vand.u32 4294901760, %v6600_v38  ;;  %v6614_v17 = vsub.f32 %v17004_v48, %v21030_v47  ;;  %v6608_v11 = vand.u32 4294901760, %v6607_v35 }
 0x3f3   :  { %6397 = vmatpush1.msra.mxu0 %v16861_v28  ;;  %6588 = vmatpush1.msra.mxu1 %v6587_v30  ;;  %v21031_v38 = vand.u32 4294901760, %v17017_v26  ;;  %v17071_v8 = vsub.f32 %v6373_v14, %v17049_v40 }
 0x3f4   :  { %6398 = vmatprep.subr.mxu0 %v20893_v44  ;;  %6589 = vmatprep.subr.mxu1 %v20893_v44  ;;  %v6469_v19 = vand.u32 4294901760, %v6468_v22  ;;  %v6615_v1 = vand.u32 4294901760, %v6614_v17 }
 0x3f5   :  { %6400 = vmatpush1.msra.mxu0 %v16872_v9  ;;  %6595 = vmatpush1.msra.mxu1 %v6594_v13  ;;  %v5061_v30 = vpop.f32.mrf.mxu0  ;;  %v17062_v39 = vpop.f32.mrf.mxu1  ;;  %v6621_v47 = vsub.f32 %v17017_v26, %v21031_v38  ;;  %v6628_v38 = vsub.f32 %v17029_v20, %v21032_v15 }
 0x3f6   :  { %6217 = vmatmul.mubr.f32.gmra.mxu0 %v16644_v58  ;;  %6401 = vmatprep.subr.mxu0 %v20893_v44  ;;  %v5062_v13 = vadd.f32 %v5061_v30, %v16812_v23 }
 0x3f7   :  { %6596 = vmatprep.subr.mxu1 %v20893_v44  ;;  %6403 = vmatpush1.msra.mxu0 %v16897_v7  ;;  %v5063_v22 = vpop.f32.mrf.mxu0  ;;  %v5206_v35 = vpop.f32.mrf.mxu1  ;;  %v6622_v23 = vand.u32 4294901760, %v6621_v47  ;;  %v6629_v30 = vand.u32 4294901760, %v6628_v38  ;;  %v21034_v38 = vld [vmem:[#allocation46_spill] sm:$0xff] }
 0x3f8   :  { %6470 = vmatprep.mubr.f32.mxu0 %v6469_v19  ;;  %6602 = vmatpush1.msra.mxu1 %v6601_v5  ;;  %v17081_v14 = vadd.f32 %v16998_v46, %v5062_v13  ;;  %v21033_v5 = vand.u32 4294901760, %v17047_v59  ;;  %v20544_v19 = vand.u32 4294901760, %v17071_v8 }
 0x3f9   :  { %6404 = vmatprep.subr.mxu0 %v20893_v44  ;;  %6603 = vmatprep.subr.mxu1 %v20893_v44 }
 0x3fa   :  { %6406 = vmatpush1.msra.mxu0 %v16908_v62  ;;  %6609 = vmatpush1.msra.mxu1 %v6608_v11  ;;  %v6635_v17 = vsub.f32 %v17047_v59, %v21033_v5  ;;  %v6670_v11 = vsub.f32 %v17059_v57, %v20543_v24  ;;  %v6377_v5 = vsel %vm4399_vm3, %v21034_v38, 0 }
 0x3fb   :  { %6407 = vmatprep.subr.mxu0 %v20893_v44  ;;  %6610 = vmatprep.subr.mxu1 %v20893_v44  ;;  %v5070_v15 = vpop.f32.mrf.mxu0  ;;  %v5215_v46 = vpop.f32.mrf.mxu1 }
 0x3fc   :  { %6409 = vmatpush1.msra.mxu0 %v16921_v10  ;;  %6616 = vmatpush1.msra.mxu1 %v6615_v1  ;;  %v5071_v47 = vadd.f32 %v5070_v15, %v16841_v54  ;;  %v6636_v35 = vand.u32 4294901760, %v6635_v17  ;;  %v6677_v1 = vsub.f32 %v17071_v8, %v20544_v19  ;;  %v21035_v54 = vld [vmem:[#allocation31_spill] sm:$0xff]  ;;  %v17116_v17 = vand.u32 4294901760, %v6377_v5 }
 0x3fd   :  { %6410 = vmatprep.subr.mxu0 %v20893_v44  ;;  %6617 = vmatprep.subr.mxu1 %v20893_v44  ;;  %v5072_v13 = vpop.f32.mrf.mxu0  ;;  %v5217_v22 = vpop.f32.mrf.mxu1  ;;  %v17111_v15 = vand.u32 4294901760, %v21035_v54 }
 0x3fe   :  { %6412 = vmatpush1.msra.mxu0 %v16934_v0  ;;  %6623 = vmatpush1.msra.mxu1 %v6622_v23  ;;  %v17106_v24 = vadd.f32 %v17033_v34, %v5071_v47  ;;  %v6671_v23 = vand.u32 4294901760, %v6670_v11  ;;  %v6678_v34 = vand.u32 4294901760, %v6677_v1  ;;  %v21036_v22 = vld [vmem:[#allocation47_spill] sm:$0xff] }
 0x3ff   :  { %6413 = vmatprep.subr.mxu0 %v20893_v44  ;;  %6624 = vmatprep.subr.mxu1 %v20893_v44  ;;  %v6379_v38 = vsel %vm4399_vm3, %v21036_v22, 0  ;;  %v21038_v22 = vld [vmem:[#allocation50_spill] sm:$0xff] }
 0x400   :  { %6415 = vmatpush1.msra.mxu0 %v16953_v12  ;;  %6630 = vmatpush1.msra.mxu1 %v6629_v30  ;;  %v17124_v30 = vsub.f32 %v21035_v54, %v17111_v15  ;;  %v17138_v54 = vsub.f32 %v6377_v5, %v17116_v17  ;;  %v6381_v19 = vsel %vm4399_vm3, %v21038_v22, 0 }
 0x401   :  { %6416 = vmatprep.subr.mxu0 %v20893_v44  ;;  %6631 = vmatprep.subr.mxu1 %v20893_v44  ;;  %v5079_v13 = vpop.f32.mrf.mxu0 }
 0x402   :  { %6418 = vmatpush1.msra.mxu0 %v16962_v27  ;;  %6637 = vmatpush1.msra.mxu1 %v6636_v35  ;;  %v5080_v47 = vadd.f32 %v5079_v13, %v16911_v3  ;;  %v21037_v3 = vld [vmem:[#allocation44_spill] sm:$0xff] }
 0x403   :  { %6419 = vmatprep.subr.mxu0 %v20893_v44  ;;  %6666 = vmatprep.subr.mxu1 %v20893_v44  ;;  %v5081_v11 = vpop.f32.mrf.mxu0  ;;  %v17135_v1 = vand.u32 4294901760, %v21037_v3 }
 0x404   :  { %6421 = vmatpush1.msra.mxu0 %v16979_v45  ;;  %6672 = vmatpush2.msra.mxu1 %v6671_v23  ;;  %v17130_v35 = vadd.f32 %v17062_v39, %v5080_v47  ;;  %v17143_v39 = vand.u32 4294901760, %v6379_v38 }
 0x405   :  { %6422 = vmatprep.subr.mxu0 %v20893_v44  ;;  %6673 = vmatprep.subr.mxu1 %v20893_v44 }
 0x406   :  { %6424 = vmatpush1.msra.mxu0 %v16991_v32  ;;  %6679 = vmatpush2.msra.mxu1 %v6678_v34  ;;  %v5088_v23 = vpop.f32.mrf.mxu0  ;;  %v17153_v34 = vsub.f32 %v21037_v3, %v17135_v1  ;;  %v17171_v11 = vsub.f32 %v6379_v38, %v17143_v39 }
 0x407   :  { %6425 = vmatprep.subr.mxu0 %v20893_v44  ;;  %6683 = vmatmul.mubr.f32.vlgmr.msra.gmra.mxu1 %v17111_v15  ;;  %v5089_v47 = vadd.f32 %v5088_v23, %v16943_v60  ;;  %v21039_v60 = vand.u32 4294901760, %v17124_v30  ;;  %v21040_v23 = vld [vmem:[#allocation48_spill] sm:$0xff] }
 0x408   :  { %6846 = vmatprep.subr.mxu1 %v20893_v44  ;;  %6427 = vmatpush1.msra.mxu0 %v17006_v63  ;;  %v5090_v5 = vpop.f32.mrf.mxu0  ;;  %v20553_v37 = vand.u32 4294901760, %v17171_v11  ;;  %v21045_v61 = vand.u32 4294901760, %v17153_v34 }
 0x409   :  { %6688 = vmatprep.mubr.f32.mxu1 %v17116_v17  ;;  %6848 = vmatpush1.msra.mxu1 %v16808_v33  ;;  %v17158_v13 = vadd.f32 %v5215_v46, %v5089_v47  ;;  %v6474_v3 = vsub.f32 %v17124_v30, %v21039_v60  ;;  %v17168_v5 = vand.u32 4294901760, %v21040_v23  ;;  %v17175_v46 = vand.u32 4294901760, %v6381_v19 }
 0x40a   :  { %6428 = vmatprep.subr.mxu0 %v20893_v44  ;;  %6849 = vmatprep.subr.mxu1 %v20893_v44  ;;  %v21043_v47 = vand.u32 4294901760, %v17138_v54 }
 0x40b   :  { %6430 = vmatpush1.msra.mxu0 %v17019_v43  ;;  %6851 = vmatpush1.msra.mxu1 %v16817_v42  ;;  %21041 = vst [vmem:[#allocation82_spill] sm:$0xff] %v17168_v5  ;;  %21042 = vst [vmem:[#allocation86_spill] sm:$0xff] %v17175_v46  ;;  %v6475_v38 = vand.u32 4294901760, %v6474_v3  ;;  %v17189_v58 = vsub.f32 %v21040_v23, %v17168_v5  ;;  %v17198_v25 = vsub.f32 %v6381_v19, %v17175_v46 }
 0x40c   :  { %6459 = vmatprep.subr.mxu0 %v20893_v44  ;;  %6690 = vmatmul.mubr.f32.gmra.mxu1 %v17135_v1  ;;  %v6483_v22 = vsub.f32 %v17138_v54, %v21043_v47  ;;  %v21044_v47 = vld [vmem:[#allocation52_spill] sm:$0xff]  ;;  %v6489_v23 = vsub.f32 %v17153_v34, %v21045_v61  ;;  %v6498_v19 = vsub.f32 %v17171_v11, %v20553_v37 }
 0x40d   :  { %6852 = vmatprep.subr.mxu1 %v20893_v44  ;;  %6461 = vmatpush2.msra.mxu0 %v17031_v49  ;;  %v17195_v60 = vand.u32 4294901760, %v21044_v47 }
 0x40e   :  { %6695 = vmatprep.mubr.f32.mxu1 %v17143_v39  ;;  %6854 = vmatpush1.msra.mxu1 %v16829_v55  ;;  %v6484_v3 = vand.u32 4294901760, %v6483_v22  ;;  %v20559_v22 = vand.u32 4294901760, %v17198_v25  ;;  %v6499_v37 = vand.u32 4294901760, %v6498_v19  ;;  %v21046_v19 = vand.u32 4294901760, %v16985_v41 }
 0x40f   :  { %6462 = vmatprep.subr.mxu0 %v20893_v44  ;;  %6855 = vmatprep.subr.mxu1 %v20893_v44  ;;  %v17215_v61 = vsub.f32 %v21044_v47, %v17195_v60 }
 0x410   :  { %6464 = vmatpush2.msra.mxu0 %v17049_v40  ;;  %6857 = vmatpush1.msra.mxu1 %v16839_v56 }
 0x411   :  { %6476 = vmatmul.mubr.f32.vlgmr.msra.gmra.mxu0 %v6475_v38  ;;  %6697 = vmatmul.mubr.f32.gmra.mxu1 %v17168_v5  ;;  %v20558_v38 = vand.u32 4294901760, %v17189_v58  ;;  %v20560_v5 = vand.u32 4294901760, %v17215_v61 }
 0x412   :  { %6709 = vmatprep.subr.mxu0 %v20893_v44  ;;  %6858 = vmatprep.subr.mxu1 %v20893_v44 }
 0x413   :  { %6485 = vmatprep.mubr.f32.mxu0 %v6484_v3  ;;  %6702 = vmatprep.mubr.f32.mxu1 %v17175_v46  ;;  %v6490_v3 = vand.u32 4294901760, %v6489_v23  ;;  %v6504_v47 = vsub.f32 %v17189_v58, %v20558_v38  ;;  %v6513_v23 = vsub.f32 %v17198_v25, %v20559_v22 }
 0x414   :  { %6712 = vmatpush1.msra.mxu0 %v16824_v4  ;;  %6860 = vmatpush1.msra.mxu1 %v16861_v28 }
 0x415   :  { %6713 = vmatprep.subr.mxu0 %v20893_v44  ;;  %6861 = vmatprep.subr.mxu1 %v20893_v44  ;;  %v6505_v38 = vand.u32 4294901760, %v6504_v47  ;;  %v6514_v22 = vand.u32 4294901760, %v6513_v23 }
 0x416   :  { %6716 = vmatpush1.msra.mxu0 %v16834_v29  ;;  %6863 = vmatpush1.msra.mxu1 %v16872_v9 }
 0x417   :  { %6491 = vmatmul.mubr.f32.gmra.mxu0 %v6490_v3  ;;  %6704 = vmatmul.mubr.f32.gmra.mxu1 %v17195_v60  ;;  %v5452_v46 = vpop.f32.mrf.mxu1 }
 0x418   :  { %6717 = vmatprep.subr.mxu0 %v20893_v44  ;;  %6864 = vmatprep.subr.mxu1 %v20893_v44 }
 0x419   :  { %6500 = vmatprep.mubr.f32.mxu0 %v6499_v37  ;;  %6720 = vmatpush1.msra.mxu0 %v16850_v2  ;;  %v5454_v3 = vpop.f32.mrf.mxu1  ;;  %v6519_v37 = vsub.f32 %v17215_v61, %v20560_v5 }
 0x41a   :  { %6866 = vmatpush1.msra.mxu1 %v16897_v7  ;;  %6931 = vmatprep.mubr.f32.mxu1 %v21046_v19 }
 0x41b   :  { %6721 = vmatprep.subr.mxu0 %v20893_v44  ;;  %6867 = vmatprep.subr.mxu1 %v20893_v44  ;;  %v6520_v47 = vand.u32 4294901760, %v6519_v37 }
 0x41c   :  { %6724 = vmatpush1.msra.mxu0 %v16859_v50  ;;  %6869 = vmatpush1.msra.mxu1 %v16908_v62  ;;  %v5459_v3 = vpop.f32.mrf.mxu1 }
 0x41d   :  { %6506 = vmatmul.mubr.f32.gmra.mxu0 %v6505_v38  ;;  %6725 = vmatprep.subr.mxu0 %v20893_v44 }
 0x41e   :  { %6870 = vmatprep.subr.mxu1 %v20893_v44  ;;  %6515 = vmatprep.mubr.f32.mxu0 %v6514_v22  ;;  %v5461_v19 = vpop.f32.mrf.mxu1 }
 0x41f   :  { %6728 = vmatpush1.msra.mxu0 %v16884_v6  ;;  %6872 = vmatpush1.msra.mxu1 %v16921_v10 }
 0x420   :  { %6729 = vmatprep.subr.mxu0 %v20893_v44  ;;  %6873 = vmatprep.subr.mxu1 %v20893_v44 }
 0x421   :  { %6732 = vmatpush1.msra.mxu0 %v16895_v31  ;;  %6875 = vmatpush1.msra.mxu1 %v16934_v0  ;;  %v5341_v38 = vpop.f32.mrf.mxu0  ;;  %v5466_v23 = vpop.f32.mrf.mxu1 }
 0x422   :  { %6521 = vmatmul.mubr.f32.gmra.mxu0 %v6520_v47  ;;  %6733 = vmatprep.subr.mxu0 %v20893_v44  ;;  %v5342_v22 = vadd.f32 %v5341_v38, %v17081_v14 }
 0x423   :  { %6876 = vmatprep.subr.mxu1 %v20893_v44  ;;  %6736 = vmatpush1.msra.mxu0 %v16917_v36  ;;  %v5343_v19 = vpop.f32.mrf.mxu0  ;;  %v5468_v5 = vpop.f32.mrf.mxu1 }
 0x424   :  { %6811 = vmatprep.mubr.f32.mxu0 %v16985_v41  ;;  %6878 = vmatpush1.msra.mxu1 %v16953_v12  ;;  %v17257_v37 = vadd.f32 %v5452_v46, %v5342_v22 }
 0x425   :  { %6737 = vmatprep.subr.mxu0 %v20893_v44  ;;  %6879 = vmatprep.subr.mxu1 %v20893_v44 }
 0x426   :  { %6740 = vmatpush1.msra.mxu0 %v16929_v21  ;;  %6881 = vmatpush1.msra.mxu1 %v16962_v27 }
 0x427   :  { %6741 = vmatprep.subr.mxu0 %v20893_v44  ;;  %6882 = vmatprep.subr.mxu1 %v20893_v44  ;;  %v5348_v14 = vpop.f32.mrf.mxu0  ;;  %v5473_v5 = vpop.f32.mrf.mxu1 }
 0x428   :  { %6744 = vmatpush1.msra.mxu0 %v16948_v52  ;;  %6884 = vmatpush1.msra.mxu1 %v16979_v45  ;;  %v5349_v41 = vadd.f32 %v5348_v14, %v17106_v24  ;;  %v21047_v14 = vand.u32 4294901760, %v17124_v30 }
 0x429   :  { %6745 = vmatprep.subr.mxu0 %v20893_v44  ;;  %6885 = vmatprep.subr.mxu1 %v20893_v44  ;;  %v5350_v46 = vpop.f32.mrf.mxu0  ;;  %v5475_v47 = vpop.f32.mrf.mxu1 }
 0x42a   :  { %6748 = vmatpush1.msra.mxu0 %v16960_v51  ;;  %6887 = vmatpush1.msra.mxu1 %v16991_v32  ;;  %v17272_v38 = vadd.f32 %v5459_v3, %v5349_v41  ;;  %v21048_v46 = vand.u32 4294901760, %v17138_v54 }
 0x42b   :  { %6749 = vmatprep.subr.mxu0 %v20893_v44  ;;  %6888 = vmatprep.subr.mxu1 %v20893_v44 }
 0x42c   :  { %6752 = vmatpush1.msra.mxu0 %v16977_v53  ;;  %6890 = vmatpush1.msra.mxu1 %v17006_v63 }
 0x42d   :  { %6753 = vmatprep.subr.mxu0 %v20893_v44  ;;  %6891 = vmatprep.subr.mxu1 %v20893_v44  ;;  %v5355_v24 = vpop.f32.mrf.mxu0 }
 0x42e   :  { %6756 = vmatpush1.msra.mxu0 %v16988_v18  ;;  %6893 = vmatpush1.msra.mxu1 %v17019_v43  ;;  %v5356_v3 = vadd.f32 %v5355_v24, %v17130_v35  ;;  %v7273_v24 = vld [vmem:[#allocation8 + $0x218] sm:$0xff] }
 0x42f   :  { %6757 = vmatprep.subr.mxu0 %v20893_v44  ;;  %6922 = vmatprep.subr.mxu1 %v20893_v44  ;;  %v5357_v22 = vpop.f32.mrf.mxu0 }
 0x430   :  { %6760 = vmatpush1.msra.mxu0 %v17004_v48  ;;  %6924 = vmatpush2.msra.mxu1 %v17031_v49  ;;  %v17287_v19 = vadd.f32 %v5466_v23, %v5356_v3 }
 0x431   :  { %6761 = vmatprep.subr.mxu0 %v20893_v44  ;;  %6925 = vmatprep.subr.mxu1 %v20893_v44 }
 0x432   :  { %6764 = vmatpush1.msra.mxu0 %v17017_v26  ;;  %6927 = vmatpush2.msra.mxu1 %v17049_v40  ;;  %v5362_v35 = vpop.f32.mrf.mxu0 }
 0x433   :  { %6765 = vmatprep.subr.mxu0 %v20893_v44  ;;  %6935 = vmatmul.mubr.f32.vlgmr.msra.gmra.mxu1 %v21047_v14  ;;  %v5363_v41 = vadd.f32 %v5362_v35, %v17158_v13  ;;  %v21049_v13 = vand.u32 4294901760, %v17153_v34  ;;  %v17387_v35 = vand.u32 4294901760, %v7273_v24 }
 0x434   :  { %7120 = vmatprep.subr.mxu1 %v20893_v44  ;;  %6768 = vmatpush1.msra.mxu0 %v17029_v20  ;;  %v5364_v23 = vpop.f32.mrf.mxu0 }
 0x435   :  { %6942 = vmatprep.mubr.f32.mxu1 %v21048_v46  ;;  %7122 = vmatpush1.msra.mxu1 %v16808_v33  ;;  %v17302_v47 = vadd.f32 %v5473_v5, %v5363_v41  ;;  %v21050_v33 = vand.u32 4294901760, %v17171_v11  ;;  %v21053_v5 = vand.u32 4294901760, %v16824_v4  ;;  %v21056_v4 = vand.u32 4294901760, %v16850_v2  ;;  %v7275_v2 = vld [vmem:[#allocation8 + $0x228] sm:$0xff] }
 0x436   :  { %6769 = vmatprep.subr.mxu0 %v20893_v44  ;;  %7123 = vmatprep.subr.mxu1 %v20893_v44  ;;  %v21062_v41 = vand.u32 4294901760, %v16948_v52  ;;  %v7271_v46 = vld [vmem:[#allocation8 + $0x208] sm:$0xff]  ;;  %v17409_v52 = vsub.f32 %v7273_v24, %v17387_v35 }
 0x437   :  { %6772 = vmatpush1.msra.mxu0 %v17047_v59  ;;  %7125 = vmatpush1.msra.mxu1 %v16817_v42  ;;  %v21051_v42 = vand.u32 4294901760, %v17189_v58 }
 0x438   :  { %6801 = vmatprep.subr.mxu0 %v20893_v44  ;;  %6946 = vmatmul.mubr.f32.gmra.mxu1 %v21049_v13 }
 0x439   :  { %7126 = vmatprep.subr.mxu1 %v20893_v44  ;;  %6804 = vmatpush2.msra.mxu0 %v17059_v57 }
 0x43a   :  { %6953 = vmatprep.mubr.f32.mxu1 %v21050_v33  ;;  %7128 = vmatpush1.msra.mxu1 %v16829_v55  ;;  %v21052_v55 = vand.u32 4294901760, %v17198_v25 }
 0x43b   :  { %6805 = vmatprep.subr.mxu0 %v20893_v44  ;;  %7129 = vmatprep.subr.mxu1 %v20893_v44 }
 0x43c   :  { %6808 = vmatpush2.msra.mxu0 %v17071_v8  ;;  %7131 = vmatpush1.msra.mxu1 %v16839_v56  ;;  %v21054_v56 = vand.u32 4294901760, %v16834_v29  ;;  %v21057_v29 = vand.u32 4294901760, %v16859_v50  ;;  %v7274_v50 = vld [vmem:[#allocation8 + $0x220] sm:$0xff] }
 0x43d   :  { %6814 = vmatmul.mubr.f32.vlgmr.msra.gmra.mxu0 %v17124_v30  ;;  %6957 = vmatmul.mubr.f32.gmra.mxu1 %v21051_v42  ;;  %v21055_v30 = vand.u32 4294901760, %v17215_v61  ;;  %v21063_v42 = vand.u32 4294901760, %v16960_v51 }
 0x43e   :  { %6973 = vmatprep.subr.mxu0 %v20893_v44  ;;  %7132 = vmatprep.subr.mxu1 %v20893_v44 }
 0x43f   :  { %6820 = vmatprep.mubr.f32.mxu0 %v17138_v54  ;;  %6964 = vmatprep.mubr.f32.mxu1 %v21052_v55  ;;  %v7270_v55 = vld [vmem:[#allocation8 + $0x200] sm:$0xff] }
 0x440   :  { %6977 = vmatpush1.msra.mxu0 %v21053_v5  ;;  %7134 = vmatpush1.msra.mxu1 %v16861_v28  ;;  %v21064_v5 = vand.u32 4294901760, %v16977_v53  ;;  %v17433_v53 = vand.u32 4294901760, %v7270_v55 }
 0x441   :  { %6978 = vmatprep.subr.mxu0 %v20893_v44  ;;  %7135 = vmatprep.subr.mxu1 %v20893_v44 }
 0x442   :  { %6982 = vmatpush1.msra.mxu0 %v21054_v56  ;;  %7137 = vmatpush1.msra.mxu1 %v16872_v9 }
 0x443   :  { %6823 = vmatmul.mubr.f32.gmra.mxu0 %v17153_v34  ;;  %6968 = vmatmul.mubr.f32.gmra.mxu1 %v21055_v30  ;;  %v5786_v54 = vpop.f32.mrf.mxu1  ;;  %v21058_v34 = vand.u32 4294901760, %v16884_v6 }
 0x444   :  { %6983 = vmatprep.subr.mxu0 %v20893_v44  ;;  %7138 = vmatprep.subr.mxu1 %v20893_v44 }
 0x445   :  { %6829 = vmatprep.mubr.f32.mxu0 %v17171_v11  ;;  %6987 = vmatpush1.msra.mxu0 %v21056_v4  ;;  %v5788_v28 = vpop.f32.mrf.mxu1 }
 0x446   :  { %7140 = vmatpush1.msra.mxu1 %v16897_v7  ;;  %7203 = vmatprep.mubr.f32.mxu1 %v16957_v16 }
 0x447   :  { %6988 = vmatprep.subr.mxu0 %v20893_v44  ;;  %7141 = vmatprep.subr.mxu1 %v20893_v44 }
 0x448   :  { %6992 = vmatpush1.msra.mxu0 %v21057_v29  ;;  %7143 = vmatpush1.msra.mxu1 %v16908_v62  ;;  %v5793_v9 = vpop.f32.mrf.mxu1  ;;  %v17363_v62 = vand.u32 4294901760, %v7275_v2  ;;  %v7269_v29 = vld [vmem:[#allocation8 + $0x1f8] sm:$0xff] }
 0x449   :  { %6832 = vmatmul.mubr.f32.gmra.mxu0 %v17189_v58  ;;  %6993 = vmatprep.subr.mxu0 %v20893_v44  ;;  %v21059_v58 = vand.u32 4294901760, %v16895_v31  ;;  %v17373_v31 = vand.u32 4294901760, %v7274_v50 }
 0x44a   :  { %7144 = vmatprep.subr.mxu1 %v20893_v44  ;;  %6838 = vmatprep.mubr.f32.mxu0 %v17198_v25  ;;  %v5795_v7 = vpop.f32.mrf.mxu1 }
 0x44b   :  { %6997 = vmatpush1.msra.mxu0 %v21058_v34  ;;  %7146 = vmatpush1.msra.mxu1 %v16921_v10  ;;  %v21060_v10 = vand.u32 4294901760, %v16917_v36  ;;  %v7272_v36 = vld [vmem:[#allocation8 + $0x210] sm:$0xff] }
 0x44c   :  { %6998 = vmatprep.subr.mxu0 %v20893_v44  ;;  %7147 = vmatprep.subr.mxu1 %v20893_v44  ;;  %v7268_v34 = vld [vmem:[#allocation8 + $0x1f0] sm:$0xff] }
 0x44d   :  { %7002 = vmatpush1.msra.mxu0 %v21059_v58  ;;  %7149 = vmatpush1.msra.mxu1 %v16934_v0  ;;  %v5579_v25 = vpop.f32.mrf.mxu0  ;;  %v17365_v11 = vpop.f32.mrf.mxu1  ;;  %v17462_v58 = vand.u32 4294901760, %v7269_v29  ;;  %v17474_v24 = vand.u32 4294901760, %v7268_v34 }
 0x44e   :  { %6841 = vmatmul.mubr.f32.gmra.mxu0 %v17215_v61  ;;  %7003 = vmatprep.subr.mxu0 %v20893_v44  ;;  %v5580_v6 = vadd.f32 %v5579_v25, %v17257_v37  ;;  %v17382_v61 = vsub.f32 %v7275_v2, %v17363_v62  ;;  %v21061_v37 = vand.u32 4294901760, %v16929_v21  ;;  %v17399_v21 = vand.u32 4294901760, %v7272_v36 }
 0x44f   :  { %7150 = vmatprep.subr.mxu1 %v20893_v44  ;;  %7007 = vmatpush1.msra.mxu0 %v21060_v10  ;;  %v5581_v0 = vpop.f32.mrf.mxu0  ;;  %v5802_v3 = vpop.f32.mrf.mxu1 }
 0x450   :  { %7092 = vmatprep.mubr.f32.mxu0 %v16957_v16  ;;  %7152 = vmatpush1.msra.mxu1 %v16953_v12  ;;  %v17377_v22 = vadd.f32 %v5786_v54, %v5580_v6  ;;  %v17392_v12 = vsub.f32 %v7274_v50, %v17373_v31  ;;  %v20578_v23 = vand.u32 4294901760, %v17382_v61  ;;  %v17420_v51 = vsub.f32 %v7272_v36, %v17399_v21  ;;  %v7267_v0 = vld [vmem:[#allocation8 + $0x1e8] sm:$0xff] }
 0x451   :  { %7008 = vmatprep.subr.mxu0 %v20893_v44  ;;  %7153 = vmatprep.subr.mxu1 %v20893_v44  ;;  %v21065_v54 = vand.u32 4294901760, %v16988_v18  ;;  %v21066_v18 = vand.u32 4294901760, %v17004_v48  ;;  %v21067_v50 = vand.u32 4294901760, %v17017_v26  ;;  %v17460_v48 = vsub.f32 %v7270_v55, %v17433_v53 }
 0x452   :  { %7012 = vmatpush1.msra.mxu0 %v21061_v37  ;;  %7155 = vmatpush1.msra.mxu1 %v16962_v27  ;;  %v7433_v56 = vsub.f32 %v17382_v61, %v20578_v23  ;;  %v17484_v37 = vsub.f32 %v7269_v29, %v17462_v58 }
 0x453   :  { %7013 = vmatprep.subr.mxu0 %v20893_v44  ;;  %7156 = vmatprep.subr.mxu1 %v20893_v44  ;;  %v5594_v16 = vpop.f32.mrf.mxu0  ;;  %v17394_v14 = vpop.f32.mrf.mxu1  ;;  %v20567_v36 = vand.u32 4294901760, %v17460_v48 }
 0x454   :  { %7017 = vmatpush1.msra.mxu0 %v21062_v41  ;;  %7158 = vmatpush1.msra.mxu1 %v16979_v45  ;;  %v5595_v27 = vadd.f32 %v5594_v16, %v17272_v38  ;;  %v20577_v38 = vand.u32 4294901760, %v17392_v12  ;;  %v7434_v7 = vand.u32 4294901760, %v7433_v56  ;;  %v7266_v16 = vld [vmem:[#allocation8 + $0x1e0] sm:$0xff]  ;;  %v21069_v41 = vand.u32 4294901760, %v17047_v59  ;;  %v21071_v56 = vld [vmem:[#allocation54_spill] sm:$0xff] }
 0x455   :  { %7018 = vmatprep.subr.mxu0 %v20893_v44  ;;  %7159 = vmatprep.subr.mxu1 %v20893_v44  ;;  %v5596_v13 = vpop.f32.mrf.mxu0  ;;  %v5809_v33 = vpop.f32.mrf.mxu1  ;;  %v21070_v59 = vand.u32 4294901760, %v17059_v57  ;;  %v7468_v55 = vsub.f32 %v17460_v48, %v20567_v36 }
 0x456   :  { %7022 = vmatpush1.msra.mxu0 %v21063_v42  ;;  %7161 = vmatpush1.msra.mxu1 %v16991_v32  ;;  %v17411_v45 = vadd.f32 %v5793_v9, %v5595_v27  ;;  %v17422_v32 = vand.u32 4294901760, %v7271_v46  ;;  %v7440_v28 = vsub.f32 %v17392_v12, %v20577_v38  ;;  %v17488_v27 = vand.u32 4294901760, %v7267_v0  ;;  %v7265_v42 = vld [vmem:[#allocation8 + $0x1d8] sm:$0xff] }
 0x457   :  { %7023 = vmatprep.subr.mxu0 %v20893_v44  ;;  %7162 = vmatprep.subr.mxu1 %v20893_v44  ;;  %v17496_v13 = vsub.f32 %v7268_v34, %v17474_v24  ;;  %v17501_v33 = vand.u32 4294901760, %v7266_v16 }
 0x458   :  { %7027 = vmatpush1.msra.mxu0 %v21064_v5  ;;  %7164 = vmatpush1.msra.mxu1 %v17006_v63  ;;  %v20572_v63 = vand.u32 4294901760, %v17409_v52  ;;  %v17446_v2 = vsub.f32 %v7271_v46, %v17422_v32  ;;  %v20565_v5 = vand.u32 4294901760, %v17484_v37  ;;  %v17513_v57 = vsub.f32 %v7267_v0, %v17488_v27 }
 0x459   :  { %7028 = vmatprep.subr.mxu0 %v20893_v44  ;;  %7165 = vmatprep.subr.mxu1 %v20893_v44  ;;  %v5609_v30 = vpop.f32.mrf.mxu0  ;;  %v20563_v29 = vand.u32 4294901760, %v17496_v13  ;;  %v17525_v34 = vsub.f32 %v7266_v16, %v17501_v33  ;;  %v7261_v16 = vld [vmem:[#allocation8 + $0x1b8] sm:$0xff] }
 0x45a   :  { %7032 = vmatpush1.msra.mxu0 %v21065_v54  ;;  %7167 = vmatpush1.msra.mxu1 %v17019_v43  ;;  %v5610_v4 = vadd.f32 %v5609_v30, %v17287_v19  ;;  %v20569_v43 = vand.u32 4294901760, %v17420_v51  ;;  %v20568_v10 = vand.u32 4294901760, %v17446_v2  ;;  %v7278_v30 = vsel %vm4399_vm3, %v21071_v56, 0  ;;  %v7264_v54 = vld [vmem:[#allocation8 + $0x1d0] sm:$0xff] }
 0x45b   :  { %7033 = vmatprep.subr.mxu0 %v20893_v44  ;;  %7196 = vmatprep.subr.mxu1 %v20893_v44  ;;  %v5611_v9 = vpop.f32.mrf.mxu0 }
 0x45c   :  { %7037 = vmatpush1.msra.mxu0 %v21066_v18  ;;  %7198 = vmatpush2.msra.mxu1 %v17031_v49  ;;  %v17449_v19 = vadd.f32 %v17365_v11, %v5610_v4  ;;  %v7447_v49 = vsub.f32 %v17409_v52, %v20572_v63  ;;  %v7441_v11 = vand.u32 4294901760, %v7440_v28  ;;  %v7454_v6 = vsub.f32 %v17420_v51, %v20569_v43  ;;  %v21073_v18 = vld [vmem:[#allocation82_spill] sm:$0xff] }
 0x45d   :  { %7038 = vmatprep.subr.mxu0 %v20893_v44  ;;  %7199 = vmatprep.subr.mxu1 %v20893_v44  ;;  %v7461_v46 = vsub.f32 %v17446_v2, %v20568_v10  ;;  %v21072_v4 = vand.u32 4294901760, %v17071_v8  ;;  %v17518_v9 = vand.u32 4294901760, %v7265_v42  ;;  %v7469_v8 = vand.u32 4294901760, %v7468_v55 }
 0x45e   :  { %7042 = vmatpush1.msra.mxu0 %v21067_v50  ;;  %7201 = vmatpush2.msra.mxu1 %v17049_v40  ;;  %v5624_v25 = vpop.f32.mrf.mxu0  ;;  %v21068_v40 = vand.u32 4294901760, %v17029_v20  ;;  %v7448_v20 = vand.u32 4294901760, %v7447_v49  ;;  %v17527_v50 = vand.u32 4294901760, %v7264_v54  ;;  %v7263_v49 = vld [vmem:[#allocation8 + $0x1c8] sm:$0xff] }
 0x45f   :  { %7043 = vmatprep.subr.mxu0 %v20893_v44  ;;  %7205 = vmatmul.mubr.f32.vlgmr.msra.gmra.mxu1 %v17111_v15  ;;  %v5625_v26 = vadd.f32 %v5624_v25, %v17302_v47  ;;  %v7462_v28 = vand.u32 4294901760, %v7461_v46  ;;  %v7475_v25 = vsub.f32 %v17484_v37, %v20565_v5  ;;  %v17544_v0 = vand.u32 4294901760, %v7263_v49 }
 0x460   :  { %7429 = vmatprep.subr.mxu1 %v20893_v44  ;;  %7047 = vmatpush1.msra.mxu0 %v21068_v40  ;;  %v5626_v3 = vpop.f32.mrf.mxu0  ;;  %v7482_v40 = vsub.f32 %v17496_v13, %v20563_v29 }
 0x461   :  { %7210 = vmatprep.mubr.f32.mxu1 %v17116_v17  ;;  %7435 = vmatpush1.msra.mxu1 %v7434_v7  ;;  %v17478_v47 = vadd.f32 %v17394_v14, %v5625_v26  ;;  %v7455_v14 = vand.u32 4294901760, %v7454_v6  ;;  %v17522_v7 = vand.u32 4294901760, %v7278_v30  ;;  %v7262_v26 = vld [vmem:[#allocation8 + $0x1c0] sm:$0xff]  ;;  %v17542_v6 = vsub.f32 %v7265_v42, %v17518_v9 }
 0x462   :  { %7048 = vmatprep.subr.mxu0 %v20893_v44  ;;  %7436 = vmatprep.subr.mxu1 %v20893_v44  ;;  %v7483_v55 = vand.u32 4294901760, %v7482_v40 }
 0x463   :  { %7052 = vmatpush1.msra.mxu0 %v21069_v41  ;;  %7442 = vmatpush1.msra.mxu1 %v7441_v11  ;;  %v20562_v11 = vand.u32 4294901760, %v17513_v57  ;;  %v17550_v3 = vsub.f32 %v7278_v30, %v17522_v7  ;;  %v7476_v41 = vand.u32 4294901760, %v7475_v25  ;;  %v20564_v56 = vand.u32 4294901760, %v17542_v6 }
 0x464   :  { %7081 = vmatprep.subr.mxu0 %v20893_v44  ;;  %7212 = vmatmul.mubr.f32.gmra.mxu1 %v17135_v1  ;;  %v17569_v30 = vsub.f32 %v7263_v49, %v17544_v0 }
 0x465   :  { %7443 = vmatprep.subr.mxu1 %v20893_v44  ;;  %7085 = vmatpush2.msra.mxu0 %v21070_v59  ;;  %v7489_v46 = vsub.f32 %v17513_v57, %v20562_v11  ;;  %v7260_v59 = vld [vmem:[#allocation8 + $0x1b0] sm:$0xff] }
 0x466   :  { %7217 = vmatprep.mubr.f32.mxu1 %v17143_v39  ;;  %7449 = vmatpush1.msra.mxu1 %v7448_v20  ;;  %v17553_v20 = vsub.f32 %v7264_v54, %v17527_v50  ;;  %v17584_v40 = vand.u32 4294901760, %v7260_v59 }
 0x467   :  { %7086 = vmatprep.subr.mxu0 %v20893_v44  ;;  %7450 = vmatprep.subr.mxu1 %v20893_v44 }
 0x468   :  { %7090 = vmatpush2.msra.mxu0 %v21072_v4  ;;  %7456 = vmatpush1.msra.mxu1 %v7455_v14  ;;  %v17556_v14 = vand.u32 4294901760, %v7262_v26  ;;  %v20581_v4 = vand.u32 4294901760, %v17550_v3  ;;  %v17612_v5 = vsub.f32 %v7260_v59, %v17584_v40 }
 0x469   :  { %7094 = vmatmul.mubr.f32.vlgmr.msra.gmra.mxu0 %v17111_v15  ;;  %7219 = vmatmul.mubr.f32.gmra.mxu1 %v21073_v18  ;;  %v21074_v15 = vld [vmem:[#allocation86_spill] sm:$0xff] }
 0x46a   :  { %7286 = vmatprep.subr.mxu0 %v20893_v44  ;;  %7457 = vmatprep.subr.mxu1 %v20893_v44  ;;  %v17582_v49 = vsub.f32 %v7262_v26, %v17556_v14 }
 0x46b   :  { %7099 = vmatprep.mubr.f32.mxu0 %v17116_v17  ;;  %7224 = vmatprep.mubr.f32.mxu1 %v21074_v15  ;;  %v20561_v17 = vand.u32 4294901760, %v17525_v34 }
 0x46c   :  { %7288 = vmatpush1.msra.mxu0 %v17363_v62  ;;  %7463 = vmatpush1.msra.mxu1 %v7462_v28  ;;  %v20566_v28 = vand.u32 4294901760, %v17553_v20 }
 0x46d   :  { %7289 = vmatprep.subr.mxu0 %v20893_v44  ;;  %7464 = vmatprep.subr.mxu1 %v20893_v44  ;;  %v7496_v54 = vsub.f32 %v17525_v34, %v20561_v17  ;;  %v7276_v17 = vld [vmem:[#allocation8 + $0x230] sm:$0xff] }
 0x46e   :  { %7291 = vmatpush1.msra.mxu0 %v17373_v31  ;;  %7470 = vmatpush1.msra.mxu1 %v7469_v8  ;;  %v7277_v8 = vld [vmem:[#allocation8 + $0x238] sm:$0xff] }
 0x46f   :  { %7101 = vmatmul.mubr.f32.gmra.mxu0 %v17135_v1  ;;  %7226 = vmatmul.mubr.f32.gmra.mxu1 %v17195_v60  ;;  %v17563_v42 = vpop.f32.mrf.mxu1  ;;  %v17571_v1 = vand.u32 4294901760, %v7261_v16  ;;  %v17596_v11 = vand.u32 4294901760, %v7277_v8 }
 0x470   :  { %7292 = vmatprep.subr.mxu0 %v20893_v44  ;;  %7471 = vmatprep.subr.mxu1 %v20893_v44 }
 0x471   :  { %7106 = vmatprep.mubr.f32.mxu0 %v17143_v39  ;;  %7294 = vmatpush1.msra.mxu0 %v17387_v35  ;;  %v6040_v25 = vpop.f32.mrf.mxu1  ;;  %v7490_v39 = vand.u32 4294901760, %v7489_v46  ;;  %v17594_v26 = vsub.f32 %v7261_v16, %v17571_v1  ;;  %v7497_v46 = vand.u32 4294901760, %v7496_v54  ;;  %v20571_v16 = vand.u32 4294901760, %v17582_v49 }
 0x472   :  { %7477 = vmatpush1.msra.mxu1 %v7476_v41  ;;  %7584 = vmatprep.mubr.f32.mxu1 %v17522_v7  ;;  %v7503_v41 = vsub.f32 %v17542_v6, %v20564_v56  ;;  %v20570_v25 = vand.u32 4294901760, %v17569_v30  ;;  %v7510_v56 = vsub.f32 %v17553_v20, %v20566_v28  ;;  %v17624_v59 = vsub.f32 %v7277_v8, %v17596_v11 }
 0x473   :  { %7295 = vmatprep.subr.mxu0 %v20893_v44  ;;  %7478 = vmatprep.subr.mxu1 %v20893_v44  ;;  %v20576_v36 = vand.u32 4294901760, %v17594_v26 }
 0x474   :  { %7297 = vmatpush1.msra.mxu0 %v17399_v21  ;;  %7484 = vmatpush1.msra.mxu1 %v7483_v55  ;;  %v17598_v29 = vpop.f32.mrf.mxu1  ;;  %v7371_v55 = vsub.f32 %v17550_v3, %v20581_v4  ;;  %v7504_v28 = vand.u32 4294901760, %v7503_v41  ;;  %v7511_v10 = vand.u32 4294901760, %v7510_v56  ;;  %v7524_v41 = vsub.f32 %v17582_v49, %v20571_v16 }
 0x475   :  { %7108 = vmatmul.mubr.f32.gmra.mxu0 %v21073_v18  ;;  %7298 = vmatprep.subr.mxu0 %v20893_v44  ;;  %v17614_v18 = vand.u32 4294901760, %v7276_v17  ;;  %v7531_v16 = vsub.f32 %v17594_v26, %v20576_v36  ;;  %v20574_v63 = vand.u32 4294901760, %v17624_v59 }
 0x476   :  { %7485 = vmatprep.subr.mxu1 %v20893_v44  ;;  %7113 = vmatprep.mubr.f32.mxu0 %v21074_v15  ;;  %v6051_v54 = vpop.f32.mrf.mxu1  ;;  %v7517_v15 = vsub.f32 %v17569_v30, %v20570_v25  ;;  %v20573_v25 = vand.u32 4294901760, %v17612_v5 }
 0x477   :  { %7300 = vmatpush1.msra.mxu0 %v17422_v32  ;;  %7491 = vmatpush1.msra.mxu1 %v7490_v39  ;;  %v7372_v54 = vand.u32 4294901760, %v7371_v55  ;;  %v17636_v8 = vsub.f32 %v7276_v17, %v17614_v18 }
 0x478   :  { %7301 = vmatprep.subr.mxu0 %v20893_v44  ;;  %7492 = vmatprep.subr.mxu1 %v20893_v44 }
 0x479   :  { %7303 = vmatpush1.msra.mxu0 %v17433_v53  ;;  %7498 = vmatpush1.msra.mxu1 %v7497_v46  ;;  %v5917_v39 = vpop.f32.mrf.mxu0  ;;  %v17627_v43 = vpop.f32.mrf.mxu1 }
 0x47a   :  { %7115 = vmatmul.mubr.f32.gmra.mxu0 %v17195_v60  ;;  %7304 = vmatprep.subr.mxu0 %v20893_v44  ;;  %v5918_v46 = vadd.f32 %v5917_v39, %v17377_v22  ;;  %v7518_v60 = vand.u32 4294901760, %v7517_v15  ;;  %v7525_v22 = vand.u32 4294901760, %v7524_v41  ;;  %v20575_v15 = vand.u32 4294901760, %v17636_v8 }
 0x47b   :  { %7499 = vmatprep.subr.mxu1 %v20893_v44  ;;  %7306 = vmatpush1.msra.mxu0 %v17462_v58  ;;  %v5919_v56 = vpop.f32.mrf.mxu0  ;;  %v6062_v55 = vpop.f32.mrf.mxu1  ;;  %v7532_v39 = vand.u32 4294901760, %v7531_v16 }
 0x47c   :  { %7373 = vmatprep.mubr.f32.mxu0 %v7372_v54  ;;  %7505 = vmatpush1.msra.mxu1 %v7504_v28  ;;  %v17646_v17 = vadd.f32 %v17563_v42, %v5918_v46  ;;  %v7538_v28 = vsub.f32 %v17612_v5, %v20573_v25  ;;  %v7580_v16 = vsub.f32 %v17636_v8, %v20575_v15 }
 0x47d   :  { %7307 = vmatprep.subr.mxu0 %v20893_v44  ;;  %7506 = vmatprep.subr.mxu1 %v20893_v44 }
 0x47e   :  { %7309 = vmatpush1.msra.mxu0 %v17474_v24  ;;  %7512 = vmatpush1.msra.mxu1 %v7511_v10  ;;  %v7573_v10 = vsub.f32 %v17624_v59, %v20574_v63  ;;  %v7539_v55 = vand.u32 4294901760, %v7538_v28 }
 0x47f   :  { %7310 = vmatprep.subr.mxu0 %v20893_v44  ;;  %7513 = vmatprep.subr.mxu1 %v20893_v44  ;;  %v5926_v42 = vpop.f32.mrf.mxu0  ;;  %v6071_v54 = vpop.f32.mrf.mxu1 }
 0x480   :  { %7312 = vmatpush1.msra.mxu0 %v17488_v27  ;;  %7519 = vmatpush1.msra.mxu1 %v7518_v60  ;;  %v5927_v41 = vadd.f32 %v5926_v42, %v17411_v45  ;;  %v21075_v60 = vld [vmem:[#allocation56_spill] sm:$0xff]  ;;  %v21076_v45 = vld [vmem:[#allocation49_spill] sm:$0xff] }
 0x481   :  { %7313 = vmatprep.subr.mxu0 %v20893_v44  ;;  %7520 = vmatprep.subr.mxu1 %v20893_v44  ;;  %v5928_v46 = vpop.f32.mrf.mxu0  ;;  %v6073_v56 = vpop.f32.mrf.mxu1  ;;  %v7280_v25 = vsel %vm4399_vm3, %v21075_v60, 0  ;;  %v17676_v42 = vand.u32 4294901760, %v21076_v45 }
 0x482   :  { %7315 = vmatpush1.msra.mxu0 %v17501_v33  ;;  %7526 = vmatpush1.msra.mxu1 %v7525_v22  ;;  %v17671_v63 = vadd.f32 %v17598_v29, %v5927_v41  ;;  %v7574_v22 = vand.u32 4294901760, %v7573_v10  ;;  %v17681_v28 = vand.u32 4294901760, %v7280_v25  ;;  %v7581_v29 = vand.u32 4294901760, %v7580_v16  ;;  %v21077_v56 = vld [vmem:[#allocation53_spill] sm:$0xff] }
 0x483   :  { %7316 = vmatprep.subr.mxu0 %v20893_v44  ;;  %7527 = vmatprep.subr.mxu1 %v20893_v44  ;;  %v7282_v60 = vsel %vm4399_vm3, %v21077_v56, 0  ;;  %v21079_v56 = vld [vmem:[#allocation57_spill] sm:$0xff] }
 0x484   :  { %7318 = vmatpush1.msra.mxu0 %v17518_v9  ;;  %7533 = vmatpush1.msra.mxu1 %v7532_v39  ;;  %v17689_v39 = vsub.f32 %v21076_v45, %v17676_v42  ;;  %v17703_v45 = vsub.f32 %v7280_v25, %v17681_v28  ;;  %v7284_v15 = vsel %vm4399_vm3, %v21079_v56, 0 }
 0x485   :  { %7319 = vmatprep.subr.mxu0 %v20893_v44  ;;  %7534 = vmatprep.subr.mxu1 %v20893_v44  ;;  %v5935_v46 = vpop.f32.mrf.mxu0 }
 0x486   :  { %7321 = vmatpush1.msra.mxu0 %v17527_v50  ;;  %7540 = vmatpush1.msra.mxu1 %v7539_v55  ;;  %v5936_v41 = vadd.f32 %v5935_v46, %v17449_v19  ;;  %v21078_v19 = vld [vmem:[#allocation51_spill] sm:$0xff]  ;;  %v20580_v46 = vand.u32 4294901760, %v17689_v39 }
 0x487   :  { %7322 = vmatprep.subr.mxu0 %v20893_v44  ;;  %7569 = vmatprep.subr.mxu1 %v20893_v44  ;;  %v5937_v10 = vpop.f32.mrf.mxu0  ;;  %v17700_v16 = vand.u32 4294901760, %v21078_v19 }
 0x488   :  { %7324 = vmatpush1.msra.mxu0 %v17544_v0  ;;  %7575 = vmatpush2.msra.mxu1 %v7574_v22  ;;  %v17695_v55 = vadd.f32 %v17627_v43, %v5936_v41  ;;  %v17708_v43 = vand.u32 4294901760, %v7282_v60  ;;  %v20579_v10 = vand.u32 4294901760, %v17703_v45 }
 0x489   :  { %7325 = vmatprep.subr.mxu0 %v20893_v44  ;;  %7576 = vmatprep.subr.mxu1 %v20893_v44 }
 0x48a   :  { %7327 = vmatpush1.msra.mxu0 %v17556_v14  ;;  %7582 = vmatpush2.msra.mxu1 %v7581_v29  ;;  %v5944_v22 = vpop.f32.mrf.mxu0  ;;  %v17718_v29 = vsub.f32 %v21078_v19, %v17700_v16  ;;  %v21080_v19 = vld [vmem:[#allocation55_spill] sm:$0xff] }
 0x48b   :  { %7328 = vmatprep.subr.mxu0 %v20893_v44  ;;  %7586 = vmatmul.mubr.f32.vlgmr.msra.gmra.mxu1 %v17676_v42  ;;  %v5945_v41 = vadd.f32 %v5944_v22, %v17478_v47  ;;  %v7377_v47 = vsub.f32 %v17689_v39, %v20580_v46  ;;  %v17733_v22 = vand.u32 4294901760, %v21080_v19 }
 0x48c   :  { %7749 = vmatprep.subr.mxu1 %v20893_v44  ;;  %7330 = vmatpush1.msra.mxu0 %v17571_v1  ;;  %v5946_v25 = vpop.f32.mrf.mxu0  ;;  %v20582_v56 = vand.u32 4294901760, %v17718_v29 }
 0x48d   :  { %7591 = vmatprep.mubr.f32.mxu1 %v17681_v28  ;;  %7751 = vmatpush1.msra.mxu1 %v17363_v62  ;;  %v17723_v36 = vadd.f32 %v6071_v54, %v5945_v41  ;;  %21081 = vst [vmem:[#allocation22_spill] sm:$0xff] %v17733_v22  ;;  %v17736_v25 = vsub.f32 %v7282_v60, %v17708_v43  ;;  %v17740_v54 = vand.u32 4294901760, %v7284_v15  ;;  %v7378_v60 = vand.u32 4294901760, %v7377_v47 }
 0x48e   :  { %7331 = vmatprep.subr.mxu0 %v20893_v44  ;;  %7752 = vmatprep.subr.mxu1 %v20893_v44  ;;  %v7386_v41 = vsub.f32 %v17703_v45, %v20579_v10  ;;  %v17754_v38 = vsub.f32 %v21080_v19, %v17733_v22  ;;  %v21083_v10 = vld [vmem:[#allocation33_spill] sm:$0xff]  ;;  %v7392_v19 = vsub.f32 %v17718_v29, %v20582_v56 }
 0x48f   :  { %7333 = vmatpush1.msra.mxu0 %v17584_v40  ;;  %7754 = vmatpush1.msra.mxu1 %v17373_v31  ;;  %21082 = vst [vmem:[#allocation88_spill] sm:$0xff] %v17740_v54  ;;  %v20583_v23 = vand.u32 4294901760, %v17736_v25  ;;  %v17760_v46 = vand.u32 4294901760, %v21083_v10  ;;  %v17763_v4 = vsub.f32 %v7284_v15, %v17740_v54 }
 0x490   :  { %7362 = vmatprep.subr.mxu0 %v20893_v44  ;;  %7593 = vmatmul.mubr.f32.gmra.mxu1 %v17700_v16  ;;  %v7387_v47 = vand.u32 4294901760, %v7386_v41 }
 0x491   :  { %7755 = vmatprep.subr.mxu1 %v20893_v44  ;;  %7364 = vmatpush2.msra.mxu0 %v17596_v11  ;;  %v7401_v15 = vsub.f32 %v17736_v25, %v20583_v23  ;;  %v17780_v41 = vsub.f32 %v21083_v10, %v17760_v46  ;;  %v20589_v56 = vand.u32 4294901760, %v17763_v4 }
 0x492   :  { %7598 = vmatprep.mubr.f32.mxu1 %v17708_v43  ;;  %7757 = vmatpush1.msra.mxu1 %v17387_v35 }
 0x493   :  { %7365 = vmatprep.subr.mxu0 %v20893_v44  ;;  %7758 = vmatprep.subr.mxu1 %v20893_v44  ;;  %v7402_v23 = vand.u32 4294901760, %v7401_v15  ;;  %v21084_v15 = vand.u32 4294901760, %v17550_v3 }
 0x494   :  { %7367 = vmatpush2.msra.mxu0 %v17614_v18  ;;  %7760 = vmatpush1.msra.mxu1 %v17399_v21 }
 0x495   :  { %7379 = vmatmul.mubr.f32.vlgmr.msra.gmra.mxu0 %v7378_v60  ;;  %7600 = vmatmul.mubr.f32.gmra.mxu1 %v17733_v22  ;;  %v20588_v60 = vand.u32 4294901760, %v17754_v38  ;;  %v20590_v22 = vand.u32 4294901760, %v17780_v41 }
 0x496   :  { %7612 = vmatprep.subr.mxu0 %v20893_v44  ;;  %7761 = vmatprep.subr.mxu1 %v20893_v44 }
 0x497   :  { %7388 = vmatprep.mubr.f32.mxu0 %v7387_v47  ;;  %7605 = vmatprep.mubr.f32.mxu1 %v17740_v54  ;;  %v7393_v47 = vand.u32 4294901760, %v7392_v19  ;;  %v7407_v10 = vsub.f32 %v17754_v38, %v20588_v60  ;;  %v7416_v19 = vsub.f32 %v17763_v4, %v20589_v56 }
 0x498   :  { %7615 = vmatpush1.msra.mxu0 %v17382_v61  ;;  %7763 = vmatpush1.msra.mxu1 %v17422_v32 }
 0x499   :  { %7616 = vmatprep.subr.mxu0 %v20893_v44  ;;  %7764 = vmatprep.subr.mxu1 %v20893_v44  ;;  %v7408_v60 = vand.u32 4294901760, %v7407_v10  ;;  %v7417_v56 = vand.u32 4294901760, %v7416_v19 }
 0x49a   :  { %7619 = vmatpush1.msra.mxu0 %v17392_v12  ;;  %7766 = vmatpush1.msra.mxu1 %v17433_v53 }
 0x49b   :  { %7394 = vmatmul.mubr.f32.gmra.mxu0 %v7393_v47  ;;  %7607 = vmatmul.mubr.f32.gmra.mxu1 %v17760_v46  ;;  %v6308_v54 = vpop.f32.mrf.mxu1 }
 0x49c   :  { %7620 = vmatprep.subr.mxu0 %v20893_v44  ;;  %7767 = vmatprep.subr.mxu1 %v20893_v44 }
 0x49d   :  { %7403 = vmatprep.mubr.f32.mxu0 %v7402_v23  ;;  %7623 = vmatpush1.msra.mxu0 %v17409_v52  ;;  %v6310_v47 = vpop.f32.mrf.mxu1  ;;  %v7422_v23 = vsub.f32 %v17780_v41, %v20590_v22 }
 0x49e   :  { %7769 = vmatpush1.msra.mxu1 %v17462_v58  ;;  %7834 = vmatprep.mubr.f32.mxu1 %v21084_v15 }
 0x49f   :  { %7624 = vmatprep.subr.mxu0 %v20893_v44  ;;  %7770 = vmatprep.subr.mxu1 %v20893_v44  ;;  %v7423_v10 = vand.u32 4294901760, %v7422_v23 }
 0x4a0   :  { %7627 = vmatpush1.msra.mxu0 %v17420_v51  ;;  %7772 = vmatpush1.msra.mxu1 %v17474_v24  ;;  %v6315_v47 = vpop.f32.mrf.mxu1 }
 0x4a1   :  { %7409 = vmatmul.mubr.f32.gmra.mxu0 %v7408_v60  ;;  %7628 = vmatprep.subr.mxu0 %v20893_v44 }
 0x4a2   :  { %7773 = vmatprep.subr.mxu1 %v20893_v44  ;;  %7418 = vmatprep.mubr.f32.mxu0 %v7417_v56  ;;  %v6317_v15 = vpop.f32.mrf.mxu1 }
 0x4a3   :  { %7631 = vmatpush1.msra.mxu0 %v17446_v2  ;;  %7775 = vmatpush1.msra.mxu1 %v17488_v27 }
 0x4a4   :  { %7632 = vmatprep.subr.mxu0 %v20893_v44  ;;  %7776 = vmatprep.subr.mxu1 %v20893_v44 }
 0x4a5   :  { %7635 = vmatpush1.msra.mxu0 %v17460_v48  ;;  %7778 = vmatpush1.msra.mxu1 %v17501_v33  ;;  %v6197_v60 = vpop.f32.mrf.mxu0  ;;  %v6322_v19 = vpop.f32.mrf.mxu1 }
 0x4a6   :  { %7424 = vmatmul.mubr.f32.gmra.mxu0 %v7423_v10  ;;  %7636 = vmatprep.subr.mxu0 %v20893_v44  ;;  %v6198_v56 = vadd.f32 %v6197_v60, %v17646_v17 }
 0x4a7   :  { %7779 = vmatprep.subr.mxu1 %v20893_v44  ;;  %7639 = vmatpush1.msra.mxu0 %v17484_v37  ;;  %v6199_v15 = vpop.f32.mrf.mxu0  ;;  %v6324_v22 = vpop.f32.mrf.mxu1 }
 0x4a8   :  { %7714 = vmatprep.mubr.f32.mxu0 %v17550_v3  ;;  %7781 = vmatpush1.msra.mxu1 %v17518_v9  ;;  %v17822_v23 = vadd.f32 %v6308_v54, %v6198_v56 }
 0x4a9   :  { %7640 = vmatprep.subr.mxu0 %v20893_v44  ;;  %7782 = vmatprep.subr.mxu1 %v20893_v44 }
 0x4aa   :  { %7643 = vmatpush1.msra.mxu0 %v17496_v13  ;;  %7784 = vmatpush1.msra.mxu1 %v17527_v50 }
 0x4ab   :  { %7644 = vmatprep.subr.mxu0 %v20893_v44  ;;  %7785 = vmatprep.subr.mxu1 %v20893_v44  ;;  %v6204_v17 = vpop.f32.mrf.mxu0  ;;  %v6329_v22 = vpop.f32.mrf.mxu1 }
 0x4ac   :  { %7647 = vmatpush1.msra.mxu0 %v17513_v57  ;;  %7787 = vmatpush1.msra.mxu1 %v17544_v0  ;;  %v6205_v3 = vadd.f32 %v6204_v17, %v17671_v63  ;;  %v21085_v17 = vand.u32 4294901760, %v17689_v39 }
 0x4ad   :  { %7648 = vmatprep.subr.mxu0 %v20893_v44  ;;  %7788 = vmatprep.subr.mxu1 %v20893_v44  ;;  %v6206_v54 = vpop.f32.mrf.mxu0  ;;  %v6331_v10 = vpop.f32.mrf.mxu1 }
 0x4ae   :  { %7651 = vmatpush1.msra.mxu0 %v17525_v34  ;;  %7790 = vmatpush1.msra.mxu1 %v17556_v14  ;;  %v17837_v60 = vadd.f32 %v6315_v47, %v6205_v3  ;;  %v21086_v54 = vand.u32 4294901760, %v17703_v45 }
 0x4af   :  { %7652 = vmatprep.subr.mxu0 %v20893_v44  ;;  %7791 = vmatprep.subr.mxu1 %v20893_v44 }
 0x4b0   :  { %7655 = vmatpush1.msra.mxu0 %v17542_v6  ;;  %7793 = vmatpush1.msra.mxu1 %v17571_v1 }
 0x4b1   :  { %7656 = vmatprep.subr.mxu0 %v20893_v44  ;;  %7794 = vmatprep.subr.mxu1 %v20893_v44  ;;  %v6211_v63 = vpop.f32.mrf.mxu0 }
 0x4b2   :  { %7659 = vmatpush1.msra.mxu0 %v17553_v20  ;;  %7796 = vmatpush1.msra.mxu1 %v17584_v40  ;;  %v6212_v47 = vadd.f32 %v6211_v63, %v17695_v55 }
 0x4b3   :  { %7660 = vmatprep.subr.mxu0 %v20893_v44  ;;  %7825 = vmatprep.subr.mxu1 %v20893_v44  ;;  %v6213_v56 = vpop.f32.mrf.mxu0 }
 0x4b4   :  { %7663 = vmatpush1.msra.mxu0 %v17569_v30  ;;  %7827 = vmatpush2.msra.mxu1 %v17596_v11  ;;  %v17852_v15 = vadd.f32 %v6322_v19, %v6212_v47  ;;  %v8150_v56 = vld [vmem:[#allocation8 + $0x2a0] sm:$0xff] }
 0x4b5   :  { %7664 = vmatprep.subr.mxu0 %v20893_v44  ;;  %7828 = vmatprep.subr.mxu1 %v20893_v44 }
 0x4b6   :  { %7667 = vmatpush1.msra.mxu0 %v17582_v49  ;;  %7830 = vmatpush2.msra.mxu1 %v17614_v18  ;;  %v6218_v55 = vpop.f32.mrf.mxu0 }
 0x4b7   :  { %7668 = vmatprep.subr.mxu0 %v20893_v44  ;;  %7838 = vmatmul.mubr.f32.vlgmr.msra.gmra.mxu1 %v21085_v17  ;;  %v6219_v3 = vadd.f32 %v6218_v55, %v17723_v36  ;;  %v21087_v36 = vand.u32 4294901760, %v17718_v29 }
 0x4b8   :  { %8023 = vmatprep.subr.mxu1 %v20893_v44  ;;  %7671 = vmatpush1.msra.mxu0 %v17594_v26  ;;  %v6220_v19 = vpop.f32.mrf.mxu0 }
 0x4b9   :  { %7845 = vmatprep.mubr.f32.mxu1 %v21086_v54  ;;  %8025 = vmatpush1.msra.mxu1 %v17363_v62  ;;  %v17867_v10 = vadd.f32 %v6329_v22, %v6219_v3  ;;  %v21088_v62 = vand.u32 4294901760, %v17736_v25  ;;  %v21091_v22 = vand.u32 4294901760, %v17382_v61  ;;  %v21094_v61 = vand.u32 4294901760, %v17409_v52  ;;  %v8153_v52 = vld [vmem:[#allocation8 + $0x2b8] sm:$0xff] }
 0x4ba   :  { %7672 = vmatprep.subr.mxu0 %v20893_v44  ;;  %8026 = vmatprep.subr.mxu1 %v20893_v44  ;;  %v21100_v3 = vand.u32 4294901760, %v17513_v57  ;;  %v8149_v54 = vld [vmem:[#allocation8 + $0x298] sm:$0xff] }
 0x4bb   :  { %7675 = vmatpush1.msra.mxu0 %v17612_v5  ;;  %8028 = vmatpush1.msra.mxu1 %v17373_v31  ;;  %v21089_v31 = vand.u32 4294901760, %v17754_v38 }
 0x4bc   :  { %7704 = vmatprep.subr.mxu0 %v20893_v44  ;;  %7849 = vmatmul.mubr.f32.gmra.mxu1 %v21087_v36 }
 0x4bd   :  { %8029 = vmatprep.subr.mxu1 %v20893_v44  ;;  %7707 = vmatpush2.msra.mxu0 %v17624_v59 }
 0x4be   :  { %7856 = vmatprep.mubr.f32.mxu1 %v21088_v62  ;;  %8031 = vmatpush1.msra.mxu1 %v17387_v35  ;;  %v21090_v35 = vand.u32 4294901760, %v17763_v4 }
 0x4bf   :  { %7708 = vmatprep.subr.mxu0 %v20893_v44  ;;  %8032 = vmatprep.subr.mxu1 %v20893_v44 }
 0x4c0   :  { %7711 = vmatpush2.msra.mxu0 %v17636_v8  ;;  %8034 = vmatpush1.msra.mxu1 %v17399_v21  ;;  %v21092_v21 = vand.u32 4294901760, %v17392_v12  ;;  %v21095_v12 = vand.u32 4294901760, %v17420_v51  ;;  %v8152_v51 = vld [vmem:[#allocation8 + $0x2b0] sm:$0xff] }
 0x4c1   :  { %7717 = vmatmul.mubr.f32.vlgmr.msra.gmra.mxu0 %v17689_v39  ;;  %7860 = vmatmul.mubr.f32.gmra.mxu1 %v21089_v31  ;;  %v21093_v39 = vand.u32 4294901760, %v17780_v41  ;;  %v17937_v63 = vand.u32 4294901760, %v8152_v51  ;;  %v21101_v31 = vand.u32 4294901760, %v17525_v34 }
 0x4c2   :  { %7876 = vmatprep.subr.mxu0 %v20893_v44  ;;  %8035 = vmatprep.subr.mxu1 %v20893_v44 }
 0x4c3   :  { %7723 = vmatprep.mubr.f32.mxu0 %v17703_v45  ;;  %7867 = vmatprep.mubr.f32.mxu1 %v21090_v35  ;;  %v8148_v35 = vld [vmem:[#allocation8 + $0x290] sm:$0xff] }
 0x4c4   :  { %7880 = vmatpush1.msra.mxu0 %v21091_v22  ;;  %8037 = vmatpush1.msra.mxu1 %v17422_v32  ;;  %v21102_v22 = vand.u32 4294901760, %v17542_v6 }
 0x4c5   :  { %7881 = vmatprep.subr.mxu0 %v20893_v44  ;;  %8038 = vmatprep.subr.mxu1 %v20893_v44 }
 0x4c6   :  { %7885 = vmatpush1.msra.mxu0 %v21092_v21  ;;  %8040 = vmatpush1.msra.mxu1 %v17433_v53  ;;  %v17981_v21 = vand.u32 4294901760, %v8149_v54 }
 0x4c7   :  { %7726 = vmatmul.mubr.f32.gmra.mxu0 %v17718_v29  ;;  %7871 = vmatmul.mubr.f32.gmra.mxu1 %v21093_v39  ;;  %v6684_v45 = vpop.f32.mrf.mxu1  ;;  %v21096_v29 = vand.u32 4294901760, %v17446_v2 }
 0x4c8   :  { %7886 = vmatprep.subr.mxu0 %v20893_v44  ;;  %8041 = vmatprep.subr.mxu1 %v20893_v44 }
 0x4c9   :  { %7732 = vmatprep.mubr.f32.mxu0 %v17736_v25  ;;  %7890 = vmatpush1.msra.mxu0 %v21094_v61  ;;  %v6686_v32 = vpop.f32.mrf.mxu1 }
 0x4ca   :  { %8043 = vmatpush1.msra.mxu1 %v17462_v58  ;;  %8106 = vmatprep.mubr.f32.mxu1 %v17522_v7 }
 0x4cb   :  { %7891 = vmatprep.subr.mxu0 %v20893_v44  ;;  %8044 = vmatprep.subr.mxu1 %v20893_v44 }
 0x4cc   :  { %7895 = vmatpush1.msra.mxu0 %v21095_v12  ;;  %8046 = vmatpush1.msra.mxu1 %v17474_v24  ;;  %v6691_v53 = vpop.f32.mrf.mxu1  ;;  %v17928_v24 = vand.u32 4294901760, %v8153_v52  ;;  %v8147_v12 = vld [vmem:[#allocation8 + $0x288] sm:$0xff] }
 0x4cd   :  { %7735 = vmatmul.mubr.f32.gmra.mxu0 %v17754_v38  ;;  %7896 = vmatprep.subr.mxu0 %v20893_v44  ;;  %v21097_v38 = vand.u32 4294901760, %v17460_v48  ;;  %v8151_v48 = vld [vmem:[#allocation8 + $0x2a8] sm:$0xff] }
 0x4ce   :  { %8047 = vmatprep.subr.mxu1 %v20893_v44  ;;  %7741 = vmatprep.mubr.f32.mxu0 %v17763_v4  ;;  %v6693_v58 = vpop.f32.mrf.mxu1  ;;  %v17949_v55 = vand.u32 4294901760, %v8151_v48 }
 0x4cf   :  { %7900 = vmatpush1.msra.mxu0 %v21096_v29  ;;  %8049 = vmatpush1.msra.mxu1 %v17488_v27  ;;  %v21098_v27 = vand.u32 4294901760, %v17484_v37  ;;  %v21099_v37 = vand.u32 4294901760, %v17496_v13  ;;  %v17959_v13 = vand.u32 4294901760, %v8150_v56  ;;  %v8146_v29 = vld [vmem:[#allocation8 + $0x280] sm:$0xff] }
 0x4d0   :  { %7901 = vmatprep.subr.mxu0 %v20893_v44  ;;  %8050 = vmatprep.subr.mxu1 %v20893_v44  ;;  %v17970_v57 = vsub.f32 %v8151_v48, %v17949_v55 }
 0x4d1   :  { %7905 = vmatpush1.msra.mxu0 %v21097_v38  ;;  %8052 = vmatpush1.msra.mxu1 %v17501_v33  ;;  %v6477_v4 = vpop.f32.mrf.mxu0  ;;  %v6698_v25 = vpop.f32.mrf.mxu1  ;;  %v17979_v34 = vsub.f32 %v8150_v56, %v17959_v13  ;;  %v18019_v38 = vand.u32 4294901760, %v8147_v12 }
 0x4d2   :  { %7744 = vmatmul.mubr.f32.gmra.mxu0 %v17780_v41  ;;  %7906 = vmatprep.subr.mxu0 %v20893_v44  ;;  %v17932_v2 = vadd.f32 %v6684_v45, %v6477_v4  ;;  %v17944_v41 = vsub.f32 %v8153_v52, %v17928_v24  ;;  %v21103_v45 = vand.u32 4294901760, %v17553_v20  ;;  %v20601_v6 = vand.u32 4294901760, %v17970_v57 }
 0x4d3   :  { %8053 = vmatprep.subr.mxu1 %v20893_v44  ;;  %7910 = vmatpush1.msra.mxu0 %v21098_v27  ;;  %v6479_v47 = vpop.f32.mrf.mxu0  ;;  %v6700_v33 = vpop.f32.mrf.mxu1  ;;  %v21104_v20 = vand.u32 4294901760, %v17569_v30  ;;  %v18006_v52 = vsub.f32 %v8149_v54, %v17981_v21 }
 0x4d4   :  { %7995 = vmatprep.mubr.f32.mxu0 %v17522_v7  ;;  %8055 = vmatpush1.msra.mxu1 %v17518_v9  ;;  %v17954_v9 = vsub.f32 %v8152_v51, %v17937_v63  ;;  %v21105_v51 = vand.u32 4294901760, %v17582_v49  ;;  %v21106_v49 = vand.u32 4294901760, %v17594_v26  ;;  %v18032_v47 = vand.u32 4294901760, %v8146_v29  ;;  %v8145_v33 = vld [vmem:[#allocation8 + $0x278] sm:$0xff] }
 0x4d5   :  { %7911 = vmatprep.subr.mxu0 %v20893_v44  ;;  %8056 = vmatprep.subr.mxu1 %v20893_v44  ;;  %v20597_v48 = vand.u32 4294901760, %v18006_v52  ;;  %v18043_v54 = vand.u32 4294901760, %v8145_v33 }
 0x4d6   :  { %7915 = vmatpush1.msra.mxu0 %v21099_v37  ;;  %8058 = vmatpush1.msra.mxu1 %v17527_v50  ;;  %v20604_v50 = vand.u32 4294901760, %v17944_v41 }
 0x4d7   :  { %7916 = vmatprep.subr.mxu0 %v20893_v44  ;;  %8059 = vmatprep.subr.mxu1 %v20893_v44  ;;  %v6492_v7 = vpop.f32.mrf.mxu0  ;;  %v6705_v17 = vpop.f32.mrf.mxu1 }
 0x4d8   :  { %7920 = vmatpush1.msra.mxu0 %v21100_v3  ;;  %8061 = vmatpush1.msra.mxu1 %v17544_v0  ;;  %v17961_v19 = vadd.f32 %v6691_v53, %v6492_v7  ;;  %v20602_v0 = vand.u32 4294901760, %v17954_v9  ;;  %v18039_v7 = vsub.f32 %v8147_v12, %v18019_v38  ;;  %v21107_v3 = vand.u32 4294901760, %v17612_v5 }
 0x4d9   :  { %7921 = vmatprep.subr.mxu0 %v20893_v44  ;;  %8062 = vmatprep.subr.mxu1 %v20893_v44  ;;  %v6494_v36 = vpop.f32.mrf.mxu0  ;;  %v6707_v62 = vpop.f32.mrf.mxu1  ;;  %v21108_v5 = vand.u32 4294901760, %v17624_v59  ;;  %v18066_v59 = vsub.f32 %v8145_v33, %v18043_v54 }
 0x4da   :  { %7925 = vmatpush1.msra.mxu0 %v21101_v31  ;;  %8064 = vmatpush1.msra.mxu1 %v17556_v14  ;;  %v8307_v14 = vsub.f32 %v17944_v41, %v20604_v50  ;;  %v8314_v32 = vsub.f32 %v17954_v9, %v20602_v0  ;;  %v8335_v62 = vsub.f32 %v18006_v52, %v20597_v48 }
 0x4db   :  { %7926 = vmatprep.subr.mxu0 %v20893_v44  ;;  %8065 = vmatprep.subr.mxu1 %v20893_v44  ;;  %v18051_v31 = vsub.f32 %v8146_v29, %v18032_v47 }
 0x4dc   :  { %7930 = vmatpush1.msra.mxu0 %v21102_v22  ;;  %8067 = vmatpush1.msra.mxu1 %v17571_v1  ;;  %v17992_v1 = vand.u32 4294901760, %v8148_v35  ;;  %v8308_v58 = vand.u32 4294901760, %v8307_v14  ;;  %v8143_v22 = vld [vmem:[#allocation8 + $0x268] sm:$0xff]  ;;  %v8336_v12 = vand.u32 4294901760, %v8335_v62 }
 0x4dd   :  { %7931 = vmatprep.subr.mxu0 %v20893_v44  ;;  %8068 = vmatprep.subr.mxu1 %v20893_v44  ;;  %v6507_v39 = vpop.f32.mrf.mxu0 }
 0x4de   :  { %7935 = vmatpush1.msra.mxu0 %v21103_v45  ;;  %8070 = vmatpush1.msra.mxu1 %v17584_v40  ;;  %v17994_v61 = vadd.f32 %v6698_v25, %v6507_v39  ;;  %v20598_v40 = vand.u32 4294901760, %v17979_v34  ;;  %v18017_v30 = vsub.f32 %v8148_v35, %v17992_v1  ;;  %v8315_v25 = vand.u32 4294901760, %v8314_v32  ;;  %v8142_v45 = vld [vmem:[#allocation8 + $0x260] sm:$0xff] }
 0x4df   :  { %7936 = vmatprep.subr.mxu0 %v20893_v44  ;;  %8099 = vmatprep.subr.mxu1 %v20893_v44  ;;  %v6509_v53 = vpop.f32.mrf.mxu0  ;;  %v20593_v39 = vand.u32 4294901760, %v18039_v7  ;;  %v21109_v32 = vand.u32 4294901760, %v17636_v8 }
 0x4e0   :  { %7940 = vmatpush1.msra.mxu0 %v21104_v20  ;;  %8101 = vmatpush2.msra.mxu1 %v17596_v11  ;;  %v8321_v11 = vsub.f32 %v17970_v57, %v20601_v6  ;;  %v20595_v26 = vand.u32 4294901760, %v18017_v30  ;;  %v20592_v53 = vand.u32 4294901760, %v18051_v31  ;;  %v18071_v20 = vand.u32 4294901760, %v8143_v22 }
 0x4e1   :  { %7941 = vmatprep.subr.mxu0 %v20893_v44  ;;  %8102 = vmatprep.subr.mxu1 %v20893_v44 }
 0x4e2   :  { %7945 = vmatpush1.msra.mxu0 %v21105_v51  ;;  %8104 = vmatpush2.msra.mxu1 %v17614_v18  ;;  %v6522_v4 = vpop.f32.mrf.mxu0  ;;  %v8328_v18 = vsub.f32 %v17979_v34, %v20598_v40  ;;  %v8322_v37 = vand.u32 4294901760, %v8321_v11  ;;  %v8342_v14 = vsub.f32 %v18017_v30, %v20595_v26  ;;  %v18078_v51 = vand.u32 4294901760, %v8142_v45  ;;  %v8141_v11 = vld [vmem:[#allocation8 + $0x258] sm:$0xff] }
 0x4e3   :  { %7946 = vmatprep.subr.mxu0 %v20893_v44  ;;  %8108 = vmatmul.mubr.f32.vlgmr.msra.gmra.mxu1 %v17676_v42  ;;  %v18023_v27 = vadd.f32 %v6705_v17, %v6522_v4  ;;  %v8144_v17 = vld [vmem:[#allocation8 + $0x270] sm:$0xff]  ;;  %v8349_v4 = vsub.f32 %v18039_v7, %v20593_v39  ;;  %v18093_v33 = vsub.f32 %v8143_v22, %v18071_v20  ;;  %v8154_v39 = vld [vmem:[#allocation8 + $0x2c0] sm:$0xff] }
 0x4e4   :  { %8303 = vmatprep.subr.mxu1 %v20893_v44  ;;  %7950 = vmatpush1.msra.mxu0 %v21106_v49  ;;  %v6524_v56 = vpop.f32.mrf.mxu0  ;;  %v8329_v36 = vand.u32 4294901760, %v8328_v18  ;;  %v18056_v35 = vand.u32 4294901760, %v8144_v17  ;;  %v8343_v8 = vand.u32 4294901760, %v8342_v14  ;;  %v8140_v49 = vld [vmem:[#allocation8 + $0x250] sm:$0xff]  ;;  %v8356_v18 = vsub.f32 %v18051_v31, %v20592_v53 }
 0x4e5   :  { %8113 = vmatprep.mubr.f32.mxu1 %v17681_v28  ;;  %8309 = vmatpush1.msra.mxu1 %v8308_v58  ;;  %v21110_v58 = vld [vmem:[#allocation22_spill] sm:$0xff]  ;;  %v18095_v56 = vand.u32 4294901760, %v8141_v11  ;;  %v18158_v48 = vand.u32 4294901760, %v8154_v39 }
 0x4e6   :  { %7951 = vmatprep.subr.mxu0 %v20893_v44  ;;  %8310 = vmatprep.subr.mxu1 %v20893_v44  ;;  %v18076_v29 = vsub.f32 %v8144_v17, %v18056_v35  ;;  %v8139_v17 = vld [vmem:[#allocation8 + $0x248] sm:$0xff]  ;;  %v8357_v14 = vand.u32 4294901760, %v8356_v18  ;;  %v21112_v18 = vld [vmem:[#allocation58_spill] sm:$0xff] }
 0x4e7   :  { %7955 = vmatpush1.msra.mxu0 %v21107_v3  ;;  %8316 = vmatpush1.msra.mxu1 %v8315_v25  ;;  %v20591_v25 = vand.u32 4294901760, %v18066_v59  ;;  %v8350_v3 = vand.u32 4294901760, %v8349_v4  ;;  %v8155_v4 = vld [vmem:[#allocation8 + $0x2c8] sm:$0xff]  ;;  %v18178_v6 = vsub.f32 %v8154_v39, %v18158_v48 }
 0x4e8   :  { %7984 = vmatprep.subr.mxu0 %v20893_v44  ;;  %8115 = vmatmul.mubr.f32.gmra.mxu1 %v17700_v16 }
 0x4e9   :  { %8317 = vmatprep.subr.mxu1 %v20893_v44  ;;  %7988 = vmatpush2.msra.mxu0 %v21108_v5  ;;  %v8363_v62 = vsub.f32 %v18066_v59, %v20591_v25  ;;  %v8138_v5 = vld [vmem:[#allocation8 + $0x240] sm:$0xff] }
 0x4ea   :  { %8120 = vmatprep.mubr.f32.mxu1 %v17708_v43  ;;  %8323 = vmatpush1.msra.mxu1 %v8322_v37  ;;  %v18101_v37 = vsub.f32 %v8142_v45, %v18078_v51  ;;  %v20596_v45 = vand.u32 4294901760, %v18093_v33  ;;  %v18131_v53 = vand.u32 4294901760, %v8138_v5 }
 0x4eb   :  { %7989 = vmatprep.subr.mxu0 %v20893_v44  ;;  %8324 = vmatprep.subr.mxu1 %v20893_v44 }
 0x4ec   :  { %7993 = vmatpush2.msra.mxu0 %v21109_v32  ;;  %8330 = vmatpush1.msra.mxu1 %v8329_v36  ;;  %v18104_v36 = vand.u32 4294901760, %v8140_v49  ;;  %v18117_v32 = vsub.f32 %v8141_v11, %v18095_v56 }
 0x4ed   :  { %7997 = vmatmul.mubr.f32.vlgmr.msra.gmra.mxu0 %v17676_v42  ;;  %8122 = vmatmul.mubr.f32.gmra.mxu1 %v21110_v58  ;;  %v21111_v42 = vld [vmem:[#allocation88_spill] sm:$0xff] }
 0x4ee   :  { %8160 = vmatprep.subr.mxu0 %v20893_v44  ;;  %8331 = vmatprep.subr.mxu1 %v20893_v44  ;;  %v18129_v11 = vsub.f32 %v8140_v49, %v18104_v36 }
 0x4ef   :  { %8002 = vmatprep.mubr.f32.mxu0 %v17681_v28  ;;  %8127 = vmatprep.mubr.f32.mxu1 %v21111_v42  ;;  %v20594_v28 = vand.u32 4294901760, %v18076_v29 }
 0x4f0   :  { %8162 = vmatpush1.msra.mxu0 %v17928_v24  ;;  %8337 = vmatpush1.msra.mxu1 %v8336_v12 }
 0x4f1   :  { %8163 = vmatprep.subr.mxu0 %v20893_v44  ;;  %8338 = vmatprep.subr.mxu1 %v20893_v44  ;;  %v8370_v12 = vsub.f32 %v18076_v29, %v20594_v28  ;;  %v18143_v28 = vand.u32 4294901760, %v8155_v4 }
 0x4f2   :  { %8165 = vmatpush1.msra.mxu0 %v17937_v63  ;;  %8344 = vmatpush1.msra.mxu1 %v8343_v8  ;;  %v20599_v8 = vand.u32 4294901760, %v18101_v37 }
 0x4f3   :  { %8004 = vmatmul.mubr.f32.gmra.mxu0 %v17700_v16  ;;  %8129 = vmatmul.mubr.f32.gmra.mxu1 %v17760_v46  ;;  %v18111_v22 = vpop.f32.mrf.mxu1  ;;  %v18119_v16 = vand.u32 4294901760, %v8139_v17 }
 0x4f4   :  { %8166 = vmatprep.subr.mxu0 %v20893_v44  ;;  %8345 = vmatprep.subr.mxu1 %v20893_v44 }
 0x4f5   :  { %8009 = vmatprep.mubr.f32.mxu0 %v17708_v43  ;;  %8168 = vmatpush1.msra.mxu0 %v17949_v55  ;;  %v6938_v25 = vpop.f32.mrf.mxu1  ;;  %v8364_v43 = vand.u32 4294901760, %v8363_v62  ;;  %v18141_v49 = vsub.f32 %v8139_v17, %v18119_v16  ;;  %v8371_v62 = vand.u32 4294901760, %v8370_v12  ;;  %v20603_v17 = vand.u32 4294901760, %v18129_v11 }
 0x4f6   :  { %8351 = vmatpush1.msra.mxu1 %v8350_v3  ;;  %8458 = vmatprep.mubr.f32.mxu1 %v21112_v18  ;;  %v8377_v25 = vsub.f32 %v18093_v33, %v20596_v45  ;;  %v20600_v3 = vand.u32 4294901760, %v18117_v32  ;;  %v18156_v45 = vsub.f32 %v8138_v5, %v18131_v53  ;;  %v18168_v5 = vsub.f32 %v8155_v4, %v18143_v28 }
 0x4f7   :  { %8169 = vmatprep.subr.mxu0 %v20893_v44  ;;  %8352 = vmatprep.subr.mxu1 %v20893_v44  ;;  %v20608_v12 = vand.u32 4294901760, %v18141_v49 }
 0x4f8   :  { %8171 = vmatpush1.msra.mxu0 %v17959_v13  ;;  %8358 = vmatpush1.msra.mxu1 %v8357_v14  ;;  %v18145_v26 = vpop.f32.mrf.mxu1  ;;  %v8384_v14 = vsub.f32 %v18101_v37, %v20599_v8  ;;  %v20606_v50 = vand.u32 4294901760, %v18168_v5 }
 0x4f9   :  { %8011 = vmatmul.mubr.f32.gmra.mxu0 %v21110_v58  ;;  %8172 = vmatprep.subr.mxu0 %v20893_v44  ;;  %v8378_v58 = vand.u32 4294901760, %v8377_v25  ;;  %v8398_v25 = vsub.f32 %v18129_v11, %v20603_v17  ;;  %v8405_v17 = vsub.f32 %v18141_v49, %v20608_v12 }
 0x4fa   :  { %8359 = vmatprep.subr.mxu1 %v20893_v44  ;;  %8016 = vmatprep.mubr.f32.mxu0 %v21111_v42  ;;  %v6949_v40 = vpop.f32.mrf.mxu1  ;;  %v8391_v42 = vsub.f32 %v18117_v32, %v20600_v3  ;;  %v20605_v3 = vand.u32 4294901760, %v18156_v45 }
 0x4fb   :  { %8174 = vmatpush1.msra.mxu0 %v17981_v21  ;;  %8365 = vmatpush1.msra.mxu1 %v8364_v43  ;;  %v8385_v40 = vand.u32 4294901760, %v8384_v14 }
 0x4fc   :  { %8175 = vmatprep.subr.mxu0 %v20893_v44  ;;  %8366 = vmatprep.subr.mxu1 %v20893_v44  ;;  %v8392_v0 = vand.u32 4294901760, %v8391_v42 }
 0x4fd   :  { %8177 = vmatpush1.msra.mxu0 %v17992_v1  ;;  %8372 = vmatpush1.msra.mxu1 %v8371_v62  ;;  %v6815_v8 = vpop.f32.mrf.mxu0  ;;  %v6958_v43 = vpop.f32.mrf.mxu1 }
 0x4fe   :  { %8018 = vmatmul.mubr.f32.gmra.mxu0 %v17760_v46  ;;  %8178 = vmatprep.subr.mxu0 %v20893_v44  ;;  %v6816_v4 = vadd.f32 %v6815_v8, %v17932_v2  ;;  %v21113_v46 = vld [vmem:[#allocation79_spill] sm:$0xff]  ;;  %v8399_v2 = vand.u32 4294901760, %v8398_v25  ;;  %v8412_v8 = vsub.f32 %v18156_v45, %v20605_v3 }
 0x4ff   :  { %8373 = vmatprep.subr.mxu1 %v20893_v44  ;;  %8180 = vmatpush1.msra.mxu0 %v18019_v38  ;;  %v6817_v62 = vpop.f32.mrf.mxu0  ;;  %v6960_v14 = vpop.f32.mrf.mxu1 }
 0x500   :  { %8247 = vmatprep.mubr.f32.mxu0 %v21113_v46  ;;  %8379 = vmatpush1.msra.mxu1 %v8378_v58  ;;  %v18189_v39 = vadd.f32 %v18111_v22, %v6816_v4  ;;  %v20607_v58 = vand.u32 4294901760, %v18178_v6  ;;  %v8406_v4 = vand.u32 4294901760, %v8405_v17  ;;  %v8413_v46 = vand.u32 4294901760, %v8412_v8  ;;  %v13386_v17 = vld [vmem:[#allocation2 + $0x28] sm:$0xff] }
 0x501   :  { %8181 = vmatprep.subr.mxu0 %v20893_v44  ;;  %8380 = vmatprep.subr.mxu1 %v20893_v44  ;;  %v8156_v3 = vsel %vm4399_vm3, %v13386_v17, 0  ;;  %v13388_v17 = vld [vmem:[#allocation2 + $0x58] sm:$0xff] }
 0x502   :  { %8183 = vmatpush1.msra.mxu0 %v18032_v47  ;;  %8386 = vmatpush1.msra.mxu1 %v8385_v40  ;;  %v8447_v40 = vsub.f32 %v18168_v5, %v20606_v50 }
 0x503   :  { %8184 = vmatprep.subr.mxu0 %v20893_v44  ;;  %8387 = vmatprep.subr.mxu1 %v20893_v44  ;;  %v6824_v22 = vpop.f32.mrf.mxu0  ;;  %v6969_v42 = vpop.f32.mrf.mxu1 }
 0x504   :  { %8186 = vmatpush1.msra.mxu0 %v18043_v54  ;;  %8393 = vmatpush1.msra.mxu1 %v8392_v0  ;;  %v6825_v25 = vadd.f32 %v6824_v22, %v17961_v19  ;;  %v8454_v0 = vsub.f32 %v18178_v6, %v20607_v58  ;;  %v8448_v19 = vand.u32 4294901760, %v8447_v40  ;;  %v13387_v40 = vld [vmem:[#allocation2 + $0x20] sm:$0xff] }
 0x505   :  { %8187 = vmatprep.subr.mxu0 %v20893_v44  ;;  %8394 = vmatprep.subr.mxu1 %v20893_v44  ;;  %v6826_v62 = vpop.f32.mrf.mxu0  ;;  %v6971_v14 = vpop.f32.mrf.mxu1 }
 0x506   :  { %8189 = vmatpush1.msra.mxu0 %v18056_v35  ;;  %8400 = vmatpush1.msra.mxu1 %v8399_v2  ;;  %v18213_v50 = vadd.f32 %v18145_v26, %v6825_v25  ;;  %v18220_v2 = vand.u32 4294901760, %v8156_v3  ;;  %v8455_v26 = vand.u32 4294901760, %v8454_v0  ;;  %v18231_v62 = vand.u32 4294901760, %v13387_v40 }
 0x507   :  { %8190 = vmatprep.subr.mxu0 %v20893_v44  ;;  %8401 = vmatprep.subr.mxu1 %v20893_v44 }
 0x508   :  { %8192 = vmatpush1.msra.mxu0 %v18071_v20  ;;  %8407 = vmatpush1.msra.mxu1 %v8406_v4  ;;  %v18234_v14 = vsub.f32 %v8156_v3, %v18220_v2 }
 0x509   :  { %8193 = vmatprep.subr.mxu0 %v20893_v44  ;;  %8408 = vmatprep.subr.mxu1 %v20893_v44  ;;  %v6833_v8 = vpop.f32.mrf.mxu0 }
 0x50a   :  { %8195 = vmatpush1.msra.mxu0 %v18078_v51  ;;  %8414 = vmatpush1.msra.mxu1 %v8413_v46  ;;  %v6834_v22 = vadd.f32 %v6833_v8, %v17994_v61  ;;  %v21114_v46 = vld [vmem:[#allocation65_spill] sm:$0xff]  ;;  %v20610_v3 = vand.u32 4294901760, %v18234_v14  ;;  %v18247_v8 = vsub.f32 %v13387_v40, %v18231_v62 }
 0x50b   :  { %8196 = vmatprep.subr.mxu0 %v20893_v44  ;;  %8443 = vmatprep.subr.mxu1 %v20893_v44  ;;  %v6835_v25 = vpop.f32.mrf.mxu0  ;;  %v13389_v40 = vld [vmem:[#allocation2 + $0x50] sm:$0xff] }
 0x50c   :  { %8198 = vmatpush1.msra.mxu0 %v18095_v56  ;;  %8449 = vmatpush2.msra.mxu1 %v8448_v19  ;;  %v18227_v4 = vadd.f32 %v6958_v43, %v6834_v22  ;;  %v8158_v19 = vsel %vm4399_vm3, %v13388_v17, 0  ;;  %v20609_v22 = vand.u32 4294901760, %v18247_v8  ;;  %v21116_v25 = vld [vmem:[#allocation18_spill] sm:$0xff]  ;;  %v21119_v17 = vld [vmem:[#allocation20_spill] sm:$0xff] }
 0x50d   :  { %8199 = vmatprep.subr.mxu0 %v20893_v44  ;;  %8450 = vmatprep.subr.mxu1 %v20893_v44 }
 0x50e   :  { %8201 = vmatpush1.msra.mxu0 %v18104_v36  ;;  %8456 = vmatpush2.msra.mxu1 %v8455_v26  ;;  %v6842_v61 = vpop.f32.mrf.mxu0  ;;  %v8266_v12 = vsub.f32 %v18247_v8, %v20609_v22 }
 0x50f   :  { %8202 = vmatprep.subr.mxu0 %v20893_v44  ;;  %8460 = vmatmul.mubr.f32.vlgmr.msra.gmra.mxu1 %v21114_v46  ;;  %v6843_v43 = vadd.f32 %v6842_v61, %v18023_v27  ;;  %v18257_v27 = vand.u32 4294901760, %v8158_v19  ;;  %v18271_v61 = vand.u32 4294901760, %v13389_v40 }
 0x510   :  { %8623 = vmatprep.subr.mxu1 %v20893_v44  ;;  %8204 = vmatpush1.msra.mxu0 %v18119_v16  ;;  %v6844_v0 = vpop.f32.mrf.mxu0 }
 0x511   :  { %8465 = vmatprep.mubr.f32.mxu1 %v18220_v2  ;;  %8625 = vmatpush1.msra.mxu1 %v17928_v24  ;;  %v18249_v26 = vadd.f32 %v6969_v42, %v6843_v43  ;;  %21115 = vst [vmem:[#allocation24_spill] sm:$0xff] %v18257_v27  ;;  %v8260_v42 = vsub.f32 %v18234_v14, %v20610_v3  ;;  %21117 = vst [vmem:[#allocation25_spill] sm:$0xff] %v18271_v61  ;;  %v21118_v0 = vld [vmem:[#allocation80_spill] sm:$0xff]  ;;  %v21120_v3 = vld [vmem:[#allocation85_spill] sm:$0xff] }
 0x512   :  { %8205 = vmatprep.subr.mxu0 %v20893_v44  ;;  %8626 = vmatprep.subr.mxu1 %v20893_v44  ;;  %v18274_v43 = vsub.f32 %v8158_v19, %v18257_v27 }
 0x513   :  { %8207 = vmatpush1.msra.mxu0 %v18131_v53  ;;  %8628 = vmatpush1.msra.mxu1 %v17937_v63  ;;  %v8261_v58 = vand.u32 4294901760, %v8260_v42  ;;  %v8267_v42 = vand.u32 4294901760, %v8266_v12 }
 0x514   :  { %8236 = vmatprep.subr.mxu0 %v20893_v44  ;;  %8467 = vmatmul.mubr.f32.gmra.mxu1 %v18231_v62  ;;  %v20611_v19 = vand.u32 4294901760, %v18274_v43 }
 0x515   :  { %8629 = vmatprep.subr.mxu1 %v20893_v44  ;;  %8238 = vmatpush2.msra.mxu0 %v18143_v28 }
 0x516   :  { %8472 = vmatprep.mubr.f32.mxu1 %v21116_v25  ;;  %8631 = vmatpush1.msra.mxu1 %v17949_v55 }
 0x517   :  { %8239 = vmatprep.subr.mxu0 %v20893_v44  ;;  %8632 = vmatprep.subr.mxu1 %v20893_v44 }
 0x518   :  { %8241 = vmatpush2.msra.mxu0 %v18158_v48  ;;  %8634 = vmatpush1.msra.mxu1 %v17959_v13 }
 0x519   :  { %8253 = vmatmul.mubr.f32.vlgmr.msra.gmra.mxu0 %v21118_v0  ;;  %8474 = vmatmul.mubr.f32.gmra.mxu1 %v21119_v17  ;;  %v18288_v0 = vsub.f32 %v13389_v40, %v18271_v61  ;;  %v8290_v40 = vsub.f32 %v18274_v43, %v20611_v19  ;;  %v21123_v17 = vld [vmem:[#allocation69_spill] sm:$0xff] }
 0x51a   :  { %8486 = vmatprep.subr.mxu0 %v20893_v44  ;;  %8635 = vmatprep.subr.mxu1 %v20893_v44 }
 0x51b   :  { %8262 = vmatprep.mubr.f32.mxu0 %v8261_v58  ;;  %8479 = vmatprep.mubr.f32.mxu1 %v18257_v27  ;;  %v20616_v22 = vand.u32 4294901760, %v18288_v0  ;;  %v8291_v19 = vand.u32 4294901760, %v8290_v40  ;;  %v21122_v27 = vld [vmem:[#allocation87_spill] sm:$0xff] }
 0x51c   :  { %8489 = vmatpush1.msra.mxu0 %v17944_v41  ;;  %8637 = vmatpush1.msra.mxu1 %v17981_v21 }
 0x51d   :  { %8490 = vmatprep.subr.mxu0 %v20893_v44  ;;  %8638 = vmatprep.subr.mxu1 %v20893_v44 }
 0x51e   :  { %8493 = vmatpush1.msra.mxu0 %v17954_v9  ;;  %8640 = vmatpush1.msra.mxu1 %v17992_v1 }
 0x51f   :  { %8268 = vmatmul.mubr.f32.gmra.mxu0 %v8267_v42  ;;  %8481 = vmatmul.mubr.f32.gmra.mxu1 %v18271_v61  ;;  %v7206_v58 = vpop.f32.mrf.mxu1  ;;  %v21121_v42 = vld [vmem:[#allocation35_spill] sm:$0xff] }
 0x520   :  { %8494 = vmatprep.subr.mxu0 %v20893_v44  ;;  %8641 = vmatprep.subr.mxu1 %v20893_v44 }
 0x521   :  { %8277 = vmatprep.mubr.f32.mxu0 %v21120_v3  ;;  %8497 = vmatpush1.msra.mxu0 %v17970_v57  ;;  %v7208_v12 = vpop.f32.mrf.mxu1  ;;  %v8296_v3 = vsub.f32 %v18288_v0, %v20616_v22 }
 0x522   :  { %8643 = vmatpush1.msra.mxu1 %v18019_v38  ;;  %8708 = vmatprep.mubr.f32.mxu1 %v21121_v42 }
 0x523   :  { %8498 = vmatprep.subr.mxu0 %v20893_v44  ;;  %8644 = vmatprep.subr.mxu1 %v20893_v44  ;;  %v8297_v40 = vand.u32 4294901760, %v8296_v3 }
 0x524   :  { %8501 = vmatpush1.msra.mxu0 %v17979_v34  ;;  %8646 = vmatpush1.msra.mxu1 %v18032_v47  ;;  %v7213_v61 = vpop.f32.mrf.mxu1 }
 0x525   :  { %8283 = vmatmul.mubr.f32.gmra.mxu0 %v21122_v27  ;;  %8502 = vmatprep.subr.mxu0 %v20893_v44 }
 0x526   :  { %8647 = vmatprep.subr.mxu1 %v20893_v44  ;;  %8292 = vmatprep.mubr.f32.mxu0 %v8291_v19  ;;  %v7215_v12 = vpop.f32.mrf.mxu1 }
 0x527   :  { %8505 = vmatpush1.msra.mxu0 %v18006_v52  ;;  %8649 = vmatpush1.msra.mxu1 %v18043_v54 }
 0x528   :  { %8506 = vmatprep.subr.mxu0 %v20893_v44  ;;  %8650 = vmatprep.subr.mxu1 %v20893_v44 }
 0x529   :  { %8509 = vmatpush1.msra.mxu0 %v18017_v30  ;;  %8652 = vmatpush1.msra.mxu1 %v18056_v35  ;;  %v7095_v27 = vpop.f32.mrf.mxu0  ;;  %v7220_v42 = vpop.f32.mrf.mxu1 }
 0x52a   :  { %8298 = vmatmul.mubr.f32.gmra.mxu0 %v8297_v40  ;;  %8510 = vmatprep.subr.mxu0 %v20893_v44  ;;  %v7096_v19 = vadd.f32 %v7095_v27, %v18189_v39 }
 0x52b   :  { %8653 = vmatprep.subr.mxu1 %v20893_v44  ;;  %8513 = vmatpush1.msra.mxu0 %v18039_v7  ;;  %v7097_v12 = vpop.f32.mrf.mxu0  ;;  %v7222_v22 = vpop.f32.mrf.mxu1 }
 0x52c   :  { %8588 = vmatprep.mubr.f32.mxu0 %v21123_v17  ;;  %8655 = vmatpush1.msra.mxu1 %v18071_v20  ;;  %v7207_v3 = vadd.f32 %v7206_v58, %v7096_v19 }
 0x52d   :  { %8514 = vmatprep.subr.mxu0 %v20893_v44  ;;  %8656 = vmatprep.subr.mxu1 %v20893_v44 }
 0x52e   :  { %8517 = vmatpush1.msra.mxu0 %v18051_v31  ;;  %8658 = vmatpush1.msra.mxu1 %v18078_v51  ;;  %v18332_v39 = vadd.f32 %v7207_v3, %v17822_v23 }
 0x52f   :  { %8518 = vmatprep.subr.mxu0 %v20893_v44  ;;  %8659 = vmatprep.subr.mxu1 %v20893_v44  ;;  %v7102_v22 = vpop.f32.mrf.mxu0  ;;  %v7227_v17 = vpop.f32.mrf.mxu1 }
 0x530   :  { %8521 = vmatpush1.msra.mxu0 %v18066_v59  ;;  %8661 = vmatpush1.msra.mxu1 %v18095_v56  ;;  %v7103_v58 = vadd.f32 %v7102_v22, %v18213_v50  ;;  %v21124_v22 = vld [vmem:[#allocation19_spill] sm:$0xff] }
 0x531   :  { %8522 = vmatprep.subr.mxu0 %v20893_v44  ;;  %8662 = vmatprep.subr.mxu1 %v20893_v44  ;;  %v7104_v40 = vpop.f32.mrf.mxu0  ;;  %v7229_v27 = vpop.f32.mrf.mxu1 }
 0x532   :  { %8525 = vmatpush1.msra.mxu0 %v18076_v29  ;;  %8664 = vmatpush1.msra.mxu1 %v18104_v36  ;;  %v7214_v23 = vadd.f32 %v7213_v61, %v7103_v58  ;;  %v21125_v40 = vand.u32 4294901760, %v18234_v14 }
 0x533   :  { %8526 = vmatprep.subr.mxu0 %v20893_v44  ;;  %8665 = vmatprep.subr.mxu1 %v20893_v44 }
 0x534   :  { %8529 = vmatpush1.msra.mxu0 %v18093_v33  ;;  %8667 = vmatpush1.msra.mxu1 %v18119_v16  ;;  %v18348_v50 = vadd.f32 %v7214_v23, %v17837_v60 }
 0x535   :  { %8530 = vmatprep.subr.mxu0 %v20893_v44  ;;  %8668 = vmatprep.subr.mxu1 %v20893_v44  ;;  %v7109_v19 = vpop.f32.mrf.mxu0 }
 0x536   :  { %8533 = vmatpush1.msra.mxu0 %v18101_v37  ;;  %8670 = vmatpush1.msra.mxu1 %v18131_v53  ;;  %v7110_v61 = vadd.f32 %v7109_v19, %v18227_v4 }
 0x537   :  { %8534 = vmatprep.subr.mxu0 %v20893_v44  ;;  %8699 = vmatprep.subr.mxu1 %v20893_v44  ;;  %v7111_v12 = vpop.f32.mrf.mxu0 }
 0x538   :  { %8537 = vmatpush1.msra.mxu0 %v18117_v32  ;;  %8701 = vmatpush2.msra.mxu1 %v18143_v28  ;;  %v7221_v60 = vadd.f32 %v7220_v42, %v7110_v61 }
 0x539   :  { %8538 = vmatprep.subr.mxu0 %v20893_v44  ;;  %8702 = vmatprep.subr.mxu1 %v20893_v44 }
 0x53a   :  { %8541 = vmatpush1.msra.mxu0 %v18129_v11  ;;  %8704 = vmatpush2.msra.mxu1 %v18158_v48  ;;  %v18364_v4 = vadd.f32 %v7221_v60, %v17852_v15  ;;  %v7116_v3 = vpop.f32.mrf.mxu0  ;;  %v21145_v60 = vand.u32 4294901760, %v18101_v37  ;;  %v21147_v37 = vand.u32 4294901760, %v18129_v11  ;;  %v21151_v11 = vand.u32 4294901760, %v18178_v6 }
 0x53b   :  { %8542 = vmatprep.subr.mxu0 %v20893_v44  ;;  %8712 = vmatmul.mubr.f32.vlgmr.msra.gmra.mxu1 %v21124_v22  ;;  %v7117_v58 = vadd.f32 %v7116_v3, %v18249_v26  ;;  %v21126_v26 = vand.u32 4294901760, %v18247_v8  ;;  %v21149_v3 = vand.u32 4294901760, %v18156_v45  ;;  %v21154_v22 = vld [vmem:[#allocation25_spill] sm:$0xff] }
 0x53c   :  { %8897 = vmatprep.subr.mxu1 %v20893_v44  ;;  %8545 = vmatpush1.msra.mxu0 %v18141_v49  ;;  %v7118_v42 = vpop.f32.mrf.mxu0 }
 0x53d   :  { %8719 = vmatprep.mubr.f32.mxu1 %v21125_v40  ;;  %8899 = vmatpush1.msra.mxu1 %v17928_v24  ;;  %v7228_v27 = vadd.f32 %v7227_v17, %v7117_v58  ;;  %v21127_v24 = vld [vmem:[#allocation83_spill] sm:$0xff]  ;;  %v21131_v17 = vand.u32 4294901760, %v17944_v41  ;;  %v21134_v41 = vld [vmem:[#allocation21_spill] sm:$0xff] }
 0x53e   :  { %8546 = vmatprep.subr.mxu0 %v20893_v44  ;;  %8900 = vmatprep.subr.mxu1 %v20893_v44 }
 0x53f   :  { %8549 = vmatpush1.msra.mxu0 %v18156_v45  ;;  %8902 = vmatpush1.msra.mxu1 %v17937_v63  ;;  %v18379_v15 = vadd.f32 %v7228_v27, %v17867_v10  ;;  %v21128_v10 = vld [vmem:[#allocation23_spill] sm:$0xff]  ;;  %v21129_v63 = vld [vmem:[#allocation81_spill] sm:$0xff]  ;;  %v21153_v45 = vld [vmem:[#allocation24_spill] sm:$0xff] }
 0x540   :  { %8578 = vmatprep.subr.mxu0 %v20893_v44  ;;  %8723 = vmatmul.mubr.f32.gmra.mxu1 %v21126_v26 }
 0x541   :  { %8903 = vmatprep.subr.mxu1 %v20893_v44  ;;  %8581 = vmatpush2.msra.mxu0 %v18168_v5 }
 0x542   :  { %8730 = vmatprep.mubr.f32.mxu1 %v21127_v24  ;;  %8905 = vmatpush1.msra.mxu1 %v17949_v55  ;;  %v21130_v55 = vand.u32 4294901760, %v18274_v43 }
 0x543   :  { %8582 = vmatprep.subr.mxu0 %v20893_v44  ;;  %8906 = vmatprep.subr.mxu1 %v20893_v44 }
 0x544   :  { %8585 = vmatpush2.msra.mxu0 %v18178_v6  ;;  %8908 = vmatpush1.msra.mxu1 %v17959_v13  ;;  %v21132_v13 = vand.u32 4294901760, %v17954_v9  ;;  %v21136_v9 = vand.u32 4294901760, %v17979_v34  ;;  %v21139_v34 = vand.u32 4294901760, %v18017_v30  ;;  %v21141_v30 = vand.u32 4294901760, %v18051_v31 }
 0x545   :  { %8591 = vmatmul.mubr.f32.vlgmr.msra.gmra.mxu0 %v21128_v10  ;;  %8734 = vmatmul.mubr.f32.gmra.mxu1 %v21129_v63 }
 0x546   :  { %8750 = vmatprep.subr.mxu0 %v20893_v44  ;;  %8909 = vmatprep.subr.mxu1 %v20893_v44 }
 0x547   :  { %8597 = vmatprep.mubr.f32.mxu0 %v18234_v14  ;;  %8741 = vmatprep.mubr.f32.mxu1 %v21130_v55  ;;  %v21133_v14 = vand.u32 4294901760, %v18288_v0 }
 0x548   :  { %8754 = vmatpush1.msra.mxu0 %v21131_v17  ;;  %8911 = vmatpush1.msra.mxu1 %v17981_v21  ;;  %v21135_v21 = vand.u32 4294901760, %v17970_v57 }
 0x549   :  { %8755 = vmatprep.subr.mxu0 %v20893_v44  ;;  %8912 = vmatprep.subr.mxu1 %v20893_v44 }
 0x54a   :  { %8759 = vmatpush1.msra.mxu0 %v21132_v13  ;;  %8914 = vmatpush1.msra.mxu1 %v17992_v1 }
 0x54b   :  { %8600 = vmatmul.mubr.f32.gmra.mxu0 %v18247_v8  ;;  %8745 = vmatmul.mubr.f32.gmra.mxu1 %v21133_v14  ;;  %v7587_v23 = vpop.f32.mrf.mxu1  ;;  %v21137_v8 = vld [vmem:[#allocation84_spill] sm:$0xff] }
 0x54c   :  { %8760 = vmatprep.subr.mxu0 %v20893_v44  ;;  %8915 = vmatprep.subr.mxu1 %v20893_v44 }
 0x54d   :  { %8606 = vmatprep.mubr.f32.mxu0 %v21134_v41  ;;  %8764 = vmatpush1.msra.mxu0 %v21135_v21  ;;  %v7589_v19 = vpop.f32.mrf.mxu1 }
 0x54e   :  { %8917 = vmatpush1.msra.mxu1 %v18019_v38  ;;  %8980 = vmatprep.mubr.f32.mxu1 %v21112_v18  ;;  %v21138_v38 = vand.u32 4294901760, %v18006_v52  ;;  %v21140_v52 = vand.u32 4294901760, %v18039_v7 }
 0x54f   :  { %8765 = vmatprep.subr.mxu0 %v20893_v44  ;;  %8918 = vmatprep.subr.mxu1 %v20893_v44 }
 0x550   :  { %8769 = vmatpush1.msra.mxu0 %v21136_v9  ;;  %8920 = vmatpush1.msra.mxu1 %v18032_v47  ;;  %v7594_v1 = vpop.f32.mrf.mxu1 }
 0x551   :  { %8609 = vmatmul.mubr.f32.gmra.mxu0 %v21137_v8  ;;  %8770 = vmatprep.subr.mxu0 %v20893_v44 }
 0x552   :  { %8921 = vmatprep.subr.mxu1 %v20893_v44  ;;  %8615 = vmatprep.mubr.f32.mxu0 %v18274_v43  ;;  %v7596_v57 = vpop.f32.mrf.mxu1 }
 0x553   :  { %8774 = vmatpush1.msra.mxu0 %v21138_v38  ;;  %8923 = vmatpush1.msra.mxu1 %v18043_v54 }
 0x554   :  { %8775 = vmatprep.subr.mxu0 %v20893_v44  ;;  %8924 = vmatprep.subr.mxu1 %v20893_v44 }
 0x555   :  { %8779 = vmatpush1.msra.mxu0 %v21139_v34  ;;  %8926 = vmatpush1.msra.mxu1 %v18056_v35  ;;  %v7380_v47 = vpop.f32.mrf.mxu0  ;;  %v7601_v61 = vpop.f32.mrf.mxu1 }
 0x556   :  { %8618 = vmatmul.mubr.f32.gmra.mxu0 %v18288_v0  ;;  %8780 = vmatprep.subr.mxu0 %v20893_v44  ;;  %v18436_v43 = vadd.f32 %v7587_v23, %v7380_v47  ;;  %v21142_v0 = vand.u32 4294901760, %v18066_v59  ;;  %v21144_v59 = vand.u32 4294901760, %v18093_v33  ;;  %v21146_v33 = vand.u32 4294901760, %v18117_v32 }
 0x557   :  { %8927 = vmatprep.subr.mxu1 %v20893_v44  ;;  %8784 = vmatpush1.msra.mxu0 %v21140_v52  ;;  %v7382_v54 = vpop.f32.mrf.mxu0  ;;  %v7603_v12 = vpop.f32.mrf.mxu1  ;;  %v21148_v32 = vand.u32 4294901760, %v18141_v49  ;;  %v21152_v49 = vld [vmem:[#allocation20_spill] sm:$0xff] }
 0x558   :  { %8869 = vmatprep.mubr.f32.mxu0 %v21112_v18  ;;  %8929 = vmatpush1.msra.mxu1 %v18071_v20 }
 0x559   :  { %8785 = vmatprep.subr.mxu0 %v20893_v44  ;;  %8930 = vmatprep.subr.mxu1 %v20893_v44 }
 0x55a   :  { %8789 = vmatpush1.msra.mxu0 %v21141_v30  ;;  %8932 = vmatpush1.msra.mxu1 %v18078_v51  ;;  %v21143_v51 = vand.u32 4294901760, %v18076_v29 }
 0x55b   :  { %8790 = vmatprep.subr.mxu0 %v20893_v44  ;;  %8933 = vmatprep.subr.mxu1 %v20893_v44  ;;  %v7395_v7 = vpop.f32.mrf.mxu0  ;;  %v7608_v35 = vpop.f32.mrf.mxu1 }
 0x55c   :  { %8794 = vmatpush1.msra.mxu0 %v21142_v0  ;;  %8935 = vmatpush1.msra.mxu1 %v18095_v56  ;;  %v18453_v20 = vadd.f32 %v7594_v1, %v7395_v7 }
 0x55d   :  { %8795 = vmatprep.subr.mxu0 %v20893_v44  ;;  %8936 = vmatprep.subr.mxu1 %v20893_v44  ;;  %v7397_v31 = vpop.f32.mrf.mxu0  ;;  %v7610_v18 = vpop.f32.mrf.mxu1 }
 0x55e   :  { %8799 = vmatpush1.msra.mxu0 %v21143_v51  ;;  %8938 = vmatpush1.msra.mxu1 %v18104_v36 }
 0x55f   :  { %8800 = vmatprep.subr.mxu0 %v20893_v44  ;;  %8939 = vmatprep.subr.mxu1 %v20893_v44 }
 0x560   :  { %8804 = vmatpush1.msra.mxu0 %v21144_v59  ;;  %8941 = vmatpush1.msra.mxu1 %v18119_v16 }
 0x561   :  { %8805 = vmatprep.subr.mxu0 %v20893_v44  ;;  %8942 = vmatprep.subr.mxu1 %v20893_v44  ;;  %v7410_v56 = vpop.f32.mrf.mxu0 }
 0x562   :  { %8809 = vmatpush1.msra.mxu0 %v21145_v60  ;;  %8944 = vmatpush1.msra.mxu1 %v18131_v53  ;;  %v7602_v29 = vadd.f32 %v7601_v61, %v7410_v56 }
 0x563   :  { %8810 = vmatprep.subr.mxu0 %v20893_v44  ;;  %8973 = vmatprep.subr.mxu1 %v20893_v44  ;;  %v7412_v36 = vpop.f32.mrf.mxu0 }
 0x564   :  { %8814 = vmatpush1.msra.mxu0 %v21146_v33  ;;  %8975 = vmatpush2.msra.mxu1 %v18143_v28 }
 0x565   :  { %8815 = vmatprep.subr.mxu0 %v20893_v44  ;;  %8976 = vmatprep.subr.mxu1 %v20893_v44 }
 0x566   :  { %8819 = vmatpush1.msra.mxu0 %v21147_v37  ;;  %8978 = vmatpush2.msra.mxu1 %v18158_v48  ;;  %v7425_v53 = vpop.f32.mrf.mxu0  ;;  %v21150_v48 = vand.u32 4294901760, %v18168_v5 }
 0x567   :  { %8820 = vmatprep.subr.mxu0 %v20893_v44  ;;  %8982 = vmatmul.mubr.f32.vlgmr.msra.gmra.mxu1 %v21114_v46  ;;  %v7609_v16 = vadd.f32 %v7608_v35, %v7425_v53 }
 0x568   :  { %8824 = vmatpush1.msra.mxu0 %v21148_v32  ;;  %8987 = vmatprep.mubr.f32.mxu1 %v18220_v2  ;;  %v7427_v28 = vpop.f32.mrf.mxu0 }
 0x569   :  { %8825 = vmatprep.subr.mxu0 %v20893_v44 }
 0x56a   :  { %8829 = vmatpush1.msra.mxu0 %v21149_v3 }
 0x56b   :  { %8858 = vmatprep.subr.mxu0 %v20893_v44  ;;  %8989 = vmatmul.mubr.f32.gmra.mxu1 %v18231_v62 }
 0x56c   :  { %8862 = vmatpush2.msra.mxu0 %v21150_v48  ;;  %8994 = vmatprep.mubr.f32.mxu1 %v21116_v25 }
 0x56d   :  { %8863 = vmatprep.subr.mxu0 %v20893_v44 }
 0x56e   :  { %8867 = vmatpush2.msra.mxu0 %v21151_v11 }
 0x56f   :  { %8871 = vmatmul.mubr.f32.vlgmr.msra.gmra.mxu0 %v21114_v46  ;;  %8996 = vmatmul.mubr.f32.gmra.mxu1 %v21152_v49 }
 0x570   :  { %8876 = vmatprep.mubr.f32.mxu0 %v18220_v2  ;;  %9001 = vmatprep.mubr.f32.mxu1 %v21153_v45 }
 0x573   :  { %8878 = vmatmul.mubr.f32.gmra.mxu0 %v18231_v62  ;;  %9003 = vmatmul.mubr.f32.gmra.mxu1 %v21154_v22 }
 0x574   :  { %8883 = vmatprep.mubr.f32.mxu0 %v21116_v25 }
 0x577   :  { %8885 = vmatmul.mubr.f32.gmra.mxu0 %v21152_v49  ;;  %v7839_v5 = vpop.f32.mrf.mxu1 }
 0x578   :  { %8890 = vmatprep.mubr.f32.mxu0 %v21153_v45 }
 0x579   :  { %v7841_v6 = vpop.f32.mrf.mxu1 }
 0x57b   :  { %8892 = vmatmul.mubr.f32.gmra.mxu0 %v21154_v22 }
 0x57c   :  { %v7850_v46 = vpop.f32.mrf.mxu1 }
 0x57e   :  { %v7852_v58 = vpop.f32.mrf.mxu1 }
 0x581   :  { %v7718_v42 = vpop.f32.mrf.mxu0  ;;  %v7861_v2 = vpop.f32.mrf.mxu1 }
 0x582   :  { %v7719_v40 = vadd.f32 %v7718_v42, %v18436_v43 }
 0x583   :  { %v7720_v27 = vpop.f32.mrf.mxu0  ;;  %v7863_v62 = vpop.f32.mrf.mxu1 }
 0x584   :  { %v7840_v26 = vadd.f32 %v7839_v5, %v7719_v40 }
 0x587   :  { %v7727_v24 = vpop.f32.mrf.mxu0  ;;  %v7872_v10 = vpop.f32.mrf.mxu1 }
 0x588   :  { %v7728_v25 = vadd.f32 %v7727_v24, %v18453_v20 }
 0x589   :  { %v7729_v63 = vpop.f32.mrf.mxu0  ;;  %v7874_v55 = vpop.f32.mrf.mxu1 }
 0x58a   :  { %v7851_v17 = vadd.f32 %v7850_v46, %v7728_v25 }
 0x58d   :  { %v7736_v13 = vpop.f32.mrf.mxu0 }
 0x58e   :  { %v7737_v14 = vadd.f32 %v7736_v13, %v7602_v29 }
 0x58f   :  { %v7738_v23 = vpop.f32.mrf.mxu0 }
 0x590   :  { %v7862_v41 = vadd.f32 %v7861_v2, %v7737_v14 }
 0x592   :  { %v7745_v21 = vpop.f32.mrf.mxu0 }
 0x593   :  { %v7746_v19 = vadd.f32 %v7745_v21, %v7609_v16 }
 0x594   :  { %v7747_v9 = vpop.f32.mrf.mxu0 }
 0x595   :  { %v7873_v1 = vadd.f32 %v7872_v10, %v7746_v19 }
 0x5a3   :  { %v8109_v8 = vpop.f32.mrf.mxu1 }
 0x5a5   :  { %v8111_v57 = vpop.f32.mrf.mxu1 }
 0x5a8   :  { %v8116_v38 = vpop.f32.mrf.mxu1 }
 0x5aa   :  { %v8118_v34 = vpop.f32.mrf.mxu1 }
 0x5ad   :  { %v7998_v47 = vpop.f32.mrf.mxu0  ;;  %v8123_v61 = vpop.f32.mrf.mxu1 }
 0x5ae   :  { %v7999_v43 = vadd.f32 %v7998_v47, %v7840_v26 }
 0x5af   :  { %v8000_v52 = vpop.f32.mrf.mxu0  ;;  %v8125_v54 = vpop.f32.mrf.mxu1 }
 0x5b0   :  { %v8110_v12 = vadd.f32 %v8109_v8, %v7999_v43 }
 0x5b2   :  { %v18509_v30 = vadd.f32 %v8110_v12, %v18332_v39 }
 0x5b3   :  { %v8005_v7 = vpop.f32.mrf.mxu0  ;;  %v8130_v35 = vpop.f32.mrf.mxu1 }
 0x5b4   :  { %v8006_v0 = vadd.f32 %v8005_v7, %v7851_v17 }
 0x5b5   :  { %v8007_v20 = vpop.f32.mrf.mxu0  ;;  %v8132_v31 = vpop.f32.mrf.mxu1 }
 0x5b6   :  { %v8117_v18 = vadd.f32 %v8116_v38, %v8006_v0 }
 0x5b8   :  { %v18512_v51 = vadd.f32 %v8117_v18, %v18348_v50 }
 0x5b9   :  { %v8012_v59 = vpop.f32.mrf.mxu0 }
 0x5ba   :  { %v8013_v56 = vadd.f32 %v8012_v59, %v7862_v41 }
 0x5bb   :  { %v8014_v60 = vpop.f32.mrf.mxu0 }
 0x5bc   :  { %v8124_v29 = vadd.f32 %v8123_v61, %v8013_v56  ;;  %v18523_v56 = vld [vmem:[%s20421_s4] ss:$0 sm:$0xff]  ;;  %s13509_s4 = smov 112  }
 0x5be   :  { %v18515_v36 = vadd.f32 %v8124_v29, %v18364_v4  ;;  %v8019_v33 = vpop.f32.mrf.mxu0 }
 0x5bf   :  { %v8020_v37 = vadd.f32 %v8019_v33, %v7873_v1  ;;  %v9165_v33 = vld [vmem:[#allocation10 + $0xf8] sm:$0xff] }
 0x5c0   :  { %v8021_v39 = vpop.f32.mrf.mxu0 }
 0x5c1   :  { %v8131_v53 = vadd.f32 %v8130_v35, %v8020_v37 }
 0x5c3   :  { %v18518_v16 = vadd.f32 %v8131_v53, %v18379_v15  ;;  %v18526_v53 = vand.u32 4294901760, %v9165_v33 }
 0x5c5   :  { %12321 = vmatprep.subr.mxu0 %v18526_v53 }
 0x5cf   :  { %v8461_v32 = vpop.f32.mrf.mxu1 }
 0x5d1   :  { %v8463_v28 = vpop.f32.mrf.mxu1 }
 0x5d4   :  { %v8468_v3 = vpop.f32.mrf.mxu1 }
 0x5d6   :  { %v8470_v48 = vpop.f32.mrf.mxu1 }
 0x5d9   :  { %v8254_v50 = vpop.f32.mrf.mxu0  ;;  %v8475_v11 = vpop.f32.mrf.mxu1 }
 0x5da   :  { %v8462_v49 = vadd.f32 %v8461_v32, %v8254_v50  ;;  %v9149_v32 = vld [vmem:[#allocation10 + $0x78] sm:$0xff] }
 0x5db   :  { %v8256_v45 = vpop.f32.mrf.mxu0  ;;  %v8477_v22 = vpop.f32.mrf.mxu1  ;;  %v18528_v50 = vand.u32 4294901760, %v9149_v32 }
 0x5dc   :  { %v18532_v22 = vsub.f32 %v9165_v33, %v18526_v53 }
 0x5dd   :  { %12322 = vmatpush3.msra.mxu0 %v18528_v50 }
 0x5de   :  { %21155 = vst [vmem:[#allocation27_spill] sm:$0xff] %v18532_v22 }
 0x5df   :  { %v8269_v5 = vpop.f32.mrf.mxu0  ;;  %v8482_v6 = vpop.f32.mrf.mxu1 }
 0x5e0   :  { %v8469_v4 = vadd.f32 %v8468_v3, %v8269_v5 }
 0x5e1   :  { %v8271_v46 = vpop.f32.mrf.mxu0  ;;  %v8484_v58 = vpop.f32.mrf.mxu1 }
 0x5e2   :  { %v18538_v46 = vsub.f32 %v9149_v32, %v18528_v50 }
 0x5e5   :  { %v8284_v42 = vpop.f32.mrf.mxu0 }
 0x5e6   :  { %v8476_v2 = vadd.f32 %v8475_v11, %v8284_v42  ;;  %v9164_v11 = vld [vmem:[#allocation10 + $0xf0] sm:$0xff]  ;;  %v9163_v42 = vld [vmem:[#allocation10 + $0xe8] sm:$0xff] }
 0x5e7   :  { %v8286_v40 = vpop.f32.mrf.mxu0  ;;  %v18534_v5 = vand.u32 4294901760, %v9164_v11 }
 0x5e9   :  { %12323 = vmatprep.subr.mxu0 %v18534_v5 }
 0x5ea   :  { %v8299_v27 = vpop.f32.mrf.mxu0 }
 0x5eb   :  { %v8483_v15 = vadd.f32 %v8482_v6, %v8299_v27  ;;  %v9148_v6 = vld [vmem:[#allocation10 + $0x70] sm:$0xff] }
 0x5ec   :  { %v8301_v62 = vpop.f32.mrf.mxu0  ;;  %v18540_v58 = vand.u32 4294901760, %v9148_v6 }
 0x5ed   :  { %v9147_v62 = vld [vmem:[#allocation10 + $0x68] sm:$0xff] }
 0x5ee   :  { %12324 = vmatpush3.msra.mxu0 %v18540_v58 }
 0x5fb   :  { %v8713_v26 = vpop.f32.mrf.mxu1 }
 0x5fd   :  { %v8715_v24 = vpop.f32.mrf.mxu1 }
 0x5fe   :  { %v20631_v24 = vand.u32 4294901760, %v18538_v46 }
 0x600   :  { %v8724_v10 = vpop.f32.mrf.mxu1 }
 0x602   :  { %v8726_v25 = vpop.f32.mrf.mxu1 }
 0x603   :  { %v18551_v25 = vsub.f32 %v9148_v6, %v18540_v58 }
 0x605   :  { %v8592_v63 = vpop.f32.mrf.mxu0  ;;  %v8735_v55 = vpop.f32.mrf.mxu1 }
 0x606   :  { %v8593_v34 = vadd.f32 %v8592_v63, %v8462_v49  ;;  %v18553_v63 = vand.u32 4294901760, %v9163_v42 }
 0x607   :  { %v8594_v17 = vpop.f32.mrf.mxu0  ;;  %v8737_v13 = vpop.f32.mrf.mxu1 }
 0x608   :  { %v8714_v52 = vadd.f32 %v8713_v26, %v8593_v34  ;;  %v18560_v13 = vand.u32 4294901760, %v9147_v62  ;;  %12325 = vmatprep.subr.mxu0 %v18553_v63 }
 0x60a   :  { %12326 = vmatpush3.msra.mxu0 %v18560_v13 }
 0x60b   :  { %v8601_v14 = vpop.f32.mrf.mxu0  ;;  %v8746_v23 = vpop.f32.mrf.mxu1 }
 0x60c   :  { %v8602_v43 = vadd.f32 %v8601_v14, %v8469_v4 }
 0x60d   :  { %v8603_v41 = vpop.f32.mrf.mxu0  ;;  %v8748_v21 = vpop.f32.mrf.mxu1 }
 0x60e   :  { %v8725_v18 = vadd.f32 %v8724_v10, %v8602_v43  ;;  %v18548_v10 = vsub.f32 %v9164_v11, %v18534_v5  ;;  %v20628_v21 = vand.u32 4294901760, %v18551_v25  ;;  %v9160_v11 = vld [vmem:[#allocation10 + $0xd0] sm:$0xff] }
 0x610   :  { %v20630_v41 = vand.u32 4294901760, %v18548_v10 }
 0x611   :  { %v8610_v19 = vpop.f32.mrf.mxu0 }
 0x612   :  { %v8611_v35 = vadd.f32 %v8610_v19, %v8476_v2  ;;  %v18568_v19 = vsub.f32 %v9163_v42, %v18553_v63 }
 0x613   :  { %v8612_v9 = vpop.f32.mrf.mxu0 }
 0x614   :  { %v8736_v48 = vadd.f32 %v8735_v55, %v8611_v35  ;;  %v20627_v43 = vand.u32 4294901760, %v18568_v19  ;;  %v9146_v35 = vld [vmem:[#allocation10 + $0x60] sm:$0xff] }
 0x616   :  { %v8619_v1 = vpop.f32.mrf.mxu0 }
 0x617   :  { %v8620_v59 = vadd.f32 %v8619_v1, %v8483_v15  ;;  %v20634_v15 = vand.u32 4294901760, %v18532_v22 }
 0x618   :  { %v8621_v8 = vpop.f32.mrf.mxu0 }
 0x619   :  { %v8747_v4 = vadd.f32 %v8746_v23, %v8620_v59  ;;  %v9455_v17 = vsub.f32 %v18532_v22, %v20634_v15  ;;  %v9343_v23 = vsub.f32 %v18538_v46, %v20631_v24  ;;  %v9137_v24 = vld [vmem:[#allocation10 + $0x18] sm:$0xff] }
 0x61b   :  { %v9344_v34 = vand.u32 4294901760, %v9343_v23  ;;  %v9159_v23 = vld [vmem:[#allocation10 + $0xc8] sm:$0xff] }
 0x627   :  { %v8983_v57 = vpop.f32.mrf.mxu1 }
 0x629   :  { %v8985_v38 = vpop.f32.mrf.mxu1 }
 0x62b   :  { %v8990_v47 = vpop.f32.mrf.mxu1 }
 0x62d   :  { %v8992_v61 = vpop.f32.mrf.mxu1 }
 0x62e   :  { %v9350_v61 = vsub.f32 %v18551_v25, %v20628_v21 }
 0x62f   :  { %v8872_v54 = vpop.f32.mrf.mxu0  ;;  %v8997_v12 = vpop.f32.mrf.mxu1 }
 0x630   :  { %v8873_v7 = vadd.f32 %v8872_v54, %v8714_v52  ;;  %v9162_v52 = vld [vmem:[#allocation10 + $0xe0] sm:$0xff]  ;;  %v9351_v59 = vand.u32 4294901760, %v9350_v61 }
 0x631   :  { %v8874_v0 = vpop.f32.mrf.mxu0  ;;  %v8999_v20 = vpop.f32.mrf.mxu1 }
 0x632   :  { %v8984_v31 = vadd.f32 %v8983_v57, %v8873_v7  ;;  %v9456_v57 = vand.u32 4294901760, %v9455_v17  ;;  %v18583_v7 = vsub.f32 %v9147_v62, %v18560_v13  ;;  %v9161_v0 = vld [vmem:[#allocation10 + $0xd8] sm:$0xff] }
 0x633   :  { %v8879_v60 = vpop.f32.mrf.mxu0  ;;  %v9004_v29 = vpop.f32.mrf.mxu1  ;;  %v9145_v20 = vld [vmem:[#allocation10 + $0x58] sm:$0xff] }
 0x634   :  { %v9008_v37 = vadd.f32 %v8984_v31, %v18509_v30  ;;  %v8880_v39 = vadd.f32 %v8879_v60, %v8725_v18  ;;  %12356 = vmatprep.subr.mxu1 %v9456_v57  ;;  %v9469_v60 = vsub.f32 %v18568_v19, %v20627_v43 }
 0x635   :  { %v8881_v28 = vpop.f32.mrf.mxu0  ;;  %v9006_v3 = vpop.f32.mrf.mxu1  ;;  %12357 = vmatpush3.msra.mxu1 %v9344_v34 }
 0x636   :  { %v9019_v49 = vadd.f32 %v18523_v56, %v9008_v37  ;;  %v8991_v45 = vadd.f32 %v8990_v47, %v8880_v39  ;;  %v9462_v47 = vsub.f32 %v18548_v10, %v20630_v41  ;;  %v18592_v39 = vand.u32 4294901760, %v9162_v52  ;;  %v9153_v41 = vld [vmem:[#allocation10 + $0x98] sm:$0xff] }
 0x637   :  { %v8886_v30 = vpop.f32.mrf.mxu0  ;;  %v9470_v32 = vand.u32 4294901760, %v9469_v60  ;;  %v18597_v28 = vand.u32 4294901760, %v9146_v35  ;;  %v18599_v3 = vand.u32 4294901760, %v9161_v0 }
 0x638   :  { %v9027_v2 = vrot.slane %v9019_v49, 2  ;;  %v9009_v40 = vadd.f32 %v8991_v45, %v18512_v51  ;;  %v8887_v27 = vadd.f32 %v8886_v30, %v8736_v48  ;;  %v9463_v18 = vand.u32 4294901760, %v9462_v47  ;;  %v9144_v30 = vld [vmem:[#allocation10 + $0x50] sm:$0xff]  ;;  %12327 = vmatprep.subr.mxu0 %v18592_v39 }
 0x639   :  { %v8888_v26 = vpop.f32.mrf.mxu0  ;;  %v18601_v48 = vand.u32 4294901760, %v9145_v20  ;;  %v18609_v6 = vsub.f32 %v9162_v52, %v18592_v39  ;;  %v18614_v42 = vsub.f32 %v9146_v35, %v18597_v28  ;;  %12328 = vmatpush3.msra.mxu0 %v18597_v28 }
 0x63a   :  { %v9020_v51 = vadd.f32 %v18523_v56, %v9009_v40  ;;  %v8998_v55 = vadd.f32 %v8997_v12, %v8887_v27  ;;  %12358 = vmatprep.subr.mxu1 %v9463_v18  ;;  %v18623_v26 = vand.u32 4294901760, %v9160_v11  ;;  %12329 = vmatprep.subr.mxu0 %v18599_v3  ;;  %v9157_v18 = vld [vmem:[#allocation10 + $0xb8] sm:$0xff] }
 0x63b   :  { %v8893_v14 = vpop.f32.mrf.mxu0  ;;  %12359 = vmatpush3.msra.mxu1 %v9351_v59  ;;  %v20624_v62 = vand.u32 4294901760, %v18609_v6  ;;  %12330 = vmatpush3.msra.mxu0 %v18601_v48  ;;  %v9141_v59 = vld [vmem:[#allocation10 + $0x38] sm:$0xff] }
 0x63c   :  { %v9028_v9 = vrot.slane %v9020_v51, 2  ;;  %v9010_v1 = vadd.f32 %v8998_v55, %v18515_v36  ;;  %v8894_v8 = vadd.f32 %v8893_v14, %v8747_v4  ;;  %12360 = vmatprep.subr.mxu1 %v9470_v32  ;;  %v18632_v14 = vand.u32 4294901760, %v9144_v30  ;;  %12331 = vmatprep.subr.mxu0 %v18623_v26 }
 0x63d   :  { %v8895_v38 = vpop.f32.mrf.mxu0  ;;  %v18640_v57 = vsub.f32 %v9160_v11, %v18623_v26 }
 0x63e   :  { %v9029_v54 = vsel %vm4572_vm9, %v9027_v2, %v9028_v9  ;;  %v9021_v36 = vadd.f32 %v18523_v56, %v9010_v1  ;;  %v9005_v12 = vadd.f32 %v9004_v29, %v8894_v8  ;;  %v20625_v29 = vand.u32 4294901760, %v18583_v7  ;;  %v9143_v38 = vld [vmem:[#allocation10 + $0x48] sm:$0xff]  ;;  %12332 = vmatpush3.msra.mxu0 %v18632_v14 }
 0x63f   :  { %v18585_v31 = vmax.f32 %v9019_v49, %v9029_v54  ;;  %v18617_v2 = vsub.f32 %v9161_v0, %v18599_v3  ;;  %v9476_v8 = vsub.f32 %v18609_v6, %v20624_v62  ;;  %v9158_v54 = vld [vmem:[#allocation10 + $0xc0] sm:$0xff]  ;;  %v18656_v35 = vsub.f32 %v9144_v30, %v18632_v14 }
 0x640   :  { %v9030_v33 = vrot.slane %v9021_v36, 2  ;;  %v9011_v37 = vadd.f32 %v9005_v12, %v18518_v16  ;;  %v9357_v45 = vsub.f32 %v18583_v7, %v20625_v29  ;;  %v18658_v0 = vand.u32 4294901760, %v9159_v23 }
 0x641   :  { %9042 = vst [vmem:[#allocation3] sm:$0xff] %v18585_v31  ;;  %9055 = vrot.lane.b32.xlu0 %v18585_v31, %s13509_s4  ;;  %v20622_v55 = vand.u32 4294901760, %v18617_v2  ;;  %v9477_v12 = vand.u32 4294901760, %v9476_v8  ;;  %v18664_v32 = vand.u32 4294901760, %v9143_v38 }
 0x642   :  { %v9031_v16 = vsel %vm4572_vm9, %v9028_v9, %v9030_v33  ;;  %v9022_v49 = vadd.f32 %v18523_v56, %v9011_v37  ;;  %v18620_v56 = vsub.f32 %v9145_v20, %v18601_v48  ;;  %v9358_v27 = vand.u32 4294901760, %v9357_v45  ;;  %v9142_v20 = vld [vmem:[#allocation10 + $0x40] sm:$0xff]  ;;  %12333 = vmatprep.subr.mxu0 %v18658_v0 }
 0x643   :  { %v18611_v4 = vmax.f32 %v9020_v51, %v9031_v16  ;;  %v20623_v51 = vand.u32 4294901760, %v18614_v42  ;;  %v9483_v61 = vsub.f32 %v18617_v2, %v20622_v55  ;;  %v20617_v16 = vand.u32 4294901760, %v18656_v35  ;;  %12334 = vmatpush3.msra.mxu0 %v18664_v32 }
 0x644   :  { %v9032_v40 = vrot.slane %v9022_v49, 2  ;;  %9046 = vst [vmem:[#allocation3 + $0x18] sm:$0xc0] %v9022_v49  ;;  %v20620_v17 = vand.u32 4294901760, %v18620_v56  ;;  %12361 = vmatpush3.msra.mxu1 %v9358_v27  ;;  %v18674_v45 = vand.u32 4294901760, %v9158_v54  ;;  %v18678_v30 = vsub.f32 %v9143_v38, %v18664_v32 }
 0x645   :  { %9043 = vst [vmem:[#allocation3 + $0x8] sm:$0xff] %v18611_v4  ;;  %9057 = vrot.lane.b32.xlu1 %v18611_v4, %s13509_s4  ;;  %v9364_v47 = vsub.f32 %v18614_v42, %v20623_v51  ;;  %12362 = vmatprep.subr.mxu1 %v9477_v12  ;;  %v18682_v27 = vand.u32 4294901760, %v9157_v18  ;;  %v9378_v8 = vsub.f32 %v18656_v35, %v20617_v16  ;;  %v9139_v51 = vld [vmem:[#allocation10 + $0x28] sm:$0xff] }
 0x646   :  { %v9033_v9 = vsel %vm4572_vm9, %v9030_v33, %v9032_v40  ;;  %v9041_v1 = vmax.f32 %v9022_v49, %v9032_v40  ;;  %v9371_v52 = vsub.f32 %v18620_v56, %v20620_v17  ;;  %v9484_v33 = vand.u32 4294901760, %v9483_v61  ;;  %12335 = vmatprep.subr.mxu0 %v18674_v45 }
 0x647   :  { %v18642_v34 = vmax.f32 %v9021_v36, %v9033_v9  ;;  %v20618_v36 = vand.u32 4294901760, %v18640_v57  ;;  %v9365_v60 = vand.u32 4294901760, %v9364_v47  ;;  %v18672_v49 = vsub.f32 %v9159_v23, %v18658_v0 }
 0x648   :  { %9045 = vst [vmem:[#allocation3 + $0x18] sm:$0x3f] %v9041_v1  ;;  %v9372_v37 = vand.u32 4294901760, %v9371_v52  ;;  %v18680_v40 = vand.u32 4294901760, %v9142_v20  ;;  %v18684_v9 = vand.u32 4294901760, %v9141_v59  ;;  %v9156_v1 = vld [vmem:[#allocation10 + $0xb0] sm:$0xff]  ;;  %v18692_v38 = vsub.f32 %v9158_v54, %v18674_v45 }
 0x649   :  { %9044 = vst [vmem:[#allocation3 + $0x10] sm:$0xff] %v18642_v34  ;;  %9059 = vrot.lane.b32.xlu0 %v18642_v34, %s13509_s4  ;;  %v9490_v11 = vsub.f32 %v18640_v57, %v20618_v36  ;;  %12363 = vmatpush3.msra.mxu1 %v9365_v60  ;;  %v20619_v47 = vand.u32 4294901760, %v18672_v49  ;;  %v20621_v61 = vand.u32 4294901760, %v18678_v30  ;;  %v18700_v12 = vsub.f32 %v9157_v18, %v18682_v27  ;;  %v9155_v36 = vld [vmem:[#allocation10 + $0xa8] sm:$0xff] }
 0x64a   :  { %12364 = vmatprep.subr.mxu1 %v9484_v33  ;;  %v18697_v52 = vsub.f32 %v9142_v20, %v18680_v40  ;;  %v18703_v60 = vsub.f32 %v9141_v59, %v18684_v9  ;;  %v9140_v33 = vld [vmem:[#allocation10 + $0x30] sm:$0xff]  ;;  %v9379_v54 = vand.u32 4294901760, %v9378_v8  ;;  %v18710_v16 = vand.u32 4294901760, %v9156_v1  ;;  %12336 = vmatpush3.msra.mxu0 %v18680_v40 }
 0x64b   :  { %v9491_v23 = vand.u32 4294901760, %v9490_v11  ;;  %12365 = vmatpush3.msra.mxu1 %v9372_v37  ;;  %21157 = vst [vmem:[#allocation29_spill] sm:$0xff] %v18700_v12  ;;  %v9497_v37 = vsub.f32 %v18672_v49, %v20619_v47  ;;  %v20626_v11 = vand.u32 4294901760, %v18692_v38  ;;  %v9385_v18 = vsub.f32 %v18678_v30, %v20621_v61  ;;  %12337 = vmatprep.subr.mxu0 %v18682_v27 }
 0x64c   :  { %21156 = vst [vmem:[#allocation28_spill] sm:$0xff] %v18697_v52  ;;  %21158 = vst [vmem:[#allocation30_spill] sm:$0xff] %v18703_v60  ;;  %v20629_v59 = vand.u32 4294901760, %v18697_v52  ;;  %v20633_v8 = vand.u32 4294901760, %v18703_v60  ;;  %v18728_v61 = vsub.f32 %v9156_v1, %v18710_v16  ;;  %v18730_v55 = vand.u32 4294901760, %v9140_v33  ;;  %12338 = vmatpush3.msra.mxu0 %v18684_v9 }
 0x64d   :  { %12366 = vmatprep.subr.mxu1 %v9491_v23  ;;  %v20632_v23 = vand.u32 4294901760, %v18700_v12  ;;  %v9498_v47 = vand.u32 4294901760, %v9497_v37  ;;  %v9504_v17 = vsub.f32 %v18692_v38, %v20626_v11  ;;  %v9386_v62 = vand.u32 4294901760, %v9385_v18  ;;  %v9154_v11 = vld [vmem:[#allocation10 + $0xa0] sm:$0xff]  ;;  %12339 = vmatprep.subr.mxu0 %v18710_v16 }
 0x64e   :  { %12367 = vmatpush3.msra.mxu1 %v9379_v54  ;;  %21159 = vst [vmem:[#allocation73_spill] sm:$0xff] %v18728_v61  ;;  %v9392_v29 = vsub.f32 %v18697_v52, %v20629_v59  ;;  %v9399_v37 = vsub.f32 %v18703_v60, %v20633_v8  ;;  %v20638_v43 = vand.u32 4294901760, %v18728_v61  ;;  %v18744_v18 = vsub.f32 %v9140_v33, %v18730_v55  ;;  %v9138_v59 = vld [vmem:[#allocation10 + $0x20] sm:$0xff] }
 0x64f   :  { %v18713_v20 = vld [vmem:[#allocation3 + $0x18] sm:$0xff]  ;;  %v9511_v54 = vsub.f32 %v18700_v12, %v20632_v23  ;;  %12368 = vmatprep.subr.mxu1 %v9498_v47  ;;  %v9505_v1 = vand.u32 4294901760, %v9504_v17  ;;  %v18746_v21 = vand.u32 4294901760, %v9155_v36  ;;  %v18749_v44 = vand.u32 4294901760, %v9139_v51  ;;  %12340 = vmatpush3.msra.mxu0 %v18730_v55 }
 0x650   :  { %9061 = vrot.lane.b32.xlu1 %v18713_v20, %s13509_s4  ;;  %21160 = vst [vmem:[#allocation74_spill] sm:$0xff] %v18744_v18  ;;  %12369 = vmatpush3.msra.mxu1 %v9386_v62  ;;  %v9393_v23 = vand.u32 4294901760, %v9392_v29  ;;  %v9400_v15 = vand.u32 4294901760, %v9399_v37  ;;  %v9518_v17 = vsub.f32 %v18728_v61, %v20638_v43  ;;  %v20643_v47 = vand.u32 4294901760, %v18744_v18 }
 0x651   :  { %v9512_v8 = vand.u32 4294901760, %v9511_v54  ;;  %12370 = vmatprep.subr.mxu1 %v9505_v1  ;;  %v18757_v33 = vsub.f32 %v9155_v36, %v18746_v21  ;;  %v18759_v60 = vand.u32 4294901760, %v9154_v11  ;;  %12341 = vmatprep.subr.mxu0 %v18746_v21  ;;  %v18763_v29 = vsub.f32 %v9139_v51, %v18749_v44  ;;  %v9152_v1 = vld [vmem:[#allocation10 + $0x90] sm:$0xff] }
 0x652   :  { %12371 = vmatpush3.msra.mxu1 %v9393_v23  ;;  %v18765_v62 = vand.u32 4294901760, %v9138_v59  ;;  %v18767_v54 = vand.u32 4294901760, %v9153_v41  ;;  %v18769_v37 = vand.u32 4294901760, %v9137_v24  ;;  %12342 = vmatpush3.msra.mxu0 %v18749_v44  ;;  %v9519_v36 = vand.u32 4294901760, %v9518_v17 }
 0x653   :  { %21161 = vst [vmem:[#allocation75_spill] sm:$0xff] %v18757_v33  ;;  %21162 = vst [vmem:[#allocation76_spill] sm:$0xff] %v18759_v60  ;;  %12372 = vmatprep.subr.mxu1 %v9512_v8  ;;  %v9406_v43 = vsub.f32 %v18744_v18, %v20643_v47  ;;  %v20648_v23 = vand.u32 4294901760, %v18757_v33  ;;  %v18777_v51 = vsub.f32 %v9154_v11, %v18759_v60  ;;  %12343 = vmatprep.subr.mxu0 %v18759_v60  ;;  %v9136_v47 = vld [vmem:[#allocation10 + $0x10] sm:$0xff]  ;;  %v9134_v60 = vld [vmem:[#allocation10] sm:$0xff] }
 0x654   :  { %21163 = vst [vmem:[#allocation77_spill] sm:$0xff] %v18763_v29  ;;  %21164 = vst [vmem:[#allocation78_spill] sm:$0xff] %v18765_v62  ;;  %12373 = vmatpush3.msra.mxu1 %v9400_v15  ;;  %v18782_v12 = vsub.f32 %v9138_v59, %v18765_v62  ;;  %v18785_v8 = vsub.f32 %v9153_v41, %v18767_v54  ;;  %v18788_v17 = vsub.f32 %v9137_v24, %v18769_v37 }
 0x655   :  { %21165 = vst [vmem:[#allocation59_spill] sm:$0xff] %v18767_v54  ;;  %21166 = vst [vmem:[#allocation60_spill] sm:$0xff] %v18769_v37  ;;  %12344 = vmatpush3.msra.mxu0 %v18765_v62  ;;  %12374 = vmatprep.subr.mxu1 %v9519_v36  ;;  %v9407_v11 = vand.u32 4294901760, %v9406_v43  ;;  %v9525_v15 = vsub.f32 %v18757_v33, %v20648_v23  ;;  %v20657_v61 = vand.u32 4294901760, %v18777_v51  ;;  %v18795_v18 = vand.u32 4294901760, %v9152_v1  ;;  %v9151_v36 = vld [vmem:[#allocation10 + $0x88] sm:$0xff] }
 0x656   :  { %21167 = vst [vmem:[#allocation61_spill] sm:$0xff] %v18777_v51  ;;  %21168 = vst [vmem:[#allocation62_spill] sm:$0xff] %v18782_v12  ;;  %12345 = vmatprep.subr.mxu0 %v18767_v54  ;;  %v21171_v41 = vand.u32 4294901760, %v18763_v29  ;;  %v20666_v59 = vand.u32 4294901760, %v18782_v12  ;;  %v18811_v52 = vand.u32 4294901760, %v9136_v47 }
 0x657   :  { %21169 = vst [vmem:[#allocation66_spill] sm:$0xff] %v18785_v8  ;;  %21170 = vst [vmem:[#allocation63_spill] sm:$0xff] %v18795_v18  ;;  %12346 = vmatpush3.msra.mxu0 %v18769_v37  ;;  %12375 = vmatpush3.msra.mxu1 %v9407_v11  ;;  %v9526_v23 = vand.u32 4294901760, %v9525_v15  ;;  %v9532_v33 = vsub.f32 %v18777_v51, %v20657_v61  ;;  %v18809_v54 = vsub.f32 %v9152_v1, %v18795_v18  ;;  %v9150_v1 = vld [vmem:[#allocation10 + $0x80] sm:$0xff] }
 0x658   :  { %v9413_v24 = vsub.f32 %v18763_v29, %v21171_v41  ;;  %21172 = vst [vmem:[#allocation72_spill] sm:$0xff] %v18811_v52  ;;  %v9135_v41 = vld [vmem:[#allocation10 + $0x8] sm:$0xff]  ;;  %12347 = vmatprep.subr.mxu0 %v18795_v18  ;;  %v9420_v43 = vsub.f32 %v18782_v12, %v20666_v59  ;;  %v21173_v11 = vand.u32 4294901760, %v18785_v8  ;;  %v21174_v29 = vand.u32 4294901760, %v18788_v17 }
 0x659   :  { %12376 = vmatprep.subr.mxu1 %v9526_v23  ;;  %v9533_v51 = vand.u32 4294901760, %v9532_v33  ;;  %v20673_v37 = vand.u32 4294901760, %v18809_v54  ;;  %v18825_v18 = vsub.f32 %v9136_v47, %v18811_v52  ;;  %12348 = vmatpush3.msra.mxu0 %v18811_v52  ;;  %v18830_v12 = vand.u32 4294901760, %v9135_v41 }
 0x65a   :  { %v9414_v62 = vand.u32 4294901760, %v9413_v24  ;;  %v9539_v15 = vsub.f32 %v18785_v8, %v21173_v11  ;;  %v9427_v61 = vsub.f32 %v18788_v17, %v21174_v29  ;;  %v18827_v24 = vand.u32 4294901760, %v9151_v36 }
 0x65b   :  { %v9421_v59 = vand.u32 4294901760, %v9420_v43  ;;  %v9546_v33 = vsub.f32 %v18809_v54, %v20673_v37  ;;  %v20671_v29 = vand.u32 4294901760, %v18825_v18  ;;  %v18839_v23 = vand.u32 4294901760, %v9150_v1 }
 0x65c   :  { %12377 = vmatpush3.msra.mxu1 %v9414_v62  ;;  %v9540_v11 = vand.u32 4294901760, %v9539_v15  ;;  %v9428_v8 = vand.u32 4294901760, %v9427_v61  ;;  %v18837_v47 = vsub.f32 %v9151_v36, %v18827_v24  ;;  %12349 = vmatprep.subr.mxu0 %v18827_v24  ;;  %v18843_v62 = vsub.f32 %v9135_v41, %v18830_v12 }
 0x65d   :  { %12378 = vmatprep.subr.mxu1 %v9533_v51  ;;  %v18845_v61 = vand.u32 4294901760, %v9134_v60  ;;  %12350 = vmatpush3.msra.mxu0 %v18830_v12  ;;  %v9547_v51 = vand.u32 4294901760, %v9546_v33  ;;  %v9434_v43 = vsub.f32 %v18825_v18, %v20671_v29  ;;  %v18853_v15 = vsub.f32 %v9150_v1, %v18839_v23 }
 0x65e   :  { %12379 = vmatpush3.msra.mxu1 %v9421_v59  ;;  %v20672_v36 = vand.u32 4294901760, %v18837_v47  ;;  %12351 = vmatprep.subr.mxu0 %v18839_v23  ;;  %v20677_v59 = vand.u32 4294901760, %v18843_v62 }
 0x65f   :  { %12380 = vmatprep.subr.mxu1 %v9540_v11  ;;  %v18858_v41 = vsub.f32 %v9134_v60, %v18845_v61  ;;  %12352 = vmatpush3.msra.mxu0 %v18845_v61  ;;  %v9435_v11 = vand.u32 4294901760, %v9434_v43  ;;  %v20676_v29 = vand.u32 4294901760, %v18853_v15 }
 0x660   :  { %12381 = vmatpush3.msra.mxu1 %v9428_v8  ;;  %v9553_v33 = vsub.f32 %v18837_v47, %v20672_v36  ;;  %12391 = vmatprep.subr.mxu0 %v18532_v22  ;;  %v9441_v8 = vsub.f32 %v18843_v62, %v20677_v59 }
 0x661   :  { %12382 = vmatprep.subr.mxu1 %v9547_v51  ;;  %v20675_v1 = vand.u32 4294901760, %v18858_v41  ;;  %v9560_v51 = vsub.f32 %v18853_v15, %v20676_v29 }
 0x662   :  { %12383 = vmatpush3.msra.mxu1 %v9435_v11  ;;  %v9554_v60 = vand.u32 4294901760, %v9553_v33  ;;  %v9442_v43 = vand.u32 4294901760, %v9441_v8 }
 0x663   :  { %v9448_v36 = vsub.f32 %v18858_v41, %v20675_v1  ;;  %v9561_v37 = vand.u32 4294901760, %v9560_v51 }
 0x664   :  { %12384 = vmatprep.subr.mxu1 %v9554_v60 }
 0x665   :  { %12385 = vmatpush3.msra.mxu1 %v9442_v43  ;;  %v9449_v22 = vand.u32 4294901760, %v9448_v36 }
 0x666   :  { %12386 = vmatprep.subr.mxu1 %v9561_v37 }
 0x667   :  { %12387 = vmatpush3.msra.mxu1 %v9449_v22 }
 0x668   :  { %12426 = vmatprep.subr.mxu1 %v18526_v53 }
 0x6b3   :  { %v9056_v11 = vpop.permute.xlu0 %9055 }
 0x6b4   :  { %v9067_v33 = vmax.f32 %v18585_v31, %v9056_v11 }
 0x6b6   :  { %9072 = vst.msk [vmem:[#allocation3] sm:$0xff] %vm9071_vm11, %v9067_v33 }
 0x6b7   :  { %9077 = vst.msk [vmem:[#allocation3] sm:$0xff] %vm9076_vm12, %v18585_v31  ;;  %v9058_v8 = vpop.permute.xlu1 %9057 }
 0x6b8   :  { %v9068_v60 = vmax.f32 %v18611_v4, %v9058_v8 }
 0x6ba   :  { %9073 = vst.msk [vmem:[#allocation3 + $0x8] sm:$0xff] %vm9071_vm11, %v9068_v60 }
 0x6bb   :  { %9078 = vst.msk [vmem:[#allocation3 + $0x8] sm:$0xff] %vm9076_vm12, %v18611_v4  ;;  %v9060_v22 = vpop.permute.xlu0 %9059 }
 0x6bc   :  { %v9069_v37 = vmax.f32 %v18642_v34, %v9060_v22 }
 0x6be   :  { %9074 = vst.msk [vmem:[#allocation3 + $0x10] sm:$0xff] %vm9071_vm11, %v9069_v37  ;;  %v9081_v36 = vld [vmem:[#allocation3] sm:$0xff] }
 0x6bf   :  { %9079 = vst.msk [vmem:[#allocation3 + $0x10] sm:$0xff] %vm9076_vm12, %v18642_v34  ;;  %9085 = vst [vmem:[#allocation4] sm:$0x1] %v9081_v36  ;;  %v9087_v51 = vcombine.high %v9081_v36, %v9081_v36  ;;  %v13510_v34 = vmov 1983009808  }
 0x6c0   :  { %v9208_v60 = vunpack.c.l.s4 %v13510_v34 }
 0x6c1   :  { %12314 = vst.sshfl [vmem:[#allocation4 + $0x2] sm:$0x1 pattern:$0x76325410] %v9087_v51  ;;  %v21175_v51 = vld [vmem:[#allocation26_spill] sm:$0xff] }
 0x6c2   :  { %v9062_v31 = vpop.permute.xlu1 %9061  ;;  %v9082_v43 = vld [vmem:[#allocation3 + $0x8] sm:$0xff]  ;;  %v9209_v36 = vunpack.c.0.s8 %v9208_v60 }
 0x6c3   :  { %v9070_v11 = vmax.f32 %v18713_v20, %v9062_v31  ;;  %9097 = vst [vmem:[#allocation4 + $0x4] sm:$0x1] %v9082_v43  ;;  %v9099_v33 = vcombine.high %v9082_v43, %v9082_v43 }
 0x6c4   :  { %v9212_v31 = vsub.s32 %v9209_v36, %v21175_v51  ;;  %v21177_v51 = vld [vmem:[#allocation76_spill] sm:$0xff] }
 0x6c5   :  { %9075 = vst.msk [vmem:[#allocation3 + $0x18] sm:$0xff] %vm9071_vm11, %v9070_v11  ;;  %12315 = vst.sshfl [vmem:[#allocation4 + $0x6] sm:$0x1 pattern:$0x76325410] %v9099_v33 }
 0x6c6   :  { %9080 = vst.msk [vmem:[#allocation3 + $0x18] sm:$0xff] %vm9076_vm12, %v18713_v20  ;;  %v9083_v4 = vld [vmem:[#allocation3 + $0x10] sm:$0xff] }
 0x6c7   :  { %9109 = vst [vmem:[#allocation4 + $0x1] sm:$0x1] %v9083_v4  ;;  %v9111_v8 = vcombine.high %v9083_v4, %v9083_v4 }
 0x6c9   :  { %12316 = vst.sshfl [vmem:[#allocation4 + $0x3] sm:$0x1 pattern:$0x76325410] %v9111_v8 }
 0x6cd   :  { %v9084_v22 = vld [vmem:[#allocation3 + $0x18] sm:$0xff] }
 0x6ce   :  { %9121 = vst [vmem:[#allocation4 + $0x5] sm:$0x1] %v9084_v22  ;;  %v9123_v37 = vcombine.high %v9084_v22, %v9084_v22 }
 0x6d0   :  { %12317 = vst.sshfl [vmem:[#allocation4 + $0x7] sm:$0x1 pattern:$0x76325410] %v9123_v37 }
 0x6d7   :  { %v9133_v43 = vld [vmem:[#allocation4] sm:$0xff] }
 0x6d8   :  { %v9213_v1 = vrot.slane %v9133_v43, %v9212_v31  ;;  %v9206_v11 = vcombine.high %v9133_v43, %v9133_v43  ;;  %v21179_v43 = vld [vmem:[#allocation78_spill] sm:$0xff] }
 0x6da   :  { %v9221_v33 = vcombine.high %v9213_v1, %v9213_v1  ;;  %v18894_v29 = vand.u32 4294901760, %v9213_v1  ;;  %v18896_v20 = vrot.slane %v9206_v11, %v9212_v31  ;;  %v21178_v31 = vld [vmem:[#allocation28_spill] sm:$0xff]  ;;  %v21180_v11 = vld [vmem:[#allocation29_spill] sm:$0xff] }
 0x6dc   :  { %21176 = vst [vmem:[#allocation67_spill] sm:$0xff] %v18894_v29  ;;  %v18898_v59 = vand.u32 4294901760, %v9221_v33  ;;  %v18901_v4 = vsub.f32 %v9213_v1, %v18894_v29 }
 0x6de   :  { %9564 = vmatprep.mubr.f32.mxu1 %v18898_v59  ;;  %v9324_v8 = vsub.f32 %v9221_v33, %v18898_v59  ;;  %v20678_v34 = vand.u32 4294901760, %v18901_v4  ;;  %v21181_v33 = vld [vmem:[#allocation59_spill] sm:$0xff] }
 0x6df   :  { %9566 = vmatmul.mubr.f32.vlgmr.msra.gmra.mxu1 %v18894_v29  ;;  %v21189_v29 = vld [vmem:[#allocation61_spill] sm:$0xff] }
 0x6e0   :  { %12427 = vmatpush3.msra.mxu1 %v18528_v50  ;;  %v9325_v60 = vand.u32 4294901760, %v9324_v8  ;;  %v9332_v22 = vsub.f32 %v18901_v4, %v20678_v34  ;;  %v21188_v34 = vld [vmem:[#allocation77_spill] sm:$0xff] }
 0x6e1   :  { %12428 = vmatprep.subr.mxu1 %v18534_v5 }
 0x6e2   :  { %12429 = vmatpush3.msra.mxu1 %v18540_v58  ;;  %9808 = vmatprep.mubr.f32.mxu1 %v9325_v60  ;;  %v9326_v1 = vsub.f32 %v9324_v8, %v9325_v60  ;;  %v9333_v36 = vand.u32 4294901760, %v9332_v22  ;;  %v21183_v60 = vld [vmem:[#allocation60_spill] sm:$0xff]  ;;  %v21184_v22 = vld [vmem:[#allocation73_spill] sm:$0xff] }
 0x6e3   :  { %12430 = vmatprep.subr.mxu1 %v18553_v63 }
 0x6e4   :  { %12431 = vmatpush3.msra.mxu1 %v18560_v13  ;;  %v9327_v37 = vand.u32 4294901760, %v9326_v1  ;;  %v21185_v1 = vld [vmem:[#allocation63_spill] sm:$0xff] }
 0x6e5   :  { %12432 = vmatprep.subr.mxu1 %v18592_v39 }
 0x6e6   :  { %12433 = vmatpush3.msra.mxu1 %v18597_v28  ;;  %9328 = vmatprep.mubr.f32.mxu0 %v9327_v37  ;;  %v21186_v37 = vld [vmem:[#allocation74_spill] sm:$0xff] }
 0x6e7   :  { %12434 = vmatprep.subr.mxu1 %v18599_v3  ;;  %9334 = vmatmul.mubr.f32.vlgmr.msra.gmra.mxu0 %v9333_v36  ;;  %v21187_v36 = vld [vmem:[#allocation75_spill] sm:$0xff] }
 0x6e8   :  { %12392 = vmatpush3.msra.mxu0 %v18538_v46  ;;  %12435 = vmatpush3.msra.mxu1 %v18601_v48 }
 0x6e9   :  { %12393 = vmatprep.subr.mxu0 %v18548_v10  ;;  %9701 = vmatprep.mubr.f32.mxu0 %v9324_v8  ;;  %v21182_v8 = vld [vmem:[#allocation30_spill] sm:$0xff] }
 0x6ea   :  { %12436 = vmatprep.subr.mxu1 %v18623_v26  ;;  %12394 = vmatpush3.msra.mxu0 %v18551_v25 }
 0x6eb   :  { %12437 = vmatpush3.msra.mxu1 %v18632_v14  ;;  %12395 = vmatprep.subr.mxu0 %v18568_v19 }
 0x6ec   :  { %12438 = vmatprep.subr.mxu1 %v18658_v0  ;;  %12396 = vmatpush3.msra.mxu0 %v18583_v7 }
 0x6ed   :  { %12439 = vmatpush3.msra.mxu1 %v18664_v32  ;;  %12397 = vmatprep.subr.mxu0 %v18609_v6 }
 0x6ee   :  { %12440 = vmatprep.subr.mxu1 %v18674_v45  ;;  %12398 = vmatpush3.msra.mxu0 %v18614_v42 }
 0x6ef   :  { %12441 = vmatpush3.msra.mxu1 %v18680_v40  ;;  %12399 = vmatprep.subr.mxu0 %v18617_v2 }
 0x6f0   :  { %12442 = vmatprep.subr.mxu1 %v18682_v27  ;;  %12400 = vmatpush3.msra.mxu0 %v18620_v56 }
 0x6f1   :  { %12443 = vmatpush3.msra.mxu1 %v18684_v9  ;;  %12401 = vmatprep.subr.mxu0 %v18640_v57 }
 0x6f2   :  { %12444 = vmatprep.subr.mxu1 %v18710_v16  ;;  %12402 = vmatpush3.msra.mxu0 %v18656_v35 }
 0x6f3   :  { %12445 = vmatpush3.msra.mxu1 %v18730_v55  ;;  %12403 = vmatprep.subr.mxu0 %v18672_v49 }
 0x6f4   :  { %12446 = vmatprep.subr.mxu1 %v18746_v21  ;;  %12404 = vmatpush3.msra.mxu0 %v18678_v30 }
 0x6f5   :  { %12447 = vmatpush3.msra.mxu1 %v18749_v44  ;;  %12405 = vmatprep.subr.mxu0 %v18692_v38 }
 0x6f6   :  { %12448 = vmatprep.subr.mxu1 %v21177_v51  ;;  %12406 = vmatpush3.msra.mxu0 %v21178_v31 }
 0x6f7   :  { %12449 = vmatpush3.msra.mxu1 %v21179_v43  ;;  %12407 = vmatprep.subr.mxu0 %v21180_v11 }
 0x6f8   :  { %12450 = vmatprep.subr.mxu1 %v21181_v33  ;;  %12408 = vmatpush3.msra.mxu0 %v21182_v8 }
 0x6f9   :  { %12451 = vmatpush3.msra.mxu1 %v21183_v60  ;;  %12409 = vmatprep.subr.mxu0 %v21184_v22  ;;  %v21190_v60 = vld [vmem:[#allocation62_spill] sm:$0xff] }
 0x6fa   :  { %12452 = vmatprep.subr.mxu1 %v21185_v1  ;;  %12410 = vmatpush3.msra.mxu0 %v21186_v37  ;;  %v21191_v1 = vld [vmem:[#allocation66_spill] sm:$0xff] }
 0x6fb   :  { %12453 = vmatpush3.msra.mxu1 %v18811_v52  ;;  %12411 = vmatprep.subr.mxu0 %v21187_v36  ;;  %v21192_v52 = vand.u32 4294901760, %v18901_v4 }
 0x6fc   :  { %12454 = vmatprep.subr.mxu1 %v18827_v24  ;;  %12412 = vmatpush3.msra.mxu0 %v21188_v34 }
 0x6fd   :  { %12455 = vmatpush3.msra.mxu1 %v18830_v12  ;;  %12413 = vmatprep.subr.mxu0 %v21189_v29 }
 0x6fe   :  { %12456 = vmatprep.subr.mxu1 %v18839_v23  ;;  %12414 = vmatpush3.msra.mxu0 %v21190_v60 }
 0x6ff   :  { %12457 = vmatpush3.msra.mxu1 %v18845_v61  ;;  %12415 = vmatprep.subr.mxu0 %v21191_v1 }
 0x700   :  { %9812 = vmatmul.mubr.f32.vlgmr.msra.gmra.mxu1 %v21192_v52  ;;  %12496 = vmatprep.subr.mxu1 %v18526_v53  ;;  %v9197_v53 = vld [vmem:[#allocation10 + $0x1f8] sm:$0xff] }
 0x701   :  { %12416 = vmatpush3.msra.mxu0 %v18788_v17  ;;  %12497 = vmatpush3.msra.mxu1 %v18528_v50  ;;  %v18984_v50 = vand.u32 4294901760, %v9197_v53 }
 0x702   :  { %10082 = vmatprep.mubr.f32.mxu1 %v18898_v59  ;;  %12417 = vmatprep.subr.mxu0 %v18809_v54 }
 0x703   :  { %12498 = vmatprep.subr.mxu1 %v18534_v5  ;;  %12418 = vmatpush3.msra.mxu0 %v18825_v18  ;;  %v9181_v5 = vld [vmem:[#allocation10 + $0x178] sm:$0xff] }
 0x704   :  { %12499 = vmatpush3.msra.mxu1 %v18540_v58  ;;  %12419 = vmatprep.subr.mxu0 %v18837_v47  ;;  %v21193_v58 = vld [vmem:[#allocation27_spill] sm:$0xff]  ;;  %v18995_v52 = vand.u32 4294901760, %v9181_v5 }
 0x705   :  { %12500 = vmatprep.subr.mxu1 %v18553_v63  ;;  %12420 = vmatpush3.msra.mxu0 %v18843_v62  ;;  %v21194_v63 = vand.u32 4294901760, %v21193_v58  ;;  %v21197_v58 = vand.u32 4294901760, %v18551_v25  ;;  %v9194_v25 = vld [vmem:[#allocation10 + $0x1e0] sm:$0xff] }
 0x706   :  { %12501 = vmatpush3.msra.mxu1 %v18560_v13  ;;  %12421 = vmatprep.subr.mxu0 %v18853_v15  ;;  %v21195_v13 = vand.u32 4294901760, %v18538_v46  ;;  %v9195_v46 = vld [vmem:[#allocation10 + $0x1e8] sm:$0xff] }
 0x707   :  { %12502 = vmatprep.subr.mxu1 %v18592_v39  ;;  %12422 = vmatpush3.msra.mxu0 %v18858_v41  ;;  %v9196_v39 = vld [vmem:[#allocation10 + $0x1f0] sm:$0xff] }
 0x708   :  { %12503 = vmatpush3.msra.mxu1 %v18597_v28  ;;  %9704 = vmatmul.mubr.f32.vlgmr.msra.gmra.mxu0 %v18901_v4  ;;  %v21196_v28 = vand.u32 4294901760, %v18548_v10  ;;  %v9180_v4 = vld [vmem:[#allocation10 + $0x170] sm:$0xff]  ;;  %v9179_v10 = vld [vmem:[#allocation10 + $0x168] sm:$0xff] }
 0x709   :  { %12461 = vmatprep.subr.mxu0 %v21194_v63  ;;  %12504 = vmatprep.subr.mxu1 %v18599_v3  ;;  %v19001_v3 = vsub.f32 %v9197_v53, %v18984_v50  ;;  %v21199_v63 = vand.u32 4294901760, %v18583_v7  ;;  %v21200_v53 = vand.u32 4294901760, %v18609_v6  ;;  %v21203_v6 = vand.u32 4294901760, %v18617_v2 }
 0x70a   :  { %12462 = vmatpush3.msra.mxu0 %v21195_v13  ;;  %9978 = vmatprep.mubr.f32.mxu0 %v18898_v59  ;;  %v21198_v59 = vand.u32 4294901760, %v18568_v19  ;;  %v19019_v19 = vand.u32 4294901760, %v9195_v46  ;;  %v9178_v13 = vld [vmem:[#allocation10 + $0x160] sm:$0xff]  ;;  %v21207_v2 = vand.u32 4294901760, %v18640_v57 }
 0x70b   :  { %12505 = vmatpush3.msra.mxu1 %v18601_v48  ;;  %12463 = vmatprep.subr.mxu0 %v21196_v28  ;;  %v19006_v48 = vand.u32 4294901760, %v9196_v39  ;;  %v20682_v7 = vand.u32 4294901760, %v19001_v3  ;;  %v19025_v28 = vand.u32 4294901760, %v9179_v10 }
 0x70c   :  { %12506 = vmatprep.subr.mxu1 %v18623_v26  ;;  %12464 = vmatpush3.msra.mxu0 %v21197_v58  ;;  %v19011_v26 = vand.u32 4294901760, %v9180_v4  ;;  %v9193_v58 = vld [vmem:[#allocation10 + $0x1d8] sm:$0xff] }
 0x70d   :  { %12507 = vmatpush3.msra.mxu1 %v18632_v14  ;;  %12465 = vmatprep.subr.mxu0 %v21198_v59  ;;  %v19017_v14 = vsub.f32 %v9181_v5, %v18995_v52  ;;  %v19033_v5 = vand.u32 4294901760, %v9194_v25  ;;  %v9177_v59 = vld [vmem:[#allocation10 + $0x158] sm:$0xff]  ;;  %v19061_v57 = vsub.f32 %v9179_v10, %v19025_v28  ;;  %v21213_v10 = vand.u32 4294901760, %v18678_v30  ;;  %v9174_v30 = vld [vmem:[#allocation10 + $0x140] sm:$0xff] }
 0x70e   :  { %12508 = vmatprep.subr.mxu1 %v18658_v0  ;;  %12466 = vmatpush3.msra.mxu0 %v21199_v63  ;;  %v21202_v0 = vand.u32 4294901760, %v18614_v42  ;;  %v21205_v42 = vand.u32 4294901760, %v18620_v56  ;;  %v19041_v63 = vand.u32 4294901760, %v9178_v13  ;;  %v9176_v56 = vld [vmem:[#allocation10 + $0x150] sm:$0xff] }
 0x70f   :  { %12509 = vmatpush3.msra.mxu1 %v18664_v32  ;;  %12467 = vmatprep.subr.mxu0 %v21200_v53  ;;  %21201 = vst [vmem:[#allocation64_spill] sm:$0xff] %v19017_v14  ;;  %v19031_v32 = vsub.f32 %v9196_v39, %v19006_v48  ;;  %v20683_v39 = vand.u32 4294901760, %v19017_v14  ;;  %v19048_v53 = vsub.f32 %v9195_v46, %v19019_v19  ;;  %21210 = vst [vmem:[#allocation70_spill] sm:$0xff] %v19061_v57  ;;  %v9191_v46 = vld [vmem:[#allocation10 + $0x1c8] sm:$0xff] }
 0x710   :  { %12510 = vmatprep.subr.mxu1 %v18674_v45  ;;  %12468 = vmatpush3.msra.mxu0 %v21202_v0  ;;  %v19039_v45 = vsub.f32 %v9180_v4, %v19011_v26  ;;  %v21209_v4 = vand.u32 4294901760, %v18656_v35  ;;  %v19063_v0 = vand.u32 4294901760, %v9177_v59  ;;  %v19070_v35 = vsub.f32 %v9194_v25, %v19033_v5  ;;  %v9190_v25 = vld [vmem:[#allocation10 + $0x1c0] sm:$0xff] }
 0x711   :  { %12511 = vmatpush3.msra.mxu1 %v18680_v40  ;;  %12469 = vmatprep.subr.mxu0 %v21203_v6  ;;  %21204 = vst [vmem:[#allocation68_spill] sm:$0xff] %v19031_v32  ;;  %v9192_v40 = vld [vmem:[#allocation10 + $0x1d0] sm:$0xff]  ;;  %21208 = vst [vmem:[#allocation41_spill] sm:$0xff] %v19048_v53  ;;  %v21211_v6 = vand.u32 4294901760, %v18672_v49  ;;  %v19081_v49 = vsub.f32 %v9178_v13, %v19041_v63  ;;  %v19097_v13 = vand.u32 4294901760, %v9191_v46 }
 0x712   :  { %12512 = vmatprep.subr.mxu1 %v18682_v27  ;;  %12470 = vmatpush3.msra.mxu0 %v21205_v42  ;;  %21206 = vst [vmem:[#allocation34_spill] sm:$0xff] %v19039_v45  ;;  %v19050_v27 = vand.u32 4294901760, %v9193_v58  ;;  %21212 = vst [vmem:[#allocation37_spill] sm:$0xff] %v19070_v35  ;;  %v19072_v42 = vand.u32 4294901760, %v9192_v40 }
 0x713   :  { %12513 = vmatpush3.msra.mxu1 %v18684_v9  ;;  %12471 = vmatprep.subr.mxu0 %v21207_v2  ;;  %v19058_v9 = vsub.f32 %v19001_v3, %v20682_v7  ;;  %v9175_v2 = vld [vmem:[#allocation10 + $0x148] sm:$0xff]  ;;  %21214 = vst [vmem:[#allocation71_spill] sm:$0xff] %v19081_v49  ;;  %v21215_v7 = vand.u32 4294901760, %v18692_v38  ;;  %v21226_v38 = vand.u32 4294901760, %v21184_v22 }
 0x714   :  { %12514 = vmatprep.subr.mxu1 %v18710_v16  ;;  %12472 = vmatpush3.msra.mxu0 %v21209_v4  ;;  %v20684_v16 = vand.u32 4294901760, %v19031_v32  ;;  %v9222_v4 = vcombine.high %v18896_v20, %v18896_v20 }
 0x715   :  { %12515 = vmatpush3.msra.mxu1 %v18730_v55  ;;  %12473 = vmatprep.subr.mxu0 %v21211_v6  ;;  %v19083_v6 = vand.u32 4294901760, %v9176_v56  ;;  %v21217_v55 = vand.u32 4294901760, %v21178_v31 }
 0x716   :  { %12516 = vmatprep.subr.mxu1 %v18746_v21  ;;  %12474 = vmatpush3.msra.mxu0 %v21213_v10  ;;  %v19091_v21 = vsub.f32 %v19017_v14, %v20683_v39  ;;  %v19095_v10 = vsub.f32 %v9193_v58, %v19050_v27  ;;  %v19107_v39 = vand.u32 4294901760, %v9175_v2  ;;  %v21219_v58 = vand.u32 4294901760, %v21180_v11 }
 0x717   :  { %12517 = vmatpush3.msra.mxu1 %v18749_v44  ;;  %12475 = vmatprep.subr.mxu0 %v21215_v7  ;;  %v19105_v7 = vsub.f32 %v9177_v59, %v19063_v0  ;;  %v19121_v59 = vand.u32 4294901760, %v9190_v25  ;;  %v21221_v44 = vand.u32 4294901760, %v21182_v8  ;;  %v21223_v11 = vand.u32 4294901760, %v19039_v45 }
 0x718   :  { %21216 = vst [vmem:[#allocation36_spill] sm:$0xff] %v19095_v10  ;;  %12518 = vmatprep.subr.mxu1 %v21177_v51  ;;  %12476 = vmatpush3.msra.mxu0 %v21217_v55  ;;  %v19115_v51 = vsub.f32 %v19031_v32, %v20684_v16  ;;  %v19119_v55 = vsub.f32 %v9192_v40, %v19072_v42  ;;  %v21225_v40 = vld [vmem:[#allocation60_spill] sm:$0xff]  ;;  %v21229_v16 = vld [vmem:[#allocation63_spill] sm:$0xff]  ;;  %v10206_v22 = vand.u32 4294901760, %v19091_v21 }
 0x719   :  { %21218 = vst [vmem:[#allocation39_spill] sm:$0xff] %v19105_v7  ;;  %12519 = vmatpush3.msra.mxu1 %v21179_v43  ;;  %12477 = vmatprep.subr.mxu0 %v21219_v58  ;;  %v19126_v43 = vand.u32 4294901760, %v9222_v4  ;;  %v19131_v58 = vsub.f32 %v19039_v45, %v21223_v11  ;;  %v19135_v31 = vsub.f32 %v9176_v56, %v19083_v6  ;;  %v19149_v45 = vand.u32 4294901760, %v9174_v30 }
 0x71a   :  { %21220 = vst [vmem:[#allocation40_spill] sm:$0xff] %v19119_v55  ;;  %12520 = vmatprep.subr.mxu1 %v21181_v33  ;;  %12478 = vmatpush3.msra.mxu0 %v21221_v44  ;;  %v21227_v33 = vand.u32 4294901760, %v19048_v53  ;;  %v19147_v11 = vsub.f32 %v9191_v46, %v19097_v13  ;;  %v21230_v56 = vand.u32 4294901760, %v21186_v37  ;;  %v19162_v44 = vsub.f32 %v9175_v2, %v19107_v39  ;;  %v21233_v46 = vld [vmem:[#allocation72_spill] sm:$0xff] }
 0x71b   :  { %21222 = vst [vmem:[#allocation38_spill] sm:$0xff] %v19126_v43  ;;  %21224 = vst [vmem:[#allocation42_spill] sm:$0xff] %v19135_v31  ;;  %12521 = vmatpush3.msra.mxu1 %v21225_v40  ;;  %12479 = vmatprep.subr.mxu0 %v21226_v38  ;;  %v21231_v38 = vand.u32 4294901760, %v19061_v57  ;;  %v10325_v37 = vand.u32 4294901760, %v19115_v51  ;;  %v21237_v2 = vand.u32 4294901760, %v21188_v34 }
 0x71c   :  { %v19143_v8 = vsub.f32 %v19048_v53, %v21227_v33  ;;  %21228 = vst [vmem:[#allocation43_spill] sm:$0xff] %v19147_v11  ;;  %12522 = vmatprep.subr.mxu1 %v21229_v16  ;;  %12480 = vmatpush3.msra.mxu0 %v21230_v56  ;;  %21232 = vst [vmem:[#allocation32_spill] sm:$0xff] %v19162_v44  ;;  %v21234_v53 = vand.u32 4294901760, %v21187_v36  ;;  %v21235_v16 = vand.u32 4294901760, %v19070_v35  ;;  %v9189_v33 = vld [vmem:[#allocation10 + $0x1b8] sm:$0xff]  ;;  %v10213_v36 = vand.u32 4294901760, %v19131_v58 }
 0x71d   :  { %v19158_v40 = vsub.f32 %v19061_v57, %v21231_v38  ;;  %12523 = vmatpush3.msra.mxu1 %v21233_v46  ;;  %v19175_v38 = vsub.f32 %v9190_v25, %v19121_v59  ;;  %v19187_v46 = vsub.f32 %v9222_v4, %v19126_v43  ;;  %v9173_v25 = vld [vmem:[#allocation10 + $0x138] sm:$0xff]  ;;  %v21240_v58 = vand.u32 4294901760, %v19095_v10  ;;  %v9188_v56 = vld [vmem:[#allocation10 + $0x1b0] sm:$0xff] }
 0x71e   :  { %12481 = vmatprep.subr.mxu0 %v21234_v53  ;;  %v19171_v21 = vsub.f32 %v19070_v35, %v21235_v16  ;;  %12524 = vmatprep.subr.mxu1 %v18827_v24  ;;  %v21238_v53 = vand.u32 4294901760, %v19081_v49  ;;  %v21239_v24 = vand.u32 4294901760, %v21189_v29  ;;  %v10332_v34 = vand.u32 4294901760, %v19143_v8 }
 0x71f   :  { %21236 = vst [vmem:[#allocation45_spill] sm:$0xff] %v19175_v38  ;;  %12482 = vmatpush3.msra.mxu0 %v21237_v2  ;;  %12525 = vmatpush3.msra.mxu1 %v18830_v12  ;;  %v19197_v2 = vsub.f32 %v19095_v10, %v21240_v58  ;;  %v19201_v4 = vsub.f32 %v9174_v30, %v19149_v45  ;;  %v21242_v12 = vand.u32 4294901760, %v21190_v60  ;;  %v10220_v29 = vand.u32 4294901760, %v19158_v40  ;;  %v9187_v58 = vld [vmem:[#allocation10 + $0x1a8] sm:$0xff] }
 0x720   :  { %v19184_v51 = vsub.f32 %v19081_v49, %v21238_v53  ;;  %12483 = vmatprep.subr.mxu0 %v21239_v24  ;;  %12526 = vmatprep.subr.mxu1 %v18839_v23  ;;  %v21243_v8 = vand.u32 4294901760, %v19105_v7  ;;  %v19213_v16 = vand.u32 4294901760, %v9189_v33  ;;  %v9172_v53 = vld [vmem:[#allocation10 + $0x130] sm:$0xff]  ;;  %v21244_v30 = vand.u32 4294901760, %v21191_v1 }
 0x721   :  { %21241 = vst [vmem:[#allocation46_spill] sm:$0xff] %v19201_v4  ;;  %12484 = vmatpush3.msra.mxu0 %v21242_v12  ;;  %12527 = vmatpush3.msra.mxu1 %v18845_v61  ;;  %v10339_v23 = vand.u32 4294901760, %v19171_v21  ;;  %v21245_v60 = vand.u32 4294901760, %v19119_v55  ;;  %v21247_v10 = vand.u32 4294901760, %v19058_v9  ;;  %v21248_v21 = vand.u32 4294901760, %v19135_v31  ;;  %v9171_v12 = vld [vmem:[#allocation10 + $0x128] sm:$0xff] }
 0x722   :  { %v19210_v24 = vsub.f32 %v19105_v7, %v21243_v8  ;;  %12485 = vmatprep.subr.mxu0 %v21244_v30  ;;  %v19225_v8 = vand.u32 4294901760, %v9173_v25  ;;  %v21246_v7 = vld [vmem:[#allocation67_spill] sm:$0xff]  ;;  %v10227_v61 = vand.u32 4294901760, %v19184_v51  ;;  %v10346_v49 = vand.u32 4294901760, %v19197_v2  ;;  %v9170_v51 = vld [vmem:[#allocation10 + $0x120] sm:$0xff] }
 0x723   :  { %v19222_v40 = vsub.f32 %v19119_v55, %v21245_v60  ;;  %10084 = vmatmul.mubr.f32.vlgmr.msra.gmra.mxu1 %v21246_v7  ;;  %12566 = vmatprep.subr.mxu1 %v21247_v10  ;;  %v19235_v30 = vsub.f32 %v19135_v31, %v21248_v21  ;;  %v19237_v60 = vand.u32 4294901760, %v9188_v56  ;;  %v21249_v55 = vand.u32 4294901760, %v18788_v17  ;;  %v9186_v21 = vld [vmem:[#allocation10 + $0x1a0] sm:$0xff] }
 0x724   :  { %12567 = vmatpush3.msra.mxu1 %v10206_v22  ;;  %v21250_v9 = vand.u32 4294901760, %v19147_v11  ;;  %v19248_v1 = vand.u32 4294901760, %v9172_v53  ;;  %10426 = vmatprep.mubr.f32.mxu1 %v19126_v43  ;;  %v21251_v31 = vand.u32 4294901760, %v18809_v54  ;;  %v10234_v17 = vand.u32 4294901760, %v19210_v24 }
 0x725   :  { %12486 = vmatpush3.msra.mxu0 %v21249_v55  ;;  %v21252_v55 = vand.u32 4294901760, %v19162_v44  ;;  %v19260_v2 = vsub.f32 %v9189_v33, %v19213_v16  ;;  %12568 = vmatprep.subr.mxu1 %v10325_v37  ;;  %v10353_v54 = vand.u32 4294901760, %v19222_v40  ;;  %v19275_v43 = vand.u32 4294901760, %v9171_v12  ;;  %v9185_v33 = vld [vmem:[#allocation10 + $0x198] sm:$0xff] }
 0x726   :  { %v19245_v10 = vsub.f32 %v19147_v11, %v21250_v9  ;;  %12487 = vmatprep.subr.mxu0 %v21251_v31  ;;  %v19262_v9 = vand.u32 4294901760, %v9187_v58  ;;  %v21255_v11 = vand.u32 4294901760, %v18825_v18  ;;  %v21256_v31 = vand.u32 4294901760, %v19175_v38  ;;  %12569 = vmatpush3.msra.mxu1 %v10213_v36 }
 0x727   :  { %v19257_v22 = vsub.f32 %v19162_v44, %v21252_v55  ;;  %21253 = vst [vmem:[#allocation31_spill] sm:$0xff] %v19260_v2  ;;  %v19273_v55 = vsub.f32 %v9173_v25, %v19225_v8  ;;  %v21258_v44 = vand.u32 4294901760, %v18837_v47  ;;  %v21259_v18 = vand.u32 4294901760, %v19187_v46  ;;  %v9169_v25 = vld [vmem:[#allocation10 + $0x118] sm:$0xff]  ;;  %12570 = vmatprep.subr.mxu1 %v10332_v34 }
 0x728   :  { %21254 = vst [vmem:[#allocation47_spill] sm:$0xff] %v19262_v9  ;;  %12488 = vmatpush3.msra.mxu0 %v21255_v11  ;;  %v19270_v24 = vsub.f32 %v19175_v38, %v21256_v31  ;;  %v10241_v37 = vand.u32 4294901760, %v19235_v30  ;;  %v19284_v40 = vsub.f32 %v9188_v56, %v19237_v60  ;;  %v19286_v31 = vand.u32 4294901760, %v9186_v21  ;;  %v9184_v56 = vld [vmem:[#allocation10 + $0x190] sm:$0xff]  ;;  %12571 = vmatpush3.msra.mxu1 %v10220_v29 }
 0x729   :  { %21257 = vst [vmem:[#allocation44_spill] sm:$0xff] %v19273_v55  ;;  %12489 = vmatprep.subr.mxu0 %v21258_v44  ;;  %v10188_v11 = vsub.f32 %v19187_v46, %v21259_v18  ;;  %v21261_v38 = vand.u32 4294901760, %v18843_v62  ;;  %v10360_v36 = vand.u32 4294901760, %v19245_v10  ;;  %v21262_v47 = vand.u32 4294901760, %v19201_v4  ;;  %12572 = vmatprep.subr.mxu1 %v10339_v23 }
 0x72a   :  { %21260 = vst [vmem:[#allocation50_spill] sm:$0xff] %v19284_v40  ;;  %v19297_v18 = vsub.f32 %v9172_v53, %v19248_v1  ;;  %v19299_v30 = vand.u32 4294901760, %v9170_v51  ;;  %v21263_v35 = vand.u32 4294901760, %v18853_v15  ;;  %v10248_v62 = vand.u32 4294901760, %v19257_v22  ;;  %v9183_v22 = vld [vmem:[#allocation10 + $0x188] sm:$0xff]  ;;  %12573 = vmatpush3.msra.mxu1 %v10227_v61 }
 0x72b   :  { %12490 = vmatpush3.msra.mxu0 %v21261_v38  ;;  %v19294_v44 = vsub.f32 %v19201_v4, %v21262_v47  ;;  %v19306_v34 = vsub.f32 %v9187_v58, %v19262_v9  ;;  %v19308_v10 = vand.u32 4294901760, %v9185_v33  ;;  %v9168_v47 = vld [vmem:[#allocation10 + $0x110] sm:$0xff]  ;;  %v21264_v53 = vand.u32 4294901760, %v18858_v41  ;;  %12574 = vmatprep.subr.mxu1 %v10346_v49 }
 0x72c   :  { %12491 = vmatprep.subr.mxu0 %v21263_v35  ;;  %v10367_v4 = vand.u32 4294901760, %v19270_v24  ;;  %v19315_v15 = vsub.f32 %v9171_v12, %v19275_v43  ;;  %v19317_v35 = vand.u32 4294901760, %v9169_v25  ;;  %v10189_v58 = vand.u32 4294901760, %v10188_v11  ;;  %v9167_v24 = vld [vmem:[#allocation10 + $0x108] sm:$0xff]  ;;  %v9182_v11 = vld [vmem:[#allocation10 + $0x180] sm:$0xff]  ;;  %12575 = vmatpush3.msra.mxu1 %v10234_v17 }
 0x72d   :  { %12492 = vmatpush3.msra.mxu0 %v21264_v53  ;;  %v19322_v23 = vsub.f32 %v9186_v21, %v19286_v31  ;;  %v19324_v41 = vand.u32 4294901760, %v9184_v56  ;;  %v10255_v12 = vand.u32 4294901760, %v19294_v44  ;;  %v19330_v61 = vsub.f32 %v9170_v51, %v19299_v30  ;;  %v9166_v53 = vld [vmem:[#allocation10 + $0x100] sm:$0xff]  ;;  %12576 = vmatprep.subr.mxu1 %v10353_v54 }
 0x72e   :  { %9980 = vmatmul.mubr.f32.vlgmr.msra.gmra.mxu0 %v21246_v7  ;;  %12531 = vmatprep.subr.mxu0 %v18984_v50  ;;  %v19332_v7 = vand.u32 4294901760, %v9168_v47  ;;  %v21266_v21 = vand.u32 4294901760, %v19260_v2  ;;  %v19340_v49 = vsub.f32 %v9185_v33, %v19308_v10  ;;  %v19342_v44 = vand.u32 4294901760, %v9183_v22 }
 0x72f   :  { %12532 = vmatpush3.msra.mxu0 %v18995_v52  ;;  %10190 = vmatprep.mubr.f32.mxu0 %v10189_v58  ;;  %v21267_v51 = vand.u32 4294901760, %v19273_v55  ;;  %v19350_v32 = vsub.f32 %v9169_v25, %v19317_v35  ;;  %v21269_v33 = vand.u32 4294901760, %v19284_v40  ;;  %v21270_v25 = vand.u32 4294901760, %v19297_v18 }
 0x730   :  { %21265 = vst [vmem:[#allocation48_spill] sm:$0xff] %v19332_v7  ;;  %v10373_v38 = vsub.f32 %v19260_v2, %v21266_v21  ;;  %12533 = vmatprep.subr.mxu0 %v19006_v48  ;;  %v19352_v21 = vand.u32 4294901760, %v9167_v24  ;;  %v19360_v2 = vsub.f32 %v9184_v56, %v19324_v41  ;;  %12577 = vmatpush3.msra.mxu1 %v10241_v37  ;;  %v21271_v29 = vand.u32 4294901760, %v19306_v34 }
 0x731   :  { %v10261_v57 = vsub.f32 %v19273_v55, %v21267_v51  ;;  %12534 = vmatpush3.msra.mxu0 %v19011_v26  ;;  %v10380_v17 = vsub.f32 %v19284_v40, %v21269_v33  ;;  %v19362_v51 = vand.u32 4294901760, %v9182_v11  ;;  %v10268_v54 = vsub.f32 %v19297_v18, %v21270_v25  ;;  %12578 = vmatprep.subr.mxu1 %v10360_v36 }
 0x732   :  { %21268 = vst [vmem:[#allocation52_spill] sm:$0xff] %v19352_v21  ;;  %12535 = vmatprep.subr.mxu0 %v19019_v19  ;;  %v19370_v55 = vsub.f32 %v9168_v47, %v19332_v7  ;;  %v19372_v33 = vand.u32 4294901760, %v9166_v53  ;;  %v10374_v56 = vand.u32 4294901760, %v10373_v38  ;;  %v10387_v37 = vsub.f32 %v19306_v34, %v21271_v29  ;;  %12579 = vmatpush3.msra.mxu1 %v10248_v62 }
 0x733   :  { %12536 = vmatpush3.msra.mxu0 %v19025_v28  ;;  %v19380_v14 = vsub.f32 %v9183_v22, %v19342_v44  ;;  %v10262_v47 = vand.u32 4294901760, %v10261_v57  ;;  %v21272_v25 = vand.u32 4294901760, %v19315_v15  ;;  %v19388_v38 = vsub.f32 %v9167_v24, %v19352_v21  ;;  %12580 = vmatprep.subr.mxu1 %v10367_v4 }
 0x734   :  { %12537 = vmatprep.subr.mxu0 %v19033_v5  ;;  %v10381_v29 = vand.u32 4294901760, %v10380_v17  ;;  %v21273_v22 = vand.u32 4294901760, %v19322_v23  ;;  %v19396_v57 = vsub.f32 %v9182_v11, %v19362_v51  ;;  %12581 = vmatpush3.msra.mxu1 %v10255_v12  ;;  %v21274_v24 = vand.u32 4294901760, %v19330_v61 }
 0x735   :  { %v10275_v36 = vsub.f32 %v19315_v15, %v21272_v25  ;;  %12538 = vmatpush3.msra.mxu0 %v19041_v63  ;;  %v10269_v25 = vand.u32 4294901760, %v10268_v54  ;;  %v19404_v17 = vsub.f32 %v9166_v53, %v19372_v33  ;;  %12582 = vmatprep.subr.mxu1 %v10374_v56  ;;  %v21275_v11 = vand.u32 4294901760, %v19340_v49 }
 0x736   :  { %v10394_v62 = vsub.f32 %v19322_v23, %v21273_v22  ;;  %12539 = vmatprep.subr.mxu0 %v19050_v27  ;;  %v10282_v4 = vsub.f32 %v19330_v61, %v21274_v24  ;;  %v10388_v22 = vand.u32 4294901760, %v10387_v37  ;;  %12583 = vmatpush3.msra.mxu1 %v10262_v47  ;;  %v21276_v24 = vand.u32 4294901760, %v19350_v32 }
 0x737   :  { %12540 = vmatpush3.msra.mxu0 %v19063_v0  ;;  %v10401_v12 = vsub.f32 %v19340_v49, %v21275_v11  ;;  %v10276_v54 = vand.u32 4294901760, %v10275_v36  ;;  %12584 = vmatprep.subr.mxu1 %v10381_v29  ;;  %v21277_v37 = vand.u32 4294901760, %v19360_v2  ;;  %v21278_v36 = vand.u32 4294901760, %v19370_v55 }
 0x738   :  { %12541 = vmatprep.subr.mxu0 %v19072_v42  ;;  %v10289_v58 = vsub.f32 %v19350_v32, %v21276_v24  ;;  %v10395_v56 = vand.u32 4294901760, %v10394_v62  ;;  %12585 = vmatpush3.msra.mxu1 %v10269_v25  ;;  %v10283_v47 = vand.u32 4294901760, %v10282_v4  ;;  %v21279_v62 = vand.u32 4294901760, %v19380_v14 }
 0x739   :  { %12542 = vmatpush3.msra.mxu0 %v19083_v6  ;;  %v10408_v11 = vsub.f32 %v19360_v2, %v21277_v37  ;;  %v10296_v24 = vsub.f32 %v19370_v55, %v21278_v36  ;;  %12586 = vmatprep.subr.mxu1 %v10388_v22  ;;  %v10402_v29 = vand.u32 4294901760, %v10401_v12  ;;  %v21280_v4 = vand.u32 4294901760, %v19388_v38 }
 0x73a   :  { %12543 = vmatprep.subr.mxu0 %v19097_v13  ;;  %v10415_v37 = vsub.f32 %v19380_v14, %v21279_v62  ;;  %12587 = vmatpush3.msra.mxu1 %v10276_v54  ;;  %v10290_v25 = vand.u32 4294901760, %v10289_v58  ;;  %v21281_v22 = vand.u32 4294901760, %v19396_v57  ;;  %v19439_v53 = vand.u32 4294901760, %v18896_v20 }
 0x73b   :  { %12544 = vmatpush3.msra.mxu0 %v19107_v39  ;;  %v10303_v40 = vsub.f32 %v19388_v38, %v21280_v4  ;;  %12588 = vmatprep.subr.mxu1 %v10395_v56  ;;  %v10409_v36 = vand.u32 4294901760, %v10408_v11  ;;  %v10297_v54 = vand.u32 4294901760, %v10296_v24  ;;  %v21283_v58 = vand.u32 4294901760, %v19404_v17 }
 0x73c   :  { %12545 = vmatprep.subr.mxu0 %v19121_v59  ;;  %v10422_v12 = vsub.f32 %v19396_v57, %v21281_v22  ;;  %21282 = vst [vmem:[#allocation54_spill] sm:$0xff] %v19439_v53  ;;  %12589 = vmatpush3.msra.mxu1 %v10283_v47  ;;  %v10416_v56 = vand.u32 4294901760, %v10415_v37  ;;  %v19450_v47 = vsub.f32 %v18896_v20, %v19439_v53  ;;  %v21284_v20 = vand.u32 4294901760, %v19187_v46  ;;  %v21287_v22 = vld [vmem:[#allocation34_spill] sm:$0xff] }
 0x73d   :  { %12546 = vmatpush3.msra.mxu0 %v19149_v45  ;;  %v10310_v62 = vsub.f32 %v19404_v17, %v21283_v58  ;;  %12590 = vmatprep.subr.mxu1 %v10402_v29  ;;  %v10304_v11 = vand.u32 4294901760, %v10303_v40  ;;  %v21290_v58 = vld [vmem:[#allocation37_spill] sm:$0xff] }
 0x73e   :  { %12547 = vmatprep.subr.mxu0 %v19213_v16  ;;  %12591 = vmatpush3.msra.mxu1 %v10290_v25  ;;  %v10423_v4 = vand.u32 4294901760, %v10422_v12  ;;  %v20723_v40 = vand.u32 4294901760, %v19450_v47  ;;  %v21285_v25 = vld [vmem:[#allocation64_spill] sm:$0xff]  ;;  %v21288_v12 = vld [vmem:[#allocation41_spill] sm:$0xff] }
 0x73f   :  { %12548 = vmatpush3.msra.mxu0 %v19225_v8  ;;  %12592 = vmatprep.subr.mxu1 %v10409_v36  ;;  %v10311_v24 = vand.u32 4294901760, %v10310_v62  ;;  %v21286_v36 = vld [vmem:[#allocation68_spill] sm:$0xff] }
 0x740   :  { %12549 = vmatprep.subr.mxu0 %v19237_v60  ;;  %12593 = vmatpush3.msra.mxu1 %v10297_v54  ;;  %v10194_v29 = vsub.f32 %v19450_v47, %v20723_v40  ;;  %v21289_v54 = vld [vmem:[#allocation70_spill] sm:$0xff]  ;;  %v21292_v62 = vld [vmem:[#allocation36_spill] sm:$0xff]  ;;  %v21300_v40 = vld [vmem:[#allocation31_spill] sm:$0xff] }
 0x741   :  { %12550 = vmatpush3.msra.mxu0 %v19248_v1  ;;  %12594 = vmatprep.subr.mxu1 %v10416_v56  ;;  %v21293_v56 = vld [vmem:[#allocation39_spill] sm:$0xff] }
 0x742   :  { %12551 = vmatprep.subr.mxu0 %v19262_v9  ;;  %12595 = vmatpush3.msra.mxu1 %v10304_v11  ;;  %v10195_v37 = vand.u32 4294901760, %v10194_v29  ;;  %v21294_v11 = vld [vmem:[#allocation40_spill] sm:$0xff]  ;;  %v21298_v29 = vld [vmem:[#allocation45_spill] sm:$0xff] }
 0x743   :  { %12552 = vmatpush3.msra.mxu0 %v19275_v43  ;;  %12596 = vmatprep.subr.mxu1 %v10423_v4  ;;  %v21295_v4 = vld [vmem:[#allocation42_spill] sm:$0xff] }
 0x744   :  { %12553 = vmatprep.subr.mxu0 %v19286_v31  ;;  %12597 = vmatpush3.msra.mxu1 %v10311_v24  ;;  %v21296_v24 = vld [vmem:[#allocation43_spill] sm:$0xff] }
 0x745   :  { %12554 = vmatpush3.msra.mxu0 %v19299_v30  ;;  %10428 = vmatmul.mubr.f32.vlgmr.msra.gmra.mxu1 %v19439_v53  ;;  %v21301_v53 = vld [vmem:[#allocation44_spill] sm:$0xff] }
 0x746   :  { %12555 = vmatprep.subr.mxu0 %v19308_v10  ;;  %12636 = vmatprep.subr.mxu1 %v18984_v50 }
 0x747   :  { %12556 = vmatpush3.msra.mxu0 %v19317_v35  ;;  %12637 = vmatpush3.msra.mxu1 %v18995_v52 }
 0x748   :  { %10670 = vmatprep.mubr.f32.mxu1 %v21284_v20  ;;  %12557 = vmatprep.subr.mxu0 %v19324_v41  ;;  %v21297_v20 = vld [vmem:[#allocation32_spill] sm:$0xff] }
 0x749   :  { %12638 = vmatprep.subr.mxu1 %v19006_v48  ;;  %12558 = vmatpush3.msra.mxu0 %v19332_v7 }
 0x74a   :  { %12639 = vmatpush3.msra.mxu1 %v19011_v26  ;;  %12559 = vmatprep.subr.mxu0 %v19342_v44 }
 0x74b   :  { %12640 = vmatprep.subr.mxu1 %v19019_v19  ;;  %12560 = vmatpush3.msra.mxu0 %v19352_v21 }
 0x74c   :  { %12641 = vmatpush3.msra.mxu1 %v19025_v28  ;;  %12561 = vmatprep.subr.mxu0 %v19362_v51 }
 0x74d   :  { %12642 = vmatprep.subr.mxu1 %v19033_v5  ;;  %12562 = vmatpush3.msra.mxu0 %v19372_v33 }
 0x74e   :  { %12643 = vmatpush3.msra.mxu1 %v19041_v63  ;;  %10196 = vmatmul.mubr.f32.vlgmr.msra.gmra.mxu0 %v10195_v37  ;;  %v21299_v37 = vld [vmem:[#allocation46_spill] sm:$0xff] }
 0x74f   :  { %12601 = vmatprep.subr.mxu0 %v19001_v3  ;;  %12644 = vmatprep.subr.mxu1 %v19050_v27 }
 0x750   :  { %12602 = vmatpush3.msra.mxu0 %v21285_v25  ;;  %10563 = vmatprep.mubr.f32.mxu0 %v19187_v46  ;;  %v21291_v46 = vld [vmem:[#allocation71_spill] sm:$0xff] }
 0x751   :  { %12645 = vmatpush3.msra.mxu1 %v19063_v0  ;;  %12603 = vmatprep.subr.mxu0 %v21286_v36 }
 0x752   :  { %12646 = vmatprep.subr.mxu1 %v19072_v42  ;;  %12604 = vmatpush3.msra.mxu0 %v21287_v22 }
 0x753   :  { %12647 = vmatpush3.msra.mxu1 %v19083_v6  ;;  %12605 = vmatprep.subr.mxu0 %v21288_v12 }
 0x754   :  { %12648 = vmatprep.subr.mxu1 %v19097_v13  ;;  %12606 = vmatpush3.msra.mxu0 %v21289_v54 }
 0x755   :  { %12649 = vmatpush3.msra.mxu1 %v19107_v39  ;;  %12607 = vmatprep.subr.mxu0 %v21290_v58 }
 0x756   :  { %12650 = vmatprep.subr.mxu1 %v19121_v59  ;;  %12608 = vmatpush3.msra.mxu0 %v21291_v46 }
 0x757   :  { %12651 = vmatpush3.msra.mxu1 %v19149_v45  ;;  %12609 = vmatprep.subr.mxu0 %v21292_v62 }
 0x758   :  { %12652 = vmatprep.subr.mxu1 %v19213_v16  ;;  %12610 = vmatpush3.msra.mxu0 %v21293_v56 }
 0x759   :  { %12653 = vmatpush3.msra.mxu1 %v19225_v8  ;;  %12611 = vmatprep.subr.mxu0 %v21294_v11 }
 0x75a   :  { %12654 = vmatprep.subr.mxu1 %v19237_v60  ;;  %12612 = vmatpush3.msra.mxu0 %v21295_v4 }
 0x75b   :  { %12655 = vmatpush3.msra.mxu1 %v19248_v1  ;;  %12613 = vmatprep.subr.mxu0 %v21296_v24 }
 0x75c   :  { %12656 = vmatprep.subr.mxu1 %v19262_v9  ;;  %12614 = vmatpush3.msra.mxu0 %v21297_v20  ;;  %v21302_v9 = vld [vmem:[#allocation50_spill] sm:$0xff] }
 0x75d   :  { %12657 = vmatpush3.msra.mxu1 %v19275_v43  ;;  %12615 = vmatprep.subr.mxu0 %v21298_v29 }
 0x75e   :  { %12658 = vmatprep.subr.mxu1 %v19286_v31  ;;  %12616 = vmatpush3.msra.mxu0 %v21299_v37 }
 0x75f   :  { %12659 = vmatpush3.msra.mxu1 %v19299_v30  ;;  %12617 = vmatprep.subr.mxu0 %v21300_v40 }
 0x760   :  { %12660 = vmatprep.subr.mxu1 %v19308_v10  ;;  %12618 = vmatpush3.msra.mxu0 %v21301_v53 }
 0x761   :  { %12661 = vmatpush3.msra.mxu1 %v19317_v35  ;;  %12619 = vmatprep.subr.mxu0 %v21302_v9 }
 0x762   :  { %12662 = vmatprep.subr.mxu1 %v19324_v41  ;;  %12620 = vmatpush3.msra.mxu0 %v19297_v18 }
 0x763   :  { %12663 = vmatpush3.msra.mxu1 %v19332_v7  ;;  %12621 = vmatprep.subr.mxu0 %v19306_v34  ;;  %v21303_v7 = vand.u32 4294901760, %v19450_v47 }
 0x764   :  { %12664 = vmatprep.subr.mxu1 %v19342_v44  ;;  %12622 = vmatpush3.msra.mxu0 %v19315_v15 }
 0x765   :  { %12665 = vmatpush3.msra.mxu1 %v19352_v21  ;;  %12623 = vmatprep.subr.mxu0 %v19322_v23  ;;  %v21304_v21 = vld [vmem:[#allocation38_spill] sm:$0xff] }
 0x766   :  { %12666 = vmatprep.subr.mxu1 %v19362_v51  ;;  %12624 = vmatpush3.msra.mxu0 %v19330_v61 }
 0x767   :  { %12667 = vmatpush3.msra.mxu1 %v19372_v33  ;;  %12625 = vmatprep.subr.mxu0 %v19340_v49 }
 0x768   :  { %10674 = vmatmul.mubr.f32.vlgmr.msra.gmra.mxu1 %v21303_v7  ;;  %12706 = vmatprep.subr.mxu1 %v18984_v50  ;;  %v21305_v50 = vand.u32 4294901760, %v19001_v3  ;;  %v21309_v3 = vand.u32 4294901760, %v21288_v12  ;;  %v21337_v7 = vand.u32 4294901760, %v19370_v55 }
 0x769   :  { %12626 = vmatpush3.msra.mxu0 %v19350_v32  ;;  %12707 = vmatpush3.msra.mxu1 %v18995_v52  ;;  %v21306_v52 = vand.u32 4294901760, %v21285_v25  ;;  %v10960_v25 = vld [vmem:[%s20424_s7 + $0x48] sm:$0xff] }
 0x76a   :  { %10944 = vmatprep.mubr.f32.mxu1 %v21304_v21  ;;  %12627 = vmatprep.subr.mxu0 %v19360_v2 }
 0x76b   :  { %12708 = vmatprep.subr.mxu1 %v19006_v48  ;;  %12628 = vmatpush3.msra.mxu0 %v19370_v55  ;;  %v21307_v48 = vand.u32 4294901760, %v21286_v36 }
 0x76c   :  { %12709 = vmatpush3.msra.mxu1 %v19011_v26  ;;  %12629 = vmatprep.subr.mxu0 %v19380_v14  ;;  %v21308_v26 = vand.u32 4294901760, %v21287_v22 }
 0x76d   :  { %12710 = vmatprep.subr.mxu1 %v19019_v19  ;;  %12630 = vmatpush3.msra.mxu0 %v19388_v38  ;;  %v21310_v19 = vand.u32 4294901760, %v21289_v54  ;;  %v19684_v54 = vand.u32 4294901760, %v10960_v25 }
 0x76e   :  { %12711 = vmatpush3.msra.mxu1 %v19025_v28  ;;  %12631 = vmatprep.subr.mxu0 %v19396_v57  ;;  %v21311_v28 = vand.u32 4294901760, %v21290_v58 }
 0x76f   :  { %12712 = vmatprep.subr.mxu1 %v19033_v5  ;;  %12632 = vmatpush3.msra.mxu0 %v19404_v17  ;;  %v21312_v5 = vand.u32 4294901760, %v21291_v46 }
 0x770   :  { %12713 = vmatpush3.msra.mxu1 %v19041_v63  ;;  %10566 = vmatmul.mubr.f32.vlgmr.msra.gmra.mxu0 %v19450_v47  ;;  %v21313_v63 = vand.u32 4294901760, %v21292_v62 }
 0x771   :  { %12671 = vmatprep.subr.mxu0 %v21305_v50  ;;  %12714 = vmatprep.subr.mxu1 %v19050_v27  ;;  %v21314_v27 = vand.u32 4294901760, %v21293_v56 }
 0x772   :  { %12672 = vmatpush3.msra.mxu0 %v21306_v52  ;;  %10840 = vmatprep.mubr.f32.mxu0 %v21304_v21 }
 0x773   :  { %12715 = vmatpush3.msra.mxu1 %v19063_v0  ;;  %12673 = vmatprep.subr.mxu0 %v21307_v48  ;;  %v21316_v0 = vand.u32 4294901760, %v21295_v4 }
 0x774   :  { %12716 = vmatprep.subr.mxu1 %v19072_v42  ;;  %12674 = vmatpush3.msra.mxu0 %v21308_v26  ;;  %v21318_v42 = vld [vmem:[#allocation47_spill] sm:$0xff] }
 0x775   :  { %12717 = vmatpush3.msra.mxu1 %v19083_v6  ;;  %12675 = vmatprep.subr.mxu0 %v21309_v3  ;;  %v21319_v6 = vand.u32 4294901760, %v21297_v20 }
 0x776   :  { %12718 = vmatprep.subr.mxu1 %v19097_v13  ;;  %12676 = vmatpush3.msra.mxu0 %v21310_v19  ;;  %v21320_v13 = vand.u32 4294901760, %v21298_v29 }
 0x777   :  { %12719 = vmatpush3.msra.mxu1 %v19107_v39  ;;  %12677 = vmatprep.subr.mxu0 %v21311_v28  ;;  %v21315_v39 = vand.u32 4294901760, %v21294_v11 }
 0x778   :  { %12720 = vmatprep.subr.mxu1 %v19121_v59  ;;  %12678 = vmatpush3.msra.mxu0 %v21312_v5  ;;  %v21321_v59 = vand.u32 4294901760, %v21299_v37 }
 0x779   :  { %12721 = vmatpush3.msra.mxu1 %v19149_v45  ;;  %12679 = vmatprep.subr.mxu0 %v21313_v63  ;;  %v21317_v45 = vand.u32 4294901760, %v21296_v24  ;;  %v19705_v24 = vsub.f32 %v10960_v25, %v19684_v54 }
 0x77a   :  { %12722 = vmatprep.subr.mxu1 %v19213_v16  ;;  %12680 = vmatpush3.msra.mxu0 %v21314_v27  ;;  %v21322_v16 = vand.u32 4294901760, %v21300_v40  ;;  %v10961_v40 = vld [vmem:[%s20424_s7 + $0x50] sm:$0xff] }
 0x77b   :  { %12723 = vmatpush3.msra.mxu1 %v19225_v8  ;;  %12681 = vmatprep.subr.mxu0 %v21315_v39  ;;  %v21323_v8 = vand.u32 4294901760, %v21301_v53  ;;  %v19682_v12 = vand.u32 4294901760, %v10961_v40  ;;  %v20738_v5 = vand.u32 4294901760, %v19705_v24 }
 0x77c   :  { %12724 = vmatprep.subr.mxu1 %v19237_v60  ;;  %12682 = vmatpush3.msra.mxu0 %v21316_v0  ;;  %v21326_v60 = vld [vmem:[#allocation48_spill] sm:$0xff]  ;;  %v10959_v0 = vld [vmem:[%s20424_s7 + $0x40] sm:$0xff] }
 0x77d   :  { %12725 = vmatpush3.msra.mxu1 %v19248_v1  ;;  %12683 = vmatprep.subr.mxu0 %v21317_v45  ;;  %v21325_v1 = vand.u32 4294901760, %v19297_v18  ;;  %v21331_v18 = vand.u32 4294901760, %v19330_v61  ;;  %v21338_v61 = vand.u32 4294901760, %v19380_v14  ;;  %v10965_v14 = vld [vmem:[%s20424_s7 + $0x70] sm:$0xff]  ;;  %v19701_v4 = vsub.f32 %v10961_v40, %v19682_v12 }
 0x77e   :  { %12726 = vmatprep.subr.mxu1 %v21318_v42  ;;  %12684 = vmatpush3.msra.mxu0 %v21319_v6  ;;  %v11111_v42 = vsub.f32 %v19705_v24, %v20738_v5  ;;  %v19742_v6 = vand.u32 4294901760, %v10959_v0  ;;  %v10953_v40 = vld [vmem:[%s20424_s7 + $0x10] sm:$0xff] }
 0x77f   :  { %12727 = vmatpush3.msra.mxu1 %v19275_v43  ;;  %12685 = vmatprep.subr.mxu0 %v21320_v13  ;;  %v21324_v43 = vand.u32 4294901760, %v21302_v9  ;;  %v21330_v9 = vand.u32 4294901760, %v19322_v23  ;;  %v21336_v23 = vmov 0.0   ;;  %v20739_v48 = vand.u32 4294901760, %v19701_v4  ;;  %v10958_v13 = vld [vmem:[%s20424_s7 + $0x38] sm:$0xff] }
 0x780   :  { %12728 = vmatprep.subr.mxu1 %v19286_v31  ;;  %12686 = vmatpush3.msra.mxu0 %v21321_v59  ;;  %v21327_v31 = vand.u32 4294901760, %v19306_v34  ;;  %v21332_v34 = vand.u32 4294901760, %v19340_v49  ;;  %v21340_v49 = vand.u32 4294901760, %v19396_v57  ;;  %v10962_v57 = vld [vmem:[%s20424_s7 + $0x58] sm:$0xff] }
 0x781   :  { %12729 = vmatpush3.msra.mxu1 %v19299_v30  ;;  %12687 = vmatprep.subr.mxu0 %v21322_v16  ;;  %v21328_v30 = vand.u32 4294901760, %v19315_v15  ;;  %v21334_v15 = vand.u32 4294901760, %v19350_v32  ;;  %v21341_v32 = vand.u32 4294901760, %v19404_v17  ;;  %v19668_v47 = vand.u32 4294901760, %v10962_v57 }
 0x782   :  { %12730 = vmatprep.subr.mxu1 %v19308_v10  ;;  %12688 = vmatpush3.msra.mxu0 %v21323_v8  ;;  %v21329_v10 = vld [vmem:[#allocation52_spill] sm:$0xff]  ;;  %v11104_v39 = vsub.f32 %v19701_v4, %v20739_v48  ;;  %v19751_v16 = vsub.f32 %v10959_v0, %v19742_v6  ;;  %v19753_v8 = vand.u32 4294901760, %v10958_v13  ;;  %v10951_v0 = vld [vmem:[%s20424_s7] sm:$0xff] }
 0x783   :  { %12731 = vmatpush3.msra.mxu1 %v19317_v35  ;;  %12689 = vmatprep.subr.mxu0 %v21324_v43  ;;  %v21333_v35 = vld [vmem:[#allocation54_spill] sm:$0xff]  ;;  %v19693_v62 = vsub.f32 %v10962_v57, %v19668_v47  ;;  %v10957_v43 = vld [vmem:[%s20424_s7 + $0x30] sm:$0xff] }
 0x784   :  { %12732 = vmatprep.subr.mxu1 %v19324_v41  ;;  %12690 = vmatpush3.msra.mxu0 %v21325_v1  ;;  %v21335_v41 = vand.u32 4294901760, %v19360_v2  ;;  %v10966_v2 = vld [vmem:[%s20424_s7 + $0x78] sm:$0xff]  ;;  %v11105_v59 = vand.u32 4294901760, %v11104_v39  ;;  %v11112_v1 = vand.u32 4294901760, %v11111_v42 }
 0x785   :  { %12733 = vmatpush3.msra.mxu1 %v21326_v60  ;;  %12691 = vmatprep.subr.mxu0 %v21327_v31  ;;  %v19644_v55 = vand.u32 4294901760, %v10966_v2  ;;  %v20740_v37 = vand.u32 4294901760, %v19693_v62  ;;  %v20737_v60 = vand.u32 4294901760, %v19751_v16  ;;  %v19763_v31 = vsub.f32 %v10958_v13, %v19753_v8 }
 0x786   :  { %12734 = vmatprep.subr.mxu1 %v19342_v44  ;;  %12692 = vmatpush3.msra.mxu0 %v21328_v30  ;;  %v21339_v44 = vand.u32 4294901760, %v19388_v38  ;;  %v10963_v38 = vld [vmem:[%s20424_s7 + $0x60] sm:$0xff]  ;;  %v19765_v30 = vand.u32 4294901760, %v10957_v43  ;;  %v19853_v13 = vand.u32 4294901760, %v10951_v0 }
 0x787   :  { %12735 = vmatpush3.msra.mxu1 %v21329_v10  ;;  %12693 = vmatprep.subr.mxu0 %v21330_v9  ;;  %v19650_v21 = vsub.f32 %v10966_v2, %v19644_v55  ;;  %v19666_v53 = vand.u32 4294901760, %v10963_v38  ;;  %v11097_v28 = vsub.f32 %v19693_v62, %v20740_v37  ;;  %v10956_v10 = vld [vmem:[%s20424_s7 + $0x28] sm:$0xff]  ;;  %v11118_v9 = vsub.f32 %v19751_v16, %v20737_v60 }
 0x788   :  { %12736 = vmatprep.subr.mxu1 %v19362_v51  ;;  %12694 = vmatpush3.msra.mxu0 %v21331_v18  ;;  %v19652_v51 = vand.u32 4294901760, %v10965_v14  ;;  %v20736_v18 = vand.u32 4294901760, %v19763_v31 }
 0x789   :  { %12737 = vmatpush3.msra.mxu1 %v19372_v33  ;;  %12695 = vmatprep.subr.mxu0 %v21332_v34  ;;  %v10964_v33 = vld [vmem:[%s20424_s7 + $0x68] sm:$0xff]  ;;  %v11068_v36 = vand.u32 4294901760, %v19650_v21  ;;  %v19690_v46 = vsub.f32 %v10963_v38, %v19666_v53  ;;  %v11098_v45 = vand.u32 4294901760, %v11097_v28  ;;  %v19778_v34 = vsub.f32 %v10957_v43, %v19765_v30 }
 0x78a   :  { %10946 = vmatmul.mubr.f32.vlgmr.msra.gmra.mxu1 %v21333_v35  ;;  %12696 = vmatpush3.msra.mxu0 %v21334_v15  ;;  %v19664_v17 = vand.u32 4294901760, %v10964_v33  ;;  %v19679_v22 = vsub.f32 %v10965_v14, %v19652_v51  ;;  %v10955_v15 = vld [vmem:[%s20424_s7 + $0x20] sm:$0xff] }
 0x78b   :  { %12697 = vmatprep.subr.mxu0 %v21335_v41  ;;  %12980 = vmatprep.subr.mxu1 %v21336_v23  ;;  %v11069_v56 = vsub.f32 %v19650_v21, %v11068_v36  ;;  %v11089_v29 = vand.u32 4294901760, %v19690_v46  ;;  %v11119_v41 = vand.u32 4294901760, %v11118_v9  ;;  %v19861_v9 = vsub.f32 %v10951_v0, %v19853_v13 }
 0x78c   :  { %12698 = vmatpush3.msra.mxu0 %v21337_v7  ;;  %v19687_v58 = vsub.f32 %v10964_v33, %v19664_v17  ;;  %v11075_v11 = vand.u32 4294901760, %v19679_v22  ;;  %v11125_v7 = vsub.f32 %v19763_v31, %v20736_v18  ;;  %13012 = vmatprep.mubr.msk.f32.mxu1 %vm13511_vm13, %v21336_v23 }
 0x78d   :  { %12699 = vmatprep.subr.mxu0 %v21338_v61  ;;  %v11070_v50 = vand.u32 4294901760, %v11069_v56  ;;  %v11090_v3 = vsub.f32 %v19690_v46, %v11089_v29  ;;  %v20735_v61 = vand.u32 4294901760, %v19778_v34 }
 0x78e   :  { %12700 = vmatpush3.msra.mxu0 %v21339_v44  ;;  %v11082_v20 = vand.u32 4294901760, %v19687_v58  ;;  %v11076_v52 = vsub.f32 %v19679_v22, %v11075_v11  ;;  %v11126_v2 = vand.u32 4294901760, %v11125_v7  ;;  %v20729_v7 = vand.u32 4294901760, %v19861_v9 }
 0x78f   :  { %12701 = vmatprep.subr.mxu0 %v21340_v49  ;;  %12981 = vmatpush3.msra.mxu1 %v11070_v50  ;;  %v11091_v27 = vand.u32 4294901760, %v11090_v3  ;;  %v19797_v49 = vand.u32 4294901760, %v10955_v15  ;;  %v11132_v14 = vsub.f32 %v19778_v34, %v20735_v61  ;;  %v10952_v3 = vld [vmem:[%s20424_s7 + $0x8] sm:$0xff] }
 0x790   :  { %12702 = vmatpush3.msra.mxu0 %v21341_v32  ;;  %v11083_v26 = vsub.f32 %v19687_v58, %v11082_v20  ;;  %v11077_v19 = vand.u32 4294901760, %v11076_v52  ;;  %12982 = vmatprep.subr.mxu1 %v21336_v23  ;;  %v10954_v32 = vld [vmem:[%s20424_s7 + $0x18] sm:$0xff] }
 0x791   :  { %10842 = vmatmul.mubr.f32.vlgmr.msra.gmra.mxu0 %v21333_v35  ;;  %12945 = vmatprep.subr.mxu0 %v21336_v23  ;;  %v19780_v35 = vand.u32 4294901760, %v10956_v10  ;;  %v19807_v38 = vand.u32 4294901760, %v10954_v32  ;;  %v19811_v57 = vsub.f32 %v10955_v15, %v19797_v49  ;;  %v11133_v25 = vand.u32 4294901760, %v11132_v14 }
 0x792   :  { %12946 = vmatpush3.msra.mxu0 %v19644_v55  ;;  %v11084_v63 = vand.u32 4294901760, %v11083_v26  ;;  %12983 = vmatpush3.msra.mxu1 %v11077_v19  ;;  %v19826_v26 = vand.u32 4294901760, %v10953_v40  ;;  %v11174_v14 = vsub.f32 %v19861_v9, %v20729_v7 }
 0x793   :  { %12947 = vmatprep.subr.mxu0 %v21336_v23  ;;  %12984 = vmatprep.subr.mxu1 %v21336_v23  ;;  %v19793_v44 = vsub.f32 %v10956_v10, %v19780_v35  ;;  %v19821_v50 = vsub.f32 %v10954_v32, %v19807_v38  ;;  %v20733_v52 = vand.u32 4294901760, %v19811_v57 }
 0x794   :  { %12948 = vmatpush3.msra.mxu0 %v19652_v51  ;;  %12985 = vmatpush3.msra.mxu1 %v11084_v63  ;;  %v19833_v63 = vand.u32 4294901760, %v10952_v3  ;;  %v19841_v39 = vsub.f32 %v10953_v40, %v19826_v26  ;;  %v11175_v40 = vand.u32 4294901760, %v11174_v14 }
 0x795   :  { %12949 = vmatprep.subr.mxu0 %v21336_v23  ;;  %12986 = vmatprep.subr.mxu1 %v21336_v23  ;;  %v20734_v33 = vand.u32 4294901760, %v19793_v44  ;;  %v20732_v28 = vand.u32 4294901760, %v19821_v50 }
 0x796   :  { %12950 = vmatpush3.msra.mxu0 %v19664_v17  ;;  %12987 = vmatpush3.msra.mxu1 %v11091_v27  ;;  %v11146_v27 = vsub.f32 %v19811_v57, %v20733_v52  ;;  %v19851_v42 = vsub.f32 %v10952_v3, %v19833_v63  ;;  %v20731_v43 = vand.u32 4294901760, %v19841_v39 }
 0x797   :  { %12951 = vmatprep.subr.mxu0 %v21336_v23  ;;  %12988 = vmatprep.subr.mxu1 %v21336_v23  ;;  %v11139_v56 = vsub.f32 %v19793_v44, %v20734_v33 }
 0x798   :  { %12952 = vmatpush3.msra.mxu0 %v19666_v53  ;;  %12989 = vmatpush3.msra.mxu1 %v11098_v45  ;;  %v11153_v45 = vsub.f32 %v19821_v50, %v20732_v28  ;;  %v20730_v10 = vand.u32 4294901760, %v19851_v42  ;;  %v11160_v15 = vsub.f32 %v19841_v39, %v20731_v43 }
 0x799   :  { %12953 = vmatprep.subr.mxu0 %v21336_v23  ;;  %12990 = vmatprep.subr.mxu1 %v21336_v23  ;;  %v11140_v19 = vand.u32 4294901760, %v11139_v56 }
 0x79a   :  { %12954 = vmatpush3.msra.mxu0 %v19668_v47  ;;  %12991 = vmatpush3.msra.mxu1 %v11105_v59  ;;  %v11147_v59 = vand.u32 4294901760, %v11146_v27  ;;  %v11161_v32 = vand.u32 4294901760, %v11160_v15 }
 0x79b   :  { %12955 = vmatprep.subr.mxu0 %v21336_v23  ;;  %12992 = vmatprep.subr.mxu1 %v21336_v23 }
 0x79c   :  { %12956 = vmatpush3.msra.mxu0 %v19682_v12  ;;  %12993 = vmatpush3.msra.mxu1 %v11112_v1  ;;  %v11154_v1 = vand.u32 4294901760, %v11153_v45  ;;  %v12318_v45 = vld [vmem:[%s20423_s6] ss:$0 sm:$0xff] }
 0x79d   :  { %12957 = vmatprep.subr.mxu0 %v21336_v23  ;;  %12994 = vmatprep.subr.mxu1 %v21336_v23 }
 0x79e   :  { %12958 = vmatpush3.msra.mxu0 %v19684_v54  ;;  %12995 = vmatpush3.msra.mxu1 %v11119_v41  ;;  %v11167_v41 = vsub.f32 %v19851_v42, %v20730_v10 }
 0x79f   :  { %12959 = vmatprep.subr.mxu0 %v21336_v23  ;;  %12996 = vmatprep.subr.mxu1 %v21336_v23  ;;  %v12388_v56 = vpop.f32.mrf.mxu1 }
 0x7a0   :  { %12960 = vmatpush3.msra.mxu0 %v19742_v6  ;;  %12997 = vmatpush3.msra.mxu1 %v11126_v2  ;;  %v11168_v2 = vand.u32 4294901760, %v11167_v41 }
 0x7a1   :  { %12961 = vmatprep.subr.mxu0 %v21336_v23  ;;  %12998 = vmatprep.subr.mxu1 %v21336_v23  ;;  %v12389_v0 = vpop.f32.mrf.mxu1 }
 0x7a2   :  { %12962 = vmatpush3.msra.mxu0 %v19753_v8  ;;  %12999 = vmatpush3.msra.mxu1 %v11133_v25 }
 0x7a3   :  { %12963 = vmatprep.subr.mxu0 %v21336_v23  ;;  %13000 = vmatprep.subr.mxu1 %v21336_v23 }
 0x7a4   :  { %12964 = vmatpush3.msra.mxu0 %v19765_v30  ;;  %13001 = vmatpush3.msra.mxu1 %v11140_v19 }
 0x7a5   :  { %12965 = vmatprep.subr.mxu0 %v21336_v23  ;;  %13002 = vmatprep.subr.mxu1 %v21336_v23 }
 0x7a6   :  { %12966 = vmatpush3.msra.mxu0 %v19780_v35  ;;  %13003 = vmatpush3.msra.mxu1 %v11147_v59 }
 0x7a7   :  { %12967 = vmatprep.subr.mxu0 %v21336_v23  ;;  %13004 = vmatprep.subr.mxu1 %v21336_v23  ;;  %v12353_v25 = vpop.f32.mrf.mxu0 }
 0x7a8   :  { %12968 = vmatpush3.msra.mxu0 %v19797_v49  ;;  %13005 = vmatpush3.msra.mxu1 %v11154_v1 }
 0x7a9   :  { %12969 = vmatprep.subr.mxu0 %v21336_v23  ;;  %13006 = vmatprep.subr.mxu1 %v21336_v23  ;;  %v12354_v3 = vpop.f32.mrf.mxu0 }
 0x7aa   :  { %12970 = vmatpush3.msra.mxu0 %v19807_v38  ;;  %13007 = vmatpush3.msra.mxu1 %v11161_v32  ;;  %v12355_v27 = vadd.f32 %v12354_v3, %v12353_v25  ;;  %v12390_v32 = vadd.f32 %v12389_v0, %v12388_v56 }
 0x7ab   :  { %12971 = vmatprep.subr.mxu0 %v21336_v23  ;;  %13008 = vmatprep.subr.mxu1 %v21336_v23 }
 0x7ac   :  { %12972 = vmatpush3.msra.mxu0 %v19826_v26  ;;  %13009 = vmatpush3.msra.mxu1 %v11168_v2  ;;  %v9336_v15 = vadd.f32 %v12355_v27, %v12318_v45 }
 0x7ad   :  { %12973 = vmatprep.subr.mxu0 %v21336_v23  ;;  %13010 = vmatprep.subr.mxu1 %v21336_v23 }
 0x7ae   :  { %12974 = vmatpush3.msra.mxu0 %v19833_v63  ;;  %13011 = vmatpush3.msra.mxu1 %v11175_v40  ;;  %v9568_v40 = vadd.f32 %v12390_v32, %v9336_v15 }
 0x7af   :  { %12975 = vmatprep.subr.mxu0 %v21336_v23  ;;  %13050 = vmatprep.subr.mxu1 %v21336_v23 }
 0x7b0   :  { %12976 = vmatpush3.msra.mxu0 %v19853_v13  ;;  %12977 = vmatprep.mubr.msk.f32.mxu0 %vm13511_vm13, %v21336_v23 }
 0x7b1   :  { %13015 = vmatprep.subr.mxu0 %v21336_v23 }
 0x7c0   :  { %v12458_v59 = vpop.f32.mrf.mxu1 }
 0x7c2   :  { %v12459_v14 = vpop.f32.mrf.mxu1 }
 0x7c3   :  { %v12460_v52 = vadd.f32 %v12459_v14, %v12458_v59 }
 0x7c8   :  { %v12423_v19 = vpop.f32.mrf.mxu0 }
 0x7ca   :  { %v12424_v1 = vpop.f32.mrf.mxu0 }
 0x7cb   :  { %v12425_v2 = vadd.f32 %v12424_v1, %v12423_v19 }
 0x7cd   :  { %v9706_v43 = vadd.f32 %v12425_v2, %v9568_v40 }
 0x7cf   :  { %v9814_v3 = vadd.f32 %v12460_v52, %v9706_v43 }
 0x7e3   :  { %v12528_v7 = vpop.f32.mrf.mxu1 }
 0x7e5   :  { %v12529_v25 = vpop.f32.mrf.mxu1 }
 0x7e6   :  { %v12530_v48 = vadd.f32 %v12529_v25, %v12528_v7  ;;  %v11622_v25 = vld [vmem:[#allocation11 + $0x38] sm:$0xff] }
 0x7ee   :  { %v12493_v41 = vpop.f32.mrf.mxu0 }
 0x7f0   :  { %v12494_v10 = vpop.f32.mrf.mxu0 }
 0x7f1   :  { %v12495_v33 = vadd.f32 %v12494_v10, %v12493_v41 }
 0x7f3   :  { %v9982_v60 = vadd.f32 %v12495_v33, %v9814_v3 }
 0x7f5   :  { %v10086_v45 = vadd.f32 %v12530_v48, %v9982_v60 }
 0x805   :  { %v12598_v61 = vpop.f32.mrf.mxu1 }
 0x807   :  { %v12599_v27 = vpop.f32.mrf.mxu1 }
 0x808   :  { %v12600_v1 = vadd.f32 %v12599_v27, %v12598_v61 }
 0x80e   :  { %v12563_v28 = vpop.f32.mrf.mxu0 }
 0x810   :  { %v12564_v18 = vpop.f32.mrf.mxu0 }
 0x811   :  { %v12565_v37 = vadd.f32 %v12564_v18, %v12563_v28 }
 0x813   :  { %v10198_v0 = vadd.f32 %v12565_v37, %v10086_v45 }
 0x815   :  { %v10430_v2 = vadd.f32 %v12600_v1, %v10198_v0 }
 0x828   :  { %v12668_v56 = vpop.f32.mrf.mxu1 }
 0x82a   :  { %v12669_v32 = vpop.f32.mrf.mxu1 }
 0x82b   :  { %v12670_v41 = vadd.f32 %v12669_v32, %v12668_v56 }
 0x830   :  { %v12633_v5 = vpop.f32.mrf.mxu0 }
 0x832   :  { %v12634_v19 = vpop.f32.mrf.mxu0 }
 0x833   :  { %v12635_v15 = vadd.f32 %v12634_v19, %v12633_v5 }
 0x835   :  { %v10568_v59 = vadd.f32 %v12635_v15, %v10430_v2 }
 0x837   :  { %v10676_v14 = vadd.f32 %v12670_v41, %v10568_v59 }
 0x84a   :  { %v12738_v40 = vpop.f32.mrf.mxu1 }
 0x84c   :  { %v12739_v52 = vpop.f32.mrf.mxu1 }
 0x84d   :  { %v12740_v3 = vadd.f32 %v12739_v52, %v12738_v40 }
 0x851   :  { %v12703_v10 = vpop.f32.mrf.mxu0 }
 0x853   :  { %v12704_v43 = vpop.f32.mrf.mxu0 }
 0x854   :  { %v12705_v33 = vadd.f32 %v12704_v43, %v12703_v10  ;;  %v20120_v10 = vand.u32 4294901760, %v11622_v25 }
 0x856   :  { %v10844_v7 = vadd.f32 %v12705_v33, %v10676_v14 }
 0x858   :  { %v10948_v18 = vadd.f32 %v12740_v3, %v10844_v7  ;;  %v20135_v3 = vsub.f32 %v11622_v25, %v20120_v10 }
 0x85a   :  { %v19888_v28 = vand.u32 4294901760, %v10948_v18 }
 0x85c   :  { %v19891_v48 = vsub.f32 %v10948_v18, %v19888_v28  ;;  %13013 = vmatmul.mubr.f32.vlgmr.msra.gmra.mxu1 %v19888_v28 }
 0x85d   :  { %13051 = vmatpush3.msra.mxu1 %v19644_v55  ;;  %13082 = vmatprep.mubr.msk.f32.mxu1 %vm13511_vm13, %v21336_v23 }
 0x85e   :  { %v11057_v37 = vand.u32 4294901760, %v19891_v48  ;;  %13052 = vmatprep.subr.mxu1 %v21336_v23 }
 0x85f   :  { %13053 = vmatpush3.msra.mxu1 %v19652_v51 }
 0x860   :  { %v11058_v5 = vsub.f32 %v19891_v48, %v11057_v37  ;;  %13054 = vmatprep.subr.mxu1 %v21336_v23 }
 0x861   :  { %13055 = vmatpush3.msra.mxu1 %v19664_v17 }
 0x862   :  { %v11059_v60 = vand.u32 4294901760, %v11058_v5  ;;  %13056 = vmatprep.subr.mxu1 %v21336_v23 }
 0x863   :  { %13057 = vmatpush3.msra.mxu1 %v19666_v53 }
 0x864   :  { %13058 = vmatprep.subr.mxu1 %v21336_v23  ;;  %12978 = vmatmul.mubr.f32.vlgmr.msra.gmra.mxu0 %v11059_v60  ;;  %v11621_v60 = vld [vmem:[#allocation11 + $0x30] sm:$0xff] }
 0x865   :  { %13016 = vmatpush3.msra.mxu0 %v19650_v21  ;;  %13059 = vmatpush3.msra.mxu1 %v19668_v47  ;;  %v21343_v21 = vand.u32 4294901760, %v19701_v4 }
 0x866   :  { %13017 = vmatprep.subr.mxu0 %v21336_v23  ;;  %13060 = vmatprep.subr.mxu1 %v21336_v23 }
 0x867   :  { %13018 = vmatpush3.msra.mxu0 %v19679_v22  ;;  %13061 = vmatpush3.msra.mxu1 %v19682_v12  ;;  %v21349_v22 = vand.u32 4294901760, %v19811_v57 }
 0x868   :  { %13019 = vmatprep.subr.mxu0 %v21336_v23  ;;  %13062 = vmatprep.subr.mxu1 %v21336_v23 }
 0x869   :  { %13020 = vmatpush3.msra.mxu0 %v19687_v58  ;;  %13063 = vmatpush3.msra.mxu1 %v19684_v54  ;;  %v21352_v58 = vand.u32 4294901760, %v19851_v42 }
 0x86a   :  { %13021 = vmatprep.subr.mxu0 %v21336_v23  ;;  %13064 = vmatprep.subr.mxu1 %v21336_v23 }
 0x86b   :  { %13022 = vmatpush3.msra.mxu0 %v19690_v46  ;;  %13065 = vmatpush3.msra.mxu1 %v19742_v6  ;;  %v21353_v46 = vand.u32 4294901760, %v19861_v9 }
 0x86c   :  { %13023 = vmatprep.subr.mxu0 %v21336_v23  ;;  %13066 = vmatprep.subr.mxu1 %v21336_v23 }
 0x86d   :  { %13024 = vmatpush3.msra.mxu0 %v19693_v62  ;;  %13067 = vmatpush3.msra.mxu1 %v19753_v8 }
 0x86e   :  { %13025 = vmatprep.subr.mxu0 %v21336_v23  ;;  %13068 = vmatprep.subr.mxu1 %v21336_v23 }
 0x86f   :  { %13026 = vmatpush3.msra.mxu0 %v19701_v4  ;;  %13069 = vmatpush3.msra.mxu1 %v19765_v30  ;;  %v11629_v4 = vld [vmem:[#allocation11 + $0x70] sm:$0xff] }
 0x870   :  { %13027 = vmatprep.subr.mxu0 %v21336_v23  ;;  %13070 = vmatprep.subr.mxu1 %v21336_v23 }
 0x871   :  { %13028 = vmatpush3.msra.mxu0 %v19705_v24  ;;  %13071 = vmatpush3.msra.mxu1 %v19780_v35 }
 0x872   :  { %13029 = vmatprep.subr.mxu0 %v21336_v23  ;;  %13072 = vmatprep.subr.mxu1 %v21336_v23 }
 0x873   :  { %13030 = vmatpush3.msra.mxu0 %v19751_v16  ;;  %13073 = vmatpush3.msra.mxu1 %v19797_v49 }
 0x874   :  { %13031 = vmatprep.subr.mxu0 %v21336_v23  ;;  %13074 = vmatprep.subr.mxu1 %v21336_v23 }
 0x875   :  { %13032 = vmatpush3.msra.mxu0 %v19763_v31  ;;  %13075 = vmatpush3.msra.mxu1 %v19807_v38 }
 0x876   :  { %13033 = vmatprep.subr.mxu0 %v21336_v23  ;;  %13076 = vmatprep.subr.mxu1 %v21336_v23 }
 0x877   :  { %13034 = vmatpush3.msra.mxu0 %v19778_v34  ;;  %13077 = vmatpush3.msra.mxu1 %v19826_v26 }
 0x878   :  { %13035 = vmatprep.subr.mxu0 %v21336_v23  ;;  %13078 = vmatprep.subr.mxu1 %v21336_v23 }
 0x879   :  { %13036 = vmatpush3.msra.mxu0 %v19793_v44  ;;  %13079 = vmatpush3.msra.mxu1 %v19833_v63 }
 0x87a   :  { %13037 = vmatprep.subr.mxu0 %v21336_v23  ;;  %13080 = vmatprep.subr.mxu1 %v21336_v23 }
 0x87b   :  { %13038 = vmatpush3.msra.mxu0 %v19811_v57  ;;  %13081 = vmatpush3.msra.mxu1 %v19853_v13 }
 0x87c   :  { %13039 = vmatprep.subr.mxu0 %v21336_v23  ;;  %13083 = vmatmul.mubr.f32.vlgmr.msra.gmra.mxu1 %v11057_v37 }
 0x87d   :  { %13120 = vmatprep.subr.mxu1 %v21336_v23  ;;  %13040 = vmatpush3.msra.mxu0 %v19821_v50 }
 0x87e   :  { %13121 = vmatpush3.msra.mxu1 %v19644_v55  ;;  %13041 = vmatprep.subr.mxu0 %v21336_v23  ;;  %v21342_v55 = vand.u32 4294901760, %v19693_v62  ;;  %v11630_v62 = vld [vmem:[#allocation11 + $0x78] sm:$0xff] }
 0x87f   :  { %13122 = vmatprep.subr.mxu1 %v21336_v23  ;;  %13042 = vmatpush3.msra.mxu0 %v19841_v39 }
 0x880   :  { %13123 = vmatpush3.msra.mxu1 %v19652_v51  ;;  %13043 = vmatprep.subr.mxu0 %v21336_v23  ;;  %v21344_v51 = vand.u32 4294901760, %v19705_v24 }
 0x881   :  { %13124 = vmatprep.subr.mxu1 %v21336_v23  ;;  %13044 = vmatpush3.msra.mxu0 %v19851_v42 }
 0x882   :  { %13125 = vmatpush3.msra.mxu1 %v19664_v17  ;;  %13045 = vmatprep.subr.mxu0 %v21336_v23  ;;  %v21345_v17 = vand.u32 4294901760, %v19751_v16 }
 0x883   :  { %13126 = vmatprep.subr.mxu1 %v21336_v23  ;;  %13046 = vmatpush3.msra.mxu0 %v19861_v9 }
 0x884   :  { %13047 = vmatprep.mubr.msk.f32.mxu0 %vm13511_vm13, %v21336_v23  ;;  %13127 = vmatpush3.msra.mxu1 %v19666_v53  ;;  %v21346_v53 = vand.u32 4294901760, %v19763_v31  ;;  %v11627_v31 = vld [vmem:[#allocation11 + $0x60] sm:$0xff] }
 0x885   :  { %13048 = vmatmul.mubr.f32.vlgmr.msra.gmra.mxu0 %v19891_v48  ;;  %13085 = vmatprep.subr.mxu0 %v21336_v23  ;;  %v11788_v48 = vand.u32 4294901760, %v20135_v3 }
 0x886   :  { %13128 = vmatprep.subr.mxu1 %v21336_v23  ;;  %13086 = vmatpush3.msra.mxu0 %v11068_v36  ;;  %v21348_v36 = vand.u32 4294901760, %v19793_v44 }
 0x887   :  { %13129 = vmatpush3.msra.mxu1 %v19668_v47  ;;  %13087 = vmatprep.subr.mxu0 %v21336_v23  ;;  %v21347_v47 = vand.u32 4294901760, %v19778_v34  ;;  %v11625_v34 = vld [vmem:[#allocation11 + $0x50] sm:$0xff] }
 0x888   :  { %13130 = vmatprep.subr.mxu1 %v21336_v23  ;;  %13088 = vmatpush3.msra.mxu0 %v11075_v11  ;;  %v20055_v11 = vand.u32 4294901760, %v11630_v62  ;;  %v20075_v44 = vand.u32 4294901760, %v11625_v34 }
 0x889   :  { %13131 = vmatpush3.msra.mxu1 %v19682_v12  ;;  %13089 = vmatprep.subr.mxu0 %v21336_v23  ;;  %v21350_v12 = vand.u32 4294901760, %v19821_v50 }
 0x88a   :  { %13132 = vmatprep.subr.mxu1 %v21336_v23  ;;  %13090 = vmatpush3.msra.mxu0 %v11082_v20  ;;  %v20058_v24 = vsub.f32 %v11630_v62, %v20055_v11  ;;  %v20060_v20 = vand.u32 4294901760, %v11629_v4  ;;  %v11618_v62 = vld [vmem:[#allocation11 + $0x18] sm:$0xff] }
 0x88b   :  { %13133 = vmatpush3.msra.mxu1 %v19684_v54  ;;  %13091 = vmatprep.subr.mxu0 %v21336_v23  ;;  %v21351_v54 = vand.u32 4294901760, %v19841_v39 }
 0x88c   :  { %13134 = vmatprep.subr.mxu1 %v21336_v23  ;;  %13092 = vmatpush3.msra.mxu0 %v11089_v29  ;;  %v11628_v29 = vld [vmem:[#allocation11 + $0x68] sm:$0xff]  ;;  %v20066_v16 = vsub.f32 %v11629_v4, %v20060_v20 }
 0x88d   :  { %13135 = vmatpush3.msra.mxu1 %v19742_v6  ;;  %13093 = vmatprep.subr.mxu0 %v21336_v23  ;;  %v11732_v6 = vand.u32 4294901760, %v20058_v24 }
 0x88e   :  { %13136 = vmatprep.subr.mxu1 %v21336_v23  ;;  %13094 = vmatpush3.msra.mxu0 %v21342_v55  ;;  %v11739_v50 = vand.u32 4294901760, %v20066_v16 }
 0x88f   :  { %13137 = vmatpush3.msra.mxu1 %v19753_v8  ;;  %13095 = vmatprep.subr.mxu0 %v21336_v23  ;;  %v20068_v8 = vand.u32 4294901760, %v11628_v29  ;;  %v11733_v57 = vsub.f32 %v20058_v24, %v11732_v6 }
 0x890   :  { %13138 = vmatprep.subr.mxu1 %v21336_v23  ;;  %13096 = vmatpush3.msra.mxu0 %v21343_v21  ;;  %v11740_v45 = vsub.f32 %v20066_v16, %v11739_v50  ;;  %v11789_v21 = vsub.f32 %v20135_v3, %v11788_v48 }
 0x891   :  { %13139 = vmatpush3.msra.mxu1 %v19765_v30  ;;  %13097 = vmatprep.subr.mxu0 %v21336_v23  ;;  %v11626_v30 = vld [vmem:[#allocation11 + $0x58] sm:$0xff]  ;;  %v11734_v27 = vand.u32 4294901760, %v11733_v57 }
 0x892   :  { %13140 = vmatprep.subr.mxu1 %v21336_v23  ;;  %13098 = vmatpush3.msra.mxu0 %v21344_v51  ;;  %v20073_v61 = vand.u32 4294901760, %v11626_v30  ;;  %v11741_v2 = vand.u32 4294901760, %v11740_v45  ;;  %v20156_v51 = vand.u32 4294901760, %v11621_v60  ;;  %v11616_v45 = vld [vmem:[#allocation11 + $0x8] sm:$0xff] }
 0x893   :  { %13141 = vmatpush3.msra.mxu1 %v19780_v35  ;;  %13099 = vmatprep.subr.mxu0 %v21336_v23  ;;  %v20071_v35 = vand.u32 4294901760, %v11627_v31 }
 0x894   :  { %13142 = vmatprep.subr.mxu1 %v21336_v23  ;;  %13100 = vmatpush3.msra.mxu0 %v21345_v17  ;;  %v20092_v42 = vsub.f32 %v11626_v30, %v20073_v61  ;;  %v11620_v17 = vld [vmem:[#allocation11 + $0x28] sm:$0xff]  ;;  %v20185_v30 = vand.u32 4294901760, %v11618_v62 }
 0x895   :  { %13143 = vmatpush3.msra.mxu1 %v19797_v49  ;;  %13101 = vmatprep.subr.mxu0 %v21336_v23  ;;  %v11624_v49 = vld [vmem:[#allocation11 + $0x48] sm:$0xff]  ;;  %v20089_v39 = vsub.f32 %v11627_v31, %v20071_v35 }
 0x896   :  { %13144 = vmatprep.subr.mxu1 %v21336_v23  ;;  %13102 = vmatpush3.msra.mxu0 %v21346_v53  ;;  %v11760_v1 = vand.u32 4294901760, %v20092_v42  ;;  %v20195_v25 = vsub.f32 %v11618_v62, %v20185_v30 }
 0x897   :  { %13145 = vmatpush3.msra.mxu1 %v19807_v38  ;;  %13103 = vmatprep.subr.mxu0 %v21336_v23  ;;  %v11623_v38 = vld [vmem:[#allocation11 + $0x40] sm:$0xff]  ;;  %v11753_v0 = vand.u32 4294901760, %v20089_v39 }
 0x898   :  { %13146 = vmatprep.subr.mxu1 %v21336_v23  ;;  %13104 = vmatpush3.msra.mxu0 %v21347_v47  ;;  %v20098_v9 = vand.u32 4294901760, %v11623_v38  ;;  %v11761_v52 = vsub.f32 %v20092_v42, %v11760_v1  ;;  %v20162_v47 = vsub.f32 %v11621_v60, %v20156_v51 }
 0x899   :  { %13147 = vmatpush3.msra.mxu1 %v19826_v26  ;;  %13105 = vmatprep.subr.mxu0 %v21336_v23  ;;  %v20083_v26 = vsub.f32 %v11628_v29, %v20068_v8  ;;  %v11754_v41 = vsub.f32 %v20089_v39, %v11753_v0 }
 0x89a   :  { %13148 = vmatprep.subr.mxu1 %v21336_v23  ;;  %13106 = vmatpush3.msra.mxu0 %v21348_v36  ;;  %v20112_v32 = vsub.f32 %v11623_v38, %v20098_v9  ;;  %v11762_v18 = vand.u32 4294901760, %v11761_v52  ;;  %v20164_v36 = vand.u32 4294901760, %v11620_v17  ;;  %v20206_v52 = vand.u32 4294901760, %v11616_v45 }
 0x89b   :  { %13149 = vmatpush3.msra.mxu1 %v19833_v63  ;;  %13107 = vmatprep.subr.mxu0 %v21336_v23  ;;  %v20086_v63 = vand.u32 4294901760, %v11624_v49  ;;  %v11746_v56 = vand.u32 4294901760, %v20083_v26  ;;  %v11755_v7 = vand.u32 4294901760, %v11754_v41  ;;  %v20744_v41 = vand.u32 4294901760, %v20195_v25 }
 0x89c   :  { %13150 = vmatprep.subr.mxu1 %v21336_v23  ;;  %13108 = vmatpush3.msra.mxu0 %v21349_v22  ;;  %v11781_v33 = vand.u32 4294901760, %v20112_v32  ;;  %v11619_v22 = vld [vmem:[#allocation11 + $0x20] sm:$0xff] }
 0x89d   :  { %13151 = vmatpush3.msra.mxu1 %v19853_v13  ;;  %13152 = vmatprep.mubr.msk.f32.mxu1 %vm13511_vm13, %v21336_v23  ;;  %v20095_v13 = vsub.f32 %v11625_v34, %v20075_v44  ;;  %v20105_v19 = vsub.f32 %v11624_v49, %v20086_v63  ;;  %v11747_v40 = vsub.f32 %v20083_v26, %v11746_v56  ;;  %v11617_v34 = vld [vmem:[#allocation11 + $0x10] sm:$0xff] }
 0x89e   :  { %13109 = vmatprep.subr.mxu0 %v21336_v23  ;;  %13153 = vmatmul.mubr.f32.vlgmr.msra.gmra.mxu1 %v19888_v28  ;;  %v11782_v5 = vsub.f32 %v20112_v32, %v11781_v33 }
 0x89f   :  { %13110 = vmatpush3.msra.mxu0 %v21350_v12  ;;  %13117 = vmatprep.mubr.msk.f32.mxu0 %vm13511_vm13, %v21336_v23  ;;  %v11767_v15 = vand.u32 4294901760, %v20095_v13  ;;  %v11774_v59 = vand.u32 4294901760, %v20105_v19  ;;  %v11748_v43 = vand.u32 4294901760, %v11747_v40  ;;  %v11790_v12 = vand.u32 4294901760, %v11789_v21 }
 0x8a0   :  { %13111 = vmatprep.subr.mxu0 %v21336_v23  ;;  %13190 = vmatprep.subr.mxu1 %v21336_v23  ;;  %v11783_v53 = vand.u32 4294901760, %v11782_v5 }
 0x8a1   :  { %13112 = vmatpush3.msra.mxu0 %v21351_v54  ;;  %13222 = vmatprep.mubr.msk.f32.mxu1 %vm13511_vm13, %v21336_v23  ;;  %v11768_v14 = vsub.f32 %v20095_v13, %v11767_v15  ;;  %v11795_v54 = vand.u32 4294901760, %v20162_v47 }
 0x8a2   :  { %13113 = vmatprep.subr.mxu0 %v21336_v23  ;;  %13191 = vmatpush3.msra.mxu1 %v11734_v27  ;;  %v20199_v27 = vand.u32 4294901760, %v11617_v34 }
 0x8a3   :  { %13114 = vmatpush3.msra.mxu0 %v21352_v58  ;;  %13192 = vmatprep.subr.mxu1 %v21336_v23  ;;  %v11769_v37 = vand.u32 4294901760, %v11768_v14  ;;  %v20171_v58 = vsub.f32 %v11620_v17, %v20164_v36  ;;  %v11796_v4 = vsub.f32 %v20162_v47, %v11795_v54  ;;  %v11615_v14 = vld [vmem:[#allocation11] sm:$0xff] }
 0x8a4   :  { %13115 = vmatprep.subr.mxu0 %v21336_v23  ;;  %13193 = vmatpush3.msra.mxu1 %v11741_v2 }
 0x8a5   :  { %13116 = vmatpush3.msra.mxu0 %v21353_v46  ;;  %13194 = vmatprep.subr.mxu1 %v21336_v23  ;;  %v20173_v46 = vand.u32 4294901760, %v11619_v22  ;;  %v11802_v29 = vand.u32 4294901760, %v20171_v58  ;;  %v11797_v49 = vand.u32 4294901760, %v11796_v4 }
 0x8a6   :  { %13118 = vmatmul.mubr.f32.vlgmr.msra.gmra.mxu0 %v19888_v28  ;;  %13155 = vmatprep.subr.mxu0 %v21336_v23  ;;  %v11775_v28 = vsub.f32 %v20105_v19, %v11774_v59 }
 0x8a7   :  { %13187 = vmatprep.mubr.msk.f32.mxu0 %vm13511_vm13, %v21336_v23  ;;  %13156 = vmatpush3.msra.mxu0 %v20055_v11  ;;  %v20183_v31 = vsub.f32 %v11619_v22, %v20173_v46  ;;  %v11803_v38 = vsub.f32 %v20171_v58, %v11802_v29 }
 0x8a8   :  { %13157 = vmatprep.subr.mxu0 %v21336_v23  ;;  %13195 = vmatpush3.msra.mxu1 %v11748_v43  ;;  %v11776_v55 = vand.u32 4294901760, %v11775_v28  ;;  %v20210_v43 = vsub.f32 %v11617_v34, %v20199_v27  ;;  %v20217_v28 = vsub.f32 %v11616_v45, %v20206_v52 }
 0x8a9   :  { %13158 = vmatpush3.msra.mxu0 %v20060_v20  ;;  %13196 = vmatprep.subr.mxu1 %v21336_v23  ;;  %v11809_v57 = vand.u32 4294901760, %v20183_v31  ;;  %v11804_v2 = vand.u32 4294901760, %v11803_v38 }
 0x8aa   :  { %13159 = vmatprep.subr.mxu0 %v21336_v23  ;;  %13197 = vmatpush3.msra.mxu1 %v11755_v7  ;;  %v20743_v5 = vand.u32 4294901760, %v20210_v43 }
 0x8ab   :  { %13160 = vmatpush3.msra.mxu0 %v20068_v8  ;;  %13198 = vmatprep.subr.mxu1 %v21336_v23  ;;  %v11810_v40 = vsub.f32 %v20183_v31, %v11809_v57 }
 0x8ac   :  { %13161 = vmatprep.subr.mxu0 %v21336_v23  ;;  %13199 = vmatpush3.msra.mxu1 %v11762_v18  ;;  %v11817_v18 = vsub.f32 %v20195_v25, %v20744_v41  ;;  %v11824_v17 = vsub.f32 %v20210_v43, %v20743_v5 }
 0x8ad   :  { %13162 = vmatpush3.msra.mxu0 %v20071_v35  ;;  %13200 = vmatprep.subr.mxu1 %v21336_v23  ;;  %v11811_v7 = vand.u32 4294901760, %v11810_v40 }
 0x8ae   :  { %13163 = vmatprep.subr.mxu0 %v21336_v23  ;;  %13201 = vmatpush3.msra.mxu1 %v11769_v37  ;;  %v20219_v37 = vand.u32 4294901760, %v11615_v14  ;;  %v11818_v60 = vand.u32 4294901760, %v11817_v18 }
 0x8af   :  { %13164 = vmatpush3.msra.mxu0 %v20073_v61  ;;  %13202 = vmatprep.subr.mxu1 %v21336_v23 }
 0x8b0   :  { %13165 = vmatprep.subr.mxu0 %v21336_v23  ;;  %13203 = vmatpush3.msra.mxu1 %v11776_v55  ;;  %v20742_v55 = vand.u32 4294901760, %v20217_v28  ;;  %v20227_v21 = vsub.f32 %v11615_v14, %v20219_v37 }
 0x8b1   :  { %13166 = vmatpush3.msra.mxu0 %v20075_v44  ;;  %13204 = vmatprep.subr.mxu1 %v21336_v23 }
 0x8b2   :  { %13167 = vmatprep.subr.mxu0 %v21336_v23  ;;  %13205 = vmatpush3.msra.mxu1 %v11783_v53  ;;  %v11831_v53 = vsub.f32 %v20217_v28, %v20742_v55  ;;  %v20741_v22 = vand.u32 4294901760, %v20227_v21 }
 0x8b3   :  { %13168 = vmatpush3.msra.mxu0 %v20086_v63  ;;  %13206 = vmatprep.subr.mxu1 %v21336_v23 }
 0x8b4   :  { %13169 = vmatprep.subr.mxu0 %v21336_v23  ;;  %13207 = vmatpush3.msra.mxu1 %v11790_v12  ;;  %v11825_v12 = vand.u32 4294901760, %v11824_v17  ;;  %v11832_v62 = vand.u32 4294901760, %v11831_v53  ;;  %v11838_v4 = vsub.f32 %v20227_v21, %v20741_v22 }
 0x8b5   :  { %13170 = vmatpush3.msra.mxu0 %v20098_v9  ;;  %13208 = vmatprep.subr.mxu1 %v21336_v23 }
 0x8b6   :  { %13171 = vmatprep.subr.mxu0 %v21336_v23  ;;  %13209 = vmatpush3.msra.mxu1 %v11797_v49  ;;  %v11839_v34 = vand.u32 4294901760, %v11838_v4 }
 0x8b7   :  { %13172 = vmatpush3.msra.mxu0 %v20120_v10  ;;  %13210 = vmatprep.subr.mxu1 %v21336_v23 }
 0x8b8   :  { %13173 = vmatprep.subr.mxu0 %v21336_v23  ;;  %13211 = vmatpush3.msra.mxu1 %v11804_v2 }
 0x8b9   :  { %13174 = vmatpush3.msra.mxu0 %v20156_v51  ;;  %13212 = vmatprep.subr.mxu1 %v21336_v23 }
 0x8ba   :  { %13175 = vmatprep.subr.mxu0 %v21336_v23  ;;  %13213 = vmatpush3.msra.mxu1 %v11811_v7 }
 0x8bb   :  { %13176 = vmatpush3.msra.mxu0 %v20164_v36  ;;  %13214 = vmatprep.subr.mxu1 %v21336_v23 }
 0x8bc   :  { %13177 = vmatprep.subr.mxu0 %v21336_v23  ;;  %13215 = vmatpush3.msra.mxu1 %v11818_v60  ;;  %v12319_v60 = vld [vmem:[%s20425_s8] ss:$0 sm:$0xff] }
 0x8bd   :  { %13178 = vmatpush3.msra.mxu0 %v20173_v46  ;;  %13216 = vmatprep.subr.mxu1 %v21336_v23 }
 0x8be   :  { %13179 = vmatprep.subr.mxu0 %v21336_v23  ;;  %13217 = vmatpush3.msra.mxu1 %v11825_v12 }
 0x8bf   :  { %13180 = vmatpush3.msra.mxu0 %v20185_v30  ;;  %13218 = vmatprep.subr.mxu1 %v21336_v23 }
 0x8c0   :  { %13181 = vmatprep.subr.mxu0 %v21336_v23  ;;  %13219 = vmatpush3.msra.mxu1 %v11832_v62 }
 0x8c1   :  { %13182 = vmatpush3.msra.mxu0 %v20199_v27  ;;  %13220 = vmatprep.subr.mxu1 %v21336_v23 }
 0x8c2   :  { %13183 = vmatprep.subr.mxu0 %v21336_v23  ;;  %13221 = vmatpush3.msra.mxu1 %v11839_v34 }
 0x8c3   :  { %13184 = vmatpush3.msra.mxu0 %v20206_v52  ;;  %13260 = vmatprep.subr.mxu1 %v21336_v23 }
 0x8c4   :  { %13185 = vmatprep.subr.mxu0 %v21336_v23 }
 0x8c5   :  { %13186 = vmatpush3.msra.mxu0 %v20219_v37 }
 0x8c6   :  { %13225 = vmatprep.subr.mxu0 %v21336_v23 }
 0x91c   :  { %v11212_v49 = vpop.f32.mrf.mxu1 }
 0x91e   :  { %v13014_v38 = vpop.f32.mrf.mxu1 }
 0x924   :  { %v11061_v45 = vpop.f32.mrf.mxu0 }
 0x925   :  { %v11062_v17 = vadd.f32 %v12319_v60, %v11061_v45 }
 0x926   :  { %v12979_v2 = vpop.f32.mrf.mxu0 }
 0x927   :  { %v11213_v12 = vadd.f32 %v11212_v49, %v11062_v17 }
 0x93c   :  { %v11405_v40 = vpop.f32.mrf.mxu1 }
 0x93e   :  { %v13084_v14 = vpop.f32.mrf.mxu1 }
 0x945   :  { %v11316_v7 = vpop.f32.mrf.mxu0 }
 0x946   :  { %v11317_v4 = vadd.f32 %v11316_v7, %v11213_v12 }
 0x947   :  { %v13049_v18 = vpop.f32.mrf.mxu0 }
 0x948   :  { %v11406_v34 = vadd.f32 %v11405_v40, %v11317_v4 }
 0x95e   :  { %v11611_v53 = vpop.f32.mrf.mxu1 }
 0x960   :  { %v13154_v62 = vpop.f32.mrf.mxu1 }
 0x966   :  { %v11524_v22 = vpop.f32.mrf.mxu0 }
 0x967   :  { %v11525_v55 = vadd.f32 %v11524_v22, %v11406_v34 }
 0x968   :  { %v13119_v5 = vpop.f32.mrf.mxu0 }
 0x969   :  { %v11612_v38 = vadd.f32 %v11611_v53, %v11525_v55 }
 0x96b   :  { %v20250_v41 = vand.u32 4294901760, %v11612_v38 }
 0x96d   :  { %v20253_v2 = vsub.f32 %v11612_v38, %v20250_v41  ;;  %13223 = vmatmul.mubr.f32.vlgmr.msra.gmra.mxu1 %v20250_v41 }
 0x96e   :  { %13261 = vmatpush3.msra.mxu1 %v20055_v11  ;;  %13292 = vmatprep.mubr.msk.f32.mxu1 %vm13511_vm13, %v21336_v23 }
 0x96f   :  { %v11721_v49 = vand.u32 4294901760, %v20253_v2  ;;  %13262 = vmatprep.subr.mxu1 %v21336_v23 }
 0x970   :  { %13263 = vmatpush3.msra.mxu1 %v20060_v20 }
 0x971   :  { %v11722_v5 = vsub.f32 %v20253_v2, %v11721_v49  ;;  %13264 = vmatprep.subr.mxu1 %v21336_v23 }
 0x972   :  { %13265 = vmatpush3.msra.mxu1 %v20068_v8 }
 0x973   :  { %v11723_v55 = vand.u32 4294901760, %v11722_v5  ;;  %13266 = vmatprep.subr.mxu1 %v21336_v23 }
 0x974   :  { %13267 = vmatpush3.msra.mxu1 %v20071_v35 }
 0x975   :  { %13268 = vmatprep.subr.mxu1 %v21336_v23  ;;  %13188 = vmatmul.mubr.f32.vlgmr.msra.gmra.mxu0 %v11723_v55 }
 0x976   :  { %13226 = vmatpush3.msra.mxu0 %v20058_v24  ;;  %13269 = vmatpush3.msra.mxu1 %v20073_v61  ;;  %v21355_v24 = vand.u32 4294901760, %v20210_v43 }
 0x977   :  { %13227 = vmatprep.subr.mxu0 %v21336_v23  ;;  %13270 = vmatprep.subr.mxu1 %v21336_v23 }
 0x978   :  { %13228 = vmatpush3.msra.mxu0 %v20066_v16  ;;  %13271 = vmatpush3.msra.mxu1 %v20075_v44 }
 0x979   :  { %13229 = vmatprep.subr.mxu0 %v21336_v23  ;;  %13272 = vmatprep.subr.mxu1 %v21336_v23 }
 0x97a   :  { %13230 = vmatpush3.msra.mxu0 %v20083_v26  ;;  %13273 = vmatpush3.msra.mxu1 %v20086_v63 }
 0x97b   :  { %13231 = vmatprep.subr.mxu0 %v21336_v23  ;;  %13274 = vmatprep.subr.mxu1 %v21336_v23 }
 0x97c   :  { %13232 = vmatpush3.msra.mxu0 %v20089_v39  ;;  %13275 = vmatpush3.msra.mxu1 %v20098_v9  ;;  %v12320_v39 = vld [vmem:[%s20427_s10] ss:$0 sm:$0xff] }
 0x97d   :  { %13233 = vmatprep.subr.mxu0 %v21336_v23  ;;  %13276 = vmatprep.subr.mxu1 %v21336_v23 }
 0x97e   :  { %13234 = vmatpush3.msra.mxu0 %v20092_v42  ;;  %13277 = vmatpush3.msra.mxu1 %v20120_v10 }
 0x97f   :  { %13235 = vmatprep.subr.mxu0 %v21336_v23  ;;  %13278 = vmatprep.subr.mxu1 %v21336_v23 }
 0x980   :  { %13236 = vmatpush3.msra.mxu0 %v20095_v13  ;;  %13279 = vmatpush3.msra.mxu1 %v20156_v51 }
 0x981   :  { %13237 = vmatprep.subr.mxu0 %v21336_v23  ;;  %13280 = vmatprep.subr.mxu1 %v21336_v23 }
 0x982   :  { %13238 = vmatpush3.msra.mxu0 %v20105_v19  ;;  %13281 = vmatpush3.msra.mxu1 %v20164_v36 }
 0x983   :  { %13239 = vmatprep.subr.mxu0 %v21336_v23  ;;  %13282 = vmatprep.subr.mxu1 %v21336_v23 }
 0x984   :  { %13240 = vmatpush3.msra.mxu0 %v20112_v32  ;;  %13283 = vmatpush3.msra.mxu1 %v20173_v46 }
 0x985   :  { %13241 = vmatprep.subr.mxu0 %v21336_v23  ;;  %13284 = vmatprep.subr.mxu1 %v21336_v23 }
 0x986   :  { %13242 = vmatpush3.msra.mxu0 %v20135_v3  ;;  %13285 = vmatpush3.msra.mxu1 %v20185_v30 }
 0x987   :  { %13243 = vmatprep.subr.mxu0 %v21336_v23  ;;  %13286 = vmatprep.subr.mxu1 %v21336_v23 }
 0x988   :  { %13244 = vmatpush3.msra.mxu0 %v20162_v47  ;;  %13287 = vmatpush3.msra.mxu1 %v20199_v27 }
 0x989   :  { %13245 = vmatprep.subr.mxu0 %v21336_v23  ;;  %13288 = vmatprep.subr.mxu1 %v21336_v23 }
 0x98a   :  { %13246 = vmatpush3.msra.mxu0 %v20171_v58  ;;  %13289 = vmatpush3.msra.mxu1 %v20206_v52 }
 0x98b   :  { %13247 = vmatprep.subr.mxu0 %v21336_v23  ;;  %13290 = vmatprep.subr.mxu1 %v21336_v23 }
 0x98c   :  { %13248 = vmatpush3.msra.mxu0 %v20183_v31  ;;  %13291 = vmatpush3.msra.mxu1 %v20219_v37 }
 0x98d   :  { %13249 = vmatprep.subr.mxu0 %v21336_v23  ;;  %13293 = vmatmul.mubr.f32.vlgmr.msra.gmra.mxu1 %v11721_v49 }
 0x98e   :  { %13330 = vmatprep.subr.mxu1 %v21336_v23  ;;  %13250 = vmatpush3.msra.mxu0 %v20195_v25 }
 0x98f   :  { %13331 = vmatpush3.msra.mxu1 %v20055_v11  ;;  %13251 = vmatprep.subr.mxu0 %v21336_v23  ;;  %v21354_v11 = vand.u32 4294901760, %v20195_v25 }
 0x990   :  { %13332 = vmatprep.subr.mxu1 %v21336_v23  ;;  %13252 = vmatpush3.msra.mxu0 %v20210_v43 }
 0x991   :  { %13333 = vmatpush3.msra.mxu1 %v20060_v20  ;;  %13253 = vmatprep.subr.mxu0 %v21336_v23  ;;  %v21356_v20 = vand.u32 4294901760, %v20217_v28 }
 0x992   :  { %13334 = vmatprep.subr.mxu1 %v21336_v23  ;;  %13254 = vmatpush3.msra.mxu0 %v20217_v28 }
 0x993   :  { %13335 = vmatpush3.msra.mxu1 %v20068_v8  ;;  %13255 = vmatprep.subr.mxu0 %v21336_v23 }
 0x994   :  { %13336 = vmatprep.subr.mxu1 %v21336_v23  ;;  %13256 = vmatpush3.msra.mxu0 %v20227_v21 }
 0x995   :  { %13257 = vmatprep.mubr.msk.f32.mxu0 %vm13511_vm13, %v21336_v23  ;;  %13337 = vmatpush3.msra.mxu1 %v20071_v35 }
 0x996   :  { %13258 = vmatmul.mubr.f32.vlgmr.msra.gmra.mxu0 %v20253_v2  ;;  %13295 = vmatprep.subr.mxu0 %v21336_v23 }
 0x997   :  { %13338 = vmatprep.subr.mxu1 %v21336_v23  ;;  %13296 = vmatpush3.msra.mxu0 %v11732_v6  ;;  %v21357_v6 = vand.u32 4294901760, %v20227_v21 }
 0x998   :  { %13339 = vmatpush3.msra.mxu1 %v20073_v61  ;;  %13297 = vmatprep.subr.mxu0 %v21336_v23 }
 0x999   :  { %13340 = vmatprep.subr.mxu1 %v21336_v23  ;;  %13298 = vmatpush3.msra.mxu0 %v11739_v50 }
 0x99a   :  { %13341 = vmatpush3.msra.mxu1 %v20075_v44  ;;  %13299 = vmatprep.subr.mxu0 %v21336_v23 }
 0x99b   :  { %13342 = vmatprep.subr.mxu1 %v21336_v23  ;;  %13300 = vmatpush3.msra.mxu0 %v11746_v56 }
 0x99c   :  { %13343 = vmatpush3.msra.mxu1 %v20086_v63  ;;  %13301 = vmatprep.subr.mxu0 %v21336_v23 }
 0x99d   :  { %13344 = vmatprep.subr.mxu1 %v21336_v23  ;;  %13302 = vmatpush3.msra.mxu0 %v11753_v0 }
 0x99e   :  { %13345 = vmatpush3.msra.mxu1 %v20098_v9  ;;  %13303 = vmatprep.subr.mxu0 %v21336_v23 }
 0x99f   :  { %13346 = vmatprep.subr.mxu1 %v21336_v23  ;;  %13304 = vmatpush3.msra.mxu0 %v11760_v1 }
 0x9a0   :  { %13347 = vmatpush3.msra.mxu1 %v20120_v10  ;;  %13305 = vmatprep.subr.mxu0 %v21336_v23 }
 0x9a1   :  { %13348 = vmatprep.subr.mxu1 %v21336_v23  ;;  %13306 = vmatpush3.msra.mxu0 %v11767_v15 }
 0x9a2   :  { %13349 = vmatpush3.msra.mxu1 %v20156_v51  ;;  %13307 = vmatprep.subr.mxu0 %v21336_v23 }
 0x9a3   :  { %13350 = vmatprep.subr.mxu1 %v21336_v23  ;;  %13308 = vmatpush3.msra.mxu0 %v11774_v59 }
 0x9a4   :  { %13351 = vmatpush3.msra.mxu1 %v20164_v36  ;;  %13309 = vmatprep.subr.mxu0 %v21336_v23 }
 0x9a5   :  { %13352 = vmatprep.subr.mxu1 %v21336_v23  ;;  %13310 = vmatpush3.msra.mxu0 %v11781_v33 }
 0x9a6   :  { %13353 = vmatpush3.msra.mxu1 %v20173_v46  ;;  %13311 = vmatprep.subr.mxu0 %v21336_v23 }
 0x9a7   :  { %13354 = vmatprep.subr.mxu1 %v21336_v23  ;;  %13312 = vmatpush3.msra.mxu0 %v11788_v48 }
 0x9a8   :  { %13355 = vmatpush3.msra.mxu1 %v20185_v30  ;;  %13313 = vmatprep.subr.mxu0 %v21336_v23 }
 0x9a9   :  { %13356 = vmatprep.subr.mxu1 %v21336_v23  ;;  %13314 = vmatpush3.msra.mxu0 %v11795_v54 }
 0x9aa   :  { %13357 = vmatpush3.msra.mxu1 %v20199_v27  ;;  %13315 = vmatprep.subr.mxu0 %v21336_v23 }
 0x9ab   :  { %13358 = vmatprep.subr.mxu1 %v21336_v23  ;;  %13316 = vmatpush3.msra.mxu0 %v11802_v29 }
 0x9ac   :  { %13359 = vmatpush3.msra.mxu1 %v20206_v52  ;;  %13317 = vmatprep.subr.mxu0 %v21336_v23 }
 0x9ad   :  { %13360 = vmatprep.subr.mxu1 %v21336_v23  ;;  %13318 = vmatpush3.msra.mxu0 %v11809_v57 }
 0x9ae   :  { %13361 = vmatpush3.msra.mxu1 %v20219_v37  ;;  %13362 = vmatprep.mubr.msk.f32.mxu1 %vm13511_vm13, %v21336_v23 }
 0x9af   :  { %13319 = vmatprep.subr.mxu0 %v21336_v23  ;;  %13363 = vmatmul.mubr.f32.vlgmr.msra.gmra.mxu1 %v20250_v41 }
 0x9b0   :  { %13320 = vmatpush3.msra.mxu0 %v21354_v11  ;;  %13327 = vmatprep.mubr.msk.f32.mxu0 %vm13511_vm13, %v21336_v23 }
 0x9b1   :  { %13321 = vmatprep.subr.mxu0 %v21336_v23 }
 0x9b2   :  { %13322 = vmatpush3.msra.mxu0 %v21355_v24 }
 0x9b3   :  { %13323 = vmatprep.subr.mxu0 %v21336_v23 }
 0x9b4   :  { %13324 = vmatpush3.msra.mxu0 %v21356_v20 }
 0x9b5   :  { %13325 = vmatprep.subr.mxu0 %v21336_v23 }
 0x9b6   :  { %13326 = vmatpush3.msra.mxu0 %v21357_v6 }
 0x9b7   :  { %13328 = vmatmul.mubr.f32.vlgmr.msra.gmra.mxu0 %v20250_v41 }
 0xa2d   :  { %v11876_v16 = vpop.f32.mrf.mxu1 }
 0xa2f   :  { %v13224_v8 = vpop.f32.mrf.mxu1 }
 0xa35   :  { %v11725_v35 = vpop.f32.mrf.mxu0 }
 0xa36   :  { %v11726_v42 = vadd.f32 %v12320_v39, %v11725_v35 }
 0xa37   :  { %v13189_v61 = vpop.f32.mrf.mxu0 }
 0xa38   :  { %v11877_v23 = vadd.f32 %v11876_v16, %v11726_v42 }
 0xa4d   :  { %v12069_v44 = vpop.f32.mrf.mxu1 }
 0xa4f   :  { %v13294_v50 = vpop.f32.mrf.mxu1 }
 0xa56   :  { %v11980_v26 = vpop.f32.mrf.mxu0 }
 0xa57   :  { %v11981_v56 = vadd.f32 %v11980_v26, %v11877_v23 }
 0xa58   :  { %v13259_v63 = vpop.f32.mrf.mxu0 }
 0xa59   :  { %v12070_v19 = vadd.f32 %v12069_v44, %v11981_v56 }
 0xa6f   :  { %v12275_v13 = vpop.f32.mrf.mxu1 }
 0xa71   :  { %v13364_v9 = vpop.f32.mrf.mxu1 }
 0xa77   :  { %v12188_v0 = vpop.f32.mrf.mxu0 }
 0xa78   :  { %v12189_v1 = vadd.f32 %v12188_v0, %v12070_v19 }
 0xa79   :  { %v13329_v15 = vpop.f32.mrf.mxu0 }
 0xa7a   :  { %v12276_v32 = vadd.f32 %v12275_v13, %v12189_v1 }
 0xa7c   :  { %12280 = vst.msk [vmem:[#allocation13] sm:$0x3] %vm12279_vm14, %v12276_v32 }
 0xa7d   :  { %13481 = shalt.err (!%p13478_p10)
}
 0xa7e   :  { %12290 = dma.vmem_to_hbm [thread:$0]  %s12288_s22, 32, %s20428_s11, [#allocation7]  }
 0xa7f   :  { %13496 = dma.done.wait [#allocation7], 32  }
 0xa80   :  { %13497 = vsyncadd [#allocation7], 4294967264 }
 0xa81   :  { %12294 = vsyncpa [#allocation6], 1 }
 0xa82   :  { %12295 = vsyncpa [#allocation9], 1 }
 0xa83   :  { %12296 = vsyncpa [#allocation12], 1 }
 0xa84   :  { %12297 = vsyncpa [#allocation7], 1 }

</bundles_post_ra>
